<compile_context>
chip_gen: v5e
topology: v5e:2x2
jax: 0.10.0
libtpu: 0.0.40
codegen_flags: <defaults>
</compile_context>

<pallas_src>
import jax
import jax.numpy as jnp
from jax.experimental import pallas as pl
from jax.experimental.pallas import tpu as pltpu


def _round_up(a, b):
    return (a + b - 1) // b * b


def _whitened_net_kernel(x_ref, mu_ref, wz_ref, w1_ref, b1_ref, w2_ref, b2_ref,
                         out_ref, wacc_ref, hacc_ref):
    """Grid = (batch tiles i, Wz column slabs j, whitening-K tiles k).

    For each batch tile i:
      for each column slab j:
        for each K tile k:   wacc += (x[:, k] - mu[k]) @ Wz[k, j]
        hacc += wacc @ W1[j, :]
      out = relu(hacc + b1) @ W2 + b2        (only at the final (j, k) step)
    """
    j = pl.program_id(1)
    k = pl.program_id(2)
    nj = pl.num_programs(1)
    nk = pl.num_programs(2)

    tk = x_ref.shape[1]  # static

    @pl.when(jnp.logical_and(j == 0, k == 0))
    def _init_hidden():
        hacc_ref[...] = jnp.zeros_like(hacc_ref)

    @pl.when(k == 0)
    def _init_whiten():
        wacc_ref[...] = jnp.zeros_like(wacc_ref)

    # mu is fully VMEM-resident; slice the current K tile in-kernel.
    if mu_ref.shape[1] == tk:
        mu_k = mu_ref[...]
    else:
        off = pl.multiple_of(k * tk, tk)
        mu_k = mu_ref[:, pl.ds(off, tk)]

    # Whitening partial product: centering on the VPU (f32), matmul on the MXU
    # with bf16 operands and f32 accumulation.
    xc = (x_ref[...] - mu_k).astype(jnp.bfloat16)
    wacc_ref[...] += jnp.dot(xc, wz_ref[...], preferred_element_type=jnp.float32)

    @pl.when(k == nk - 1)
    def _fold_into_hidden():
        # Fold the finished whitened column slab into the hidden accumulator.
        hacc_ref[...] += jnp.dot(wacc_ref[...].astype(jnp.bfloat16), w1_ref[...],
                                 preferred_element_type=jnp.float32)

    @pl.when(jnp.logical_and(j == nj - 1, k == nk - 1))
    def _epilogue():
        h = jnp.maximum(hacc_ref[...] + b1_ref[...], 0.0)
        out = jnp.dot(h.astype(jnp.bfloat16), w2_ref[...],
                      preferred_element_type=jnp.float32) + b2_ref[...]
        out_ref[...] = out.astype(out_ref.dtype)


def _tpu_device_kind():
    try:
        return jax.devices()[0].device_kind.lower()
    except Exception:
        return ""


def _vmem_capacity_bytes(kind):
    try:
        info = pltpu.get_tpu_info()
        cap = int(getattr(info, "vmem_capacity_bytes", 0) or 0)
        if cap > 0:
            return cap
    except Exception:
        pass
    # Fallback: v7x has 64 MiB per TensorCore, earlier generations 128 MiB.
    return (64 << 20) if "v7" in kind else (128 << 20)


def whitened_network(x_nchw, mu, wz, w1, b1, w2, b2, *, stream_x_bf16=False):
    """Fused whiten + MLP forward pass as one tiled Pallas TPU kernel."""
    n = x_nchw.shape[0]
    d = mu.shape[-1]
    hid = w1.shape[-1]
    cls = w2.shape[-1]

    # glue: flatten NCHW -> (N, D), same element order as torch.nn.Flatten
    x_flat = x_nchw.reshape(n, d)

    kind = _tpu_device_kind()
    vmem_cap = _vmem_capacity_bytes(kind)

    # ---- batch tile: pick tm FIRST, then pad N up to a multiple of it ------
    # 256 rows feed the 256-wide MXU on v6e/v7x; 128 elsewhere (v5e MXU is
    # 128x128). Tiny batches keep a single, minimally padded tile (no point
    # splitting across TCs when it would only duplicate the Wz stream).
    tm_target = 256 if ("v6" in kind or "v7" in kind) else 128
    tm = min(tm_target, _round_up(n, 8))
    n_pad = _round_up(n, tm)

    # ---- lane-dense padding of feature / hidden / class dims ---------------
    d_pad = _round_up(d, 128)
    hid_pad = _round_up(hid, 128)
    cls_pad = _round_up(cls, 128)

    x_bytes = 2 if stream_x_bf16 else 4

    # ---- tn / tk selection against a per-generation VMEM budget ------------
    budget = (vmem_cap * 5) // 8          # ~40 MiB on v7x, ~80 MiB on v5e/v6e
    cands = sorted({c for c in (d_pad, 8192, 4096, 2048, 1024, 512, 256, 128)
                    if c <= d_pad and d_pad % c == 0}, reverse=True)

    # Constant footprint pieces; residents counted double-buffered so the
    # estimate stays conservative even on the fallback (non-Buffered(1)) path.
    fixed = (2 * (d_pad * 4 + hid_pad * 4 + hid_pad * cls_pad * 2 + cls_pad * 4)
             + tm * hid_pad * 4             # hidden accumulator (f32 scratch)
             + 2 * tm * cls_pad * 4)        # output tile buffers

    def footprint(tn_, tk_):
        return (fixed
                + tm * tn_ * 4              # whitening accumulator (f32 scratch)
                + 2 * tn_ * hid_pad * 2     # W1 column slab (bf16, 2 buffers)
                + 2 * tk_ * tn_ * 2         # Wz tile        (bf16, 2 buffers)
                + 2 * tm * tk_ * x_bytes)   # x tile         (2 buffers)

    tn = cands[-1]
    for c in cands:
        if footprint(c, cands[-1]) <= budget:
            tn = c
            break
    tk = cands[-1]
    for c in cands:
        if footprint(tn, c) <= budget:
            tk = c
            break
    vmem_est = footprint(tn, tk)

    # Never clamp the limit below the real footprint; soft-cap ~3/4 of VMEM.
    soft_cap = (vmem_cap * 3) // 4
    vmem_limit = int(min(max(vmem_est + (4 << 20), 16 << 20), soft_cap))
    vmem_limit = int(max(vmem_limit, vmem_est + (2 << 20)))

    # ---- pad / cast operands ------------------------------------------------
    x_p = jnp.pad(x_flat.astype(jnp.float32), ((0, n_pad - n), (0, d_pad - d)))
    if stream_x_bf16:
        # Optional (v5e): halves x HBM traffic; slight rounding of raw x.
        x_p = x_p.astype(jnp.bfloat16)
    mu_p = jnp.pad(mu.astype(jnp.float32), ((0, 0), (0, d_pad - d)))
    wz_p = jnp.pad(wz, ((0, d_pad - d), (0, d_pad - d))).astype(jnp.bfloat16)
    w1_p = jnp.pad(w1, ((0, d_pad - d), (0, hid_pad - hid))).astype(jnp.bfloat16)
    b1_p = jnp.pad(b1.astype(jnp.float32), ((0, 0), (0, hid_pad - hid)))
    w2_p = jnp.pad(w2, ((0, hid_pad - hid), (0, cls_pad - cls))).astype(jnp.bfloat16)
    b2_p = jnp.pad(b2.astype(jnp.float32), ((0, 0), (0, cls_pad - cls)))

    grid = (n_pad // tm, d_pad // tn, d_pad // tk)

    def build(single_buffer_resident):
        def resident(shape):
            if single_buffer_resident:
                return pl.BlockSpec(shape, lambda i, j, k: (0, 0),
                                    pipeline_mode=pl.Buffered(1))
            return pl.BlockSpec(shape, lambda i, j, k: (0, 0))

        return pl.pallas_call(
            _whitened_net_kernel,
            out_shape=jax.ShapeDtypeStruct((n_pad, cls_pad), jnp.float32),
            grid=grid,
            in_specs=[
                pl.BlockSpec((tm, tk), lambda i, j, k: (i, k)),       # x  (streamed)
                resident((1, d_pad)),                                 # mu (resident)
                pl.BlockSpec((tk, tn), lambda i, j, k: (k, j)),       # Wz (streamed)
                pl.BlockSpec((tn, hid_pad), lambda i, j, k: (j, 0)),  # W1 (streamed over j)
                resident((1, hid_pad)),                               # b1 (resident)
                resident((hid_pad, cls_pad)),                         # W2 (resident)
                resident((1, cls_pad)),                               # b2 (resident)
            ],
            out_specs=pl.BlockSpec((tm, cls_pad), lambda i, j, k: (i, 0)),
            scratch_shapes=[pltpu.VMEM((tm, tn), jnp.float32),        # whitening acc
                            pltpu.VMEM((tm, hid_pad), jnp.float32)],  # hidden acc
            compiler_params=pltpu.CompilerParams(
                dimension_semantics=("parallel", "arbitrary", "arbitrary"),
                vmem_limit_bytes=vmem_limit,
            ),
        )

    args = (x_p, mu_p, wz_p, w1_p, b1_p, w2_p, b2_p)
    try:
        out_padded = build(True)(*args)
    except Exception:
        # This runtime rejected pl.Buffered(1); fall back to default buffering.
        out_padded = build(False)(*args)

    return out_padded[:n, :cls]


if __name__ == "__main__":
    key = jax.random.PRNGKey(0)
    N, C, H, W = 2, 4, 16, 16
    D = C * H * W          # 1024
    HID, CLS = 128, 10

    ks = jax.random.split(key, 7)
    x = jax.random.normal(ks[0], (N, C, H, W), jnp.float32)

    # deterministic "whitening" parameters: mean + (identity + small symmetric) matrix
    mu = 0.1 * jax.random.normal(ks[1], (1, D), jnp.float32)
    a = jax.random.normal(ks[2], (D, D), jnp.float32) * (1.0 / D)
    wz = jnp.eye(D, dtype=jnp.float32) + 0.5 * (a + a.T)

    # deterministic "model" (MLP) parameters
    w1 = jax.random.normal(ks[3], (D, HID), jnp.float32) / jnp.sqrt(float(D))
    b1 = 0.01 * jax.random.normal(ks[4], (1, HID), jnp.float32)
    w2 = jax.random.normal(ks[5], (HID, CLS), jnp.float32) / jnp.sqrt(float(HID))
    b2 = 0.01 * jax.random.normal(ks[6], (1, CLS), jnp.float32)

    out = whitened_network(x, mu, wz, w1, b1, w2, b2)
    out = jax.block_until_ready(out)
    assert out.shape == (N, CLS)

    # Precision-matched reference (same bf16 operand rounding, f32 accumulation).
    xf = x.reshape(N, D)
    xc = (xf - mu).astype(jnp.bfloat16)
    xw = jnp.dot(xc, wz.astype(jnp.bfloat16), preferred_element_type=jnp.float32)
    h = jnp.dot(xw.astype(jnp.bfloat16), w1.astype(jnp.bfloat16),
                preferred_element_type=jnp.float32) + b1
    h = jnp.maximum(h, 0.0)
    ref = jnp.dot(h.astype(jnp.bfloat16), w2.astype(jnp.bfloat16),
                  preferred_element_type=jnp.float32) + b2
    assert jnp.allclose(out, ref, atol=5e-3, rtol=5e-3)

    # Loose sanity check against the full-f32 math.
    ref_f32 = jnp.maximum((xf - mu) @ wz @ w1 + b1, 0.0) @ w2 + b2
    assert jnp.allclose(out, ref_f32, atol=5e-2, rtol=5e-2)

    print("KERNEL_OK")
</pallas_src>

<mosaic_0001>
module attributes {stable_mosaic.version = 11 : i64} {
  func.func @_whitened_net_kernel(%arg0: i32, %arg1: i32, %arg2: i32, %arg3: memref<8x1024xf32, #tpu.memory_space<vmem>>, %arg4: memref<1x1024xf32, #tpu.memory_space<vmem>>, %arg5: memref<1024x1024xbf16, #tpu.memory_space<vmem>>, %arg6: memref<1024x128xbf16, #tpu.memory_space<vmem>>, %arg7: memref<1x128xf32, #tpu.memory_space<vmem>>, %arg8: memref<128x128xbf16, #tpu.memory_space<vmem>>, %arg9: memref<1x128xf32, #tpu.memory_space<vmem>>, %arg10: memref<8x128xf32, #tpu.memory_space<vmem>>, %arg11: memref<8x1024xf32, #tpu.memory_space<vmem>>, %arg12: memref<8x128xf32, #tpu.memory_space<vmem>>) attributes {dimension_semantics = [#tpu.dimension_semantics<parallel>, #tpu.dimension_semantics<arbitrary>, #tpu.dimension_semantics<arbitrary>], iteration_bounds = array<i64: 1, 1, 1>, scalar_prefetch = 0 : i64, scratch_operands = 2 : i64, tpu.core_type = #tpu.core_type<tc>, window_params = [{transform_indices = @transform_0, window_bounds = array<i64: 8, 1024>}, {pipeline_mode = #tpu.pipeline_mode<synchronous>, transform_indices = @transform_1, window_bounds = array<i64: 1, 1024>}, {transform_indices = @transform_2, window_bounds = array<i64: 1024, 1024>}, {transform_indices = @transform_3, window_bounds = array<i64: 1024, 128>}, {pipeline_mode = #tpu.pipeline_mode<synchronous>, transform_indices = @transform_4, window_bounds = array<i64: 1, 128>}, {pipeline_mode = #tpu.pipeline_mode<synchronous>, transform_indices = @transform_5, window_bounds = array<i64: 128, 128>}, {pipeline_mode = #tpu.pipeline_mode<synchronous>, transform_indices = @transform_6, window_bounds = array<i64: 1, 128>}, {transform_indices = @transform_7, window_bounds = array<i64: 8, 128>}]} {
    %c0_i32 = arith.constant 0 : i32
    %0 = arith.cmpi eq, %arg1, %c0_i32 : i32
    %c0_i32_0 = arith.constant 0 : i32
    %1 = arith.cmpi eq, %arg2, %c0_i32_0 : i32
    %2 = arith.andi %0, %1 : i1
    %3 = arith.extui %2 : i1 to i32
    %c0_i32_1 = arith.constant 0 : i32
    %4 = arith.cmpi ne, %3, %c0_i32_1 : i32
    scf.if %4 {
      %cst_18 = arith.constant 0.000000e+00 : f32
      %26 = vector.broadcast %cst_18 : f32 to vector<8x128xf32>
      %c0_19 = arith.constant 0 : index
      %c0_20 = arith.constant 0 : index
      %27 = vector.load %arg12[%c0_19, %c0_20] : memref<8x128xf32, #tpu.memory_space<vmem>>, vector<8x128xf32>
      tpu.vector_store %arg12[%c0_19, %c0_20], %26 {strides = array<i32>} : memref<8x128xf32, #tpu.memory_space<vmem>>, vector<8x128xf32>,
    } else {
    }
    %c0_i32_2 = arith.constant 0 : i32
    %5 = arith.cmpi eq, %arg2, %c0_i32_2 : i32
    %6 = arith.extui %5 : i1 to i32
    %c0_i32_3 = arith.constant 0 : i32
    %7 = arith.cmpi ne, %6, %c0_i32_3 : i32
    scf.if %7 {
      %cst_18 = arith.constant 0.000000e+00 : f32
      %26 = vector.broadcast %cst_18 : f32 to vector<8x1024xf32>
      %c0_19 = arith.constant 0 : index
      %c0_20 = arith.constant 0 : index
      %27 = vector.load %arg11[%c0_19, %c0_20] : memref<8x1024xf32, #tpu.memory_space<vmem>>, vector<8x1024xf32>
      tpu.vector_store %arg11[%c0_19, %c0_20], %26 {strides = array<i32>} : memref<8x1024xf32, #tpu.memory_space<vmem>>, vector<8x1024xf32>,
    } else {
    }
    %c0 = arith.constant 0 : index
    %c0_4 = arith.constant 0 : index
    %8 = vector.load %arg4[%c0, %c0_4] : memref<1x1024xf32, #tpu.memory_space<vmem>>, vector<1x1024xf32>
    %c0_5 = arith.constant 0 : index
    %c0_6 = arith.constant 0 : index
    %9 = vector.load %arg3[%c0_5, %c0_6] : memref<8x1024xf32, #tpu.memory_space<vmem>>, vector<8x1024xf32>
    %10 = vector.broadcast %8 : vector<1x1024xf32> to vector<8x1024xf32>
    %11 = arith.subf %9, %10 : vector<8x1024xf32>
    %12 = arith.truncf %11 : vector<8x1024xf32> to vector<8x1024xbf16>
    %c0_7 = arith.constant 0 : index
    %c0_8 = arith.constant 0 : index
    %13 = vector.load %arg11[%c0_7, %c0_8] : memref<8x1024xf32, #tpu.memory_space<vmem>>, vector<8x1024xf32>
    %c0_9 = arith.constant 0 : index
    %c0_10 = arith.constant 0 : index
    %14 = vector.load %arg5[%c0_9, %c0_10] : memref<1024x1024xbf16, #tpu.memory_space<vmem>>, vector<1024x1024xbf16>
    %cst = arith.constant dense<0.000000e+00> : vector<8x1024xf32>
    %15 = tpu.matmul %12, %14, %cst {dimension_numbers = #tpu.dot_dimension_numbers<[1], [0], [0], [1], [0, 0, 1, 1], [], []>} : vector<8x1024xbf16>, vector<1024x1024xbf16>, vector<8x1024xf32> -> vector<8x1024xf32>
    %16 = arith.addf %13, %15 : vector<8x1024xf32>
    %c0_11 = arith.constant 0 : index
    %c0_12 = arith.constant 0 : index
    %17 = vector.load %arg11[%c0_11, %c0_12] : memref<8x1024xf32, #tpu.memory_space<vmem>>, vector<8x1024xf32>
    tpu.vector_store %arg11[%c0_11, %c0_12], %16 {strides = array<i32>} : memref<8x1024xf32, #tpu.memory_space<vmem>>, vector<8x1024xf32>,
    %c0_i32_13 = arith.constant 0 : i32
    %18 = arith.cmpi eq, %arg2, %c0_i32_13 : i32
    %19 = arith.extui %18 : i1 to i32
    %c0_i32_14 = arith.constant 0 : i32
    %20 = arith.cmpi ne, %19, %c0_i32_14 : i32
    scf.if %20 {
      %c0_18 = arith.constant 0 : index
      %c0_19 = arith.constant 0 : index
      %26 = vector.load %arg12[%c0_18, %c0_19] : memref<8x128xf32, #tpu.memory_space<vmem>>, vector<8x128xf32>
      %c0_20 = arith.constant 0 : index
      %c0_21 = arith.constant 0 : index
      %27 = vector.load %arg11[%c0_20, %c0_21] : memref<8x1024xf32, #tpu.memory_space<vmem>>, vector<8x1024xf32>
      %28 = arith.truncf %27 : vector<8x1024xf32> to vector<8x1024xbf16>
      %c0_22 = arith.constant 0 : index
      %c0_23 = arith.constant 0 : index
      %29 = vector.load %arg6[%c0_22, %c0_23] : memref<1024x128xbf16, #tpu.memory_space<vmem>>, vector<1024x128xbf16>
      %cst_24 = arith.constant dense<0.000000e+00> : vector<8x128xf32>
      %30 = tpu.matmul %28, %29, %cst_24 {dimension_numbers = #tpu.dot_dimension_numbers<[1], [0], [0], [1], [0, 0, 1, 1], [], []>} : vector<8x1024xbf16>, vector<1024x128xbf16>, vector<8x128xf32> -> vector<8x128xf32>
      %31 = arith.addf %26, %30 : vector<8x128xf32>
      %c0_25 = arith.constant 0 : index
      %c0_26 = arith.constant 0 : index
      %32 = vector.load %arg12[%c0_25, %c0_26] : memref<8x128xf32, #tpu.memory_space<vmem>>, vector<8x128xf32>
      tpu.vector_store %arg12[%c0_25, %c0_26], %31 {strides = array<i32>} : memref<8x128xf32, #tpu.memory_space<vmem>>, vector<8x128xf32>,
    } else {
    }
    %c0_i32_15 = arith.constant 0 : i32
    %21 = arith.cmpi eq, %arg1, %c0_i32_15 : i32
    %c0_i32_16 = arith.constant 0 : i32
    %22 = arith.cmpi eq, %arg2, %c0_i32_16 : i32
    %23 = arith.andi %21, %22 : i1
    %24 = arith.extui %23 : i1 to i32
    %c0_i32_17 = arith.constant 0 : i32
    %25 = arith.cmpi ne, %24, %c0_i32_17 : i32
    scf.if %25 {
      %c0_18 = arith.constant 0 : index
      %c0_19 = arith.constant 0 : index
      %26 = vector.load %arg12[%c0_18, %c0_19] : memref<8x128xf32, #tpu.memory_space<vmem>>, vector<8x128xf32>
      %c0_20 = arith.constant 0 : index
      %c0_21 = arith.constant 0 : index
      %27 = vector.load %arg7[%c0_20, %c0_21] : memref<1x128xf32, #tpu.memory_space<vmem>>, vector<1x128xf32>
      %28 = vector.broadcast %27 : vector<1x128xf32> to vector<8x128xf32>
      %29 = arith.addf %26, %28 : vector<8x128xf32>
      %cst_22 = arith.constant 0.000000e+00 : f32
      %30 = vector.broadcast %cst_22 : f32 to vector<8x128xf32>
      %31 = arith.maximumf %29, %30 : vector<8x128xf32>
      %32 = arith.truncf %31 : vector<8x128xf32> to vector<8x128xbf16>
      %c0_23 = arith.constant 0 : index
      %c0_24 = arith.constant 0 : index
      %33 = vector.load %arg8[%c0_23, %c0_24] : memref<128x128xbf16, #tpu.memory_space<vmem>>, vector<128x128xbf16>
      %cst_25 = arith.constant dense<0.000000e+00> : vector<8x128xf32>
      %34 = tpu.matmul %32, %33, %cst_25 {dimension_numbers = #tpu.dot_dimension_numbers<[1], [0], [0], [1], [0, 0, 1, 1], [], []>} : vector<8x128xbf16>, vector<128x128xbf16>, vector<8x128xf32> -> vector<8x128xf32>
      %c0_26 = arith.constant 0 : index
      %c0_27 = arith.constant 0 : index
      %35 = vector.load %arg9[%c0_26, %c0_27] : memref<1x128xf32, #tpu.memory_space<vmem>>, vector<1x128xf32>
      %36 = vector.broadcast %35 : vector<1x128xf32> to vector<8x128xf32>
      %37 = arith.addf %34, %36 : vector<8x128xf32>
      %c0_28 = arith.constant 0 : index
      %c0_29 = arith.constant 0 : index
      %38 = vector.load %arg10[%c0_28, %c0_29] : memref<8x128xf32, #tpu.memory_space<vmem>>, vector<8x128xf32>
      tpu.vector_store %arg10[%c0_28, %c0_29], %37 {strides = array<i32>} : memref<8x128xf32, #tpu.memory_space<vmem>>, vector<8x128xf32>,
    } else {
    }
    return
  }
  func.func @transform_0(%arg0: i32, %arg1: i32, %arg2: i32) -> (i32, i32) {
    %c0_i32 = arith.constant 0 : i32
    return %arg0, %arg2 : i32, i32
  }
  func.func @transform_1(%arg0: i32, %arg1: i32, %arg2: i32) -> (i32, i32) {
    %c0_i32 = arith.constant 0 : i32
    %c0_i32_0 = arith.constant 0 : i32
    %c0_i32_1 = arith.constant 0 : i32
    return %c0_i32, %c0_i32_0 : i32, i32
  }
  func.func @transform_2(%arg0: i32, %arg1: i32, %arg2: i32) -> (i32, i32) {
    %c0_i32 = arith.constant 0 : i32
    return %arg2, %arg1 : i32, i32
  }
  func.func @transform_3(%arg0: i32, %arg1: i32, %arg2: i32) -> (i32, i32) {
    %c0_i32 = arith.constant 0 : i32
    %c0_i32_0 = arith.constant 0 : i32
    return %arg1, %c0_i32 : i32, i32
  }
  func.func @transform_4(%arg0: i32, %arg1: i32, %arg2: i32) -> (i32, i32) {
    %c0_i32 = arith.constant 0 : i32
    %c0_i32_0 = arith.constant 0 : i32
    %c0_i32_1 = arith.constant 0 : i32
    return %c0_i32, %c0_i32_0 : i32, i32
  }
  func.func @transform_5(%arg0: i32, %arg1: i32, %arg2: i32) -> (i32, i32) {
    %c0_i32 = arith.constant 0 : i32
    %c0_i32_0 = arith.constant 0 : i32
    %c0_i32_1 = arith.constant 0 : i32
    return %c0_i32, %c0_i32_0 : i32, i32
  }
  func.func @transform_6(%arg0: i32, %arg1: i32, %arg2: i32) -> (i32, i32) {
    %c0_i32 = arith.constant 0 : i32
    %c0_i32_0 = arith.constant 0 : i32
    %c0_i32_1 = arith.constant 0 : i32
    return %c0_i32, %c0_i32_0 : i32, i32
  }
  func.func @transform_7(%arg0: i32, %arg1: i32, %arg2: i32) -> (i32, i32) {
    %c0_i32 = arith.constant 0 : i32
    %c0_i32_0 = arith.constant 0 : i32
    return %arg0, %c0_i32 : i32, i32
  }
}

module attributes {stable_mosaic.version = 11 : i64} {
  func.func @_whitened_net_kernel(%arg0: i32, %arg1: i32, %arg2: i32, %arg3: memref<8x1024xf32, #tpu.memory_space<vmem>>, %arg4: memref<1x1024xf32, #tpu.memory_space<vmem>>, %arg5: memref<1024x1024xbf16, #tpu.memory_space<vmem>>, %arg6: memref<1024x128xbf16, #tpu.memory_space<vmem>>, %arg7: memref<1x128xf32, #tpu.memory_space<vmem>>, %arg8: memref<128x128xbf16, #tpu.memory_space<vmem>>, %arg9: memref<1x128xf32, #tpu.memory_space<vmem>>, %arg10: memref<8x128xf32, #tpu.memory_space<vmem>>, %arg11: memref<8x1024xf32, #tpu.memory_space<vmem>>, %arg12: memref<8x128xf32, #tpu.memory_space<vmem>>) attributes {dimension_semantics = [#tpu.dimension_semantics<parallel>, #tpu.dimension_semantics<arbitrary>, #tpu.dimension_semantics<arbitrary>], iteration_bounds = array<i64: 1, 1, 1>, scalar_prefetch = 0 : i64, scratch_operands = 2 : i64, tpu.core_type = #tpu.core_type<tc>, window_params = [{transform_indices = @transform_0, window_bounds = array<i64: 8, 1024>}, {pipeline_mode = #tpu.pipeline_mode<synchronous>, transform_indices = @transform_1, window_bounds = array<i64: 1, 1024>}, {transform_indices = @transform_2, window_bounds = array<i64: 1024, 1024>}, {transform_indices = @transform_3, window_bounds = array<i64: 1024, 128>}, {pipeline_mode = #tpu.pipeline_mode<synchronous>, transform_indices = @transform_4, window_bounds = array<i64: 1, 128>}, {pipeline_mode = #tpu.pipeline_mode<synchronous>, transform_indices = @transform_5, window_bounds = array<i64: 128, 128>}, {pipeline_mode = #tpu.pipeline_mode<synchronous>, transform_indices = @transform_6, window_bounds = array<i64: 1, 128>}, {transform_indices = @transform_7, window_bounds = array<i64: 8, 128>}]} {
    %c0_i32 = arith.constant 0 : i32
    %0 = arith.cmpi eq, %arg1, %c0_i32 : i32
    %c0_i32_0 = arith.constant 0 : i32
    %1 = arith.cmpi eq, %arg2, %c0_i32_0 : i32
    %2 = arith.andi %0, %1 : i1
    %3 = arith.extui %2 : i1 to i32
    %c0_i32_1 = arith.constant 0 : i32
    %4 = arith.cmpi ne, %3, %c0_i32_1 : i32
    scf.if %4 {
      %cst_18 = arith.constant 0.000000e+00 : f32
      %26 = vector.broadcast %cst_18 : f32 to vector<8x128xf32>
      %c0_19 = arith.constant 0 : index
      %c0_20 = arith.constant 0 : index
      %27 = vector.load %arg12[%c0_19, %c0_20] : memref<8x128xf32, #tpu.memory_space<vmem>>, vector<8x128xf32>
      tpu.vector_store %arg12[%c0_19, %c0_20], %26 {strides = array<i32>} : memref<8x128xf32, #tpu.memory_space<vmem>>, vector<8x128xf32>,
    } else {
    }
    %c0_i32_2 = arith.constant 0 : i32
    %5 = arith.cmpi eq, %arg2, %c0_i32_2 : i32
    %6 = arith.extui %5 : i1 to i32
    %c0_i32_3 = arith.constant 0 : i32
    %7 = arith.cmpi ne, %6, %c0_i32_3 : i32
    scf.if %7 {
      %cst_18 = arith.constant 0.000000e+00 : f32
      %26 = vector.broadcast %cst_18 : f32 to vector<8x1024xf32>
      %c0_19 = arith.constant 0 : index
      %c0_20 = arith.constant 0 : index
      %27 = vector.load %arg11[%c0_19, %c0_20] : memref<8x1024xf32, #tpu.memory_space<vmem>>, vector<8x1024xf32>
      tpu.vector_store %arg11[%c0_19, %c0_20], %26 {strides = array<i32>} : memref<8x1024xf32, #tpu.memory_space<vmem>>, vector<8x1024xf32>,
    } else {
    }
    %c0 = arith.constant 0 : index
    %c0_4 = arith.constant 0 : index
    %8 = vector.load %arg4[%c0, %c0_4] : memref<1x1024xf32, #tpu.memory_space<vmem>>, vector<1x1024xf32>
    %c0_5 = arith.constant 0 : index
    %c0_6 = arith.constant 0 : index
    %9 = vector.load %arg3[%c0_5, %c0_6] : memref<8x1024xf32, #tpu.memory_space<vmem>>, vector<8x1024xf32>
    %10 = vector.broadcast %8 : vector<1x1024xf32> to vector<8x1024xf32>
    %11 = arith.subf %9, %10 : vector<8x1024xf32>
    %12 = arith.truncf %11 : vector<8x1024xf32> to vector<8x1024xbf16>
    %c0_7 = arith.constant 0 : index
    %c0_8 = arith.constant 0 : index
    %13 = vector.load %arg11[%c0_7, %c0_8] : memref<8x1024xf32, #tpu.memory_space<vmem>>, vector<8x1024xf32>
    %c0_9 = arith.constant 0 : index
    %c0_10 = arith.constant 0 : index
    %14 = vector.load %arg5[%c0_9, %c0_10] : memref<1024x1024xbf16, #tpu.memory_space<vmem>>, vector<1024x1024xbf16>
    %cst = arith.constant dense<0.000000e+00> : vector<8x1024xf32>
    %15 = tpu.matmul %12, %14, %cst {dimension_numbers = #tpu.dot_dimension_numbers<[1], [0], [0], [1], [0, 0, 1, 1], [], []>} : vector<8x1024xbf16>, vector<1024x1024xbf16>, vector<8x1024xf32> -> vector<8x1024xf32>
    %16 = arith.addf %13, %15 : vector<8x1024xf32>
    %c0_11 = arith.constant 0 : index
    %c0_12 = arith.constant 0 : index
    %17 = vector.load %arg11[%c0_11, %c0_12] : memref<8x1024xf32, #tpu.memory_space<vmem>>, vector<8x1024xf32>
    tpu.vector_store %arg11[%c0_11, %c0_12], %16 {strides = array<i32>} : memref<8x1024xf32, #tpu.memory_space<vmem>>, vector<8x1024xf32>,
    %c0_i32_13 = arith.constant 0 : i32
    %18 = arith.cmpi eq, %arg2, %c0_i32_13 : i32
    %19 = arith.extui %18 : i1 to i32
    %c0_i32_14 = arith.constant 0 : i32
    %20 = arith.cmpi ne, %19, %c0_i32_14 : i32
    scf.if %20 {
      %c0_18 = arith.constant 0 : index
      %c0_19 = arith.constant 0 : index
      %26 = vector.load %arg12[%c0_18, %c0_19] : memref<8x128xf32, #tpu.memory_space<vmem>>, vector<8x128xf32>
      %c0_20 = arith.constant 0 : index
      %c0_21 = arith.constant 0 : index
      %27 = vector.load %arg11[%c0_20, %c0_21] : memref<8x1024xf32, #tpu.memory_space<vmem>>, vector<8x1024xf32>
      %28 = arith.truncf %27 : vector<8x1024xf32> to vector<8x1024xbf16>
      %c0_22 = arith.constant 0 : index
      %c0_23 = arith.constant 0 : index
      %29 = vector.load %arg6[%c0_22, %c0_23] : memref<1024x128xbf16, #tpu.memory_space<vmem>>, vector<1024x128xbf16>
      %cst_24 = arith.constant dense<0.000000e+00> : vector<8x128xf32>
      %30 = tpu.matmul %28, %29, %cst_24 {dimension_numbers = #tpu.dot_dimension_numbers<[1], [0], [0], [1], [0, 0, 1, 1], [], []>} : vector<8x1024xbf16>, vector<1024x128xbf16>, vector<8x128xf32> -> vector<8x128xf32>
      %31 = arith.addf %26, %30 : vector<8x128xf32>
      %c0_25 = arith.constant 0 : index
      %c0_26 = arith.constant 0 : index
      %32 = vector.load %arg12[%c0_25, %c0_26] : memref<8x128xf32, #tpu.memory_space<vmem>>, vector<8x128xf32>
      tpu.vector_store %arg12[%c0_25, %c0_26], %31 {strides = array<i32>} : memref<8x128xf32, #tpu.memory_space<vmem>>, vector<8x128xf32>,
    } else {
    }
    %c0_i32_15 = arith.constant 0 : i32
    %21 = arith.cmpi eq, %arg1, %c0_i32_15 : i32
    %c0_i32_16 = arith.constant 0 : i32
    %22 = arith.cmpi eq, %arg2, %c0_i32_16 : i32
    %23 = arith.andi %21, %22 : i1
    %24 = arith.extui %23 : i1 to i32
    %c0_i32_17 = arith.constant 0 : i32
    %25 = arith.cmpi ne, %24, %c0_i32_17 : i32
    scf.if %25 {
      %c0_18 = arith.constant 0 : index
      %c0_19 = arith.constant 0 : index
      %26 = vector.load %arg12[%c0_18, %c0_19] : memref<8x128xf32, #tpu.memory_space<vmem>>, vector<8x128xf32>
      %c0_20 = arith.constant 0 : index
      %c0_21 = arith.constant 0 : index
      %27 = vector.load %arg7[%c0_20, %c0_21] : memref<1x128xf32, #tpu.memory_space<vmem>>, vector<1x128xf32>
      %28 = vector.broadcast %27 : vector<1x128xf32> to vector<8x128xf32>
      %29 = arith.addf %26, %28 : vector<8x128xf32>
      %cst_22 = arith.constant 0.000000e+00 : f32
      %30 = vector.broadcast %cst_22 : f32 to vector<8x128xf32>
      %31 = arith.maximumf %29, %30 : vector<8x128xf32>
      %32 = arith.truncf %31 : vector<8x128xf32> to vector<8x128xbf16>
      %c0_23 = arith.constant 0 : index
      %c0_24 = arith.constant 0 : index
      %33 = vector.load %arg8[%c0_23, %c0_24] : memref<128x128xbf16, #tpu.memory_space<vmem>>, vector<128x128xbf16>
      %cst_25 = arith.constant dense<0.000000e+00> : vector<8x128xf32>
      %34 = tpu.matmul %32, %33, %cst_25 {dimension_numbers = #tpu.dot_dimension_numbers<[1], [0], [0], [1], [0, 0, 1, 1], [], []>} : vector<8x128xbf16>, vector<128x128xbf16>, vector<8x128xf32> -> vector<8x128xf32>
      %c0_26 = arith.constant 0 : index
      %c0_27 = arith.constant 0 : index
      %35 = vector.load %arg9[%c0_26, %c0_27] : memref<1x128xf32, #tpu.memory_space<vmem>>, vector<1x128xf32>
      %36 = vector.broadcast %35 : vector<1x128xf32> to vector<8x128xf32>
      %37 = arith.addf %34, %36 : vector<8x128xf32>
      %c0_28 = arith.constant 0 : index
      %c0_29 = arith.constant 0 : index
      %38 = vector.load %arg10[%c0_28, %c0_29] : memref<8x128xf32, #tpu.memory_space<vmem>>, vector<8x128xf32>
      tpu.vector_store %arg10[%c0_28, %c0_29], %37 {strides = array<i32>} : memref<8x128xf32, #tpu.memory_space<vmem>>, vector<8x128xf32>,
    } else {
    }
    return
  }
  func.func @transform_0(%arg0: i32, %arg1: i32, %arg2: i32) -> (i32, i32) {
    %c0_i32 = arith.constant 0 : i32
    return %arg0, %arg2 : i32, i32
  }
  func.func @transform_1(%arg0: i32, %arg1: i32, %arg2: i32) -> (i32, i32) {
    %c0_i32 = arith.constant 0 : i32
    %c0_i32_0 = arith.constant 0 : i32
    %c0_i32_1 = arith.constant 0 : i32
    return %c0_i32, %c0_i32_0 : i32, i32
  }
  func.func @transform_2(%arg0: i32, %arg1: i32, %arg2: i32) -> (i32, i32) {
    %c0_i32 = arith.constant 0 : i32
    return %arg2, %arg1 : i32, i32
  }
  func.func @transform_3(%arg0: i32, %arg1: i32, %arg2: i32) -> (i32, i32) {
    %c0_i32 = arith.constant 0 : i32
    %c0_i32_0 = arith.constant 0 : i32
    return %arg1, %c0_i32 : i32, i32
  }
  func.func @transform_4(%arg0: i32, %arg1: i32, %arg2: i32) -> (i32, i32) {
    %c0_i32 = arith.constant 0 : i32
    %c0_i32_0 = arith.constant 0 : i32
    %c0_i32_1 = arith.constant 0 : i32
    return %c0_i32, %c0_i32_0 : i32, i32
  }
  func.func @transform_5(%arg0: i32, %arg1: i32, %arg2: i32) -> (i32, i32) {
    %c0_i32 = arith.constant 0 : i32
    %c0_i32_0 = arith.constant 0 : i32
    %c0_i32_1 = arith.constant 0 : i32
    return %c0_i32, %c0_i32_0 : i32, i32
  }
  func.func @transform_6(%arg0: i32, %arg1: i32, %arg2: i32) -> (i32, i32) {
    %c0_i32 = arith.constant 0 : i32
    %c0_i32_0 = arith.constant 0 : i32
    %c0_i32_1 = arith.constant 0 : i32
    return %c0_i32, %c0_i32_0 : i32, i32
  }
  func.func @transform_7(%arg0: i32, %arg1: i32, %arg2: i32) -> (i32, i32) {
    %c0_i32 = arith.constant 0 : i32
    %c0_i32_0 = arith.constant 0 : i32
    return %arg0, %c0_i32 : i32, i32
  }
}

</mosaic_0001>

<bundles_post_ra>
// kernel: tpu_custom_call.1
= control target key start
LH: loop header
LB: loop body
LE: loop exit
PB: predicated region body
PF: predicated region fallthrough
CT: control target
= control target key end

     0   :  { %12 = vsyncpa [#allocation5], 0  ;;  %s8218_s0 = inlined_call_operand.hbm [shape: f32[8,1024], index: 0, kind: input, shape index: {}]   ;;  %s8219_s1 = inlined_call_operand.hbm [shape: f32[1,1024], index: 1, kind: input, shape index: {}]   ;;  %s8220_s2 = inlined_call_operand.hbm [shape: bf16[1024,1024], index: 2, kind: input, shape index: {}]   ;;  %s8221_s3 = inlined_call_operand.hbm [shape: bf16[1024,128], index: 3, kind: input, shape index: {}]   ;;  %s8222_s4 = inlined_call_operand.hbm [shape: f32[1,128], index: 4, kind: input, shape index: {}]   ;;  %s8223_s5 = inlined_call_operand.hbm [shape: bf16[128,128], index: 5, kind: input, shape index: {}]   ;;  %s8224_s6 = inlined_call_operand.hbm [shape: f32[1,128], index: 6, kind: input, shape index: {}]   ;;  %s8225_s7 = inlined_call_operand.hbm [shape: f32[8,128], index: 7, kind: output, shape index: {}]  }
   0x1   :  { %13 = vsyncpa [#allocation8], 0 }
   0x2   :  { %14 = vsyncpa [#allocation11], 0 }
   0x3   :  { %15 = vsyncpa [#allocation14], 0  ;;  %s33_s26 = sshll.u32 %s8219_s1, 4  ;;  %s34_s26 = int_to_ptr.hbm [resolvable:$true] %s33_s26 }
   0x4   :  { %16 = vsyncpa [#allocation6], 0  ;;  %s8002_s27 = smov [#allocation7]   ;;  %s56_s8 = sshll.u32 %s8221_s3, 4  ;;  %s57_s8 = int_to_ptr.hbm [resolvable:$true] %s56_s8 }
   0x5   :  { %s35_s28 = sshll.u32 %s8002_s27, 4  ;;  %s8003_s9 = smov [#allocation10]   ;;  %s36_s28 = int_to_ptr.vmem [resolvable:$true] %s35_s28 }
   0x6   :  { %38 = dma.hbm_to_vmem [thread:$0]  %s34_s26, 128, %s36_s28, [#allocation8]  }
   0x7   :  { %s58_s10 = sshll.u32 %s8003_s9, 4  ;;  %s8004_s11 = smov 64   ;;  %s59_s10 = int_to_ptr.vmem [resolvable:$true] %s58_s10 }
   0x8   :  { %s8005_s12 = smov 4   ;;  %s80_s1 = sshll.u32 %s8223_s5, 4  ;;  %s81_s1 = int_to_ptr.hbm [resolvable:$true] %s80_s1 }
   0x9   :  { %64 = dma.hbm_to_vmem [thread:$0]  %s57_s8, 8192, %s59_s10, [#allocation11], %s8004_s11, %s8004_s11, %s8005_s12  }
   0xa   :  { %s8006_s15 = smov [#allocation13]   ;;  %s22_s3 = sshll.u32 %s8218_s0, 4  ;;  %s23_s3 = int_to_ptr.hbm [resolvable:$true] %s22_s3 }
   0xb   :  { %s82_s16 = sshll.u32 %s8006_s15, 4  ;;  %s8007_s19 = smov [#allocation4]   ;;  %s83_s16 = int_to_ptr.vmem [resolvable:$true] %s82_s16 }
   0xc   :  { %88 = dma.hbm_to_vmem [thread:$0]  %s81_s1, 1024, %s83_s16, [#allocation14], %s8004_s11, %s8004_s11, %s8005_s12  }
   0xd   :  { %s24_s20 = sshll.u32 %s8007_s19, 4  ;;  %s43_s23 = sshll.u32 %s8220_s2, 4  ;;  %s25_s20 = int_to_ptr.vmem [resolvable:$true] %s24_s20  ;;  %s44_s23 = int_to_ptr.hbm [resolvable:$true] %s43_s23 }
   0xe   :  { %27 = dma.hbm_to_vmem [thread:$0]  %s23_s3, 1024, %s25_s20, [#allocation5]  }
   0xf   :  { %s8008_s5 = smov [#allocation9]   ;;  %s70_s27 = sshll.u32 %s8222_s4, 4  ;;  %s71_s27 = int_to_ptr.hbm [resolvable:$true] %s70_s27 }
  0x10   :  { %s45_s24 = sshll.u32 %s8008_s5, 4  ;;  %s8009_s28 = smov 512   ;;  %s46_s24 = int_to_ptr.vmem [resolvable:$true] %s45_s24 }
  0x11   :  { %s8010_s0 = smov 32   ;;  %s8011_s29 = smov [#allocation12]  }
  0x12   :  { %51 = dma.hbm_to_vmem [thread:$0]  %s44_s23, 65536, %s46_s24, [#allocation8], %s8009_s28, %s8009_s28, %s8010_s0  }
  0x13   :  { %s72_s30 = sshll.u32 %s8011_s29, 4  ;;  %s94_s2 = sshll.u32 %s8224_s6, 4  ;;  %s73_s30 = int_to_ptr.vmem [resolvable:$true] %s72_s30  ;;  %s95_s2 = int_to_ptr.hbm [resolvable:$true] %s94_s2 }
  0x14   :  { %75 = dma.hbm_to_vmem [thread:$0]  %s71_s27, 16, %s73_s30, [#allocation11]  }
  0x15   :  { %s8012_s10 = smov [#allocation15]  }
  0x16   :  { %s96_s11 = sshll.u32 %s8012_s10, 4  ;;  %s97_s11 = int_to_ptr.vmem [resolvable:$true] %s96_s11 }
  0x17   :  { %99 = dma.hbm_to_vmem [thread:$0]  %s95_s2, 16, %s97_s11, [#allocation14]  }
  0x18   :  { %7992 = dma.done.wait [#allocation5], 1024  }
  0x19   :  { %7993 = vsyncadd [#allocation5], 4294966272 }
  0x1a   :  { %7994 = dma.done.wait [#allocation8], 65664  }
  0x1b   :  { %7995 = vsyncadd [#allocation8], 4294901632 }
  0x1c   :  { %7996 = dma.done.wait [#allocation11], 8208  }
  0x1d   :  { %7997 = vsyncadd [#allocation11], 4294959088 }
  0x1e   :  { %7998 = dma.done.wait [#allocation14], 1040  }
  0x1f   :  { %7999 = vsyncadd [#allocation14], 4294966256  ;;  %v5092_v0 = vld [vmem:[#allocation9 + $0x1c0] sm:$0xf]  ;;  %s8013_s4 = smov [#allocation16]   ;;  %s4853_s14 = sshll.u32 %s8225_s7, 4  ;;  %s4854_s14 = int_to_ptr.hbm [resolvable:$true] %s4853_s14 }
  0x20   :  { %v7262_v1 = vld [vmem:[#allocation9 + $0x1dc] sm:$0xf0]  ;;  %s4851_s6 = sshll.u32 %s8013_s4, 4  ;;  %s4852_s6 = int_to_ptr.vmem [resolvable:$true] %s4851_s6 }
  0x21   :  { %v5348_v2 = vld [vmem:[#allocation9 + $0x3c0] sm:$0xf]  ;;  %v5093_v3 = vor.u32 %v7262_v1, %v5092_v0 }
  0x22   :  { %v7326_v4 = vld [vmem:[#allocation9 + $0x3dc] sm:$0xf0] }
  0x23   :  { %v5604_v5 = vld [vmem:[#allocation9 + $0x5c0] sm:$0xf]  ;;  %v5349_v7 = vor.u32 %v7326_v4, %v5348_v2  ;;  %3268 = vmatpush.bf16.msra.mxu0 %v5093_v3 }
  0x24   :  { %v7390_v6 = vld [vmem:[#allocation9 + $0x5dc] sm:$0xf0] }
  0x25   :  { %v5605_v8 = vor.u32 %v7390_v6, %v5604_v5  ;;  %v5860_v9 = vld [vmem:[#allocation9 + $0x7c0] sm:$0xf]  ;;  %3281 = vmatpush.bf16.msra.mxu1 %v5349_v7 }
  0x26   :  { %v7454_v10 = vld [vmem:[#allocation9 + $0x7dc] sm:$0xf0] }
  0x27   :  { %v5060_v11 = vld [vmem:[#allocation9 + $0x180] sm:$0xf]  ;;  %v5861_v12 = vor.u32 %v7454_v10, %v5860_v9  ;;  %3294 = vmatpush.bf16.msra.mxu2 %v5605_v8 }
  0x28   :  { %v7254_v13 = vld [vmem:[#allocation9 + $0x19c] sm:$0xf0] }
  0x29   :  { %v5316_v14 = vld [vmem:[#allocation9 + $0x380] sm:$0xf]  ;;  %v5061_v16 = vor.u32 %v7254_v13, %v5060_v11  ;;  %3307 = vmatpush.bf16.msra.mxu3 %v5861_v12 }
  0x2a   :  { %v7318_v15 = vld [vmem:[#allocation9 + $0x39c] sm:$0xf0] }
  0x2b   :  { %v5317_v17 = vor.u32 %v7318_v15, %v5316_v14  ;;  %v5572_v18 = vld [vmem:[#allocation9 + $0x580] sm:$0xf]  ;;  %3269 = vmatpush.bf16.msra.mxu0 %v5061_v16 }
  0x2c   :  { %v7382_v19 = vld [vmem:[#allocation9 + $0x59c] sm:$0xf0] }
  0x2d   :  { %v5828_v20 = vld [vmem:[#allocation9 + $0x780] sm:$0xf]  ;;  %v5573_v21 = vor.u32 %v7382_v19, %v5572_v18  ;;  %3282 = vmatpush.bf16.msra.mxu1 %v5317_v17 }
  0x2e   :  { %v7446_v22 = vld [vmem:[#allocation9 + $0x79c] sm:$0xf0] }
  0x2f   :  { %v5028_v23 = vld [vmem:[#allocation9 + $0x140] sm:$0xf]  ;;  %v5829_v25 = vor.u32 %v7446_v22, %v5828_v20  ;;  %3295 = vmatpush.bf16.msra.mxu2 %v5573_v21 }
  0x30   :  { %v7246_v24 = vld [vmem:[#allocation9 + $0x15c] sm:$0xf0] }
  0x31   :  { %v5284_v26 = vld [vmem:[#allocation9 + $0x340] sm:$0xf]  ;;  %v5029_v29 = vor.u32 %v7246_v24, %v5028_v23  ;;  %3308 = vmatpush.bf16.msra.mxu3 %v5829_v25 }
  0x32   :  { %v7310_v27 = vld [vmem:[#allocation9 + $0x35c] sm:$0xf0] }
  0x33   :  { %v5540_v28 = vld [vmem:[#allocation9 + $0x540] sm:$0xf]  ;;  %v5285_v33 = vor.u32 %v7310_v27, %v5284_v26  ;;  %3270 = vmatpush.bf16.msra.mxu0 %v5029_v29 }
  0x34   :  { %v7374_v30 = vld [vmem:[#allocation9 + $0x55c] sm:$0xf0] }
  0x35   :  { %v5796_v31 = vld [vmem:[#allocation9 + $0x740] sm:$0xf]  ;;  %v5541_v34 = vor.u32 %v7374_v30, %v5540_v28  ;;  %3283 = vmatpush.bf16.msra.mxu1 %v5285_v33 }
  0x36   :  { %v7438_v32 = vld [vmem:[#allocation9 + $0x75c] sm:$0xf0] }
  0x37   :  { %v4996_v35 = vld [vmem:[#allocation9 + $0x100] sm:$0xf]  ;;  %v5797_v38 = vor.u32 %v7438_v32, %v5796_v31  ;;  %3296 = vmatpush.bf16.msra.mxu2 %v5541_v34 }
  0x38   :  { %v7238_v36 = vld [vmem:[#allocation9 + $0x11c] sm:$0xf0] }
  0x39   :  { %v5252_v37 = vld [vmem:[#allocation9 + $0x300] sm:$0xf]  ;;  %v4997_v44 = vor.u32 %v7238_v36, %v4996_v35  ;;  %3309 = vmatpush.bf16.msra.mxu3 %v5797_v38 }
  0x3a   :  { %v7302_v39 = vld [vmem:[#allocation9 + $0x31c] sm:$0xf0] }
  0x3b   :  { %v5508_v40 = vld [vmem:[#allocation9 + $0x500] sm:$0xf]  ;;  %v5253_v45 = vor.u32 %v7302_v39, %v5252_v37  ;;  %3271 = vmatpush.bf16.msra.mxu0 %v4997_v44 }
  0x3c   :  { %v7366_v41 = vld [vmem:[#allocation9 + $0x51c] sm:$0xf0] }
  0x3d   :  { %v5764_v42 = vld [vmem:[#allocation9 + $0x700] sm:$0xf]  ;;  %v5509_v46 = vor.u32 %v7366_v41, %v5508_v40  ;;  %3284 = vmatpush.bf16.msra.mxu1 %v5253_v45 }
  0x3e   :  { %v7430_v43 = vld [vmem:[#allocation9 + $0x71c] sm:$0xf0] }
  0x3f   :  { %v4964_v47 = vld [vmem:[#allocation9 + $0xc0] sm:$0xf]  ;;  %v5765_v50 = vor.u32 %v7430_v43, %v5764_v42  ;;  %3297 = vmatpush.bf16.msra.mxu2 %v5509_v46 }
  0x40   :  { %v7230_v48 = vld [vmem:[#allocation9 + $0xdc] sm:$0xf0] }
  0x41   :  { %v5220_v49 = vld [vmem:[#allocation9 + $0x2c0] sm:$0xf]  ;;  %v4965_v56 = vor.u32 %v7230_v48, %v4964_v47  ;;  %3310 = vmatpush.bf16.msra.mxu3 %v5765_v50 }
  0x42   :  { %v7294_v51 = vld [vmem:[#allocation9 + $0x2dc] sm:$0xf0] }
  0x43   :  { %v5476_v52 = vld [vmem:[#allocation9 + $0x4c0] sm:$0xf]  ;;  %v5221_v57 = vor.u32 %v7294_v51, %v5220_v49  ;;  %3272 = vmatpush.bf16.msra.mxu0 %v4965_v56 }
  0x44   :  { %v7358_v53 = vld [vmem:[#allocation9 + $0x4dc] sm:$0xf0] }
  0x45   :  { %v5732_v54 = vld [vmem:[#allocation9 + $0x6c0] sm:$0xf]  ;;  %v5477_v58 = vor.u32 %v7358_v53, %v5476_v52  ;;  %3285 = vmatpush.bf16.msra.mxu1 %v5221_v57 }
  0x46   :  { %v7422_v55 = vld [vmem:[#allocation9 + $0x6dc] sm:$0xf0] }
  0x47   :  { %v4932_v59 = vld [vmem:[#allocation9 + $0x80] sm:$0xf]  ;;  %v5733_v62 = vor.u32 %v7422_v55, %v5732_v54  ;;  %3298 = vmatpush.bf16.msra.mxu2 %v5477_v58 }
  0x48   :  { %v7222_v60 = vld [vmem:[#allocation9 + $0x9c] sm:$0xf0] }
  0x49   :  { %v5188_v61 = vld [vmem:[#allocation9 + $0x280] sm:$0xf]  ;;  %v4933_v4 = vor.u32 %v7222_v60, %v4932_v59  ;;  %3311 = vmatpush.bf16.msra.mxu3 %v5733_v62  ;;  %v8075_v59 = vld [vmem:[#allocation7] sm:$0xff] }
  0x4a   :  { %v7286_v63 = vld [vmem:[#allocation9 + $0x29c] sm:$0xf0] }
  0x4b   :  { %v5444_v0 = vld [vmem:[#allocation9 + $0x480] sm:$0xf]  ;;  %v5189_v5 = vor.u32 %v7286_v63, %v5188_v61  ;;  %3273 = vmatpush.bf16.msra.mxu0 %v4933_v4  ;;  %v149_v63 = vld [vmem:[#allocation4 + $0x10] sm:$0xff] }
  0x4c   :  { %v7350_v1 = vld [vmem:[#allocation9 + $0x49c] sm:$0xf0] }
  0x4d   :  { %v5700_v2 = vld [vmem:[#allocation9 + $0x680] sm:$0xf]  ;;  %v5445_v6 = vor.u32 %v7350_v1, %v5444_v0  ;;  %3286 = vmatpush.bf16.msra.mxu1 %v5189_v5  ;;  %v158_v0 = vperm.slane %v8075_v59, 2 }
  0x4e   :  { %v7414_v3 = vld [vmem:[#allocation9 + $0x69c] sm:$0xf0] }
  0x4f   :  { %v4900_v7 = vld [vmem:[#allocation9 + $0x40] sm:$0xf]  ;;  %v5701_v10 = vor.u32 %v7414_v3, %v5700_v2  ;;  %3299 = vmatpush.bf16.msra.mxu2 %v5445_v6 }
  0x50   :  { %v7214_v8 = vld [vmem:[#allocation9 + $0x5c] sm:$0xf0] }
  0x51   :  { %v5156_v9 = vld [vmem:[#allocation9 + $0x240] sm:$0xf]  ;;  %v4901_v16 = vor.u32 %v7214_v8, %v4900_v7  ;;  %3312 = vmatpush.bf16.msra.mxu3 %v5701_v10  ;;  %v174_v8 = vsub.f32 %v149_v63, %v158_v0 }
  0x52   :  { %v7278_v11 = vld [vmem:[#allocation9 + $0x25c] sm:$0xf0] }
  0x53   :  { %v5412_v12 = vld [vmem:[#allocation9 + $0x440] sm:$0xf]  ;;  %v5157_v19 = vor.u32 %v7278_v11, %v5156_v9  ;;  %3274 = vmatpush.bf16.msra.mxu0 %v4901_v16  ;;  %v147_v11 = vld [vmem:[#allocation4] sm:$0xff] }
  0x54   :  { %v7342_v13 = vld [vmem:[#allocation9 + $0x45c] sm:$0xf0] }
  0x55   :  { %v5668_v14 = vld [vmem:[#allocation9 + $0x640] sm:$0xf]  ;;  %v5413_v20 = vor.u32 %v7342_v13, %v5412_v12  ;;  %3287 = vmatpush.bf16.msra.mxu1 %v5157_v19  ;;  %v156_v12 = vperm.slane %v8075_v59, 0  ;;  %v150_v13 = vld [vmem:[#allocation4 + $0x18] sm:$0xff]  ;;  %v8080_v19 = vpack.c.bf16 %v174_v8, %v174_v8 }
  0x56   :  { %v7406_v15 = vld [vmem:[#allocation9 + $0x65c] sm:$0xf0] }
  0x57   :  { %v4868_v17 = vld [vmem:[#allocation9] sm:$0xf]  ;;  %v5669_v24 = vor.u32 %v7406_v15, %v5668_v14  ;;  %3300 = vmatpush.bf16.msra.mxu2 %v5413_v20  ;;  %v159_v14 = vperm.slane %v8075_v59, 3  ;;  %v157_v20 = vperm.slane %v8075_v59, 1 }
  0x58   :  { %v7206_v18 = vld [vmem:[#allocation9 + $0x1c] sm:$0xf0] }
  0x59   :  { %v5124_v21 = vld [vmem:[#allocation9 + $0x200] sm:$0xf]  ;;  %v4869_v31 = vor.u32 %v7206_v18, %v4868_v17  ;;  %3313 = vmatpush.bf16.msra.mxu3 %v5669_v24  ;;  %v175_v24 = vsub.f32 %v150_v13, %v159_v14 }
  0x5a   :  { %v7270_v22 = vld [vmem:[#allocation9 + $0x21c] sm:$0xf0] }
  0x5b   :  { %v5380_v23 = vld [vmem:[#allocation9 + $0x400] sm:$0xf]  ;;  %v5125_v35 = vor.u32 %v7270_v22, %v5124_v21  ;;  %3275 = vmatpush.bf16.msra.mxu0 %v4869_v31 }
  0x5c   :  { %v7334_v25 = vld [vmem:[#allocation9 + $0x41c] sm:$0xf0] }
  0x5d   :  { %v5636_v26 = vld [vmem:[#allocation9 + $0x600] sm:$0xf]  ;;  %v5381_v36 = vor.u32 %v7334_v25, %v5380_v23  ;;  %3288 = vmatpush.bf16.msra.mxu1 %v5125_v35  ;;  %v172_v23 = vsub.f32 %v147_v11, %v156_v12 }
  0x5e   :  { %v7398_v27 = vld [vmem:[#allocation9 + $0x61c] sm:$0xf0] }
  0x5f   :  { %v6116_v28 = vld [vmem:[#allocation9 + $0x9c0] sm:$0xf]  ;;  %v5637_v39 = vor.u32 %v7398_v27, %v5636_v26  ;;  %3301 = vmatpush.bf16.msra.mxu2 %v5381_v36 }
  0x60   :  { %v7518_v29 = vld [vmem:[#allocation9 + $0x9dc] sm:$0xf0] }
  0x61   :  { %v6372_v30 = vld [vmem:[#allocation9 + $0xbc0] sm:$0xf]  ;;  %v6117_v40 = vor.u32 %v7518_v29, %v6116_v28  ;;  %3314 = vmatpush.bf16.msra.mxu3 %v5637_v39 }
  0x62   :  { %v7582_v32 = vld [vmem:[#allocation9 + $0xbdc] sm:$0xf0]  ;;  %3302 = vmatmul.bf16.vlgmr.msra.gmra.mxu2 %v8080_v19 }
  0x63   :  { %v6628_v33 = vld [vmem:[#allocation9 + $0xdc0] sm:$0xf]  ;;  %v6373_v41 = vor.u32 %v7582_v32, %v6372_v30  ;;  %3320 = vmatpush.bf16.msrb.mxu0 %v6117_v40  ;;  %v8084_v32 = vpack.c.bf16 %v172_v23, %v172_v23  ;;  %v5094_v23 = vld [vmem:[#allocation9 + $0x1e0] sm:$0xf0] }
  0x64   :  { %v7646_v34 = vld [vmem:[#allocation9 + $0xddc] sm:$0xf0] }
  0x65   :  { %v6884_v37 = vld [vmem:[#allocation9 + $0xfc0] sm:$0xf]  ;;  %v6629_v42 = vor.u32 %v7646_v34, %v6628_v33  ;;  %3333 = vmatpush.bf16.msrb.mxu1 %v6373_v41  ;;  %v8086_v33 = vpack.c.bf16 %v175_v24, %v175_v24  ;;  %3276 = vmatmul.bf16.vlgmr.msra.gmra.mxu0 %v8084_v32  ;;  %v7322_v24 = vld [vmem:[#allocation9 + $0x3c4] sm:$0xf] }
  0x66   :  { %v7710_v38 = vld [vmem:[#allocation9 + $0xfdc] sm:$0xf0] }
  0x67   :  { %v6084_v43 = vld [vmem:[#allocation9 + $0x980] sm:$0xf]  ;;  %v6885_v46 = vor.u32 %v7710_v38, %v6884_v37  ;;  %3346 = vmatpush.bf16.msrb.mxu2 %v6629_v42  ;;  %3315 = vmatmul.bf16.vlgmr.msra.gmra.mxu3 %v8086_v33 }
  0x68   :  { %v7510_v44 = vld [vmem:[#allocation9 + $0x99c] sm:$0xf0] }
  0x69   :  { %v6340_v45 = vld [vmem:[#allocation9 + $0xb80] sm:$0xf]  ;;  %v6085_v52 = vor.u32 %v7510_v44, %v6084_v43  ;;  %3359 = vmatpush.bf16.msrb.mxu3 %v6885_v46 }
  0x6a   :  { %v7574_v47 = vld [vmem:[#allocation9 + $0xb9c] sm:$0xf0] }
  0x6b   :  { %v6596_v48 = vld [vmem:[#allocation9 + $0xd80] sm:$0xf]  ;;  %v6341_v55 = vor.u32 %v7574_v47, %v6340_v45  ;;  %3321 = vmatpush.bf16.msrb.mxu0 %v6085_v52 }
  0x6c   :  { %v7638_v49 = vld [vmem:[#allocation9 + $0xd9c] sm:$0xf0] }
  0x6d   :  { %v6852_v50 = vld [vmem:[#allocation9 + $0xf80] sm:$0xf]  ;;  %v6597_v56 = vor.u32 %v7638_v49, %v6596_v48  ;;  %3334 = vmatpush.bf16.msrb.mxu1 %v6341_v55 }
  0x6e   :  { %v7702_v51 = vld [vmem:[#allocation9 + $0xf9c] sm:$0xf0] }
  0x6f   :  { %v6052_v53 = vld [vmem:[#allocation9 + $0x940] sm:$0xf]  ;;  %v6853_v60 = vor.u32 %v7702_v51, %v6852_v50  ;;  %3347 = vmatpush.bf16.msrb.mxu2 %v6597_v56 }
  0x70   :  { %v7502_v54 = vld [vmem:[#allocation9 + $0x95c] sm:$0xf0] }
  0x71   :  { %v6308_v57 = vld [vmem:[#allocation9 + $0xb40] sm:$0xf]  ;;  %v6053_v4 = vor.u32 %v7502_v54, %v6052_v53  ;;  %3360 = vmatpush.bf16.msrb.mxu3 %v6853_v60 }
  0x72   :  { %v7566_v58 = vld [vmem:[#allocation9 + $0xb5c] sm:$0xf0] }
  0x73   :  { %v6564_v61 = vld [vmem:[#allocation9 + $0xd40] sm:$0xf]  ;;  %v6309_v9 = vor.u32 %v7566_v58, %v6308_v57  ;;  %3322 = vmatpush.bf16.msrb.mxu0 %v6053_v4 }
  0x74   :  { %v7630_v62 = vld [vmem:[#allocation9 + $0xd5c] sm:$0xf0] }
  0x75   :  { %v6820_v1 = vld [vmem:[#allocation9 + $0xf40] sm:$0xf]  ;;  %v6565_v10 = vor.u32 %v7630_v62, %v6564_v61  ;;  %3335 = vmatpush.bf16.msrb.mxu1 %v6309_v9  ;;  %v153_v9 = vld [vmem:[#allocation4 + $0x30] sm:$0xff] }
  0x76   :  { %v7694_v2 = vld [vmem:[#allocation9 + $0xf5c] sm:$0xf0] }
  0x77   :  { %v6020_v3 = vld [vmem:[#allocation9 + $0x900] sm:$0xf]  ;;  %v6821_v16 = vor.u32 %v7694_v2, %v6820_v1  ;;  %3348 = vmatpush.bf16.msrb.mxu2 %v6565_v10  ;;  %v162_v10 = vperm.slane %v8075_v59, 6 }
  0x78   :  { %v7494_v5 = vld [vmem:[#allocation9 + $0x91c] sm:$0xf0] }
  0x79   :  { %v6276_v6 = vld [vmem:[#allocation9 + $0xb00] sm:$0xf]  ;;  %v6021_v25 = vor.u32 %v7494_v5, %v6020_v3  ;;  %3361 = vmatpush.bf16.msrb.mxu3 %v6821_v16  ;;  %v163_v16 = vperm.slane %v8075_v59, 7 }
  0x7a   :  { %v7558_v7 = vld [vmem:[#allocation9 + $0xb1c] sm:$0xf0] }
  0x7b   :  { %v148_v15 = vld [vmem:[#allocation4 + $0x8] sm:$0xff]  ;;  %v6277_v26 = vor.u32 %v7558_v7, %v6276_v6  ;;  %3323 = vmatpush.bf16.msrb.mxu0 %v6021_v25 }
  0x7c   :  { %v6532_v17 = vld [vmem:[#allocation9 + $0xd00] sm:$0xf]  ;;  %v173_v27 = vsub.f32 %v148_v15, %v157_v20  ;;  %v160_v15 = vperm.slane %v8075_v59, 4  ;;  %v151_v20 = vld [vmem:[#allocation4 + $0x20] sm:$0xff] }
  0x7d   :  { %v7622_v18 = vld [vmem:[#allocation9 + $0xd1c] sm:$0xf0]  ;;  %3336 = vmatpush.bf16.msrb.mxu1 %v6277_v26 }
  0x7e   :  { %v6788_v21 = vld [vmem:[#allocation9 + $0xf00] sm:$0xf]  ;;  %v6533_v28 = vor.u32 %v7622_v18, %v6532_v17  ;;  %v8088_v38 = vpack.c.bf16 %v173_v27, %v173_v27  ;;  %v7258_v18 = vld [vmem:[#allocation9 + $0x1c4] sm:$0xf] }
  0x7f   :  { %v7686_v22 = vld [vmem:[#allocation9 + $0xf1c] sm:$0xf0] }
  0x80   :  { %v5988_v29 = vld [vmem:[#allocation9 + $0x8c0] sm:$0xf]  ;;  %v6789_v34 = vor.u32 %v7686_v22, %v6788_v21  ;;  %3289 = vmatmul.bf16.vlgmr.msra.gmra.mxu1 %v8088_v38  ;;  %3349 = vmatpush.bf16.msrb.mxu2 %v6533_v28  ;;  %v154_v21 = vld [vmem:[#allocation4 + $0x38] sm:$0xff]  ;;  %v161_v22 = vperm.slane %v8075_v59, 5  ;;  %v5350_v28 = vld [vmem:[#allocation9 + $0x3e0] sm:$0xf0]  ;;  %v5097_v59 = vor.u32 %v7258_v18, %v5094_v23 }
  0x81   :  { %v7486_v30 = vld [vmem:[#allocation9 + $0x8dc] sm:$0xf0]  ;;  %v4966_v23 = vld [vmem:[#allocation9 + $0xe0] sm:$0xf0] }
  0x82   :  { %v6244_v31 = vld [vmem:[#allocation9 + $0xac0] sm:$0xf]  ;;  %v5989_v41 = vor.u32 %v7486_v30, %v5988_v29  ;;  %3362 = vmatpush.bf16.msrb.mxu3 %v6789_v34  ;;  %v7386_v29 = vld [vmem:[#allocation9 + $0x5c4] sm:$0xf] }
  0x83   :  { %v7550_v35 = vld [vmem:[#allocation9 + $0xadc] sm:$0xf0]  ;;  %v5606_v30 = vld [vmem:[#allocation9 + $0x5e0] sm:$0xf0] }
  0x84   :  { %v6500_v36 = vld [vmem:[#allocation9 + $0xcc0] sm:$0xf]  ;;  %v6245_v42 = vor.u32 %v7550_v35, %v6244_v31  ;;  %3324 = vmatpush.bf16.msrb.mxu0 %v5989_v41  ;;  %v178_v31 = vsub.f32 %v153_v9, %v162_v10  ;;  %v7450_v35 = vld [vmem:[#allocation9 + $0x7c4] sm:$0xf] }
  0x85   :  { %v7614_v37 = vld [vmem:[#allocation9 + $0xcdc] sm:$0xf0]  ;;  %v7234_v9 = vld [vmem:[#allocation9 + $0x104] sm:$0xf] }
  0x86   :  { %v6756_v39 = vld [vmem:[#allocation9 + $0xec0] sm:$0xf]  ;;  %v6501_v43 = vor.u32 %v7614_v37, %v6500_v36  ;;  %3337 = vmatpush.bf16.msrb.mxu1 %v6245_v42  ;;  %v5862_v36 = vld [vmem:[#allocation9 + $0x7e0] sm:$0xf0]  ;;  %v176_v37 = vsub.f32 %v151_v20, %v160_v15  ;;  %v5353_v42 = vor.u32 %v7322_v24, %v5350_v28 }
  0x87   :  { %v7678_v40 = vld [vmem:[#allocation9 + $0xedc] sm:$0xf0]  ;;  %v4998_v10 = vld [vmem:[#allocation9 + $0x120] sm:$0xf0] }
  0x88   :  { %v5956_v44 = vld [vmem:[#allocation9 + $0x880] sm:$0xf]  ;;  %v6757_v47 = vor.u32 %v7678_v40, %v6756_v39  ;;  %3350 = vmatpush.bf16.msrb.mxu2 %v6501_v43  ;;  %v179_v39 = vsub.f32 %v154_v21, %v163_v16  ;;  %v5609_v43 = vor.u32 %v7386_v29, %v5606_v30  ;;  %v5510_v15 = vld [vmem:[#allocation9 + $0x520] sm:$0xf0]  ;;  %v5001_v18 = vor.u32 %v7234_v9, %v4998_v10 }
  0x89   :  { %v7478_v45 = vld [vmem:[#allocation9 + $0x89c] sm:$0xf0]  ;;  %v7426_v16 = vld [vmem:[#allocation9 + $0x704] sm:$0xf] }
  0x8a   :  { %v6212_v46 = vld [vmem:[#allocation9 + $0xa80] sm:$0xf]  ;;  %v5957_v53 = vor.u32 %v7478_v45, %v5956_v44  ;;  %3363 = vmatpush.bf16.msrb.mxu3 %v6757_v47  ;;  %v7250_v44 = vld [vmem:[#allocation9 + $0x184] sm:$0xf]  ;;  %v5865_v47 = vor.u32 %v7450_v35, %v5862_v36 }
  0x8b   :  { %v7542_v48 = vld [vmem:[#allocation9 + $0xa9c] sm:$0xf0]  ;;  %v5062_v45 = vld [vmem:[#allocation9 + $0x1a0] sm:$0xf0] }
  0x8c   :  { %v6468_v49 = vld [vmem:[#allocation9 + $0xc80] sm:$0xf]  ;;  %v6213_v56 = vor.u32 %v7542_v48, %v6212_v46  ;;  %3325 = vmatpush.bf16.msrb.mxu0 %v5957_v53  ;;  %v7314_v46 = vld [vmem:[#allocation9 + $0x384] sm:$0xf] }
  0x8d   :  { %v7606_v50 = vld [vmem:[#allocation9 + $0xc9c] sm:$0xf0]  ;;  %v5318_v48 = vld [vmem:[#allocation9 + $0x3a0] sm:$0xf0] }
  0x8e   :  { %v6724_v51 = vld [vmem:[#allocation9 + $0xe80] sm:$0xf]  ;;  %v6469_v57 = vor.u32 %v7606_v50, %v6468_v49  ;;  %3338 = vmatpush.bf16.msrb.mxu1 %v6213_v56  ;;  %v7378_v49 = vld [vmem:[#allocation9 + $0x584] sm:$0xf]  ;;  %v5065_v56 = vor.u32 %v7250_v44, %v5062_v45 }
  0x8f   :  { %v7670_v52 = vld [vmem:[#allocation9 + $0xe9c] sm:$0xf0]  ;;  %v5574_v50 = vld [vmem:[#allocation9 + $0x5a0] sm:$0xf0] }
  0x90   :  { %v5924_v54 = vld [vmem:[#allocation9 + $0x840] sm:$0xf]  ;;  %v6725_v62 = vor.u32 %v7670_v52, %v6724_v51  ;;  %3351 = vmatpush.bf16.msrb.mxu2 %v6469_v57  ;;  %v8097_v51 = vpack.c.bf16 %v178_v31, %v178_v31  ;;  %v7442_v52 = vld [vmem:[#allocation9 + $0x784] sm:$0xf] }
  0x91   :  { %v7470_v55 = vld [vmem:[#allocation9 + $0x85c] sm:$0xf0]  ;;  %v5830_v53 = vld [vmem:[#allocation9 + $0x7a0] sm:$0xf0] }
  0x92   :  { %v6180_v58 = vld [vmem:[#allocation9 + $0xa40] sm:$0xf]  ;;  %v5925_v6 = vor.u32 %v7470_v55, %v5924_v54  ;;  %3364 = vmatpush.bf16.msrb.mxu3 %v6725_v62  ;;  %v8099_v54 = vpack.c.bf16 %v176_v37, %v176_v37  ;;  %v8101_v55 = vpack.c.bf16 %v179_v39, %v179_v39  ;;  %v5030_v62 = vld [vmem:[#allocation9 + $0x160] sm:$0xf0] }
  0x93   :  { %v7534_v60 = vld [vmem:[#allocation9 + $0xa5c] sm:$0xf0]  ;;  %v7290_v24 = vld [vmem:[#allocation9 + $0x2c4] sm:$0xf] }
  0x94   :  { %v6436_v61 = vld [vmem:[#allocation9 + $0xc40] sm:$0xf]  ;;  %v6181_v11 = vor.u32 %v7534_v60, %v6180_v58  ;;  %3326 = vmatpush.bf16.msrb.mxu0 %v5925_v6  ;;  %v5321_v58 = vor.u32 %v7314_v46, %v5318_v48  ;;  %v5577_v60 = vor.u32 %v7378_v49, %v5574_v50  ;;  %v5478_v28 = vld [vmem:[#allocation9 + $0x4e0] sm:$0xf0] }
  0x95   :  { %v7598_v63 = vld [vmem:[#allocation9 + $0xc5c] sm:$0xf0]  ;;  %v7418_v29 = vld [vmem:[#allocation9 + $0x6c4] sm:$0xf] }
  0x96   :  { %v6692_v0 = vld [vmem:[#allocation9 + $0xe40] sm:$0xf]  ;;  %v6437_v12 = vor.u32 %v7598_v63, %v6436_v61  ;;  %3339 = vmatpush.bf16.msrb.mxu1 %v6181_v11  ;;  %v7242_v61 = vld [vmem:[#allocation9 + $0x144] sm:$0xf] }
  0x97   :  { %v7662_v1 = vld [vmem:[#allocation9 + $0xe5c] sm:$0xf0]  ;;  %v7306_v63 = vld [vmem:[#allocation9 + $0x344] sm:$0xf]  ;;  %v5033_v6 = vor.u32 %v7242_v61, %v5030_v62 }
  0x98   :  { %v5892_v2 = vld [vmem:[#allocation9 + $0x800] sm:$0xf]  ;;  %v6693_v17 = vor.u32 %v7662_v1, %v6692_v0  ;;  %3352 = vmatpush.bf16.msrb.mxu2 %v6437_v12  ;;  %v5833_v0 = vor.u32 %v7442_v52, %v5830_v53  ;;  %v5286_v1 = vld [vmem:[#allocation9 + $0x360] sm:$0xf0] }
  0x99   :  { %v7462_v3 = vld [vmem:[#allocation9 + $0x81c] sm:$0xf0]  ;;  %v7298_v11 = vld [vmem:[#allocation9 + $0x304] sm:$0xf] }
  0x9a   :  { %v6148_v4 = vld [vmem:[#allocation9 + $0xa00] sm:$0xf]  ;;  %v5893_v26 = vor.u32 %v7462_v3, %v5892_v2  ;;  %3365 = vmatpush.bf16.msrb.mxu3 %v6693_v17  ;;  %v7370_v2 = vld [vmem:[#allocation9 + $0x544] sm:$0xf] }
  0x9b   :  { %v7526_v5 = vld [vmem:[#allocation9 + $0xa1c] sm:$0xf0]  ;;  %v5542_v3 = vld [vmem:[#allocation9 + $0x560] sm:$0xf0] }
  0x9c   :  { %v6404_v7 = vld [vmem:[#allocation9 + $0xc00] sm:$0xf]  ;;  %v6149_v27 = vor.u32 %v7526_v5, %v6148_v4  ;;  %3327 = vmatpush.bf16.msrb.mxu0 %v5893_v26  ;;  %v7434_v4 = vld [vmem:[#allocation9 + $0x744] sm:$0xf] }
  0x9d   :  { %v7590_v8 = vld [vmem:[#allocation9 + $0xc1c] sm:$0xf0]  ;;  %v5798_v5 = vld [vmem:[#allocation9 + $0x760] sm:$0xf0] }
  0x9e   :  { %v6660_v13 = vld [vmem:[#allocation9 + $0xe00] sm:$0xf]  ;;  %v6405_v34 = vor.u32 %v7590_v8, %v6404_v7  ;;  %3340 = vmatpush.bf16.msrb.mxu1 %v6149_v27  ;;  %v5289_v7 = vor.u32 %v7306_v63, %v5286_v1  ;;  %v5545_v8 = vor.u32 %v7370_v2, %v5542_v3  ;;  %v5801_v12 = vor.u32 %v7434_v4, %v5798_v5  ;;  %v5766_v17 = vld [vmem:[#allocation9 + $0x720] sm:$0xf0] }
  0x9f   :  { %v7654_v14 = vld [vmem:[#allocation9 + $0xe1c] sm:$0xf0]  ;;  %3328 = vmatmul.bf16.vlgmr.msrb.gmra.mxu0 %v8099_v54  ;;  %v5222_v26 = vld [vmem:[#allocation9 + $0x2e0] sm:$0xf0] }
  0xa0   :  { %v152_v25 = vld [vmem:[#allocation4 + $0x28] sm:$0xff]  ;;  %v6661_v40 = vor.u32 %v7654_v14, %v6660_v13  ;;  %3353 = vmatpush.bf16.msrb.mxu2 %v6405_v34  ;;  %3372 = vmatpush.bf16.msra.mxu0 %v5097_v59  ;;  %v5225_v34 = vor.u32 %v7290_v24, %v5222_v26 }
  0xa1   :  { %v177_v41 = vsub.f32 %v152_v25, %v161_v22  ;;  %v5254_v13 = vld [vmem:[#allocation9 + $0x320] sm:$0xf0]  ;;  %v5769_v25 = vor.u32 %v7426_v16, %v5766_v17 }
  0xa2   :  { %3366 = vmatpush.bf16.msrb.mxu3 %v6661_v40  ;;  %3385 = vmatpush.bf16.msra.mxu1 %v5353_v42  ;;  %v7362_v14 = vld [vmem:[#allocation9 + $0x504] sm:$0xf]  ;;  %v5257_v20 = vor.u32 %v7298_v11, %v5254_v13 }
  0xa3   :  { %v8103_v57 = vpack.c.bf16 %v177_v41, %v177_v41  ;;  %3354 = vmatmul.bf16.vlgmr.msrb.gmra.mxu2 %v8097_v51  ;;  %v5513_v21 = vor.u32 %v7362_v14, %v5510_v15  ;;  %v7226_v22 = vld [vmem:[#allocation9 + $0xc4] sm:$0xf] }
  0xa4   :  { %3398 = vmatpush.bf16.msra.mxu2 %v5609_v43  ;;  %3373 = vmatpush.bf16.msra.mxu0 %v5065_v56  ;;  %v7354_v27 = vld [vmem:[#allocation9 + $0x4c4] sm:$0xf]  ;;  %v4969_v31 = vor.u32 %v7226_v22, %v4966_v23 }
  0xa5   :  { %3367 = vmatmul.bf16.vlgmr.msrb.gmra.mxu3 %v8101_v55  ;;  %3341 = vmatmul.bf16.vlgmr.msrb.gmra.mxu1 %v8103_v57  ;;  %v5734_v30 = vld [vmem:[#allocation9 + $0x6e0] sm:$0xf0]  ;;  %v5481_v35 = vor.u32 %v7354_v27, %v5478_v28 }
  0xa6   :  { %3411 = vmatpush.bf16.msra.mxu3 %v5865_v47  ;;  %3386 = vmatpush.bf16.msra.mxu1 %v5321_v58  ;;  %v7218_v36 = vld [vmem:[#allocation9 + $0x84] sm:$0xf]  ;;  %v5737_v40 = vor.u32 %v7418_v29, %v5734_v30 }
  0xa7   :  { %v4934_v37 = vld [vmem:[#allocation9 + $0xa0] sm:$0xf0] }
  0xa8   :  { %3399 = vmatpush.bf16.msra.mxu2 %v5577_v60  ;;  %3374 = vmatpush.bf16.msra.mxu0 %v5033_v6  ;;  %v7282_v39 = vld [vmem:[#allocation9 + $0x284] sm:$0xf]  ;;  %v4937_v45 = vor.u32 %v7218_v36, %v4934_v37 }
  0xa9   :  { %v5190_v59 = vld [vmem:[#allocation9 + $0x2a0] sm:$0xf0] }
  0xaa   :  { %3412 = vmatpush.bf16.msra.mxu3 %v5833_v0  ;;  %3387 = vmatpush.bf16.msra.mxu1 %v5289_v7  ;;  %v7346_v41 = vld [vmem:[#allocation9 + $0x484] sm:$0xf]  ;;  %v5193_v46 = vor.u32 %v7282_v39, %v5190_v59 }
  0xab   :  { %v5446_v42 = vld [vmem:[#allocation9 + $0x4a0] sm:$0xf0] }
  0xac   :  { %3400 = vmatpush.bf16.msra.mxu2 %v5545_v8  ;;  %3375 = vmatpush.bf16.msra.mxu0 %v5001_v18  ;;  %v7410_v43 = vld [vmem:[#allocation9 + $0x684] sm:$0xf]  ;;  %v5449_v47 = vor.u32 %v7346_v41, %v5446_v42 }
  0xad   :  { %v5702_v44 = vld [vmem:[#allocation9 + $0x6a0] sm:$0xf0] }
  0xae   :  { %3413 = vmatpush.bf16.msra.mxu3 %v5801_v12  ;;  %3388 = vmatpush.bf16.msra.mxu1 %v5257_v20  ;;  %v7210_v48 = vld [vmem:[#allocation9 + $0x44] sm:$0xf]  ;;  %v5705_v52 = vor.u32 %v7410_v43, %v5702_v44 }
  0xaf   :  { %v4902_v49 = vld [vmem:[#allocation9 + $0x60] sm:$0xf0] }
  0xb0   :  { %3401 = vmatpush.bf16.msra.mxu2 %v5513_v21  ;;  %3376 = vmatpush.bf16.msra.mxu0 %v4969_v31  ;;  %v7274_v50 = vld [vmem:[#allocation9 + $0x244] sm:$0xf]  ;;  %v4905_v63 = vor.u32 %v7210_v48, %v4902_v49 }
  0xb1   :  { %v5158_v53 = vld [vmem:[#allocation9 + $0x260] sm:$0xf0] }
  0xb2   :  { %3414 = vmatpush.bf16.msra.mxu3 %v5769_v25  ;;  %3389 = vmatpush.bf16.msra.mxu1 %v5225_v34  ;;  %v7338_v56 = vld [vmem:[#allocation9 + $0x444] sm:$0xf]  ;;  %v5161_v3 = vor.u32 %v7274_v50, %v5158_v53 }
  0xb3   :  { %v5414_v58 = vld [vmem:[#allocation9 + $0x460] sm:$0xf0] }
  0xb4   :  { %3402 = vmatpush.bf16.msra.mxu2 %v5481_v35  ;;  %v7402_v60 = vld [vmem:[#allocation9 + $0x644] sm:$0xf]  ;;  %3377 = vmatpush.bf16.msra.mxu0 %v4937_v45  ;;  %v5417_v4 = vor.u32 %v7338_v56, %v5414_v58 }
  0xb5   :  { %v5670_v61 = vld [vmem:[#allocation9 + $0x660] sm:$0xf0] }
  0xb6   :  { %3415 = vmatpush.bf16.msra.mxu3 %v5737_v40  ;;  %v7202_v62 = vld [vmem:[#allocation9 + $0x4] sm:$0xf]  ;;  %3390 = vmatpush.bf16.msra.mxu1 %v5193_v46  ;;  %v5673_v8 = vor.u32 %v7402_v60, %v5670_v61 }
  0xb7   :  { %v4870_v0 = vld [vmem:[#allocation9 + $0x20] sm:$0xf0] }
  0xb8   :  { %v7266_v1 = vld [vmem:[#allocation9 + $0x204] sm:$0xf]  ;;  %3403 = vmatpush.bf16.msra.mxu2 %v5449_v47  ;;  %3378 = vmatpush.bf16.msra.mxu0 %v4905_v63  ;;  %v4873_v13 = vor.u32 %v7202_v62, %v4870_v0 }
  0xb9   :  { %v5126_v2 = vld [vmem:[#allocation9 + $0x220] sm:$0xf0] }
  0xba   :  { %v7330_v5 = vld [vmem:[#allocation9 + $0x404] sm:$0xf]  ;;  %3416 = vmatpush.bf16.msra.mxu3 %v5705_v52  ;;  %3391 = vmatpush.bf16.msra.mxu1 %v5161_v3  ;;  %v5129_v17 = vor.u32 %v7266_v1, %v5126_v2 }
  0xbb   :  { %v5382_v6 = vld [vmem:[#allocation9 + $0x420] sm:$0xf0] }
  0xbc   :  { %v7394_v7 = vld [vmem:[#allocation9 + $0x604] sm:$0xf]  ;;  %3404 = vmatpush.bf16.msra.mxu2 %v5417_v4  ;;  %v5385_v18 = vor.u32 %v7330_v5, %v5382_v6  ;;  %3379 = vmatpush.bf16.msra.mxu0 %v4873_v13 }
  0xbd   :  { %v5638_v9 = vld [vmem:[#allocation9 + $0x620] sm:$0xf0] }
  0xbe   :  { %v7514_v10 = vld [vmem:[#allocation9 + $0x9c4] sm:$0xf]  ;;  %3417 = vmatpush.bf16.msra.mxu3 %v5673_v8  ;;  %v5641_v22 = vor.u32 %v7394_v7, %v5638_v9  ;;  %3392 = vmatpush.bf16.msra.mxu1 %v5129_v17 }
  0xbf   :  { %v6118_v11 = vld [vmem:[#allocation9 + $0x9e0] sm:$0xf0]  ;;  %3380 = vmatmul.bf16.vlgmr.msra.gmra.mxu0 %v8084_v32 }
  0xc0   :  { %v7578_v12 = vld [vmem:[#allocation9 + $0xbc4] sm:$0xf]  ;;  %v6121_v23 = vor.u32 %v7514_v10, %v6118_v11  ;;  %3405 = vmatpush.bf16.msra.mxu2 %v5385_v18 }
  0xc1   :  { %v6374_v14 = vld [vmem:[#allocation9 + $0xbe0] sm:$0xf0]  ;;  %3393 = vmatmul.bf16.vlgmr.msra.gmra.mxu1 %v8088_v38 }
  0xc2   :  { %v7642_v15 = vld [vmem:[#allocation9 + $0xdc4] sm:$0xf]  ;;  %v6377_v24 = vor.u32 %v7578_v12, %v6374_v14  ;;  %3418 = vmatpush.bf16.msra.mxu3 %v5641_v22  ;;  %3424 = vmatpush.bf16.msrb.mxu0 %v6121_v23 }
  0xc3   :  { %v6630_v16 = vld [vmem:[#allocation9 + $0xde0] sm:$0xf0]  ;;  %3406 = vmatmul.bf16.vlgmr.msra.gmra.mxu2 %v8080_v19 }
  0xc4   :  { %v7706_v20 = vld [vmem:[#allocation9 + $0xfc4] sm:$0xf]  ;;  %v6633_v25 = vor.u32 %v7642_v15, %v6630_v16  ;;  %3437 = vmatpush.bf16.msrb.mxu1 %v6377_v24 }
  0xc5   :  { %v6886_v21 = vld [vmem:[#allocation9 + $0xfe0] sm:$0xf0]  ;;  %3419 = vmatmul.bf16.vlgmr.msra.gmra.mxu3 %v8086_v33 }
  0xc6   :  { %v7506_v26 = vld [vmem:[#allocation9 + $0x984] sm:$0xf]  ;;  %v6889_v29 = vor.u32 %v7706_v20, %v6886_v21  ;;  %3450 = vmatpush.bf16.msrb.mxu2 %v6633_v25 }
  0xc7   :  { %v6086_v27 = vld [vmem:[#allocation9 + $0x9a0] sm:$0xf0] }
  0xc8   :  { %v7570_v28 = vld [vmem:[#allocation9 + $0xb84] sm:$0xf]  ;;  %v6089_v37 = vor.u32 %v7506_v26, %v6086_v27  ;;  %3463 = vmatpush.bf16.msrb.mxu3 %v6889_v29 }
  0xc9   :  { %v6342_v30 = vld [vmem:[#allocation9 + $0xba0] sm:$0xf0] }
  0xca   :  { %v7634_v31 = vld [vmem:[#allocation9 + $0xd84] sm:$0xf]  ;;  %v6345_v39 = vor.u32 %v7570_v28, %v6342_v30  ;;  %3425 = vmatpush.bf16.msrb.mxu0 %v6089_v37 }
  0xcb   :  { %v6598_v34 = vld [vmem:[#allocation9 + $0xda0] sm:$0xf0] }
  0xcc   :  { %v7698_v35 = vld [vmem:[#allocation9 + $0xf84] sm:$0xf]  ;;  %v6601_v40 = vor.u32 %v7634_v31, %v6598_v34  ;;  %3438 = vmatpush.bf16.msrb.mxu1 %v6345_v39 }
  0xcd   :  { %v6854_v36 = vld [vmem:[#allocation9 + $0xfa0] sm:$0xf0] }
  0xce   :  { %v7498_v59 = vld [vmem:[#allocation9 + $0x944] sm:$0xf]  ;;  %v6857_v43 = vor.u32 %v7698_v35, %v6854_v36  ;;  %3451 = vmatpush.bf16.msrb.mxu2 %v6601_v40 }
  0xcf   :  { %v6054_v41 = vld [vmem:[#allocation9 + $0x960] sm:$0xf0] }
  0xd0   :  { %v7562_v42 = vld [vmem:[#allocation9 + $0xb44] sm:$0xf]  ;;  %v6057_v49 = vor.u32 %v7498_v59, %v6054_v41  ;;  %3464 = vmatpush.bf16.msrb.mxu3 %v6857_v43 }
  0xd1   :  { %v6310_v44 = vld [vmem:[#allocation9 + $0xb60] sm:$0xf0] }
  0xd2   :  { %v7626_v45 = vld [vmem:[#allocation9 + $0xd44] sm:$0xf]  ;;  %v6313_v50 = vor.u32 %v7562_v42, %v6310_v44  ;;  %3426 = vmatpush.bf16.msrb.mxu0 %v6057_v49 }
  0xd3   :  { %v6566_v46 = vld [vmem:[#allocation9 + $0xd60] sm:$0xf0] }
  0xd4   :  { %v7690_v47 = vld [vmem:[#allocation9 + $0xf44] sm:$0xf]  ;;  %v6569_v52 = vor.u32 %v7626_v45, %v6566_v46  ;;  %3439 = vmatpush.bf16.msrb.mxu1 %v6313_v50 }
  0xd5   :  { %v6822_v48 = vld [vmem:[#allocation9 + $0xf60] sm:$0xf0] }
  0xd6   :  { %v7490_v53 = vld [vmem:[#allocation9 + $0x904] sm:$0xf]  ;;  %v6825_v60 = vor.u32 %v7690_v47, %v6822_v48  ;;  %3452 = vmatpush.bf16.msrb.mxu2 %v6569_v52 }
  0xd7   :  { %v6022_v56 = vld [vmem:[#allocation9 + $0x920] sm:$0xf0] }
  0xd8   :  { %v7554_v58 = vld [vmem:[#allocation9 + $0xb04] sm:$0xf]  ;;  %v6025_v2 = vor.u32 %v7490_v53, %v6022_v56  ;;  %3465 = vmatpush.bf16.msrb.mxu3 %v6825_v60  ;;  %v5100_v56 = vld [vmem:[#allocation9 + $0x1c8] sm:$0xf] }
  0xd9   :  { %v6278_v61 = vld [vmem:[#allocation9 + $0xb20] sm:$0xf0]  ;;  %v5356_v60 = vld [vmem:[#allocation9 + $0x3c8] sm:$0xf] }
  0xda   :  { %v7618_v62 = vld [vmem:[#allocation9 + $0xd04] sm:$0xf]  ;;  %v6281_v3 = vor.u32 %v7554_v58, %v6278_v61  ;;  %3427 = vmatpush.bf16.msrb.mxu0 %v6025_v2  ;;  %v7263_v58 = vld [vmem:[#allocation9 + $0x1e4] sm:$0xf0] }
  0xdb   :  { %v6534_v63 = vld [vmem:[#allocation9 + $0xd20] sm:$0xf0] }
  0xdc   :  { %v7682_v0 = vld [vmem:[#allocation9 + $0xf04] sm:$0xf]  ;;  %v6537_v4 = vor.u32 %v7618_v62, %v6534_v63  ;;  %3440 = vmatpush.bf16.msrb.mxu1 %v6281_v3  ;;  %v7327_v62 = vld [vmem:[#allocation9 + $0x3e4] sm:$0xf0] }
  0xdd   :  { %v6790_v1 = vld [vmem:[#allocation9 + $0xf20] sm:$0xf0]  ;;  %v5612_v63 = vld [vmem:[#allocation9 + $0x5c8] sm:$0xf] }
  0xde   :  { %v7482_v5 = vld [vmem:[#allocation9 + $0x8c4] sm:$0xf]  ;;  %v6793_v8 = vor.u32 %v7682_v0, %v6790_v1  ;;  %3453 = vmatpush.bf16.msrb.mxu2 %v6537_v4  ;;  %v7391_v0 = vld [vmem:[#allocation9 + $0x5e4] sm:$0xf0] }
  0xdf   :  { %v5990_v6 = vld [vmem:[#allocation9 + $0x8e0] sm:$0xf0]  ;;  %v5868_v3 = vld [vmem:[#allocation9 + $0x7c8] sm:$0xf] }
  0xe0   :  { %v7546_v7 = vld [vmem:[#allocation9 + $0xac4] sm:$0xf]  ;;  %v5993_v14 = vor.u32 %v7482_v5, %v5990_v6  ;;  %3466 = vmatpush.bf16.msrb.mxu3 %v6793_v8  ;;  %v7455_v4 = vld [vmem:[#allocation9 + $0x7e4] sm:$0xf0]  ;;  %v5101_v6 = vor.u32 %v7263_v58, %v5100_v56  ;;  %v5613_v8 = vor.u32 %v7391_v0, %v5612_v63 }
  0xe1   :  { %v6246_v9 = vld [vmem:[#allocation9 + $0xae0] sm:$0xf0]  ;;  %v5484_v56 = vld [vmem:[#allocation9 + $0x4c8] sm:$0xf] }
  0xe2   :  { %v7610_v10 = vld [vmem:[#allocation9 + $0xcc4] sm:$0xf]  ;;  %v6249_v15 = vor.u32 %v7546_v7, %v6246_v9  ;;  %3428 = vmatpush.bf16.msrb.mxu0 %v5993_v14  ;;  %v5357_v7 = vor.u32 %v7327_v62, %v5356_v60  ;;  %v5068_v9 = vld [vmem:[#allocation9 + $0x188] sm:$0xf] }
  0xe3   :  { %v6502_v11 = vld [vmem:[#allocation9 + $0xce0] sm:$0xf0]  ;;  %v5580_v14 = vld [vmem:[#allocation9 + $0x588] sm:$0xf] }
  0xe4   :  { %v7674_v12 = vld [vmem:[#allocation9 + $0xec4] sm:$0xf]  ;;  %v6505_v16 = vor.u32 %v7610_v10, %v6502_v11  ;;  %3441 = vmatpush.bf16.msrb.mxu1 %v6249_v15  ;;  %v7255_v10 = vld [vmem:[#allocation9 + $0x1a4] sm:$0xf0] }
  0xe5   :  { %v6758_v13 = vld [vmem:[#allocation9 + $0xee0] sm:$0xf0]  ;;  %v5324_v11 = vld [vmem:[#allocation9 + $0x388] sm:$0xf] }
  0xe6   :  { %v7474_v17 = vld [vmem:[#allocation9 + $0x884] sm:$0xf]  ;;  %v6761_v21 = vor.u32 %v7674_v12, %v6758_v13  ;;  %3454 = vmatpush.bf16.msrb.mxu2 %v6505_v16  ;;  %v5869_v12 = vor.u32 %v7455_v4, %v5868_v3  ;;  %v7319_v13 = vld [vmem:[#allocation9 + $0x3a4] sm:$0xf0] }
  0xe7   :  { %v5958_v18 = vld [vmem:[#allocation9 + $0x8a0] sm:$0xf0]  ;;  %v7383_v15 = vld [vmem:[#allocation9 + $0x5a4] sm:$0xf0] }
  0xe8   :  { %v7538_v20 = vld [vmem:[#allocation9 + $0xa84] sm:$0xf]  ;;  %v5961_v27 = vor.u32 %v7474_v17, %v5958_v18  ;;  %3467 = vmatpush.bf16.msrb.mxu3 %v6761_v21  ;;  %v5836_v16 = vld [vmem:[#allocation9 + $0x788] sm:$0xf]  ;;  %v5069_v18 = vor.u32 %v7255_v10, %v5068_v9  ;;  %v5581_v21 = vor.u32 %v7383_v15, %v5580_v14 }
  0xe9   :  { %v6214_v22 = vld [vmem:[#allocation9 + $0xaa0] sm:$0xf0]  ;;  %v7447_v17 = vld [vmem:[#allocation9 + $0x7a4] sm:$0xf0] }
  0xea   :  { %v7602_v23 = vld [vmem:[#allocation9 + $0xc84] sm:$0xf]  ;;  %v6217_v28 = vor.u32 %v7538_v20, %v6214_v22  ;;  %3429 = vmatpush.bf16.msrb.mxu0 %v5961_v27  ;;  %v5325_v20 = vor.u32 %v7319_v13, %v5324_v11  ;;  %v5036_v22 = vld [vmem:[#allocation9 + $0x148] sm:$0xf] }
  0xeb   :  { %v6470_v24 = vld [vmem:[#allocation9 + $0xca0] sm:$0xf0]  ;;  %v5548_v27 = vld [vmem:[#allocation9 + $0x548] sm:$0xf] }
  0xec   :  { %v7666_v25 = vld [vmem:[#allocation9 + $0xe84] sm:$0xf]  ;;  %v6473_v29 = vor.u32 %v7602_v23, %v6470_v24  ;;  %3442 = vmatpush.bf16.msrb.mxu1 %v6217_v28  ;;  %v7247_v23 = vld [vmem:[#allocation9 + $0x164] sm:$0xf0] }
  0xed   :  { %v6726_v26 = vld [vmem:[#allocation9 + $0xea0] sm:$0xf0]  ;;  %v5292_v24 = vld [vmem:[#allocation9 + $0x348] sm:$0xf] }
  0xee   :  { %v7466_v30 = vld [vmem:[#allocation9 + $0x844] sm:$0xf]  ;;  %v6729_v35 = vor.u32 %v7666_v25, %v6726_v26  ;;  %3455 = vmatpush.bf16.msrb.mxu2 %v6473_v29  ;;  %v5837_v25 = vor.u32 %v7447_v17, %v5836_v16  ;;  %v7311_v26 = vld [vmem:[#allocation9 + $0x364] sm:$0xf0] }
  0xef   :  { %v5926_v31 = vld [vmem:[#allocation9 + $0x860] sm:$0xf0]  ;;  %v7375_v28 = vld [vmem:[#allocation9 + $0x564] sm:$0xf0] }
  0xf0   :  { %v7530_v34 = vld [vmem:[#allocation9 + $0xa44] sm:$0xf]  ;;  %v5929_v41 = vor.u32 %v7466_v30, %v5926_v31  ;;  %3468 = vmatpush.bf16.msrb.mxu3 %v6729_v35  ;;  %v5804_v29 = vld [vmem:[#allocation9 + $0x748] sm:$0xf]  ;;  %v5037_v31 = vor.u32 %v7247_v23, %v5036_v22  ;;  %v5549_v35 = vor.u32 %v7375_v28, %v5548_v27 }
  0xf1   :  { %v6182_v36 = vld [vmem:[#allocation9 + $0xa60] sm:$0xf0]  ;;  %v7439_v30 = vld [vmem:[#allocation9 + $0x764] sm:$0xf0] }
  0xf2   :  { %v7594_v37 = vld [vmem:[#allocation9 + $0xc44] sm:$0xf]  ;;  %v6185_v44 = vor.u32 %v7530_v34, %v6182_v36  ;;  %3430 = vmatpush.bf16.msrb.mxu0 %v5929_v41  ;;  %v5293_v34 = vor.u32 %v7311_v26, %v5292_v24  ;;  %v5004_v36 = vld [vmem:[#allocation9 + $0x108] sm:$0xf] }
  0xf3   :  { %v6438_v39 = vld [vmem:[#allocation9 + $0xc60] sm:$0xf0]  ;;  %v5516_v41 = vld [vmem:[#allocation9 + $0x508] sm:$0xf] }
  0xf4   :  { %v7658_v40 = vld [vmem:[#allocation9 + $0xe44] sm:$0xf]  ;;  %v6441_v45 = vor.u32 %v7594_v37, %v6438_v39  ;;  %3443 = vmatpush.bf16.msrb.mxu1 %v6185_v44  ;;  %v7239_v37 = vld [vmem:[#allocation9 + $0x124] sm:$0xf0] }
  0xf5   :  { %v6694_v59 = vld [vmem:[#allocation9 + $0xe60] sm:$0xf0]  ;;  %v5260_v39 = vld [vmem:[#allocation9 + $0x308] sm:$0xf] }
  0xf6   :  { %v7458_v42 = vld [vmem:[#allocation9 + $0x804] sm:$0xf]  ;;  %v6697_v49 = vor.u32 %v7658_v40, %v6694_v59  ;;  %3456 = vmatpush.bf16.msrb.mxu2 %v6441_v45  ;;  %v5805_v40 = vor.u32 %v7439_v30, %v5804_v29  ;;  %v7303_v59 = vld [vmem:[#allocation9 + $0x324] sm:$0xf0]  ;;  %v5005_v45 = vor.u32 %v7239_v37, %v5004_v36 }
  0xf7   :  { %v5894_v43 = vld [vmem:[#allocation9 + $0x820] sm:$0xf0]  ;;  %v7431_v44 = vld [vmem:[#allocation9 + $0x724] sm:$0xf0] }
  0xf8   :  { %v7522_v46 = vld [vmem:[#allocation9 + $0xa04] sm:$0xf]  ;;  %v5897_v61 = vor.u32 %v7458_v42, %v5894_v43  ;;  %3469 = vmatpush.bf16.msrb.mxu3 %v6697_v49  ;;  %v7367_v42 = vld [vmem:[#allocation9 + $0x524] sm:$0xf0] }
  0xf9   :  { %v6150_v47 = vld [vmem:[#allocation9 + $0xa20] sm:$0xf0]  ;;  %v5772_v43 = vld [vmem:[#allocation9 + $0x708] sm:$0xf] }
  0xfa   :  { %v7586_v48 = vld [vmem:[#allocation9 + $0xc04] sm:$0xf]  ;;  %v6153_v1 = vor.u32 %v7522_v46, %v6150_v47  ;;  %3431 = vmatpush.bf16.msrb.mxu0 %v5897_v61  ;;  %v5261_v46 = vor.u32 %v7303_v59, %v5260_v39  ;;  %v5517_v47 = vor.u32 %v7367_v42, %v5516_v41  ;;  %v7231_v49 = vld [vmem:[#allocation9 + $0xe4] sm:$0xf0] }
  0xfb   :  { %v6406_v50 = vld [vmem:[#allocation9 + $0xc20] sm:$0xf0]  ;;  %v7359_v58 = vld [vmem:[#allocation9 + $0x4e4] sm:$0xf0] }
  0xfc   :  { %v7650_v52 = vld [vmem:[#allocation9 + $0xe04] sm:$0xf]  ;;  %v6409_v2 = vor.u32 %v7586_v48, %v6406_v50  ;;  %3444 = vmatpush.bf16.msrb.mxu1 %v6153_v1  ;;  %v4972_v48 = vld [vmem:[#allocation9 + $0xc8] sm:$0xf]  ;;  %v5485_v0 = vor.u32 %v7359_v58, %v5484_v56 }
  0xfd   :  { %v6662_v53 = vld [vmem:[#allocation9 + $0xe20] sm:$0xf0]  ;;  %3432 = vmatmul.bf16.vlgmr.msrb.gmra.mxu0 %v8099_v54  ;;  %v5228_v50 = vld [vmem:[#allocation9 + $0x2c8] sm:$0xf]  ;;  %v4973_v62 = vor.u32 %v7231_v49, %v4972_v48 }
  0xfe   :  { %v6665_v5 = vor.u32 %v7650_v52, %v6662_v53  ;;  %3457 = vmatpush.bf16.msrb.mxu2 %v6409_v2  ;;  %3476 = vmatpush.bf16.msra.mxu0 %v5101_v6  ;;  %v5773_v52 = vor.u32 %v7431_v44, %v5772_v43  ;;  %v7295_v53 = vld [vmem:[#allocation9 + $0x2e4] sm:$0xf0] }
  0xff   :  { %3445 = vmatmul.bf16.vlgmr.msrb.gmra.mxu1 %v8103_v57  ;;  %v5740_v60 = vld [vmem:[#allocation9 + $0x6c8] sm:$0xf]  ;;  %v5229_v63 = vor.u32 %v7295_v53, %v5228_v50 }
 0x100   :  { %3470 = vmatpush.bf16.msrb.mxu3 %v6665_v5  ;;  %3489 = vmatpush.bf16.msra.mxu1 %v5357_v7  ;;  %v7423_v61 = vld [vmem:[#allocation9 + $0x6e4] sm:$0xf0] }
 0x101   :  { %3458 = vmatmul.bf16.vlgmr.msrb.gmra.mxu2 %v8097_v51  ;;  %v4940_v1 = vld [vmem:[#allocation9 + $0x88] sm:$0xf]  ;;  %v5741_v4 = vor.u32 %v7423_v61, %v5740_v60 }
 0x102   :  { %3502 = vmatpush.bf16.msra.mxu2 %v5613_v8  ;;  %3477 = vmatpush.bf16.msra.mxu0 %v5069_v18  ;;  %v7223_v2 = vld [vmem:[#allocation9 + $0xa4] sm:$0xf0] }
 0x103   :  { %3471 = vmatmul.bf16.vlgmr.msrb.gmra.mxu3 %v8101_v55  ;;  %v5196_v3 = vld [vmem:[#allocation9 + $0x288] sm:$0xf]  ;;  %v4941_v10 = vor.u32 %v7223_v2, %v4940_v1 }
 0x104   :  { %3515 = vmatpush.bf16.msra.mxu3 %v5869_v12  ;;  %3490 = vmatpush.bf16.msra.mxu1 %v5325_v20  ;;  %v7287_v5 = vld [vmem:[#allocation9 + $0x2a4] sm:$0xf0] }
 0x105   :  { %v5452_v6 = vld [vmem:[#allocation9 + $0x488] sm:$0xf]  ;;  %v5197_v11 = vor.u32 %v7287_v5, %v5196_v3 }
 0x106   :  { %3503 = vmatpush.bf16.msra.mxu2 %v5581_v21  ;;  %3478 = vmatpush.bf16.msra.mxu0 %v5037_v31  ;;  %v7351_v7 = vld [vmem:[#allocation9 + $0x4a4] sm:$0xf0] }
 0x107   :  { %v5708_v8 = vld [vmem:[#allocation9 + $0x688] sm:$0xf]  ;;  %v5453_v12 = vor.u32 %v7351_v7, %v5452_v6 }
 0x108   :  { %3516 = vmatpush.bf16.msra.mxu3 %v5837_v25  ;;  %3491 = vmatpush.bf16.msra.mxu1 %v5293_v34  ;;  %v7415_v9 = vld [vmem:[#allocation9 + $0x6a4] sm:$0xf0] }
 0x109   :  { %v4908_v13 = vld [vmem:[#allocation9 + $0x48] sm:$0xf]  ;;  %v5709_v16 = vor.u32 %v7415_v9, %v5708_v8 }
 0x10a   :  { %3504 = vmatpush.bf16.msra.mxu2 %v5549_v35  ;;  %3479 = vmatpush.bf16.msra.mxu0 %v5005_v45  ;;  %v7215_v14 = vld [vmem:[#allocation9 + $0x64] sm:$0xf0] }
 0x10b   :  { %v5164_v15 = vld [vmem:[#allocation9 + $0x248] sm:$0xf]  ;;  %v4909_v23 = vor.u32 %v7215_v14, %v4908_v13 }
 0x10c   :  { %3517 = vmatpush.bf16.msra.mxu3 %v5805_v40  ;;  %3492 = vmatpush.bf16.msra.mxu1 %v5261_v46  ;;  %v7279_v17 = vld [vmem:[#allocation9 + $0x264] sm:$0xf0] }
 0x10d   :  { %v5420_v18 = vld [vmem:[#allocation9 + $0x448] sm:$0xf]  ;;  %v5165_v26 = vor.u32 %v7279_v17, %v5164_v15 }
 0x10e   :  { %3505 = vmatpush.bf16.msra.mxu2 %v5517_v47  ;;  %3480 = vmatpush.bf16.msra.mxu0 %v4973_v62  ;;  %v7343_v20 = vld [vmem:[#allocation9 + $0x464] sm:$0xf0] }
 0x10f   :  { %v5676_v21 = vld [vmem:[#allocation9 + $0x648] sm:$0xf]  ;;  %v5421_v27 = vor.u32 %v7343_v20, %v5420_v18 }
 0x110   :  { %3518 = vmatpush.bf16.msra.mxu3 %v5773_v52  ;;  %3493 = vmatpush.bf16.msra.mxu1 %v5229_v63  ;;  %v7407_v22 = vld [vmem:[#allocation9 + $0x664] sm:$0xf0] }
 0x111   :  { %v4876_v24 = vld [vmem:[#allocation9 + $0x8] sm:$0xf]  ;;  %v5677_v31 = vor.u32 %v7407_v22, %v5676_v21 }
 0x112   :  { %3506 = vmatpush.bf16.msra.mxu2 %v5485_v0  ;;  %3481 = vmatpush.bf16.msra.mxu0 %v4941_v10  ;;  %v7207_v25 = vld [vmem:[#allocation9 + $0x24] sm:$0xf0] }
 0x113   :  { %v5132_v28 = vld [vmem:[#allocation9 + $0x208] sm:$0xf]  ;;  %v4877_v59 = vor.u32 %v7207_v25, %v4876_v24 }
 0x114   :  { %3519 = vmatpush.bf16.msra.mxu3 %v5741_v4  ;;  %3494 = vmatpush.bf16.msra.mxu1 %v5197_v11  ;;  %v7271_v29 = vld [vmem:[#allocation9 + $0x224] sm:$0xf0] }
 0x115   :  { %v5388_v30 = vld [vmem:[#allocation9 + $0x408] sm:$0xf]  ;;  %v5133_v44 = vor.u32 %v7271_v29, %v5132_v28 }
 0x116   :  { %3507 = vmatpush.bf16.msra.mxu2 %v5453_v12  ;;  %v7335_v34 = vld [vmem:[#allocation9 + $0x424] sm:$0xf0]  ;;  %3482 = vmatpush.bf16.msra.mxu0 %v4909_v23 }
 0x117   :  { %v5644_v35 = vld [vmem:[#allocation9 + $0x608] sm:$0xf]  ;;  %v5389_v45 = vor.u32 %v7335_v34, %v5388_v30 }
 0x118   :  { %3520 = vmatpush.bf16.msra.mxu3 %v5709_v16  ;;  %v7399_v36 = vld [vmem:[#allocation9 + $0x624] sm:$0xf0]  ;;  %3495 = vmatpush.bf16.msra.mxu1 %v5165_v26 }
 0x119   :  { %v6124_v37 = vld [vmem:[#allocation9 + $0x9c8] sm:$0xf]  ;;  %v5645_v48 = vor.u32 %v7399_v36, %v5644_v35 }
 0x11a   :  { %v7519_v39 = vld [vmem:[#allocation9 + $0x9e4] sm:$0xf0]  ;;  %3508 = vmatpush.bf16.msra.mxu2 %v5421_v27  ;;  %3483 = vmatpush.bf16.msra.mxu0 %v4877_v59 }
 0x11b   :  { %v6380_v40 = vld [vmem:[#allocation9 + $0xbc8] sm:$0xf]  ;;  %v6125_v49 = vor.u32 %v7519_v39, %v6124_v37 }
 0x11c   :  { %v7583_v41 = vld [vmem:[#allocation9 + $0xbe4] sm:$0xf0]  ;;  %3521 = vmatpush.bf16.msra.mxu3 %v5677_v31  ;;  %3496 = vmatpush.bf16.msra.mxu1 %v5133_v44 }
 0x11d   :  { %v6636_v42 = vld [vmem:[#allocation9 + $0xdc8] sm:$0xf]  ;;  %v6381_v50 = vor.u32 %v7583_v41, %v6380_v40  ;;  %3484 = vmatmul.bf16.vlgmr.msra.gmra.mxu0 %v8084_v32 }
 0x11e   :  { %v7647_v43 = vld [vmem:[#allocation9 + $0xde4] sm:$0xf0]  ;;  %3509 = vmatpush.bf16.msra.mxu2 %v5389_v45  ;;  %3528 = vmatpush.bf16.msrb.mxu0 %v6125_v49 }
 0x11f   :  { %v6892_v46 = vld [vmem:[#allocation9 + $0xfc8] sm:$0xf]  ;;  %v6637_v52 = vor.u32 %v7647_v43, %v6636_v42  ;;  %3497 = vmatmul.bf16.vlgmr.msra.gmra.mxu1 %v8088_v38 }
 0x120   :  { %v7711_v47 = vld [vmem:[#allocation9 + $0xfe4] sm:$0xf0]  ;;  %3522 = vmatpush.bf16.msra.mxu3 %v5645_v48  ;;  %3541 = vmatpush.bf16.msrb.mxu1 %v6381_v50 }
 0x121   :  { %v6092_v53 = vld [vmem:[#allocation9 + $0x988] sm:$0xf]  ;;  %v6893_v60 = vor.u32 %v7711_v47, %v6892_v46  ;;  %3510 = vmatmul.bf16.vlgmr.msra.gmra.mxu2 %v8080_v19 }
 0x122   :  { %v7511_v56 = vld [vmem:[#allocation9 + $0x9a4] sm:$0xf0]  ;;  %3554 = vmatpush.bf16.msrb.mxu2 %v6637_v52 }
 0x123   :  { %v6348_v58 = vld [vmem:[#allocation9 + $0xb88] sm:$0xf]  ;;  %v6093_v2 = vor.u32 %v7511_v56, %v6092_v53  ;;  %3523 = vmatmul.bf16.vlgmr.msra.gmra.mxu3 %v8086_v33 }
 0x124   :  { %v7575_v61 = vld [vmem:[#allocation9 + $0xba4] sm:$0xf0]  ;;  %3567 = vmatpush.bf16.msrb.mxu3 %v6893_v60 }
 0x125   :  { %v6604_v62 = vld [vmem:[#allocation9 + $0xd88] sm:$0xf]  ;;  %v6349_v3 = vor.u32 %v7575_v61, %v6348_v58  ;;  %3529 = vmatpush.bf16.msrb.mxu0 %v6093_v2  ;;  %v3277_v58 = vpop.f32.mrf.mxu0 }
 0x126   :  { %v7639_v63 = vld [vmem:[#allocation9 + $0xda4] sm:$0xf0] }
 0x127   :  { %v6860_v0 = vld [vmem:[#allocation9 + $0xf88] sm:$0xf]  ;;  %v6605_v4 = vor.u32 %v7639_v63, %v6604_v62  ;;  %3542 = vmatpush.bf16.msrb.mxu1 %v6349_v3 }
 0x128   :  { %v7703_v1 = vld [vmem:[#allocation9 + $0xfa4] sm:$0xf0] }
 0x129   :  { %v6060_v5 = vld [vmem:[#allocation9 + $0x948] sm:$0xf]  ;;  %v6861_v8 = vor.u32 %v7703_v1, %v6860_v0  ;;  %3555 = vmatpush.bf16.msrb.mxu2 %v6605_v4  ;;  %v3290_v1 = vpop.f32.mrf.mxu1 }
 0x12a   :  { %v7503_v6 = vld [vmem:[#allocation9 + $0x964] sm:$0xf0] }
 0x12b   :  { %v6316_v7 = vld [vmem:[#allocation9 + $0xb48] sm:$0xf]  ;;  %v6061_v14 = vor.u32 %v7503_v6, %v6060_v5  ;;  %3568 = vmatpush.bf16.msrb.mxu3 %v6861_v8  ;;  %v3291_v6 = vadd.f32 %v3290_v1, %v3277_v58  ;;  %v5838_v58 = vld [vmem:[#allocation9 + $0x7a8] sm:$0xf0] }
 0x12c   :  { %v7567_v9 = vld [vmem:[#allocation9 + $0xb64] sm:$0xf0]  ;;  %v5038_v1 = vld [vmem:[#allocation9 + $0x168] sm:$0xf0] }
 0x12d   :  { %v6572_v10 = vld [vmem:[#allocation9 + $0xd48] sm:$0xf]  ;;  %v6317_v15 = vor.u32 %v7567_v9, %v6316_v7  ;;  %3530 = vmatpush.bf16.msrb.mxu0 %v6061_v14  ;;  %v3303_v9 = vpop.f32.mrf.mxu2 }
 0x12e   :  { %v7631_v11 = vld [vmem:[#allocation9 + $0xd64] sm:$0xf0] }
 0x12f   :  { %v6828_v12 = vld [vmem:[#allocation9 + $0xf48] sm:$0xf]  ;;  %v6573_v16 = vor.u32 %v7631_v11, %v6572_v10  ;;  %3543 = vmatpush.bf16.msrb.mxu1 %v6317_v15 }
 0x130   :  { %v7695_v13 = vld [vmem:[#allocation9 + $0xf64] sm:$0xf0] }
 0x131   :  { %v6028_v17 = vld [vmem:[#allocation9 + $0x908] sm:$0xf]  ;;  %v6829_v21 = vor.u32 %v7695_v13, %v6828_v12  ;;  %3556 = vmatpush.bf16.msrb.mxu2 %v6573_v16  ;;  %v3304_v13 = vadd.f32 %v3303_v9, %v3291_v6  ;;  %v5550_v6 = vld [vmem:[#allocation9 + $0x568] sm:$0xf0] }
 0x132   :  { %v7495_v18 = vld [vmem:[#allocation9 + $0x924] sm:$0xf0] }
 0x133   :  { %v6284_v20 = vld [vmem:[#allocation9 + $0xb08] sm:$0xf]  ;;  %v6029_v27 = vor.u32 %v7495_v18, %v6028_v17  ;;  %3569 = vmatpush.bf16.msrb.mxu3 %v6829_v21 }
 0x134   :  { %v7559_v22 = vld [vmem:[#allocation9 + $0xb24] sm:$0xf0] }
 0x135   :  { %v6540_v23 = vld [vmem:[#allocation9 + $0xd08] sm:$0xf]  ;;  %v6285_v28 = vor.u32 %v7559_v22, %v6284_v20  ;;  %3531 = vmatpush.bf16.msrb.mxu0 %v6029_v27  ;;  %v7323_v27 = vld [vmem:[#allocation9 + $0x3cc] sm:$0xf] }
 0x136   :  { %v7623_v24 = vld [vmem:[#allocation9 + $0xd24] sm:$0xf0] }
 0x137   :  { %v6796_v25 = vld [vmem:[#allocation9 + $0xf08] sm:$0xf]  ;;  %v6541_v29 = vor.u32 %v7623_v24, %v6540_v23  ;;  %3544 = vmatpush.bf16.msrb.mxu1 %v6285_v28  ;;  %v3316_v24 = vpop.f32.mrf.mxu3 }
 0x138   :  { %v7687_v26 = vld [vmem:[#allocation9 + $0xf24] sm:$0xf0]  ;;  %v8121_v28 = vadd.f32 %v3316_v24, %v3304_v13  ;;  %v5006_v13 = vld [vmem:[#allocation9 + $0x128] sm:$0xf0] }
 0x139   :  { %v5996_v30 = vld [vmem:[#allocation9 + $0x8c8] sm:$0xf]  ;;  %v6797_v35 = vor.u32 %v7687_v26, %v6796_v25  ;;  %3557 = vmatpush.bf16.msrb.mxu2 %v6541_v29  ;;  %v7259_v25 = vld [vmem:[#allocation9 + $0x1cc] sm:$0xf] }
 0x13a   :  { %v7487_v31 = vld [vmem:[#allocation9 + $0x8e4] sm:$0xf0]  ;;  %v5102_v26 = vld [vmem:[#allocation9 + $0x1e8] sm:$0xf0] }
 0x13b   :  { %v6252_v34 = vld [vmem:[#allocation9 + $0xac8] sm:$0xf]  ;;  %v5997_v41 = vor.u32 %v7487_v31, %v5996_v30  ;;  %3570 = vmatpush.bf16.msrb.mxu3 %v6797_v35  ;;  %v5358_v30 = vld [vmem:[#allocation9 + $0x3e8] sm:$0xf0]  ;;  %v3279_v35 = vpop.f32.mrf.mxu0 }
 0x13c   :  { %v7551_v36 = vld [vmem:[#allocation9 + $0xae4] sm:$0xf0]  ;;  %v7387_v31 = vld [vmem:[#allocation9 + $0x5cc] sm:$0xf] }
 0x13d   :  { %v6508_v37 = vld [vmem:[#allocation9 + $0xcc8] sm:$0xf]  ;;  %v6253_v42 = vor.u32 %v7551_v36, %v6252_v34  ;;  %3532 = vmatpush.bf16.msrb.mxu0 %v5997_v41  ;;  %v5614_v34 = vld [vmem:[#allocation9 + $0x5e8] sm:$0xf0] }
 0x13e   :  { %v7615_v39 = vld [vmem:[#allocation9 + $0xce4] sm:$0xf0]  ;;  %v5230_v35 = vld [vmem:[#allocation9 + $0x2e8] sm:$0xf0] }
 0x13f   :  { %v6764_v40 = vld [vmem:[#allocation9 + $0xec8] sm:$0xf]  ;;  %v6509_v43 = vor.u32 %v7615_v39, %v6508_v37  ;;  %3545 = vmatpush.bf16.msrb.mxu1 %v6253_v42  ;;  %v7451_v39 = vld [vmem:[#allocation9 + $0x7cc] sm:$0xf]  ;;  %v5105_v42 = vor.u32 %v7259_v25, %v5102_v26 }
 0x140   :  { %v7679_v59 = vld [vmem:[#allocation9 + $0xee4] sm:$0xf0]  ;;  %v7227_v26 = vld [vmem:[#allocation9 + $0xcc] sm:$0xf] }
 0x141   :  { %v5964_v44 = vld [vmem:[#allocation9 + $0x888] sm:$0xf]  ;;  %v6765_v47 = vor.u32 %v7679_v59, %v6764_v40  ;;  %3558 = vmatpush.bf16.msrb.mxu2 %v6509_v43  ;;  %v5870_v40 = vld [vmem:[#allocation9 + $0x7e8] sm:$0xf0]  ;;  %v3292_v59 = vpop.f32.mrf.mxu1  ;;  %v5361_v43 = vor.u32 %v7323_v27, %v5358_v30 }
 0x142   :  { %v7479_v45 = vld [vmem:[#allocation9 + $0x8a4] sm:$0xf0]  ;;  %v4974_v27 = vld [vmem:[#allocation9 + $0xe8] sm:$0xf0] }
 0x143   :  { %v6220_v46 = vld [vmem:[#allocation9 + $0xa88] sm:$0xf]  ;;  %v5965_v56 = vor.u32 %v7479_v45, %v5964_v44  ;;  %3571 = vmatpush.bf16.msrb.mxu3 %v6765_v47  ;;  %v5617_v44 = vor.u32 %v7387_v31, %v5614_v34  ;;  %v7251_v45 = vld [vmem:[#allocation9 + $0x18c] sm:$0xf] }
 0x144   :  { %v7543_v48 = vld [vmem:[#allocation9 + $0xaa4] sm:$0xf0]  ;;  %v7315_v47 = vld [vmem:[#allocation9 + $0x38c] sm:$0xf] }
 0x145   :  { %v6476_v49 = vld [vmem:[#allocation9 + $0xc88] sm:$0xf]  ;;  %v6221_v60 = vor.u32 %v7543_v48, %v6220_v46  ;;  %3533 = vmatpush.bf16.msrb.mxu0 %v5965_v56  ;;  %v5070_v46 = vld [vmem:[#allocation9 + $0x1a8] sm:$0xf0]  ;;  %v3305_v48 = vpop.f32.mrf.mxu2 }
 0x146   :  { %v7607_v50 = vld [vmem:[#allocation9 + $0xca4] sm:$0xf0]  ;;  %v7443_v56 = vld [vmem:[#allocation9 + $0x78c] sm:$0xf] }
 0x147   :  { %v6732_v52 = vld [vmem:[#allocation9 + $0xe88] sm:$0xf]  ;;  %v6477_v61 = vor.u32 %v7607_v50, %v6476_v49  ;;  %3546 = vmatpush.bf16.msrb.mxu1 %v6221_v60  ;;  %v5873_v49 = vor.u32 %v7451_v39, %v5870_v40  ;;  %v5326_v50 = vld [vmem:[#allocation9 + $0x3a8] sm:$0xf0]  ;;  %v5073_v60 = vor.u32 %v7251_v45, %v5070_v46 }
 0x148   :  { %v7671_v53 = vld [vmem:[#allocation9 + $0xea4] sm:$0xf0]  ;;  %v7419_v39 = vld [vmem:[#allocation9 + $0x6cc] sm:$0xf] }
 0x149   :  { %v5932_v62 = vld [vmem:[#allocation9 + $0x848] sm:$0xf]  ;;  %v6733_v2 = vor.u32 %v7671_v53, %v6732_v52  ;;  %3559 = vmatpush.bf16.msrb.mxu2 %v6477_v61  ;;  %v7379_v52 = vld [vmem:[#allocation9 + $0x58c] sm:$0xf]  ;;  %v3318_v61 = vpop.f32.mrf.mxu3  ;;  %v3342_v31 = vpop.f32.mrf.mxu1 }
 0x14a   :  { %v7471_v63 = vld [vmem:[#allocation9 + $0x864] sm:$0xf0]  ;;  %v5582_v53 = vld [vmem:[#allocation9 + $0x5a8] sm:$0xf0] }
 0x14b   :  { %v6188_v0 = vld [vmem:[#allocation9 + $0xa48] sm:$0xf]  ;;  %v5933_v10 = vor.u32 %v7471_v63, %v5932_v62  ;;  %3572 = vmatpush.bf16.msrb.mxu3 %v6733_v2  ;;  %v5329_v62 = vor.u32 %v7315_v47, %v5326_v50  ;;  %v5585_v63 = vor.u32 %v7379_v52, %v5582_v53  ;;  %v7307_v2 = vld [vmem:[#allocation9 + $0x34c] sm:$0xf] }
 0x14c   :  { %v7535_v3 = vld [vmem:[#allocation9 + $0xa64] sm:$0xf0]  ;;  %v5742_v40 = vld [vmem:[#allocation9 + $0x6e8] sm:$0xf0] }
 0x14d   :  { %v6444_v4 = vld [vmem:[#allocation9 + $0xc48] sm:$0xf]  ;;  %v6189_v14 = vor.u32 %v7535_v3, %v6188_v0  ;;  %3534 = vmatpush.bf16.msrb.mxu0 %v5933_v10  ;;  %v7243_v0 = vld [vmem:[#allocation9 + $0x14c] sm:$0xf]  ;;  %v5841_v3 = vor.u32 %v7443_v56, %v5838_v58  ;;  %v3355_v47 = vpop.f32.mrf.mxu2 }
 0x14e   :  { %v7599_v5 = vld [vmem:[#allocation9 + $0xc64] sm:$0xf0]  ;;  %v5041_v9 = vor.u32 %v7243_v0, %v5038_v1  ;;  %v4942_v45 = vld [vmem:[#allocation9 + $0xa8] sm:$0xf0] }
 0x14f   :  { %v6700_v7 = vld [vmem:[#allocation9 + $0xe48] sm:$0xf]  ;;  %v6445_v15 = vor.u32 %v7599_v5, %v6444_v4  ;;  %3547 = vmatpush.bf16.msrb.mxu1 %v6189_v14  ;;  %v5294_v4 = vld [vmem:[#allocation9 + $0x368] sm:$0xf0] }
 0x150   :  { %v7663_v8 = vld [vmem:[#allocation9 + $0xe64] sm:$0xf0]  ;;  %v7371_v5 = vld [vmem:[#allocation9 + $0x54c] sm:$0xf]  ;;  %v5297_v10 = vor.u32 %v7307_v2, %v5294_v4 }
 0x151   :  { %v5900_v11 = vld [vmem:[#allocation9 + $0x808] sm:$0xf]  ;;  %v6701_v20 = vor.u32 %v7663_v8, %v6700_v7  ;;  %3560 = vmatpush.bf16.msrb.mxu2 %v6445_v15  ;;  %v7435_v7 = vld [vmem:[#allocation9 + $0x74c] sm:$0xf]  ;;  %v3368_v53 = vpop.f32.mrf.mxu3  ;;  %v3344_v4 = vpop.f32.mrf.mxu1 }
 0x152   :  { %v7463_v12 = vld [vmem:[#allocation9 + $0x824] sm:$0xf0]  ;;  %v5806_v8 = vld [vmem:[#allocation9 + $0x768] sm:$0xf0] }
 0x153   :  { %v6156_v16 = vld [vmem:[#allocation9 + $0xa08] sm:$0xf]  ;;  %v5901_v29 = vor.u32 %v7463_v12, %v5900_v11  ;;  %3573 = vmatpush.bf16.msrb.mxu3 %v6701_v20  ;;  %v5553_v11 = vor.u32 %v7371_v5, %v5550_v6  ;;  %v7235_v12 = vld [vmem:[#allocation9 + $0x10c] sm:$0xf]  ;;  %v5809_v15 = vor.u32 %v7435_v7, %v5806_v8 }
 0x154   :  { %v7527_v17 = vld [vmem:[#allocation9 + $0xa24] sm:$0xf0]  ;;  %v7299_v14 = vld [vmem:[#allocation9 + $0x30c] sm:$0xf] }
 0x155   :  { %v6412_v18 = vld [vmem:[#allocation9 + $0xc08] sm:$0xf]  ;;  %v6157_v36 = vor.u32 %v7527_v17, %v6156_v16  ;;  %3535 = vmatpush.bf16.msrb.mxu0 %v5901_v29  ;;  %v5262_v16 = vld [vmem:[#allocation9 + $0x328] sm:$0xf0] }
 0x156   :  { %v7591_v21 = vld [vmem:[#allocation9 + $0xc24] sm:$0xf0]  ;;  %v7363_v17 = vld [vmem:[#allocation9 + $0x50c] sm:$0xf]  ;;  %v5265_v24 = vor.u32 %v7299_v14, %v5262_v16 }
 0x157   :  { %v6668_v22 = vld [vmem:[#allocation9 + $0xe08] sm:$0xf]  ;;  %v6413_v37 = vor.u32 %v7591_v21, %v6412_v18  ;;  %3548 = vmatpush.bf16.msrb.mxu1 %v6157_v36  ;;  %v5518_v18 = vld [vmem:[#allocation9 + $0x528] sm:$0xf0] }
 0x158   :  { %v7655_v23 = vld [vmem:[#allocation9 + $0xe24] sm:$0xf0]  ;;  %3536 = vmatmul.bf16.vlgmr.msrb.gmra.mxu0 %v8099_v54  ;;  %v7427_v20 = vld [vmem:[#allocation9 + $0x70c] sm:$0xf]  ;;  %v5521_v25 = vor.u32 %v7363_v17, %v5518_v18 }
 0x159   :  { %v6669_v41 = vor.u32 %v7655_v23, %v6668_v22  ;;  %3561 = vmatpush.bf16.msrb.mxu2 %v6413_v37  ;;  %3580 = vmatpush.bf16.msra.mxu0 %v5105_v42  ;;  %v5774_v21 = vld [vmem:[#allocation9 + $0x728] sm:$0xf0]  ;;  %v5009_v22 = vor.u32 %v7235_v12, %v5006_v13  ;;  %v3329_v23 = vpop.f32.mrf.mxu0 }
 0x15a   :  { %3549 = vmatmul.bf16.vlgmr.msrb.gmra.mxu1 %v8103_v57  ;;  %v7291_v29 = vld [vmem:[#allocation9 + $0x2cc] sm:$0xf]  ;;  %v3330_v30 = vadd.f32 %v3329_v23, %v8121_v28  ;;  %v5777_v34 = vor.u32 %v7427_v20, %v5774_v21  ;;  %v5745_v28 = vor.u32 %v7419_v39, %v5742_v40  ;;  %v3357_v20 = vpop.f32.mrf.mxu2 }
 0x15b   :  { %3574 = vmatpush.bf16.msrb.mxu3 %v6669_v41  ;;  %3593 = vmatpush.bf16.msra.mxu1 %v5361_v43  ;;  %v7355_v36 = vld [vmem:[#allocation9 + $0x4cc] sm:$0xf]  ;;  %v4977_v41 = vor.u32 %v7227_v26, %v4974_v27  ;;  %v5233_v42 = vor.u32 %v7291_v29, %v5230_v35 }
 0x15c   :  { %3562 = vmatmul.bf16.vlgmr.msrb.gmra.mxu2 %v8097_v51  ;;  %v5486_v37 = vld [vmem:[#allocation9 + $0x4e8] sm:$0xf0]  ;;  %v3343_v59 = vadd.f32 %v3342_v31, %v3330_v30 }
 0x15d   :  { %3606 = vmatpush.bf16.msra.mxu2 %v5617_v44  ;;  %3581 = vmatpush.bf16.msra.mxu0 %v5073_v60  ;;  %v5489_v43 = vor.u32 %v7355_v36, %v5486_v37  ;;  %v7219_v44 = vld [vmem:[#allocation9 + $0x8c] sm:$0xf] }
 0x15e   :  { %3575 = vmatmul.bf16.vlgmr.msrb.gmra.mxu3 %v8101_v55  ;;  %v7283_v46 = vld [vmem:[#allocation9 + $0x28c] sm:$0xf]  ;;  %v3356_v52 = vadd.f32 %v3355_v47, %v3343_v59  ;;  %v4945_v60 = vor.u32 %v7219_v44, %v4942_v45 }
 0x15f   :  { %3619 = vmatpush.bf16.msra.mxu3 %v5873_v49  ;;  %3594 = vmatpush.bf16.msra.mxu1 %v5329_v62  ;;  %v5198_v48 = vld [vmem:[#allocation9 + $0x2a8] sm:$0xf0] }
 0x160   :  { %v7347_v49 = vld [vmem:[#allocation9 + $0x48c] sm:$0xf]  ;;  %v8128_v61 = vadd.f32 %v3368_v53, %v3356_v52 }
 0x161   :  { %3607 = vmatpush.bf16.msra.mxu2 %v5585_v63  ;;  %3582 = vmatpush.bf16.msra.mxu0 %v5041_v9  ;;  %v5454_v50 = vld [vmem:[#allocation9 + $0x4a8] sm:$0xf0]  ;;  %v3331_v62 = vpop.f32.mrf.mxu0  ;;  %v5201_v63 = vor.u32 %v7283_v46, %v5198_v48 }
 0x162   :  { %v7411_v56 = vld [vmem:[#allocation9 + $0x68c] sm:$0xf]  ;;  %v5457_v0 = vor.u32 %v7347_v49, %v5454_v50 }
 0x163   :  { %3620 = vmatpush.bf16.msra.mxu3 %v5841_v3  ;;  %3595 = vmatpush.bf16.msra.mxu1 %v5297_v10  ;;  %v5710_v58 = vld [vmem:[#allocation9 + $0x6a8] sm:$0xf0] }
 0x164   :  { %v7211_v1 = vld [vmem:[#allocation9 + $0x4c] sm:$0xf]  ;;  %v5713_v5 = vor.u32 %v7411_v56, %v5710_v58 }
 0x165   :  { %3608 = vmatpush.bf16.msra.mxu2 %v5553_v11  ;;  %3583 = vmatpush.bf16.msra.mxu0 %v5009_v22  ;;  %v4910_v2 = vld [vmem:[#allocation9 + $0x68] sm:$0xf0] }
 0x166   :  { %v7275_v3 = vld [vmem:[#allocation9 + $0x24c] sm:$0xf]  ;;  %v4913_v11 = vor.u32 %v7211_v1, %v4910_v2 }
 0x167   :  { %3621 = vmatpush.bf16.msra.mxu3 %v5809_v15  ;;  %3596 = vmatpush.bf16.msra.mxu1 %v5265_v24  ;;  %v5166_v6 = vld [vmem:[#allocation9 + $0x268] sm:$0xf0] }
 0x168   :  { %v7339_v7 = vld [vmem:[#allocation9 + $0x44c] sm:$0xf]  ;;  %v5169_v14 = vor.u32 %v7275_v3, %v5166_v6 }
 0x169   :  { %3609 = vmatpush.bf16.msra.mxu2 %v5521_v25  ;;  %3584 = vmatpush.bf16.msra.mxu0 %v4977_v41  ;;  %v5422_v8 = vld [vmem:[#allocation9 + $0x468] sm:$0xf0]  ;;  %v3370_v25 = vpop.f32.mrf.mxu3  ;;  %v3381_v20 = vpop.f32.mrf.mxu0 }
 0x16a   :  { %v7403_v9 = vld [vmem:[#allocation9 + $0x64c] sm:$0xf]  ;;  %v5425_v15 = vor.u32 %v7339_v7, %v5422_v8 }
 0x16b   :  { %3622 = vmatpush.bf16.msra.mxu3 %v5777_v34  ;;  %3597 = vmatpush.bf16.msra.mxu1 %v5233_v42  ;;  %v5678_v10 = vld [vmem:[#allocation9 + $0x668] sm:$0xf0] }
 0x16c   :  { %v7203_v12 = vld [vmem:[#allocation9 + $0xc] sm:$0xf]  ;;  %v5681_v21 = vor.u32 %v7403_v9, %v5678_v10 }
 0x16d   :  { %3610 = vmatpush.bf16.msra.mxu2 %v5489_v43  ;;  %3585 = vmatpush.bf16.msra.mxu0 %v4945_v60  ;;  %v4878_v13 = vld [vmem:[#allocation9 + $0x28] sm:$0xf0] }
 0x16e   :  { %v7267_v16 = vld [vmem:[#allocation9 + $0x20c] sm:$0xf]  ;;  %v4881_v30 = vor.u32 %v7203_v12, %v4878_v13 }
 0x16f   :  { %3623 = vmatpush.bf16.msra.mxu3 %v5745_v28  ;;  %3598 = vmatpush.bf16.msra.mxu1 %v5201_v63  ;;  %v5134_v17 = vld [vmem:[#allocation9 + $0x228] sm:$0xf0] }
 0x170   :  { %v7331_v18 = vld [vmem:[#allocation9 + $0x40c] sm:$0xf]  ;;  %v5137_v36 = vor.u32 %v7267_v16, %v5134_v17 }
 0x171   :  { %3611 = vmatpush.bf16.msra.mxu2 %v5457_v0  ;;  %v5390_v22 = vld [vmem:[#allocation9 + $0x428] sm:$0xf0]  ;;  %3586 = vmatpush.bf16.msra.mxu0 %v4913_v11 }
 0x172   :  { %v7395_v23 = vld [vmem:[#allocation9 + $0x60c] sm:$0xf]  ;;  %v5393_v37 = vor.u32 %v7331_v18, %v5390_v22 }
 0x173   :  { %3624 = vmatpush.bf16.msra.mxu3 %v5713_v5  ;;  %v5646_v24 = vld [vmem:[#allocation9 + $0x628] sm:$0xf0]  ;;  %3599 = vmatpush.bf16.msra.mxu1 %v5169_v14 }
 0x174   :  { %v7515_v26 = vld [vmem:[#allocation9 + $0x9cc] sm:$0xf]  ;;  %v5649_v59 = vor.u32 %v7395_v23, %v5646_v24 }
 0x175   :  { %v6126_v27 = vld [vmem:[#allocation9 + $0x9e8] sm:$0xf0]  ;;  %3612 = vmatpush.bf16.msra.mxu2 %v5425_v15  ;;  %3587 = vmatpush.bf16.msra.mxu0 %v4881_v30 }
 0x176   :  { %v7579_v29 = vld [vmem:[#allocation9 + $0xbcc] sm:$0xf]  ;;  %v6129_v41 = vor.u32 %v7515_v26, %v6126_v27  ;;  %v3394_v26 = vpop.f32.mrf.mxu1 }
 0x177   :  { %v6382_v31 = vld [vmem:[#allocation9 + $0xbe8] sm:$0xf0]  ;;  %3625 = vmatpush.bf16.msra.mxu3 %v5681_v21  ;;  %3600 = vmatpush.bf16.msra.mxu1 %v5137_v36 }
 0x178   :  { %v7643_v34 = vld [vmem:[#allocation9 + $0xdcc] sm:$0xf]  ;;  %v6385_v42 = vor.u32 %v7579_v29, %v6382_v31  ;;  %3588 = vmatmul.bf16.vlgmr.msra.gmra.mxu0 %v8084_v32 }
 0x179   :  { %v6638_v35 = vld [vmem:[#allocation9 + $0xde8] sm:$0xf0]  ;;  %3613 = vmatpush.bf16.msra.mxu2 %v5393_v37  ;;  %3632 = vmatpush.bf16.msrb.mxu0 %v6129_v41 }
 0x17a   :  { %v7707_v39 = vld [vmem:[#allocation9 + $0xfcc] sm:$0xf]  ;;  %v6641_v43 = vor.u32 %v7643_v34, %v6638_v35  ;;  %3601 = vmatmul.bf16.vlgmr.msra.gmra.mxu1 %v8088_v38  ;;  %v3395_v34 = vadd.f32 %v3394_v26, %v3381_v20 }
 0x17b   :  { %v6894_v40 = vld [vmem:[#allocation9 + $0xfe8] sm:$0xf0]  ;;  %3626 = vmatpush.bf16.msra.mxu3 %v5649_v59  ;;  %3645 = vmatpush.bf16.msrb.mxu1 %v6385_v42 }
 0x17c   :  { %v7507_v44 = vld [vmem:[#allocation9 + $0x98c] sm:$0xf]  ;;  %v6897_v47 = vor.u32 %v7707_v39, %v6894_v40  ;;  %3614 = vmatmul.bf16.vlgmr.msra.gmra.mxu2 %v8080_v19 }
 0x17d   :  { %v6094_v45 = vld [vmem:[#allocation9 + $0x9a8] sm:$0xf0]  ;;  %3658 = vmatpush.bf16.msrb.mxu2 %v6641_v43  ;;  %v3407_v43 = vpop.f32.mrf.mxu2 }
 0x17e   :  { %v7571_v46 = vld [vmem:[#allocation9 + $0xb8c] sm:$0xf]  ;;  %v6097_v53 = vor.u32 %v7507_v44, %v6094_v45  ;;  %3627 = vmatmul.bf16.vlgmr.msra.gmra.mxu3 %v8086_v33 }
 0x17f   :  { %v6350_v28 = vld [vmem:[#allocation9 + $0xba8] sm:$0xf0]  ;;  %3671 = vmatpush.bf16.msrb.mxu3 %v6897_v47 }
 0x180   :  { %v7635_v48 = vld [vmem:[#allocation9 + $0xd8c] sm:$0xf]  ;;  %v6353_v56 = vor.u32 %v7571_v46, %v6350_v28  ;;  %3633 = vmatpush.bf16.msrb.mxu0 %v6097_v53  ;;  %v3408_v28 = vadd.f32 %v3407_v43, %v3395_v34  ;;  %v5332_v43 = vld [vmem:[#allocation9 + $0x390] sm:$0xf] }
 0x181   :  { %v6606_v49 = vld [vmem:[#allocation9 + $0xda8] sm:$0xf0] }
 0x182   :  { %v7699_v50 = vld [vmem:[#allocation9 + $0xf8c] sm:$0xf]  ;;  %v6609_v58 = vor.u32 %v7635_v48, %v6606_v49  ;;  %3646 = vmatpush.bf16.msrb.mxu1 %v6353_v56  ;;  %v3420_v48 = vpop.f32.mrf.mxu3  ;;  %v3383_v56 = vpop.f32.mrf.mxu0 }
 0x183   :  { %v6862_v52 = vld [vmem:[#allocation9 + $0xfa8] sm:$0xf0]  ;;  %v8134_v53 = vadd.f32 %v3420_v48, %v3408_v28  ;;  %v5844_v28 = vld [vmem:[#allocation9 + $0x790] sm:$0xf] }
 0x184   :  { %v7499_v60 = vld [vmem:[#allocation9 + $0x94c] sm:$0xf]  ;;  %v6865_v0 = vor.u32 %v7699_v50, %v6862_v52  ;;  %3659 = vmatpush.bf16.msrb.mxu2 %v6609_v58  ;;  %v7448_v48 = vld [vmem:[#allocation9 + $0x7ac] sm:$0xf0] }
 0x185   :  { %v6062_v62 = vld [vmem:[#allocation9 + $0x968] sm:$0xf0]  ;;  %v5044_v56 = vld [vmem:[#allocation9 + $0x150] sm:$0xf] }
 0x186   :  { %v7563_v63 = vld [vmem:[#allocation9 + $0xb4c] sm:$0xf]  ;;  %v6065_v6 = vor.u32 %v7499_v60, %v6062_v62  ;;  %3672 = vmatpush.bf16.msrb.mxu3 %v6865_v0 }
 0x187   :  { %v6318_v1 = vld [vmem:[#allocation9 + $0xb68] sm:$0xf0] }
 0x188   :  { %v7627_v2 = vld [vmem:[#allocation9 + $0xd4c] sm:$0xf]  ;;  %v6321_v7 = vor.u32 %v7563_v63, %v6318_v1  ;;  %3634 = vmatpush.bf16.msrb.mxu0 %v6065_v6  ;;  %v3396_v1 = vpop.f32.mrf.mxu1 }
 0x189   :  { %v6574_v3 = vld [vmem:[#allocation9 + $0xd68] sm:$0xf0]  ;;  %v7376_v1 = vld [vmem:[#allocation9 + $0x56c] sm:$0xf0] }
 0x18a   :  { %v7691_v4 = vld [vmem:[#allocation9 + $0xf4c] sm:$0xf]  ;;  %v6577_v8 = vor.u32 %v7627_v2, %v6574_v3  ;;  %3647 = vmatpush.bf16.msrb.mxu1 %v6321_v7 }
 0x18b   :  { %v6830_v5 = vld [vmem:[#allocation9 + $0xf68] sm:$0xf0] }
 0x18c   :  { %v7491_v9 = vld [vmem:[#allocation9 + $0x90c] sm:$0xf]  ;;  %v6833_v12 = vor.u32 %v7691_v4, %v6830_v5  ;;  %3660 = vmatpush.bf16.msrb.mxu2 %v6577_v8 }
 0x18d   :  { %v6030_v10 = vld [vmem:[#allocation9 + $0x928] sm:$0xf0] }
 0x18e   :  { %v7555_v11 = vld [vmem:[#allocation9 + $0xb0c] sm:$0xf]  ;;  %v6033_v18 = vor.u32 %v7491_v9, %v6030_v10  ;;  %3673 = vmatpush.bf16.msrb.mxu3 %v6833_v12 }
 0x18f   :  { %v6286_v13 = vld [vmem:[#allocation9 + $0xb28] sm:$0xf0] }
 0x190   :  { %v7619_v14 = vld [vmem:[#allocation9 + $0xd0c] sm:$0xf]  ;;  %v6289_v21 = vor.u32 %v7555_v11, %v6286_v13  ;;  %3635 = vmatpush.bf16.msrb.mxu0 %v6033_v18 }
 0x191   :  { %v6542_v15 = vld [vmem:[#allocation9 + $0xd28] sm:$0xf0] }
 0x192   :  { %v7683_v16 = vld [vmem:[#allocation9 + $0xf0c] sm:$0xf]  ;;  %v6545_v22 = vor.u32 %v7619_v14, %v6542_v15  ;;  %3648 = vmatpush.bf16.msrb.mxu1 %v6289_v21 }
 0x193   :  { %v6798_v17 = vld [vmem:[#allocation9 + $0xf28] sm:$0xf0] }
 0x194   :  { %v7483_v23 = vld [vmem:[#allocation9 + $0x8cc] sm:$0xf]  ;;  %v6801_v27 = vor.u32 %v7683_v16, %v6798_v17  ;;  %3661 = vmatpush.bf16.msrb.mxu2 %v6545_v22  ;;  %v3409_v16 = vpop.f32.mrf.mxu2  ;;  %v3422_v22 = vpop.f32.mrf.mxu3 }
 0x195   :  { %v5998_v24 = vld [vmem:[#allocation9 + $0x8e8] sm:$0xf0]  ;;  %v7232_v22 = vld [vmem:[#allocation9 + $0xec] sm:$0xf0] }
 0x196   :  { %v7547_v25 = vld [vmem:[#allocation9 + $0xacc] sm:$0xf]  ;;  %v6001_v37 = vor.u32 %v7483_v23, %v5998_v24  ;;  %3674 = vmatpush.bf16.msrb.mxu3 %v6801_v27  ;;  %v5108_v23 = vld [vmem:[#allocation9 + $0x1d0] sm:$0xf] }
 0x197   :  { %v6254_v29 = vld [vmem:[#allocation9 + $0xae8] sm:$0xf0]  ;;  %v7264_v24 = vld [vmem:[#allocation9 + $0x1ec] sm:$0xf0] }
 0x198   :  { %v7611_v30 = vld [vmem:[#allocation9 + $0xccc] sm:$0xf]  ;;  %v6257_v39 = vor.u32 %v7547_v25, %v6254_v29  ;;  %3636 = vmatpush.bf16.msrb.mxu0 %v6001_v37  ;;  %v5364_v25 = vld [vmem:[#allocation9 + $0x3d0] sm:$0xf] }
 0x199   :  { %v6510_v31 = vld [vmem:[#allocation9 + $0xce8] sm:$0xf0]  ;;  %v7328_v27 = vld [vmem:[#allocation9 + $0x3ec] sm:$0xf0] }
 0x19a   :  { %v7675_v35 = vld [vmem:[#allocation9 + $0xecc] sm:$0xf]  ;;  %v6513_v40 = vor.u32 %v7611_v30, %v6510_v31  ;;  %3649 = vmatpush.bf16.msrb.mxu1 %v6257_v39  ;;  %v5620_v29 = vld [vmem:[#allocation9 + $0x5d0] sm:$0xf]  ;;  %v5109_v39 = vor.u32 %v7264_v24, %v5108_v23 }
 0x19b   :  { %v6766_v36 = vld [vmem:[#allocation9 + $0xee8] sm:$0xf0]  ;;  %v7392_v30 = vld [vmem:[#allocation9 + $0x5ec] sm:$0xf0] }
 0x19c   :  { %v7475_v59 = vld [vmem:[#allocation9 + $0x88c] sm:$0xf]  ;;  %v6769_v44 = vor.u32 %v7675_v35, %v6766_v36  ;;  %3662 = vmatpush.bf16.msrb.mxu2 %v6513_v40  ;;  %v5876_v35 = vld [vmem:[#allocation9 + $0x7d0] sm:$0xf]  ;;  %v5365_v40 = vor.u32 %v7328_v27, %v5364_v25  ;;  %v3446_v25 = vpop.f32.mrf.mxu1 }
 0x19d   :  { %v5966_v41 = vld [vmem:[#allocation9 + $0x8a8] sm:$0xf0]  ;;  %v7456_v36 = vld [vmem:[#allocation9 + $0x7ec] sm:$0xf0] }
 0x19e   :  { %v7539_v42 = vld [vmem:[#allocation9 + $0xa8c] sm:$0xf]  ;;  %v5969_v52 = vor.u32 %v7475_v59, %v5966_v41  ;;  %3675 = vmatpush.bf16.msrb.mxu3 %v6769_v44  ;;  %v5621_v59 = vor.u32 %v7392_v30, %v5620_v29  ;;  %v5076_v41 = vld [vmem:[#allocation9 + $0x190] sm:$0xf]  ;;  %v5877_v44 = vor.u32 %v7456_v36, %v5876_v35 }
 0x19f   :  { %v6222_v45 = vld [vmem:[#allocation9 + $0xaa8] sm:$0xf0]  ;;  %v5236_v23 = vld [vmem:[#allocation9 + $0x2d0] sm:$0xf] }
 0x1a0   :  { %v7603_v46 = vld [vmem:[#allocation9 + $0xc8c] sm:$0xf]  ;;  %v6225_v58 = vor.u32 %v7539_v42, %v6222_v45  ;;  %3637 = vmatpush.bf16.msrb.mxu0 %v5969_v52  ;;  %v7256_v42 = vld [vmem:[#allocation9 + $0x1ac] sm:$0xf0] }
 0x1a1   :  { %v6478_v47 = vld [vmem:[#allocation9 + $0xca8] sm:$0xf0]  ;;  %v7320_v45 = vld [vmem:[#allocation9 + $0x3ac] sm:$0xf0] }
 0x1a2   :  { %v7667_v49 = vld [vmem:[#allocation9 + $0xe8c] sm:$0xf]  ;;  %v6481_v60 = vor.u32 %v7603_v46, %v6478_v47  ;;  %3650 = vmatpush.bf16.msrb.mxu1 %v6225_v58  ;;  %v5588_v46 = vld [vmem:[#allocation9 + $0x590] sm:$0xf] }
 0x1a3   :  { %v6734_v50 = vld [vmem:[#allocation9 + $0xea8] sm:$0xf0]  ;;  %v7384_v47 = vld [vmem:[#allocation9 + $0x5ac] sm:$0xf0] }
 0x1a4   :  { %v7467_v62 = vld [vmem:[#allocation9 + $0x84c] sm:$0xf]  ;;  %v6737_v2 = vor.u32 %v7667_v49, %v6734_v50  ;;  %3663 = vmatpush.bf16.msrb.mxu2 %v6481_v60  ;;  %v5077_v49 = vor.u32 %v7256_v42, %v5076_v41  ;;  %v5333_v50 = vor.u32 %v7320_v45, %v5332_v43  ;;  %v5589_v52 = vor.u32 %v7384_v47, %v5588_v46  ;;  %v7248_v58 = vld [vmem:[#allocation9 + $0x16c] sm:$0xf0]  ;;  %v3459_v42 = vpop.f32.mrf.mxu2  ;;  %v3472_v47 = vpop.f32.mrf.mxu3 }
 0x1a5   :  { %v5934_v63 = vld [vmem:[#allocation9 + $0x868] sm:$0xf0]  ;;  %v5300_v60 = vld [vmem:[#allocation9 + $0x350] sm:$0xf] }
 0x1a6   :  { %v7531_v0 = vld [vmem:[#allocation9 + $0xa4c] sm:$0xf]  ;;  %v5937_v8 = vor.u32 %v7467_v62, %v5934_v63  ;;  %3676 = vmatpush.bf16.msrb.mxu3 %v6737_v2  ;;  %v5845_v62 = vor.u32 %v7448_v48, %v5844_v28  ;;  %v7312_v63 = vld [vmem:[#allocation9 + $0x36c] sm:$0xf0] }
 0x1a7   :  { %v6190_v3 = vld [vmem:[#allocation9 + $0xa68] sm:$0xf0]  ;;  %v5812_v2 = vld [vmem:[#allocation9 + $0x750] sm:$0xf] }
 0x1a8   :  { %v7595_v4 = vld [vmem:[#allocation9 + $0xc4c] sm:$0xf]  ;;  %v6193_v11 = vor.u32 %v7531_v0, %v6190_v3  ;;  %3638 = vmatpush.bf16.msrb.mxu0 %v5937_v8  ;;  %v5556_v0 = vld [vmem:[#allocation9 + $0x550] sm:$0xf] }
 0x1a9   :  { %v6446_v5 = vld [vmem:[#allocation9 + $0xc68] sm:$0xf0]  ;;  %v7440_v3 = vld [vmem:[#allocation9 + $0x76c] sm:$0xf0] }
 0x1aa   :  { %v7659_v6 = vld [vmem:[#allocation9 + $0xe4c] sm:$0xf]  ;;  %v6449_v12 = vor.u32 %v7595_v4, %v6446_v5  ;;  %3651 = vmatpush.bf16.msrb.mxu1 %v6193_v11  ;;  %v5045_v4 = vor.u32 %v7248_v58, %v5044_v56  ;;  %v5301_v5 = vor.u32 %v7312_v63, %v5300_v60  ;;  %v7240_v8 = vld [vmem:[#allocation9 + $0x12c] sm:$0xf0] }
 0x1ab   :  { %v6702_v7 = vld [vmem:[#allocation9 + $0xe68] sm:$0xf0]  ;;  %v7304_v11 = vld [vmem:[#allocation9 + $0x32c] sm:$0xf0] }
 0x1ac   :  { %v7459_v9 = vld [vmem:[#allocation9 + $0x80c] sm:$0xf]  ;;  %v6705_v17 = vor.u32 %v7659_v6, %v6702_v7  ;;  %3664 = vmatpush.bf16.msrb.mxu2 %v6449_v12  ;;  %v5557_v6 = vor.u32 %v7376_v1, %v5556_v0  ;;  %v5012_v7 = vld [vmem:[#allocation9 + $0x110] sm:$0xf]  ;;  %v3448_v0 = vpop.f32.mrf.mxu1 }
 0x1ad   :  { %v5902_v10 = vld [vmem:[#allocation9 + $0x828] sm:$0xf0]  ;;  %v5524_v12 = vld [vmem:[#allocation9 + $0x510] sm:$0xf]  ;;  %v5013_v16 = vor.u32 %v7240_v8, %v5012_v7 }
 0x1ae   :  { %v7523_v13 = vld [vmem:[#allocation9 + $0xa0c] sm:$0xf]  ;;  %v5905_v26 = vor.u32 %v7459_v9, %v5902_v10  ;;  %3677 = vmatpush.bf16.msrb.mxu3 %v6705_v17  ;;  %v5268_v9 = vld [vmem:[#allocation9 + $0x310] sm:$0xf]  ;;  %v5813_v10 = vor.u32 %v7440_v3, %v5812_v2  ;;  %v3433_v17 = vpop.f32.mrf.mxu0 }
 0x1af   :  { %v6158_v14 = vld [vmem:[#allocation9 + $0xa28] sm:$0xf0]  ;;  %v3434_v24 = vadd.f32 %v3433_v17, %v8134_v53  ;;  %v7296_v27 = vld [vmem:[#allocation9 + $0x2ec] sm:$0xf0] }
 0x1b0   :  { %v7587_v15 = vld [vmem:[#allocation9 + $0xc0c] sm:$0xf]  ;;  %v6161_v31 = vor.u32 %v7523_v13, %v6158_v14  ;;  %3639 = vmatpush.bf16.msrb.mxu0 %v5905_v26  ;;  %v7368_v13 = vld [vmem:[#allocation9 + $0x52c] sm:$0xf0] }
 0x1b1   :  { %v6414_v18 = vld [vmem:[#allocation9 + $0xc28] sm:$0xf0]  ;;  %v5780_v14 = vld [vmem:[#allocation9 + $0x710] sm:$0xf]  ;;  %v3447_v35 = vadd.f32 %v3446_v25, %v3434_v24 }
 0x1b2   :  { %v7651_v20 = vld [vmem:[#allocation9 + $0xe0c] sm:$0xf]  ;;  %v6417_v34 = vor.u32 %v7587_v15, %v6414_v18  ;;  %3652 = vmatpush.bf16.msrb.mxu1 %v6161_v31  ;;  %v7432_v15 = vld [vmem:[#allocation9 + $0x72c] sm:$0xf0]  ;;  %v5269_v18 = vor.u32 %v7304_v11, %v5268_v9 }
 0x1b3   :  { %v6670_v21 = vld [vmem:[#allocation9 + $0xe28] sm:$0xf0]  ;;  %3640 = vmatmul.bf16.vlgmr.msrb.gmra.mxu0 %v8099_v54  ;;  %v5781_v26 = vor.u32 %v7432_v15, %v5780_v14  ;;  %v5492_v29 = vld [vmem:[#allocation9 + $0x4d0] sm:$0xf]  ;;  %v3460_v46 = vadd.f32 %v3459_v42, %v3447_v35  ;;  %v3461_v15 = vpop.f32.mrf.mxu2 }
 0x1b4   :  { %v6673_v37 = vor.u32 %v7651_v20, %v6670_v21  ;;  %3665 = vmatpush.bf16.msrb.mxu2 %v6417_v34  ;;  %3684 = vmatpush.bf16.msra.mxu0 %v5109_v39  ;;  %v5525_v20 = vor.u32 %v7368_v13, %v5524_v12  ;;  %v4980_v21 = vld [vmem:[#allocation9 + $0xd0] sm:$0xf] }
 0x1b5   :  { %3653 = vmatmul.bf16.vlgmr.msrb.gmra.mxu1 %v8103_v57  ;;  %v7360_v30 = vld [vmem:[#allocation9 + $0x4ec] sm:$0xf0]  ;;  %v4981_v36 = vor.u32 %v7232_v22, %v4980_v21  ;;  %v3474_v21 = vpop.f32.mrf.mxu3 }
 0x1b6   :  { %3678 = vmatpush.bf16.msrb.mxu3 %v6673_v37  ;;  %3697 = vmatpush.bf16.msra.mxu1 %v5365_v40  ;;  %v5748_v31 = vld [vmem:[#allocation9 + $0x6d0] sm:$0xf]  ;;  %v5237_v37 = vor.u32 %v7296_v27, %v5236_v23  ;;  %v5493_v39 = vor.u32 %v7360_v30, %v5492_v29 }
 0x1b7   :  { %3666 = vmatmul.bf16.vlgmr.msrb.gmra.mxu2 %v8097_v51  ;;  %v7424_v34 = vld [vmem:[#allocation9 + $0x6ec] sm:$0xf0] }
 0x1b8   :  { %3710 = vmatpush.bf16.msra.mxu2 %v5621_v59  ;;  %3685 = vmatpush.bf16.msra.mxu0 %v5077_v49  ;;  %v4948_v40 = vld [vmem:[#allocation9 + $0x90] sm:$0xf]  ;;  %v5749_v53 = vor.u32 %v7424_v34, %v5748_v31 }
 0x1b9   :  { %3679 = vmatmul.bf16.vlgmr.msrb.gmra.mxu3 %v8101_v55  ;;  %v7224_v59 = vld [vmem:[#allocation9 + $0xac] sm:$0xf0] }
 0x1ba   :  { %3723 = vmatpush.bf16.msra.mxu3 %v5877_v44  ;;  %3698 = vmatpush.bf16.msra.mxu1 %v5333_v50  ;;  %v5204_v41 = vld [vmem:[#allocation9 + $0x290] sm:$0xf]  ;;  %v4949_v49 = vor.u32 %v7224_v59, %v4948_v40  ;;  %v8141_v50 = vadd.f32 %v3472_v47, %v3460_v46 }
 0x1bb   :  { %v7288_v43 = vld [vmem:[#allocation9 + $0x2ac] sm:$0xf0] }
 0x1bc   :  { %3711 = vmatpush.bf16.msra.mxu2 %v5589_v52  ;;  %3686 = vmatpush.bf16.msra.mxu0 %v5045_v4  ;;  %v5460_v44 = vld [vmem:[#allocation9 + $0x490] sm:$0xf]  ;;  %v3435_v52 = vpop.f32.mrf.mxu0  ;;  %v5205_v56 = vor.u32 %v7288_v43, %v5204_v41 }
 0x1bd   :  { %v7352_v45 = vld [vmem:[#allocation9 + $0x4ac] sm:$0xf0] }
 0x1be   :  { %3724 = vmatpush.bf16.msra.mxu3 %v5845_v62  ;;  %3699 = vmatpush.bf16.msra.mxu1 %v5301_v5  ;;  %v5716_v28 = vld [vmem:[#allocation9 + $0x690] sm:$0xf]  ;;  %v5461_v58 = vor.u32 %v7352_v45, %v5460_v44 }
 0x1bf   :  { %v7416_v48 = vld [vmem:[#allocation9 + $0x6ac] sm:$0xf0] }
 0x1c0   :  { %3712 = vmatpush.bf16.msra.mxu2 %v5557_v6  ;;  %3687 = vmatpush.bf16.msra.mxu0 %v5013_v16  ;;  %v4916_v60 = vld [vmem:[#allocation9 + $0x50] sm:$0xf]  ;;  %v5717_v1 = vor.u32 %v7416_v48, %v5716_v28 }
 0x1c1   :  { %v7216_v62 = vld [vmem:[#allocation9 + $0x6c] sm:$0xf0] }
 0x1c2   :  { %3725 = vmatpush.bf16.msra.mxu3 %v5813_v10  ;;  %3700 = vmatpush.bf16.msra.mxu1 %v5269_v18  ;;  %v5172_v63 = vld [vmem:[#allocation9 + $0x250] sm:$0xf]  ;;  %v4917_v7 = vor.u32 %v7216_v62, %v4916_v60 }
 0x1c3   :  { %v7280_v2 = vld [vmem:[#allocation9 + $0x26c] sm:$0xf0] }
 0x1c4   :  { %3713 = vmatpush.bf16.msra.mxu2 %v5525_v20  ;;  %3688 = vmatpush.bf16.msra.mxu0 %v4981_v36  ;;  %v5428_v3 = vld [vmem:[#allocation9 + $0x450] sm:$0xf]  ;;  %v5173_v10 = vor.u32 %v7280_v2, %v5172_v63 }
 0x1c5   :  { %v7344_v4 = vld [vmem:[#allocation9 + $0x46c] sm:$0xf0] }
 0x1c6   :  { %3726 = vmatpush.bf16.msra.mxu3 %v5781_v26  ;;  %3701 = vmatpush.bf16.msra.mxu1 %v5237_v37  ;;  %v5684_v5 = vld [vmem:[#allocation9 + $0x650] sm:$0xf]  ;;  %v5429_v11 = vor.u32 %v7344_v4, %v5428_v3 }
 0x1c7   :  { %v7408_v6 = vld [vmem:[#allocation9 + $0x66c] sm:$0xf0] }
 0x1c8   :  { %3714 = vmatpush.bf16.msra.mxu2 %v5493_v39  ;;  %3689 = vmatpush.bf16.msra.mxu0 %v4949_v49  ;;  %v4884_v8 = vld [vmem:[#allocation9 + $0x10] sm:$0xf]  ;;  %v5685_v16 = vor.u32 %v7408_v6, %v5684_v5 }
 0x1c9   :  { %v7208_v9 = vld [vmem:[#allocation9 + $0x2c] sm:$0xf0] }
 0x1ca   :  { %3727 = vmatpush.bf16.msra.mxu3 %v5749_v53  ;;  %3702 = vmatpush.bf16.msra.mxu1 %v5205_v56  ;;  %v5140_v12 = vld [vmem:[#allocation9 + $0x210] sm:$0xf]  ;;  %v4885_v25 = vor.u32 %v7208_v9, %v4884_v8 }
 0x1cb   :  { %v7272_v13 = vld [vmem:[#allocation9 + $0x22c] sm:$0xf0] }
 0x1cc   :  { %3715 = vmatpush.bf16.msra.mxu2 %v5461_v58  ;;  %v5396_v14 = vld [vmem:[#allocation9 + $0x410] sm:$0xf]  ;;  %3690 = vmatpush.bf16.msra.mxu0 %v4917_v7  ;;  %v5141_v30 = vor.u32 %v7272_v13, %v5140_v12 }
 0x1cd   :  { %v7336_v17 = vld [vmem:[#allocation9 + $0x42c] sm:$0xf0] }
 0x1ce   :  { %3728 = vmatpush.bf16.msra.mxu3 %v5717_v1  ;;  %v5652_v18 = vld [vmem:[#allocation9 + $0x610] sm:$0xf]  ;;  %3703 = vmatpush.bf16.msra.mxu1 %v5173_v10  ;;  %v5397_v31 = vor.u32 %v7336_v17, %v5396_v14 }
 0x1cf   :  { %v7400_v20 = vld [vmem:[#allocation9 + $0x62c] sm:$0xf0] }
 0x1d0   :  { %v6132_v22 = vld [vmem:[#allocation9 + $0x9d0] sm:$0xf]  ;;  %3716 = vmatpush.bf16.msra.mxu2 %v5429_v11  ;;  %v5653_v36 = vor.u32 %v7400_v20, %v5652_v18  ;;  %3691 = vmatpush.bf16.msra.mxu0 %v4885_v25 }
 0x1d1   :  { %v7520_v23 = vld [vmem:[#allocation9 + $0x9ec] sm:$0xf0] }
 0x1d2   :  { %v6388_v24 = vld [vmem:[#allocation9 + $0xbd0] sm:$0xf]  ;;  %3729 = vmatpush.bf16.msra.mxu3 %v5685_v16  ;;  %v6133_v37 = vor.u32 %v7520_v23, %v6132_v22  ;;  %3704 = vmatpush.bf16.msra.mxu1 %v5141_v30  ;;  %v3485_v16 = vpop.f32.mrf.mxu0  ;;  %v3498_v23 = vpop.f32.mrf.mxu1 }
 0x1d3   :  { %v7584_v26 = vld [vmem:[#allocation9 + $0xbec] sm:$0xf0]  ;;  %3692 = vmatmul.bf16.vlgmr.msra.gmra.mxu0 %v8084_v32 }
 0x1d4   :  { %v6644_v27 = vld [vmem:[#allocation9 + $0xdd0] sm:$0xf]  ;;  %v6389_v39 = vor.u32 %v7584_v26, %v6388_v24  ;;  %3717 = vmatpush.bf16.msra.mxu2 %v5397_v31  ;;  %3736 = vmatpush.bf16.msrb.mxu0 %v6133_v37 }
 0x1d5   :  { %v7648_v29 = vld [vmem:[#allocation9 + $0xdec] sm:$0xf0]  ;;  %3705 = vmatmul.bf16.vlgmr.msra.gmra.mxu1 %v8088_v38 }
 0x1d6   :  { %v6900_v34 = vld [vmem:[#allocation9 + $0xfd0] sm:$0xf]  ;;  %v6645_v40 = vor.u32 %v7648_v29, %v6644_v27  ;;  %3730 = vmatpush.bf16.msra.mxu3 %v5653_v36  ;;  %3749 = vmatpush.bf16.msrb.mxu1 %v6389_v39  ;;  %v3499_v29 = vadd.f32 %v3498_v23, %v3485_v16  ;;  %v7324_v23 = vld [vmem:[#allocation9 + $0x3d4] sm:$0xf] }
 0x1d7   :  { %v7712_v35 = vld [vmem:[#allocation9 + $0xfec] sm:$0xf0]  ;;  %3718 = vmatmul.bf16.vlgmr.msra.gmra.mxu2 %v8080_v19 }
 0x1d8   :  { %v6100_v59 = vld [vmem:[#allocation9 + $0x990] sm:$0xf]  ;;  %v6901_v53 = vor.u32 %v7712_v35, %v6900_v34  ;;  %3762 = vmatpush.bf16.msrb.mxu2 %v6645_v40 }
 0x1d9   :  { %v7512_v41 = vld [vmem:[#allocation9 + $0x9ac] sm:$0xf0]  ;;  %3731 = vmatmul.bf16.vlgmr.msra.gmra.mxu3 %v8086_v33 }
 0x1da   :  { %v6356_v42 = vld [vmem:[#allocation9 + $0xb90] sm:$0xf]  ;;  %v6101_v28 = vor.u32 %v7512_v41, %v6100_v59  ;;  %3775 = vmatpush.bf16.msrb.mxu3 %v6901_v53  ;;  %v3511_v59 = vpop.f32.mrf.mxu2 }
 0x1db   :  { %v7576_v43 = vld [vmem:[#allocation9 + $0xbac] sm:$0xf0] }
 0x1dc   :  { %v6612_v44 = vld [vmem:[#allocation9 + $0xd90] sm:$0xf]  ;;  %v6357_v48 = vor.u32 %v7576_v43, %v6356_v42  ;;  %3737 = vmatpush.bf16.msrb.mxu0 %v6101_v28 }
 0x1dd   :  { %v7640_v45 = vld [vmem:[#allocation9 + $0xdac] sm:$0xf0] }
 0x1de   :  { %v6868_v46 = vld [vmem:[#allocation9 + $0xf90] sm:$0xf]  ;;  %v6613_v49 = vor.u32 %v7640_v45, %v6612_v44  ;;  %3750 = vmatpush.bf16.msrb.mxu1 %v6357_v48  ;;  %v3512_v44 = vadd.f32 %v3511_v59, %v3499_v29  ;;  %v3524_v45 = vpop.f32.mrf.mxu3  ;;  %v5078_v59 = vld [vmem:[#allocation9 + $0x1b0] sm:$0xf0] }
 0x1df   :  { %v7704_v47 = vld [vmem:[#allocation9 + $0xfac] sm:$0xf0] }
 0x1e0   :  { %v6068_v52 = vld [vmem:[#allocation9 + $0x950] sm:$0xf]  ;;  %v6869_v60 = vor.u32 %v7704_v47, %v6868_v46  ;;  %3763 = vmatpush.bf16.msrb.mxu2 %v6613_v49  ;;  %v8147_v48 = vadd.f32 %v3524_v45, %v3512_v44  ;;  %v3487_v49 = vpop.f32.mrf.mxu0  ;;  %v5590_v44 = vld [vmem:[#allocation9 + $0x5b0] sm:$0xf0] }
 0x1e1   :  { %v7504_v56 = vld [vmem:[#allocation9 + $0x96c] sm:$0xf0]  ;;  %v7444_v45 = vld [vmem:[#allocation9 + $0x794] sm:$0xf] }
 0x1e2   :  { %v6324_v58 = vld [vmem:[#allocation9 + $0xb50] sm:$0xf]  ;;  %v6069_v3 = vor.u32 %v7504_v56, %v6068_v52  ;;  %3776 = vmatpush.bf16.msrb.mxu3 %v6869_v60 }
 0x1e3   :  { %v7568_v62 = vld [vmem:[#allocation9 + $0xb6c] sm:$0xf0] }
 0x1e4   :  { %v6580_v63 = vld [vmem:[#allocation9 + $0xd50] sm:$0xf]  ;;  %v6325_v4 = vor.u32 %v7568_v62, %v6324_v58  ;;  %3738 = vmatpush.bf16.msrb.mxu0 %v6069_v3 }
 0x1e5   :  { %v7632_v0 = vld [vmem:[#allocation9 + $0xd6c] sm:$0xf0] }
 0x1e6   :  { %v6836_v1 = vld [vmem:[#allocation9 + $0xf50] sm:$0xf]  ;;  %v6581_v5 = vor.u32 %v7632_v0, %v6580_v63  ;;  %3751 = vmatpush.bf16.msrb.mxu1 %v6325_v4  ;;  %v3500_v63 = vpop.f32.mrf.mxu1 }
 0x1e7   :  { %v7696_v2 = vld [vmem:[#allocation9 + $0xf6c] sm:$0xf0]  ;;  %v7372_v63 = vld [vmem:[#allocation9 + $0x554] sm:$0xf] }
 0x1e8   :  { %v6036_v6 = vld [vmem:[#allocation9 + $0x910] sm:$0xf]  ;;  %v6837_v9 = vor.u32 %v7696_v2, %v6836_v1  ;;  %3764 = vmatpush.bf16.msrb.mxu2 %v6581_v5 }
 0x1e9   :  { %v7496_v7 = vld [vmem:[#allocation9 + $0x92c] sm:$0xf0] }
 0x1ea   :  { %v6292_v8 = vld [vmem:[#allocation9 + $0xb10] sm:$0xf]  ;;  %v6037_v15 = vor.u32 %v7496_v7, %v6036_v6  ;;  %3777 = vmatpush.bf16.msrb.mxu3 %v6837_v9 }
 0x1eb   :  { %v7560_v10 = vld [vmem:[#allocation9 + $0xb2c] sm:$0xf0] }
 0x1ec   :  { %v6548_v11 = vld [vmem:[#allocation9 + $0xd10] sm:$0xf]  ;;  %v6293_v17 = vor.u32 %v7560_v10, %v6292_v8  ;;  %3739 = vmatpush.bf16.msrb.mxu0 %v6037_v15 }
 0x1ed   :  { %v7624_v12 = vld [vmem:[#allocation9 + $0xd2c] sm:$0xf0] }
 0x1ee   :  { %v6804_v13 = vld [vmem:[#allocation9 + $0xf10] sm:$0xf]  ;;  %v6549_v18 = vor.u32 %v7624_v12, %v6548_v11  ;;  %3752 = vmatpush.bf16.msrb.mxu1 %v6293_v17 }
 0x1ef   :  { %v7688_v14 = vld [vmem:[#allocation9 + $0xf2c] sm:$0xf0] }
 0x1f0   :  { %v6004_v20 = vld [vmem:[#allocation9 + $0x8d0] sm:$0xf]  ;;  %v6805_v24 = vor.u32 %v7688_v14, %v6804_v13  ;;  %3765 = vmatpush.bf16.msrb.mxu2 %v6549_v18  ;;  %v3513_v14 = vpop.f32.mrf.mxu2 }
 0x1f1   :  { %v7488_v21 = vld [vmem:[#allocation9 + $0x8ec] sm:$0xf0]  ;;  %v5782_v14 = vld [vmem:[#allocation9 + $0x730] sm:$0xf0] }
 0x1f2   :  { %v6260_v22 = vld [vmem:[#allocation9 + $0xad0] sm:$0xf]  ;;  %v6005_v34 = vor.u32 %v7488_v21, %v6004_v20  ;;  %3778 = vmatpush.bf16.msrb.mxu3 %v6805_v24  ;;  %v3526_v20 = vpop.f32.mrf.mxu3  ;;  %v7260_v21 = vld [vmem:[#allocation9 + $0x1d4] sm:$0xf] }
 0x1f3   :  { %v7552_v25 = vld [vmem:[#allocation9 + $0xaec] sm:$0xf0]  ;;  %v7228_v20 = vld [vmem:[#allocation9 + $0xd4] sm:$0xf] }
 0x1f4   :  { %v6516_v26 = vld [vmem:[#allocation9 + $0xcd0] sm:$0xf]  ;;  %v6261_v35 = vor.u32 %v7552_v25, %v6260_v22  ;;  %3740 = vmatpush.bf16.msrb.mxu0 %v6005_v34  ;;  %v5110_v22 = vld [vmem:[#allocation9 + $0x1f0] sm:$0xf0] }
 0x1f5   :  { %v7616_v27 = vld [vmem:[#allocation9 + $0xcec] sm:$0xf0]  ;;  %v5366_v25 = vld [vmem:[#allocation9 + $0x3f0] sm:$0xf0] }
 0x1f6   :  { %v6772_v30 = vld [vmem:[#allocation9 + $0xed0] sm:$0xf]  ;;  %v6517_v36 = vor.u32 %v7616_v27, %v6516_v26  ;;  %3753 = vmatpush.bf16.msrb.mxu1 %v6261_v35  ;;  %v7388_v26 = vld [vmem:[#allocation9 + $0x5d4] sm:$0xf] }
 0x1f7   :  { %v7680_v31 = vld [vmem:[#allocation9 + $0xeec] sm:$0xf0]  ;;  %v5622_v27 = vld [vmem:[#allocation9 + $0x5f0] sm:$0xf0] }
 0x1f8   :  { %v5972_v37 = vld [vmem:[#allocation9 + $0x890] sm:$0xf]  ;;  %v6773_v41 = vor.u32 %v7680_v31, %v6772_v30  ;;  %3766 = vmatpush.bf16.msrb.mxu2 %v6517_v36  ;;  %v7452_v31 = vld [vmem:[#allocation9 + $0x7d4] sm:$0xf]  ;;  %v5113_v36 = vor.u32 %v7260_v21, %v5110_v22 }
 0x1f9   :  { %v7480_v39 = vld [vmem:[#allocation9 + $0x8ac] sm:$0xf0]  ;;  %v5878_v34 = vld [vmem:[#allocation9 + $0x7f0] sm:$0xf0] }
 0x1fa   :  { %v6228_v40 = vld [vmem:[#allocation9 + $0xa90] sm:$0xf]  ;;  %v5973_v28 = vor.u32 %v7480_v39, %v5972_v37  ;;  %3779 = vmatpush.bf16.msrb.mxu3 %v6773_v41  ;;  %v5369_v37 = vor.u32 %v7324_v23, %v5366_v25  ;;  %v5625_v39 = vor.u32 %v7388_v26, %v5622_v27  ;;  %v7316_v41 = vld [vmem:[#allocation9 + $0x394] sm:$0xf] }
 0x1fb   :  { %v7544_v42 = vld [vmem:[#allocation9 + $0xaac] sm:$0xf0]  ;;  %v4982_v21 = vld [vmem:[#allocation9 + $0xf0] sm:$0xf0] }
 0x1fc   :  { %v6484_v53 = vld [vmem:[#allocation9 + $0xc90] sm:$0xf]  ;;  %v6229_v52 = vor.u32 %v7544_v42, %v6228_v40  ;;  %3741 = vmatpush.bf16.msrb.mxu0 %v5973_v28  ;;  %v7252_v40 = vld [vmem:[#allocation9 + $0x194] sm:$0xf]  ;;  %v5881_v42 = vor.u32 %v7452_v31, %v5878_v34 }
 0x1fd   :  { %v7608_v43 = vld [vmem:[#allocation9 + $0xcac] sm:$0xf0]  ;;  %v7292_v22 = vld [vmem:[#allocation9 + $0x2d4] sm:$0xf] }
 0x1fe   :  { %v6740_v46 = vld [vmem:[#allocation9 + $0xe90] sm:$0xf]  ;;  %v6485_v56 = vor.u32 %v7608_v43, %v6484_v53  ;;  %3754 = vmatpush.bf16.msrb.mxu1 %v6229_v52  ;;  %v5334_v53 = vld [vmem:[#allocation9 + $0x3b0] sm:$0xf0] }
 0x1ff   :  { %v7672_v47 = vld [vmem:[#allocation9 + $0xeac] sm:$0xf0]  ;;  %v7380_v43 = vld [vmem:[#allocation9 + $0x594] sm:$0xf]  ;;  %v5337_v28 = vor.u32 %v7316_v41, %v5334_v53  ;;  %v3563_v41 = vpop.f32.mrf.mxu2 }
 0x200   :  { %v5940_v58 = vld [vmem:[#allocation9 + $0x850] sm:$0xf]  ;;  %v6741_v0 = vor.u32 %v7672_v47, %v6740_v46  ;;  %3767 = vmatpush.bf16.msrb.mxu2 %v6485_v56  ;;  %v5846_v46 = vld [vmem:[#allocation9 + $0x7b0] sm:$0xf0]  ;;  %v5081_v47 = vor.u32 %v7252_v40, %v5078_v59  ;;  %v5593_v49 = vor.u32 %v7380_v43, %v5590_v44 }
 0x201   :  { %v7472_v60 = vld [vmem:[#allocation9 + $0x86c] sm:$0xf0]  ;;  %v7244_v52 = vld [vmem:[#allocation9 + $0x154] sm:$0xf] }
 0x202   :  { %v6196_v62 = vld [vmem:[#allocation9 + $0xa50] sm:$0xf]  ;;  %v5941_v6 = vor.u32 %v7472_v60, %v5940_v58  ;;  %3780 = vmatpush.bf16.msrb.mxu3 %v6741_v0  ;;  %v5046_v56 = vld [vmem:[#allocation9 + $0x170] sm:$0xf0]  ;;  %v5849_v60 = vor.u32 %v7444_v45, %v5846_v46  ;;  %v3576_v45 = vpop.f32.mrf.mxu3 }
 0x203   :  { %v7536_v1 = vld [vmem:[#allocation9 + $0xa6c] sm:$0xf0]  ;;  %v7308_v58 = vld [vmem:[#allocation9 + $0x354] sm:$0xf] }
 0x204   :  { %v6452_v2 = vld [vmem:[#allocation9 + $0xc50] sm:$0xf]  ;;  %v6197_v9 = vor.u32 %v7536_v1, %v6196_v62  ;;  %3742 = vmatpush.bf16.msrb.mxu0 %v5941_v6  ;;  %v5302_v62 = vld [vmem:[#allocation9 + $0x370] sm:$0xf0] }
 0x205   :  { %v7600_v3 = vld [vmem:[#allocation9 + $0xc6c] sm:$0xf0]  ;;  %v5558_v0 = vld [vmem:[#allocation9 + $0x570] sm:$0xf0] }
 0x206   :  { %v6708_v4 = vld [vmem:[#allocation9 + $0xe50] sm:$0xf]  ;;  %v6453_v10 = vor.u32 %v7600_v3, %v6452_v2  ;;  %3755 = vmatpush.bf16.msrb.mxu1 %v6197_v9  ;;  %v7436_v1 = vld [vmem:[#allocation9 + $0x754] sm:$0xf]  ;;  %v5049_v3 = vor.u32 %v7244_v52, %v5046_v56 }
 0x207   :  { %v7664_v5 = vld [vmem:[#allocation9 + $0xe6c] sm:$0xf0]  ;;  %v5814_v2 = vld [vmem:[#allocation9 + $0x770] sm:$0xf0] }
 0x208   :  { %v5908_v7 = vld [vmem:[#allocation9 + $0x810] sm:$0xf]  ;;  %v6709_v15 = vor.u32 %v7664_v5, %v6708_v4  ;;  %3768 = vmatpush.bf16.msrb.mxu2 %v6453_v10  ;;  %v5305_v4 = vor.u32 %v7308_v58, %v5302_v62  ;;  %v5561_v5 = vor.u32 %v7372_v63, %v5558_v0  ;;  %v7236_v6 = vld [vmem:[#allocation9 + $0x114] sm:$0xf]  ;;  %v5817_v9 = vor.u32 %v7436_v1, %v5814_v2 }
 0x209   :  { %v7464_v8 = vld [vmem:[#allocation9 + $0x82c] sm:$0xf0]  ;;  %v5270_v10 = vld [vmem:[#allocation9 + $0x330] sm:$0xf0] }
 0x20a   :  { %v6164_v11 = vld [vmem:[#allocation9 + $0xa10] sm:$0xf]  ;;  %v5909_v24 = vor.u32 %v7464_v8, %v5908_v7  ;;  %3781 = vmatpush.bf16.msrb.mxu3 %v6709_v15  ;;  %v5014_v7 = vld [vmem:[#allocation9 + $0x130] sm:$0xf0] }
 0x20b   :  { %v7528_v12 = vld [vmem:[#allocation9 + $0xa2c] sm:$0xf0]  ;;  %v7300_v8 = vld [vmem:[#allocation9 + $0x314] sm:$0xf]  ;;  %v5017_v15 = vor.u32 %v7236_v6, %v5014_v7 }
 0x20c   :  { %v6420_v13 = vld [vmem:[#allocation9 + $0xc10] sm:$0xf]  ;;  %v6165_v29 = vor.u32 %v7528_v12, %v6164_v11  ;;  %3743 = vmatpush.bf16.msrb.mxu0 %v5909_v24  ;;  %v7364_v11 = vld [vmem:[#allocation9 + $0x514] sm:$0xf]  ;;  %v3550_v24 = vpop.f32.mrf.mxu1 }
 0x20d   :  { %v7592_v16 = vld [vmem:[#allocation9 + $0xc2c] sm:$0xf0]  ;;  %v5526_v12 = vld [vmem:[#allocation9 + $0x530] sm:$0xf0] }
 0x20e   :  { %v6676_v17 = vld [vmem:[#allocation9 + $0xe10] sm:$0xf]  ;;  %v6421_v30 = vor.u32 %v7592_v16, %v6420_v13  ;;  %3756 = vmatpush.bf16.msrb.mxu1 %v6165_v29  ;;  %v7428_v13 = vld [vmem:[#allocation9 + $0x714] sm:$0xf]  ;;  %v3537_v16 = vpop.f32.mrf.mxu0 }
 0x20f   :  { %v7656_v18 = vld [vmem:[#allocation9 + $0xe2c] sm:$0xf0]  ;;  %3744 = vmatmul.bf16.vlgmr.msrb.gmra.mxu0 %v8099_v54  ;;  %v3538_v23 = vadd.f32 %v3537_v16, %v8147_v48  ;;  %v5785_v25 = vor.u32 %v7428_v13, %v5782_v14  ;;  %v5238_v26 = vld [vmem:[#allocation9 + $0x2f0] sm:$0xf0] }
 0x210   :  { %v6677_v35 = vor.u32 %v7656_v18, %v6676_v17  ;;  %3769 = vmatpush.bf16.msrb.mxu2 %v6421_v30  ;;  %3788 = vmatpush.bf16.msra.mxu0 %v5113_v36  ;;  %v5273_v17 = vor.u32 %v7300_v8, %v5270_v10  ;;  %v5529_v18 = vor.u32 %v7364_v11, %v5526_v12  ;;  %v7356_v27 = vld [vmem:[#allocation9 + $0x4d4] sm:$0xf] }
 0x211   :  { %3757 = vmatmul.bf16.vlgmr.msrb.gmra.mxu1 %v8103_v57  ;;  %v5494_v29 = vld [vmem:[#allocation9 + $0x4f0] sm:$0xf0]  ;;  %v3551_v34 = vadd.f32 %v3550_v24, %v3538_v23  ;;  %v5241_v36 = vor.u32 %v7292_v22, %v5238_v26 }
 0x212   :  { %3782 = vmatpush.bf16.msrb.mxu3 %v6677_v35  ;;  %3801 = vmatpush.bf16.msra.mxu1 %v5369_v37  ;;  %v7420_v30 = vld [vmem:[#allocation9 + $0x6d4] sm:$0xf]  ;;  %v4985_v35 = vor.u32 %v7228_v20, %v4982_v21  ;;  %v5497_v37 = vor.u32 %v7356_v27, %v5494_v29  ;;  %v3578_v21 = vpop.f32.mrf.mxu3 }
 0x213   :  { %3770 = vmatmul.bf16.vlgmr.msrb.gmra.mxu2 %v8097_v51  ;;  %v5750_v31 = vld [vmem:[#allocation9 + $0x6f0] sm:$0xf0]  ;;  %v3564_v44 = vadd.f32 %v3563_v41, %v3551_v34 }
 0x214   :  { %3814 = vmatpush.bf16.msra.mxu2 %v5625_v39  ;;  %3789 = vmatpush.bf16.msra.mxu0 %v5081_v47  ;;  %v7220_v39 = vld [vmem:[#allocation9 + $0x94] sm:$0xf]  ;;  %v5753_v48 = vor.u32 %v7420_v30, %v5750_v31  ;;  %v3552_v0 = vpop.f32.mrf.mxu1 }
 0x215   :  { %3783 = vmatmul.bf16.vlgmr.msrb.gmra.mxu3 %v8101_v55  ;;  %v4950_v40 = vld [vmem:[#allocation9 + $0xb0] sm:$0xf0] }
 0x216   :  { %3827 = vmatpush.bf16.msra.mxu3 %v5881_v42  ;;  %3802 = vmatpush.bf16.msra.mxu1 %v5337_v28  ;;  %v7284_v59 = vld [vmem:[#allocation9 + $0x294] sm:$0xf]  ;;  %v4953_v28 = vor.u32 %v7220_v39, %v4950_v40  ;;  %v3539_v52 = vpop.f32.mrf.mxu0 }
 0x217   :  { %v5206_v42 = vld [vmem:[#allocation9 + $0x2b0] sm:$0xf0] }
 0x218   :  { %3815 = vmatpush.bf16.msra.mxu2 %v5593_v49  ;;  %3790 = vmatpush.bf16.msra.mxu0 %v5049_v3  ;;  %v7348_v53 = vld [vmem:[#allocation9 + $0x494] sm:$0xf]  ;;  %v8154_v49 = vadd.f32 %v3576_v45, %v3564_v44  ;;  %v5209_v56 = vor.u32 %v7284_v59, %v5206_v42 }
 0x219   :  { %v5462_v43 = vld [vmem:[#allocation9 + $0x4b0] sm:$0xf0] }
 0x21a   :  { %3828 = vmatpush.bf16.msra.mxu3 %v5849_v60  ;;  %3803 = vmatpush.bf16.msra.mxu1 %v5305_v4  ;;  %v7412_v46 = vld [vmem:[#allocation9 + $0x694] sm:$0xf]  ;;  %v5465_v58 = vor.u32 %v7348_v53, %v5462_v43 }
 0x21b   :  { %v5718_v47 = vld [vmem:[#allocation9 + $0x6b0] sm:$0xf0] }
 0x21c   :  { %3816 = vmatpush.bf16.msra.mxu2 %v5561_v5  ;;  %3791 = vmatpush.bf16.msra.mxu0 %v5017_v15  ;;  %v7212_v60 = vld [vmem:[#allocation9 + $0x54] sm:$0xf]  ;;  %v5721_v1 = vor.u32 %v7412_v46, %v5718_v47  ;;  %v3565_v15 = vpop.f32.mrf.mxu2 }
 0x21d   :  { %v4918_v62 = vld [vmem:[#allocation9 + $0x70] sm:$0xf0] }
 0x21e   :  { %3829 = vmatpush.bf16.msra.mxu3 %v5817_v9  ;;  %3804 = vmatpush.bf16.msra.mxu1 %v5273_v17  ;;  %v7276_v63 = vld [vmem:[#allocation9 + $0x254] sm:$0xf]  ;;  %v4921_v7 = vor.u32 %v7212_v60, %v4918_v62 }
 0x21f   :  { %v5174_v2 = vld [vmem:[#allocation9 + $0x270] sm:$0xf0] }
 0x220   :  { %3817 = vmatpush.bf16.msra.mxu2 %v5529_v18  ;;  %3792 = vmatpush.bf16.msra.mxu0 %v4985_v35  ;;  %v7340_v3 = vld [vmem:[#allocation9 + $0x454] sm:$0xf]  ;;  %v5177_v10 = vor.u32 %v7276_v63, %v5174_v2 }
 0x221   :  { %v5430_v4 = vld [vmem:[#allocation9 + $0x470] sm:$0xf0] }
 0x222   :  { %3830 = vmatpush.bf16.msra.mxu3 %v5785_v25  ;;  %3805 = vmatpush.bf16.msra.mxu1 %v5241_v36  ;;  %v7404_v5 = vld [vmem:[#allocation9 + $0x654] sm:$0xf]  ;;  %v5433_v11 = vor.u32 %v7340_v3, %v5430_v4 }
 0x223   :  { %v5686_v6 = vld [vmem:[#allocation9 + $0x670] sm:$0xf0] }
 0x224   :  { %3818 = vmatpush.bf16.msra.mxu2 %v5497_v37  ;;  %3793 = vmatpush.bf16.msra.mxu0 %v4953_v28  ;;  %v7204_v8 = vld [vmem:[#allocation9 + $0x14] sm:$0xf]  ;;  %v5689_v16 = vor.u32 %v7404_v5, %v5686_v6 }
 0x225   :  { %v4886_v9 = vld [vmem:[#allocation9 + $0x30] sm:$0xf0] }
 0x226   :  { %3831 = vmatpush.bf16.msra.mxu3 %v5753_v48  ;;  %3806 = vmatpush.bf16.msra.mxu1 %v5209_v56  ;;  %v7268_v12 = vld [vmem:[#allocation9 + $0x214] sm:$0xf]  ;;  %v4889_v25 = vor.u32 %v7204_v8, %v4886_v9 }
 0x227   :  { %v5142_v13 = vld [vmem:[#allocation9 + $0x230] sm:$0xf0] }
 0x228   :  { %3819 = vmatpush.bf16.msra.mxu2 %v5465_v58  ;;  %v7332_v14 = vld [vmem:[#allocation9 + $0x414] sm:$0xf]  ;;  %3794 = vmatpush.bf16.msra.mxu0 %v4921_v7  ;;  %v5145_v30 = vor.u32 %v7268_v12, %v5142_v13 }
 0x229   :  { %v5398_v17 = vld [vmem:[#allocation9 + $0x430] sm:$0xf0] }
 0x22a   :  { %3832 = vmatpush.bf16.msra.mxu3 %v5721_v1  ;;  %v7396_v18 = vld [vmem:[#allocation9 + $0x614] sm:$0xf]  ;;  %3807 = vmatpush.bf16.msra.mxu1 %v5177_v10  ;;  %v5401_v31 = vor.u32 %v7332_v14, %v5398_v17  ;;  %v3589_v17 = vpop.f32.mrf.mxu0 }
 0x22b   :  { %v5654_v20 = vld [vmem:[#allocation9 + $0x630] sm:$0xf0] }
 0x22c   :  { %v7516_v22 = vld [vmem:[#allocation9 + $0x9d4] sm:$0xf]  ;;  %3820 = vmatpush.bf16.msra.mxu2 %v5433_v11  ;;  %v5657_v36 = vor.u32 %v7396_v18, %v5654_v20  ;;  %3795 = vmatpush.bf16.msra.mxu0 %v4889_v25 }
 0x22d   :  { %v6134_v23 = vld [vmem:[#allocation9 + $0x9f0] sm:$0xf0] }
 0x22e   :  { %v7580_v24 = vld [vmem:[#allocation9 + $0xbd4] sm:$0xf]  ;;  %3833 = vmatpush.bf16.msra.mxu3 %v5689_v16  ;;  %v6137_v37 = vor.u32 %v7516_v22, %v6134_v23  ;;  %3808 = vmatpush.bf16.msra.mxu1 %v5145_v30 }
 0x22f   :  { %v6390_v26 = vld [vmem:[#allocation9 + $0xbf0] sm:$0xf0]  ;;  %3796 = vmatmul.bf16.vlgmr.msra.gmra.mxu0 %v8084_v32 }
 0x230   :  { %v7644_v27 = vld [vmem:[#allocation9 + $0xdd4] sm:$0xf]  ;;  %v6393_v39 = vor.u32 %v7580_v24, %v6390_v26  ;;  %3821 = vmatpush.bf16.msra.mxu2 %v5401_v31  ;;  %3840 = vmatpush.bf16.msrb.mxu0 %v6137_v37  ;;  %v3602_v24 = vpop.f32.mrf.mxu1 }
 0x231   :  { %v6646_v29 = vld [vmem:[#allocation9 + $0xdf0] sm:$0xf0]  ;;  %3809 = vmatmul.bf16.vlgmr.msra.gmra.mxu1 %v8088_v38  ;;  %v3603_v30 = vadd.f32 %v3602_v24, %v3589_v17  ;;  %v7265_v24 = vld [vmem:[#allocation9 + $0x1f4] sm:$0xf0] }
 0x232   :  { %v7708_v34 = vld [vmem:[#allocation9 + $0xfd4] sm:$0xf]  ;;  %v6649_v40 = vor.u32 %v7644_v27, %v6646_v29  ;;  %3834 = vmatpush.bf16.msra.mxu3 %v5657_v36  ;;  %3853 = vmatpush.bf16.msrb.mxu1 %v6393_v39 }
 0x233   :  { %v6902_v35 = vld [vmem:[#allocation9 + $0xff0] sm:$0xf0]  ;;  %3822 = vmatmul.bf16.vlgmr.msra.gmra.mxu2 %v8080_v19 }
 0x234   :  { %v7508_v59 = vld [vmem:[#allocation9 + $0x994] sm:$0xf]  ;;  %v6905_v42 = vor.u32 %v7708_v34, %v6902_v35  ;;  %3866 = vmatpush.bf16.msrb.mxu2 %v6649_v40 }
 0x235   :  { %v6102_v41 = vld [vmem:[#allocation9 + $0x9b0] sm:$0xf0]  ;;  %3835 = vmatmul.bf16.vlgmr.msra.gmra.mxu3 %v8086_v33 }
 0x236   :  { %v7572_v48 = vld [vmem:[#allocation9 + $0xb94] sm:$0xf]  ;;  %v6105_v47 = vor.u32 %v7508_v59, %v6102_v41  ;;  %3879 = vmatpush.bf16.msrb.mxu3 %v6905_v42  ;;  %v3615_v41 = vpop.f32.mrf.mxu2 }
 0x237   :  { %v6358_v53 = vld [vmem:[#allocation9 + $0xbb0] sm:$0xf0] }
 0x238   :  { %v7636_v43 = vld [vmem:[#allocation9 + $0xd94] sm:$0xf]  ;;  %v6361_v28 = vor.u32 %v7572_v48, %v6358_v53  ;;  %3841 = vmatpush.bf16.msrb.mxu0 %v6105_v47 }
 0x239   :  { %v6614_v44 = vld [vmem:[#allocation9 + $0xdb0] sm:$0xf0] }
 0x23a   :  { %v7700_v45 = vld [vmem:[#allocation9 + $0xf94] sm:$0xf]  ;;  %v6617_v52 = vor.u32 %v7636_v43, %v6614_v44  ;;  %3854 = vmatpush.bf16.msrb.mxu1 %v6361_v28  ;;  %v3616_v44 = vadd.f32 %v3615_v41, %v3603_v30  ;;  %v7393_v30 = vld [vmem:[#allocation9 + $0x5f4] sm:$0xf0] }
 0x23b   :  { %v6870_v46 = vld [vmem:[#allocation9 + $0xfb0] sm:$0xf0]  ;;  %v5084_v41 = vld [vmem:[#allocation9 + $0x198] sm:$0xf] }
 0x23c   :  { %v7500_v56 = vld [vmem:[#allocation9 + $0x954] sm:$0xf]  ;;  %v6873_v62 = vor.u32 %v7700_v45, %v6870_v46  ;;  %3867 = vmatpush.bf16.msrb.mxu2 %v6617_v52  ;;  %v3628_v45 = vpop.f32.mrf.mxu3 }
 0x23d   :  { %v6070_v58 = vld [vmem:[#allocation9 + $0x970] sm:$0xf0]  ;;  %v8160_v52 = vadd.f32 %v3628_v45, %v3616_v44  ;;  %v5596_v44 = vld [vmem:[#allocation9 + $0x598] sm:$0xf] }
 0x23e   :  { %v7564_v60 = vld [vmem:[#allocation9 + $0xb54] sm:$0xf]  ;;  %v6073_v4 = vor.u32 %v7500_v56, %v6070_v58  ;;  %3880 = vmatpush.bf16.msrb.mxu3 %v6873_v62  ;;  %v3591_v56 = vpop.f32.mrf.mxu0  ;;  %v7385_v45 = vld [vmem:[#allocation9 + $0x5b4] sm:$0xf0] }
 0x23f   :  { %v6326_v63 = vld [vmem:[#allocation9 + $0xb70] sm:$0xf0] }
 0x240   :  { %v7628_v0 = vld [vmem:[#allocation9 + $0xd54] sm:$0xf]  ;;  %v6329_v5 = vor.u32 %v7564_v60, %v6326_v63  ;;  %3842 = vmatpush.bf16.msrb.mxu0 %v6073_v4 }
 0x241   :  { %v6582_v1 = vld [vmem:[#allocation9 + $0xd70] sm:$0xf0] }
 0x242   :  { %v7692_v2 = vld [vmem:[#allocation9 + $0xf54] sm:$0xf]  ;;  %v6585_v6 = vor.u32 %v7628_v0, %v6582_v1  ;;  %3855 = vmatpush.bf16.msrb.mxu1 %v6329_v5  ;;  %v3604_v1 = vpop.f32.mrf.mxu1 }
 0x243   :  { %v6838_v3 = vld [vmem:[#allocation9 + $0xf70] sm:$0xf0]  ;;  %v7313_v1 = vld [vmem:[#allocation9 + $0x374] sm:$0xf0] }
 0x244   :  { %v7492_v7 = vld [vmem:[#allocation9 + $0x914] sm:$0xf]  ;;  %v6841_v10 = vor.u32 %v7692_v2, %v6838_v3  ;;  %3868 = vmatpush.bf16.msrb.mxu2 %v6585_v6 }
 0x245   :  { %v6038_v8 = vld [vmem:[#allocation9 + $0x930] sm:$0xf0] }
 0x246   :  { %v7556_v9 = vld [vmem:[#allocation9 + $0xb14] sm:$0xf]  ;;  %v6041_v16 = vor.u32 %v7492_v7, %v6038_v8  ;;  %3881 = vmatpush.bf16.msrb.mxu3 %v6841_v10 }
 0x247   :  { %v6294_v11 = vld [vmem:[#allocation9 + $0xb30] sm:$0xf0] }
 0x248   :  { %v7620_v12 = vld [vmem:[#allocation9 + $0xd14] sm:$0xf]  ;;  %v6297_v18 = vor.u32 %v7556_v9, %v6294_v11  ;;  %3843 = vmatpush.bf16.msrb.mxu0 %v6041_v16  ;;  %v3617_v16 = vpop.f32.mrf.mxu2 }
 0x249   :  { %v6550_v13 = vld [vmem:[#allocation9 + $0xd30] sm:$0xf0]  ;;  %v5788_v16 = vld [vmem:[#allocation9 + $0x718] sm:$0xf] }
 0x24a   :  { %v7684_v14 = vld [vmem:[#allocation9 + $0xf14] sm:$0xf]  ;;  %v6553_v20 = vor.u32 %v7620_v12, %v6550_v13  ;;  %3856 = vmatpush.bf16.msrb.mxu1 %v6297_v18 }
 0x24b   :  { %v6806_v15 = vld [vmem:[#allocation9 + $0xf30] sm:$0xf0] }
 0x24c   :  { %v7484_v21 = vld [vmem:[#allocation9 + $0x8d4] sm:$0xf]  ;;  %v6809_v25 = vor.u32 %v7684_v14, %v6806_v15  ;;  %3869 = vmatpush.bf16.msrb.mxu2 %v6553_v20 }
 0x24d   :  { %v6006_v22 = vld [vmem:[#allocation9 + $0x8f0] sm:$0xf0] }
 0x24e   :  { %v7548_v23 = vld [vmem:[#allocation9 + $0xad4] sm:$0xf]  ;;  %v6009_v35 = vor.u32 %v7484_v21, %v6006_v22  ;;  %3882 = vmatpush.bf16.msrb.mxu3 %v6809_v25  ;;  %v3630_v22 = vpop.f32.mrf.mxu3  ;;  %v5372_v25 = vld [vmem:[#allocation9 + $0x3d8] sm:$0xf] }
 0x24f   :  { %v6262_v26 = vld [vmem:[#allocation9 + $0xaf0] sm:$0xf0] }
 0x250   :  { %v7612_v27 = vld [vmem:[#allocation9 + $0xcd4] sm:$0xf]  ;;  %v6265_v36 = vor.u32 %v7548_v23, %v6262_v26  ;;  %3844 = vmatpush.bf16.msrb.mxu0 %v6009_v35  ;;  %v5116_v23 = vld [vmem:[#allocation9 + $0x1d8] sm:$0xf] }
 0x251   :  { %v6518_v29 = vld [vmem:[#allocation9 + $0xcf0] sm:$0xf0]  ;;  %v5884_v35 = vld [vmem:[#allocation9 + $0x7d8] sm:$0xf] }
 0x252   :  { %v7676_v31 = vld [vmem:[#allocation9 + $0xed4] sm:$0xf]  ;;  %v6521_v37 = vor.u32 %v7612_v27, %v6518_v29  ;;  %3857 = vmatpush.bf16.msrb.mxu1 %v6265_v36  ;;  %v7329_v27 = vld [vmem:[#allocation9 + $0x3f4] sm:$0xf0] }
 0x253   :  { %v6774_v34 = vld [vmem:[#allocation9 + $0xef0] sm:$0xf0]  ;;  %v5628_v29 = vld [vmem:[#allocation9 + $0x5d8] sm:$0xf] }
 0x254   :  { %v7476_v39 = vld [vmem:[#allocation9 + $0x894] sm:$0xf]  ;;  %v6777_v48 = vor.u32 %v7676_v31, %v6774_v34  ;;  %3870 = vmatpush.bf16.msrb.mxu2 %v6521_v37  ;;  %v7457_v36 = vld [vmem:[#allocation9 + $0x7f4] sm:$0xf0] }
 0x255   :  { %v5974_v40 = vld [vmem:[#allocation9 + $0x8b0] sm:$0xf0] }
 0x256   :  { %v7540_v59 = vld [vmem:[#allocation9 + $0xa94] sm:$0xf]  ;;  %v5977_v28 = vor.u32 %v7476_v39, %v5974_v40  ;;  %3883 = vmatpush.bf16.msrb.mxu3 %v6777_v48  ;;  %v5117_v39 = vor.u32 %v7265_v24, %v5116_v23  ;;  %v5373_v40 = vor.u32 %v7329_v27, %v5372_v25  ;;  %v7257_v48 = vld [vmem:[#allocation9 + $0x1b4] sm:$0xf0]  ;;  %v3654_v27 = vpop.f32.mrf.mxu1 }
 0x257   :  { %v6230_v42 = vld [vmem:[#allocation9 + $0xab0] sm:$0xf0]  ;;  %v4988_v23 = vld [vmem:[#allocation9 + $0xd8] sm:$0xf] }
 0x258   :  { %v7604_v53 = vld [vmem:[#allocation9 + $0xc94] sm:$0xf]  ;;  %v6233_v58 = vor.u32 %v7540_v59, %v6230_v42  ;;  %3845 = vmatpush.bf16.msrb.mxu0 %v5977_v28  ;;  %v5629_v59 = vor.u32 %v7393_v30, %v5628_v29  ;;  %v5340_v42 = vld [vmem:[#allocation9 + $0x398] sm:$0xf]  ;;  %v5085_v28 = vor.u32 %v7257_v48, %v5084_v41 }
 0x259   :  { %v6486_v43 = vld [vmem:[#allocation9 + $0xcb0] sm:$0xf0]  ;;  %v7233_v24 = vld [vmem:[#allocation9 + $0xf4] sm:$0xf0] }
 0x25a   :  { %v7668_v46 = vld [vmem:[#allocation9 + $0xe94] sm:$0xf]  ;;  %v6489_v60 = vor.u32 %v7604_v53, %v6486_v43  ;;  %3858 = vmatpush.bf16.msrb.mxu1 %v6233_v58  ;;  %v5885_v53 = vor.u32 %v7457_v36, %v5884_v35  ;;  %v7321_v43 = vld [vmem:[#allocation9 + $0x3b4] sm:$0xf0]  ;;  %v5597_v58 = vor.u32 %v7385_v45, %v5596_v44 }
 0x25b   :  { %v6742_v47 = vld [vmem:[#allocation9 + $0xeb0] sm:$0xf0]  ;;  %v5341_v56 = vor.u32 %v7321_v43, %v5340_v42  ;;  %v5244_v25 = vld [vmem:[#allocation9 + $0x2d8] sm:$0xf] }
 0x25c   :  { %v7468_v62 = vld [vmem:[#allocation9 + $0x854] sm:$0xf]  ;;  %v6745_v2 = vor.u32 %v7668_v46, %v6742_v47  ;;  %3871 = vmatpush.bf16.msrb.mxu2 %v6489_v60  ;;  %v5852_v46 = vld [vmem:[#allocation9 + $0x798] sm:$0xf] }
 0x25d   :  { %v5942_v63 = vld [vmem:[#allocation9 + $0x870] sm:$0xf0]  ;;  %v7449_v47 = vld [vmem:[#allocation9 + $0x7b4] sm:$0xf0] }
 0x25e   :  { %v7532_v0 = vld [vmem:[#allocation9 + $0xa54] sm:$0xf]  ;;  %v5945_v8 = vor.u32 %v7468_v62, %v5942_v63  ;;  %3884 = vmatpush.bf16.msrb.mxu3 %v6745_v2  ;;  %v5052_v60 = vld [vmem:[#allocation9 + $0x158] sm:$0xf] }
 0x25f   :  { %v6198_v3 = vld [vmem:[#allocation9 + $0xa70] sm:$0xf0]  ;;  %v7249_v62 = vld [vmem:[#allocation9 + $0x174] sm:$0xf0] }
 0x260   :  { %v7596_v4 = vld [vmem:[#allocation9 + $0xc54] sm:$0xf]  ;;  %v6201_v11 = vor.u32 %v7532_v0, %v6198_v3  ;;  %3846 = vmatpush.bf16.msrb.mxu0 %v5945_v8  ;;  %v5308_v63 = vld [vmem:[#allocation9 + $0x358] sm:$0xf]  ;;  %v5853_v0 = vor.u32 %v7449_v47, %v5852_v46  ;;  %v3680_v47 = vpop.f32.mrf.mxu3 }
 0x261   :  { %v6454_v5 = vld [vmem:[#allocation9 + $0xc70] sm:$0xf0]  ;;  %v5564_v2 = vld [vmem:[#allocation9 + $0x558] sm:$0xf] }
 0x262   :  { %v7660_v6 = vld [vmem:[#allocation9 + $0xe54] sm:$0xf]  ;;  %v6457_v12 = vor.u32 %v7596_v4, %v6454_v5  ;;  %3859 = vmatpush.bf16.msrb.mxu1 %v6201_v11  ;;  %v7377_v3 = vld [vmem:[#allocation9 + $0x574] sm:$0xf0] }
 0x263   :  { %v6710_v7 = vld [vmem:[#allocation9 + $0xe70] sm:$0xf0]  ;;  %v5820_v4 = vld [vmem:[#allocation9 + $0x758] sm:$0xf]  ;;  %v5565_v8 = vor.u32 %v7377_v3, %v5564_v2 }
 0x264   :  { %v7460_v9 = vld [vmem:[#allocation9 + $0x814] sm:$0xf]  ;;  %v6713_v17 = vor.u32 %v7660_v6, %v6710_v7  ;;  %3872 = vmatpush.bf16.msrb.mxu2 %v6457_v12  ;;  %v7441_v5 = vld [vmem:[#allocation9 + $0x774] sm:$0xf0]  ;;  %v5053_v6 = vor.u32 %v7249_v62, %v5052_v60  ;;  %v5309_v7 = vor.u32 %v7313_v1, %v5308_v63 }
 0x265   :  { %v5910_v10 = vld [vmem:[#allocation9 + $0x830] sm:$0xf0]  ;;  %v5276_v11 = vld [vmem:[#allocation9 + $0x318] sm:$0xf]  ;;  %v5821_v12 = vor.u32 %v7441_v5, %v5820_v4  ;;  %v3656_v4 = vpop.f32.mrf.mxu1 }
 0x266   :  { %v7524_v13 = vld [vmem:[#allocation9 + $0xa14] sm:$0xf]  ;;  %v5913_v26 = vor.u32 %v7460_v9, %v5910_v10  ;;  %3885 = vmatpush.bf16.msrb.mxu3 %v6713_v17  ;;  %v5020_v9 = vld [vmem:[#allocation9 + $0x118] sm:$0xf] }
 0x267   :  { %v6166_v14 = vld [vmem:[#allocation9 + $0xa30] sm:$0xf0]  ;;  %v7241_v10 = vld [vmem:[#allocation9 + $0x134] sm:$0xf0] }
 0x268   :  { %v7588_v15 = vld [vmem:[#allocation9 + $0xc14] sm:$0xf]  ;;  %v6169_v31 = vor.u32 %v7524_v13, %v6166_v14  ;;  %3847 = vmatpush.bf16.msrb.mxu0 %v5913_v26  ;;  %v7305_v13 = vld [vmem:[#allocation9 + $0x334] sm:$0xf0] }
 0x269   :  { %v6422_v18 = vld [vmem:[#allocation9 + $0xc30] sm:$0xf0]  ;;  %v5532_v14 = vld [vmem:[#allocation9 + $0x518] sm:$0xf] }
 0x26a   :  { %v7652_v20 = vld [vmem:[#allocation9 + $0xe14] sm:$0xf]  ;;  %v6425_v34 = vor.u32 %v7588_v15, %v6422_v18  ;;  %3860 = vmatpush.bf16.msrb.mxu1 %v6169_v31  ;;  %v7369_v15 = vld [vmem:[#allocation9 + $0x534] sm:$0xf0]  ;;  %v5021_v18 = vor.u32 %v7241_v10, %v5020_v9 }
 0x26b   :  { %v6678_v21 = vld [vmem:[#allocation9 + $0xe30] sm:$0xf0]  ;;  %3848 = vmatmul.bf16.vlgmr.msrb.gmra.mxu0 %v8099_v54  ;;  %v7433_v17 = vld [vmem:[#allocation9 + $0x734] sm:$0xf0]  ;;  %v5533_v22 = vor.u32 %v7369_v15, %v5532_v14 }
 0x26c   :  { %v6681_v37 = vor.u32 %v7652_v20, %v6678_v21  ;;  %3873 = vmatpush.bf16.msrb.mxu2 %v6425_v34  ;;  %3892 = vmatpush.bf16.msra.mxu0 %v5117_v39  ;;  %v3641_v20 = vpop.f32.mrf.mxu0  ;;  %v5277_v21 = vor.u32 %v7305_v13, %v5276_v11  ;;  %v5789_v29 = vor.u32 %v7433_v17, %v5788_v16  ;;  %v7297_v30 = vld [vmem:[#allocation9 + $0x2f4] sm:$0xf0] }
 0x26d   :  { %3861 = vmatmul.bf16.vlgmr.msrb.gmra.mxu1 %v8103_v57  ;;  %v3642_v26 = vadd.f32 %v3641_v20, %v8160_v52  ;;  %v5500_v31 = vld [vmem:[#allocation9 + $0x4d8] sm:$0xf]  ;;  %v4989_v39 = vor.u32 %v7233_v24, %v4988_v23 }
 0x26e   :  { %3886 = vmatpush.bf16.msrb.mxu3 %v6681_v37  ;;  %3905 = vmatpush.bf16.msra.mxu1 %v5373_v40  ;;  %v7361_v34 = vld [vmem:[#allocation9 + $0x4f4] sm:$0xf0]  ;;  %v5245_v40 = vor.u32 %v7297_v30, %v5244_v25  ;;  %v3682_v25 = vpop.f32.mrf.mxu3 }
 0x26f   :  { %3874 = vmatmul.bf16.vlgmr.msrb.gmra.mxu2 %v8097_v51  ;;  %v5756_v35 = vld [vmem:[#allocation9 + $0x6d8] sm:$0xf]  ;;  %v3655_v37 = vadd.f32 %v3654_v27, %v3642_v26 }
 0x270   :  { %3918 = vmatpush.bf16.msra.mxu2 %v5629_v59  ;;  %3893 = vmatpush.bf16.msra.mxu0 %v5085_v28  ;;  %v7425_v36 = vld [vmem:[#allocation9 + $0x6f4] sm:$0xf0]  ;;  %v5501_v59 = vor.u32 %v7361_v34, %v5500_v31 }
 0x271   :  { %3887 = vmatmul.bf16.vlgmr.msrb.gmra.mxu3 %v8101_v55  ;;  %v4956_v41 = vld [vmem:[#allocation9 + $0x98] sm:$0xf]  ;;  %v5757_v52 = vor.u32 %v7425_v36, %v5756_v35 }
 0x272   :  { %3931 = vmatpush.bf16.msra.mxu3 %v5885_v53  ;;  %3906 = vmatpush.bf16.msra.mxu1 %v5341_v56  ;;  %v7225_v48 = vld [vmem:[#allocation9 + $0xb4] sm:$0xf0]  ;;  %v3667_v53 = vpop.f32.mrf.mxu2 }
 0x273   :  { %v5212_v42 = vld [vmem:[#allocation9 + $0x298] sm:$0xf]  ;;  %v3668_v46 = vadd.f32 %v3667_v53, %v3655_v37 }
 0x274   :  { %3919 = vmatpush.bf16.msra.mxu2 %v5597_v58  ;;  %3894 = vmatpush.bf16.msra.mxu0 %v5053_v6  ;;  %v7289_v43 = vld [vmem:[#allocation9 + $0x2b4] sm:$0xf0]  ;;  %v4957_v58 = vor.u32 %v7225_v48, %v4956_v41  ;;  %v3643_v62 = vpop.f32.mrf.mxu0 }
 0x275   :  { %v5468_v44 = vld [vmem:[#allocation9 + $0x498] sm:$0xf]  ;;  %v8167_v60 = vadd.f32 %v3680_v47, %v3668_v46  ;;  %v5213_v63 = vor.u32 %v7289_v43, %v5212_v42 }
 0x276   :  { %3932 = vmatpush.bf16.msra.mxu3 %v5853_v0  ;;  %3907 = vmatpush.bf16.msra.mxu1 %v5309_v7  ;;  %v7353_v45 = vld [vmem:[#allocation9 + $0x4b4] sm:$0xf0] }
 0x277   :  { %v5724_v28 = vld [vmem:[#allocation9 + $0x698] sm:$0xf]  ;;  %v5469_v0 = vor.u32 %v7353_v45, %v5468_v44 }
 0x278   :  { %3920 = vmatpush.bf16.msra.mxu2 %v5565_v8  ;;  %3895 = vmatpush.bf16.msra.mxu0 %v5021_v18  ;;  %v7417_v56 = vld [vmem:[#allocation9 + $0x6b4] sm:$0xf0] }
 0x279   :  { %v4924_v1 = vld [vmem:[#allocation9 + $0x58] sm:$0xf]  ;;  %v5725_v5 = vor.u32 %v7417_v56, %v5724_v28 }
 0x27a   :  { %3933 = vmatpush.bf16.msra.mxu3 %v5821_v12  ;;  %3908 = vmatpush.bf16.msra.mxu1 %v5277_v21  ;;  %v7217_v2 = vld [vmem:[#allocation9 + $0x74] sm:$0xf0]  ;;  %v3669_v20 = vpop.f32.mrf.mxu2 }
 0x27b   :  { %v5180_v3 = vld [vmem:[#allocation9 + $0x258] sm:$0xf]  ;;  %v4925_v11 = vor.u32 %v7217_v2, %v4924_v1 }
 0x27c   :  { %3921 = vmatpush.bf16.msra.mxu2 %v5533_v22  ;;  %3896 = vmatpush.bf16.msra.mxu0 %v4989_v39  ;;  %v7281_v6 = vld [vmem:[#allocation9 + $0x274] sm:$0xf0] }
 0x27d   :  { %v5436_v7 = vld [vmem:[#allocation9 + $0x458] sm:$0xf]  ;;  %v5181_v14 = vor.u32 %v7281_v6, %v5180_v3 }
 0x27e   :  { %3934 = vmatpush.bf16.msra.mxu3 %v5789_v29  ;;  %3909 = vmatpush.bf16.msra.mxu1 %v5245_v40  ;;  %v7345_v8 = vld [vmem:[#allocation9 + $0x474] sm:$0xf0] }
 0x27f   :  { %v5692_v9 = vld [vmem:[#allocation9 + $0x658] sm:$0xf]  ;;  %v5437_v15 = vor.u32 %v7345_v8, %v5436_v7 }
 0x280   :  { %3922 = vmatpush.bf16.msra.mxu2 %v5501_v59  ;;  %v7409_v10 = vld [vmem:[#allocation9 + $0x674] sm:$0xf0]  ;;  %3897 = vmatpush.bf16.msra.mxu0 %v4957_v58 }
 0x281   :  { %v4892_v12 = vld [vmem:[#allocation9 + $0x18] sm:$0xf]  ;;  %v5693_v21 = vor.u32 %v7409_v10, %v5692_v9 }
 0x282   :  { %3935 = vmatpush.bf16.msra.mxu3 %v5757_v52  ;;  %v7209_v13 = vld [vmem:[#allocation9 + $0x34] sm:$0xf0]  ;;  %3910 = vmatpush.bf16.msra.mxu1 %v5213_v63 }
 0x283   :  { %v5148_v16 = vld [vmem:[#allocation9 + $0x218] sm:$0xf]  ;;  %v4893_v30 = vor.u32 %v7209_v13, %v4892_v12 }
 0x284   :  { %3923 = vmatpush.bf16.msra.mxu2 %v5469_v0  ;;  %v7273_v17 = vld [vmem:[#allocation9 + $0x234] sm:$0xf0]  ;;  %3898 = vmatpush.bf16.msra.mxu0 %v4925_v11 }
 0x285   :  { %v5404_v18 = vld [vmem:[#allocation9 + $0x418] sm:$0xf]  ;;  %v5149_v36 = vor.u32 %v7273_v17, %v5148_v16 }
 0x286   :  { %3936 = vmatpush.bf16.msra.mxu3 %v5725_v5  ;;  %v7337_v22 = vld [vmem:[#allocation9 + $0x434] sm:$0xf0]  ;;  %3911 = vmatpush.bf16.msra.mxu1 %v5181_v14 }
 0x287   :  { %v5660_v23 = vld [vmem:[#allocation9 + $0x618] sm:$0xf]  ;;  %v5405_v37 = vor.u32 %v7337_v22, %v5404_v18 }
 0x288   :  { %v7401_v24 = vld [vmem:[#allocation9 + $0x634] sm:$0xf0]  ;;  %3924 = vmatpush.bf16.msra.mxu2 %v5437_v15  ;;  %3899 = vmatpush.bf16.msra.mxu0 %v4893_v30  ;;  %v3706_v30 = vpop.f32.mrf.mxu1 }
 0x289   :  { %v6140_v26 = vld [vmem:[#allocation9 + $0x9d8] sm:$0xf]  ;;  %v5661_v59 = vor.u32 %v7401_v24, %v5660_v23  ;;  %v3693_v23 = vpop.f32.mrf.mxu0 }
 0x28a   :  { %v7521_v27 = vld [vmem:[#allocation9 + $0x9f4] sm:$0xf0]  ;;  %3937 = vmatpush.bf16.msra.mxu3 %v5693_v21  ;;  %3912 = vmatpush.bf16.msra.mxu1 %v5149_v36 }
 0x28b   :  { %v6396_v29 = vld [vmem:[#allocation9 + $0xbd8] sm:$0xf]  ;;  %v6141_v41 = vor.u32 %v7521_v27, %v6140_v26  ;;  %3900 = vmatmul.bf16.vlgmr.msra.gmra.mxu0 %v8084_v32 }
 0x28c   :  { %v7585_v31 = vld [vmem:[#allocation9 + $0xbf4] sm:$0xf0]  ;;  %3925 = vmatpush.bf16.msra.mxu2 %v5405_v37  ;;  %v3707_v37 = vadd.f32 %v3706_v30, %v3693_v23  ;;  %v7261_v30 = vld [vmem:[#allocation9 + $0x1dc] sm:$0xf] }
 0x28d   :  { %v6652_v34 = vld [vmem:[#allocation9 + $0xdd8] sm:$0xf]  ;;  %v6397_v48 = vor.u32 %v7585_v31, %v6396_v29  ;;  %3944 = vmatpush.bf16.msrb.mxu0 %v6141_v41  ;;  %3913 = vmatmul.bf16.vlgmr.msra.gmra.mxu1 %v8088_v38 }
 0x28e   :  { %v7649_v35 = vld [vmem:[#allocation9 + $0xdf4] sm:$0xf0]  ;;  %3938 = vmatpush.bf16.msra.mxu3 %v5661_v59 }
 0x28f   :  { %v6908_v39 = vld [vmem:[#allocation9 + $0xfd8] sm:$0xf]  ;;  %v6653_v42 = vor.u32 %v7649_v35, %v6652_v34  ;;  %3957 = vmatpush.bf16.msrb.mxu1 %v6397_v48  ;;  %3926 = vmatmul.bf16.vlgmr.msra.gmra.mxu2 %v8080_v19 }
 0x290   :  { %v7713_v40 = vld [vmem:[#allocation9 + $0xff4] sm:$0xf0] }
 0x291   :  { %v6108_v53 = vld [vmem:[#allocation9 + $0x998] sm:$0xf]  ;;  %v6909_v44 = vor.u32 %v7713_v40, %v6908_v39  ;;  %3970 = vmatpush.bf16.msrb.mxu2 %v6653_v42  ;;  %3939 = vmatmul.bf16.vlgmr.msra.gmra.mxu3 %v8086_v33 }
 0x292   :  { %v7513_v52 = vld [vmem:[#allocation9 + $0x9b4] sm:$0xf0] }
 0x293   :  { %v6364_v43 = vld [vmem:[#allocation9 + $0xb98] sm:$0xf]  ;;  %v6109_v58 = vor.u32 %v7513_v52, %v6108_v53  ;;  %3983 = vmatpush.bf16.msrb.mxu3 %v6909_v44 }
 0x294   :  { %v7577_v45 = vld [vmem:[#allocation9 + $0xbb4] sm:$0xf0] }
 0x295   :  { %v6620_v46 = vld [vmem:[#allocation9 + $0xd98] sm:$0xf]  ;;  %v6365_v62 = vor.u32 %v7577_v45, %v6364_v43  ;;  %3945 = vmatpush.bf16.msrb.mxu0 %v6109_v58  ;;  %v3719_v43 = vpop.f32.mrf.mxu2 }
 0x296   :  { %v7641_v47 = vld [vmem:[#allocation9 + $0xdb4] sm:$0xf0] }
 0x297   :  { %v6876_v28 = vld [vmem:[#allocation9 + $0xf98] sm:$0xf]  ;;  %v6621_v63 = vor.u32 %v7641_v47, %v6620_v46  ;;  %3958 = vmatpush.bf16.msrb.mxu1 %v6365_v62 }
 0x298   :  { %v7705_v56 = vld [vmem:[#allocation9 + $0xfb4] sm:$0xf0] }
 0x299   :  { %v6076_v0 = vld [vmem:[#allocation9 + $0x958] sm:$0xf]  ;;  %v6877_v3 = vor.u32 %v7705_v56, %v6876_v28  ;;  %3971 = vmatpush.bf16.msrb.mxu2 %v6621_v63  ;;  %v3720_v28 = vadd.f32 %v3719_v43, %v3707_v37  ;;  %v3732_v56 = vpop.f32.mrf.mxu3  ;;  %v7389_v37 = vld [vmem:[#allocation9 + $0x5dc] sm:$0xf] }
 0x29a   :  { %v7505_v1 = vld [vmem:[#allocation9 + $0x974] sm:$0xf0] }
 0x29b   :  { %v6332_v2 = vld [vmem:[#allocation9 + $0xb58] sm:$0xf]  ;;  %v6077_v9 = vor.u32 %v7505_v1, %v6076_v0  ;;  %3984 = vmatpush.bf16.msrb.mxu3 %v6877_v3  ;;  %v8173_v0 = vadd.f32 %v3732_v56, %v3720_v28  ;;  %v3695_v1 = vpop.f32.mrf.mxu0  ;;  %v5342_v28 = vld [vmem:[#allocation9 + $0x3b8] sm:$0xf0] }
 0x29c   :  { %v7569_v4 = vld [vmem:[#allocation9 + $0xb74] sm:$0xf0]  ;;  %v7381_v56 = vld [vmem:[#allocation9 + $0x59c] sm:$0xf] }
 0x29d   :  { %v6588_v5 = vld [vmem:[#allocation9 + $0xd58] sm:$0xf]  ;;  %v6333_v10 = vor.u32 %v7569_v4, %v6332_v2  ;;  %3946 = vmatpush.bf16.msrb.mxu0 %v6077_v9  ;;  %v3721_v23 = vpop.f32.mrf.mxu2 }
 0x29e   :  { %v7633_v6 = vld [vmem:[#allocation9 + $0xd74] sm:$0xf0]  ;;  %v5534_v23 = vld [vmem:[#allocation9 + $0x538] sm:$0xf0] }
 0x29f   :  { %v6844_v7 = vld [vmem:[#allocation9 + $0xf58] sm:$0xf]  ;;  %v6589_v11 = vor.u32 %v7633_v6, %v6588_v5  ;;  %3959 = vmatpush.bf16.msrb.mxu1 %v6333_v10 }
 0x2a0   :  { %v7697_v8 = vld [vmem:[#allocation9 + $0xf74] sm:$0xf0] }
 0x2a1   :  { %v6044_v12 = vld [vmem:[#allocation9 + $0x918] sm:$0xf]  ;;  %v6845_v15 = vor.u32 %v7697_v8, %v6844_v7  ;;  %3972 = vmatpush.bf16.msrb.mxu2 %v6589_v11  ;;  %v3708_v7 = vpop.f32.mrf.mxu1 }
 0x2a2   :  { %v7497_v13 = vld [vmem:[#allocation9 + $0x934] sm:$0xf0] }
 0x2a3   :  { %v6300_v14 = vld [vmem:[#allocation9 + $0xb18] sm:$0xf]  ;;  %v6045_v22 = vor.u32 %v7497_v13, %v6044_v12  ;;  %3985 = vmatpush.bf16.msrb.mxu3 %v6845_v15 }
 0x2a4   :  { %v7561_v16 = vld [vmem:[#allocation9 + $0xb34] sm:$0xf0] }
 0x2a5   :  { %v6556_v17 = vld [vmem:[#allocation9 + $0xd18] sm:$0xf]  ;;  %v6301_v24 = vor.u32 %v7561_v16, %v6300_v14  ;;  %3947 = vmatpush.bf16.msrb.mxu0 %v6045_v22 }
 0x2a6   :  { %v7625_v18 = vld [vmem:[#allocation9 + $0xd34] sm:$0xf0] }
 0x2a7   :  { %v6812_v20 = vld [vmem:[#allocation9 + $0xf18] sm:$0xf]  ;;  %v6557_v25 = vor.u32 %v7625_v18, %v6556_v17  ;;  %3960 = vmatpush.bf16.msrb.mxu1 %v6301_v24 }
 0x2a8   :  { %v7689_v21 = vld [vmem:[#allocation9 + $0xf34] sm:$0xf0] }
 0x2a9   :  { %v6012_v26 = vld [vmem:[#allocation9 + $0x8d8] sm:$0xf]  ;;  %v6813_v31 = vor.u32 %v7689_v21, %v6812_v20  ;;  %3973 = vmatpush.bf16.msrb.mxu2 %v6557_v25 }
 0x2aa   :  { %v7489_v27 = vld [vmem:[#allocation9 + $0x8f4] sm:$0xf0] }
 0x2ab   :  { %v6268_v29 = vld [vmem:[#allocation9 + $0xad8] sm:$0xf]  ;;  %v6013_v59 = vor.u32 %v7489_v27, %v6012_v26  ;;  %3986 = vmatpush.bf16.msrb.mxu3 %v6813_v31  ;;  %v5118_v31 = vld [vmem:[#allocation9 + $0x1f8] sm:$0xf0] }
 0x2ac   :  { %v7553_v34 = vld [vmem:[#allocation9 + $0xaf4] sm:$0xf0] }
 0x2ad   :  { %v6524_v35 = vld [vmem:[#allocation9 + $0xcd8] sm:$0xf]  ;;  %v6269_v41 = vor.u32 %v7553_v34, %v6268_v29  ;;  %3948 = vmatpush.bf16.msrb.mxu0 %v6013_v59  ;;  %v3734_v29 = vpop.f32.mrf.mxu3  ;;  %v7325_v34 = vld [vmem:[#allocation9 + $0x3dc] sm:$0xf] }
 0x2ae   :  { %v7617_v36 = vld [vmem:[#allocation9 + $0xcf4] sm:$0xf0] }
 0x2af   :  { %v6780_v39 = vld [vmem:[#allocation9 + $0xed8] sm:$0xf]  ;;  %v6525_v48 = vor.u32 %v7617_v36, %v6524_v35  ;;  %3961 = vmatpush.bf16.msrb.mxu1 %v6269_v41  ;;  %v5374_v36 = vld [vmem:[#allocation9 + $0x3f8] sm:$0xf0] }
 0x2b0   :  { %v7681_v40 = vld [vmem:[#allocation9 + $0xef4] sm:$0xf0]  ;;  %v7453_v41 = vld [vmem:[#allocation9 + $0x7dc] sm:$0xf] }
 0x2b1   :  { %v5980_v42 = vld [vmem:[#allocation9 + $0x898] sm:$0xf]  ;;  %v6781_v44 = vor.u32 %v7681_v40, %v6780_v39  ;;  %3974 = vmatpush.bf16.msrb.mxu2 %v6525_v48  ;;  %v5630_v39 = vld [vmem:[#allocation9 + $0x5f8] sm:$0xf0] }
 0x2b2   :  { %v7481_v53 = vld [vmem:[#allocation9 + $0x8b4] sm:$0xf0]  ;;  %v5886_v48 = vld [vmem:[#allocation9 + $0x7f8] sm:$0xf0]  ;;  %v5633_v43 = vor.u32 %v7389_v37, %v5630_v39  ;;  %v3758_v37 = vpop.f32.mrf.mxu1 }
 0x2b3   :  { %v6236_v52 = vld [vmem:[#allocation9 + $0xa98] sm:$0xf]  ;;  %v5981_v63 = vor.u32 %v7481_v53, %v5980_v42  ;;  %3987 = vmatpush.bf16.msrb.mxu3 %v6781_v44  ;;  %v5121_v53 = vor.u32 %v7261_v30, %v5118_v31  ;;  %v7253_v44 = vld [vmem:[#allocation9 + $0x19c] sm:$0xf] }
 0x2b4   :  { %v7545_v45 = vld [vmem:[#allocation9 + $0xab4] sm:$0xf0]  ;;  %v7229_v31 = vld [vmem:[#allocation9 + $0xdc] sm:$0xf] }
 0x2b5   :  { %v6492_v46 = vld [vmem:[#allocation9 + $0xc98] sm:$0xf]  ;;  %v6237_v2 = vor.u32 %v7545_v45, %v6236_v52  ;;  %3949 = vmatpush.bf16.msrb.mxu0 %v5981_v63  ;;  %v5377_v52 = vor.u32 %v7325_v34, %v5374_v36  ;;  %v5086_v45 = vld [vmem:[#allocation9 + $0x1b8] sm:$0xf0] }
 0x2b6   :  { %v7609_v47 = vld [vmem:[#allocation9 + $0xcb4] sm:$0xf0]  ;;  %v5854_v63 = vld [vmem:[#allocation9 + $0x7b8] sm:$0xf0]  ;;  %v5089_v1 = vor.u32 %v7253_v44, %v5086_v45 }
 0x2b7   :  { %v6748_v58 = vld [vmem:[#allocation9 + $0xe98] sm:$0xf]  ;;  %v6493_v3 = vor.u32 %v7609_v47, %v6492_v46  ;;  %3962 = vmatpush.bf16.msrb.mxu1 %v6237_v2  ;;  %v7317_v46 = vld [vmem:[#allocation9 + $0x39c] sm:$0xf]  ;;  %v5889_v47 = vor.u32 %v7453_v41, %v5886_v48 }
 0x2b8   :  { %v7673_v62 = vld [vmem:[#allocation9 + $0xeb4] sm:$0xf0]  ;;  %v5345_v2 = vor.u32 %v7317_v46, %v5342_v28  ;;  %v4990_v34 = vld [vmem:[#allocation9 + $0xf8] sm:$0xf0]  ;;  %v3771_v28 = vpop.f32.mrf.mxu2 }
 0x2b9   :  { %v5948_v4 = vld [vmem:[#allocation9 + $0x858] sm:$0xf]  ;;  %v6749_v8 = vor.u32 %v7673_v62, %v6748_v58  ;;  %3975 = vmatpush.bf16.msrb.mxu2 %v6493_v3  ;;  %v5598_v58 = vld [vmem:[#allocation9 + $0x5b8] sm:$0xf0] }
 0x2ba   :  { %v7473_v5 = vld [vmem:[#allocation9 + $0x874] sm:$0xf0]  ;;  %v7445_v62 = vld [vmem:[#allocation9 + $0x79c] sm:$0xf]  ;;  %v5601_v3 = vor.u32 %v7381_v56, %v5598_v58 }
 0x2bb   :  { %v6204_v6 = vld [vmem:[#allocation9 + $0xa58] sm:$0xf]  ;;  %v5949_v14 = vor.u32 %v7473_v5, %v5948_v4  ;;  %3988 = vmatpush.bf16.msrb.mxu3 %v6749_v8  ;;  %v7245_v4 = vld [vmem:[#allocation9 + $0x15c] sm:$0xf]  ;;  %v5857_v7 = vor.u32 %v7445_v62, %v5854_v63 }
 0x2bc   :  { %v7537_v9 = vld [vmem:[#allocation9 + $0xa74] sm:$0xf0]  ;;  %v5054_v5 = vld [vmem:[#allocation9 + $0x178] sm:$0xf0] }
 0x2bd   :  { %v6460_v10 = vld [vmem:[#allocation9 + $0xc58] sm:$0xf]  ;;  %v6205_v17 = vor.u32 %v7537_v9, %v6204_v6  ;;  %3950 = vmatpush.bf16.msrb.mxu0 %v5949_v14  ;;  %v7309_v6 = vld [vmem:[#allocation9 + $0x35c] sm:$0xf] }
 0x2be   :  { %v7601_v11 = vld [vmem:[#allocation9 + $0xc74] sm:$0xf0]  ;;  %v5310_v8 = vld [vmem:[#allocation9 + $0x378] sm:$0xf0] }
 0x2bf   :  { %v6716_v12 = vld [vmem:[#allocation9 + $0xe58] sm:$0xf]  ;;  %v6461_v18 = vor.u32 %v7601_v11, %v6460_v10  ;;  %3963 = vmatpush.bf16.msrb.mxu1 %v6205_v17  ;;  %v7373_v9 = vld [vmem:[#allocation9 + $0x55c] sm:$0xf]  ;;  %v5313_v14 = vor.u32 %v7309_v6, %v5310_v8 }
 0x2c0   :  { %v7665_v13 = vld [vmem:[#allocation9 + $0xe74] sm:$0xf0]  ;;  %v5566_v10 = vld [vmem:[#allocation9 + $0x578] sm:$0xf0] }
 0x2c1   :  { %v5916_v15 = vld [vmem:[#allocation9 + $0x818] sm:$0xf]  ;;  %v6717_v24 = vor.u32 %v7665_v13, %v6716_v12  ;;  %3976 = vmatpush.bf16.msrb.mxu2 %v6461_v18  ;;  %v7437_v11 = vld [vmem:[#allocation9 + $0x75c] sm:$0xf]  ;;  %v5057_v13 = vor.u32 %v7245_v4, %v5054_v5 }
 0x2c2   :  { %v7465_v16 = vld [vmem:[#allocation9 + $0x834] sm:$0xf0]  ;;  %v5822_v12 = vld [vmem:[#allocation9 + $0x778] sm:$0xf0] }
 0x2c3   :  { %v6172_v20 = vld [vmem:[#allocation9 + $0xa18] sm:$0xf]  ;;  %v5917_v35 = vor.u32 %v7465_v16, %v5916_v15  ;;  %3989 = vmatpush.bf16.msrb.mxu3 %v6717_v24  ;;  %v5569_v15 = vor.u32 %v7373_v9, %v5566_v10  ;;  %v7237_v16 = vld [vmem:[#allocation9 + $0x11c] sm:$0xf] }
 0x2c4   :  { %v7529_v21 = vld [vmem:[#allocation9 + $0xa34] sm:$0xf0]  ;;  %v5022_v17 = vld [vmem:[#allocation9 + $0x138] sm:$0xf0] }
 0x2c5   :  { %v6428_v22 = vld [vmem:[#allocation9 + $0xc18] sm:$0xf]  ;;  %v6173_v40 = vor.u32 %v7529_v21, %v6172_v20  ;;  %3951 = vmatpush.bf16.msrb.mxu0 %v5917_v35  ;;  %v7301_v18 = vld [vmem:[#allocation9 + $0x31c] sm:$0xf]  ;;  %v5825_v20 = vor.u32 %v7437_v11, %v5822_v12  ;;  %v3760_v12 = vpop.f32.mrf.mxu1 }
 0x2c6   :  { %v7593_v25 = vld [vmem:[#allocation9 + $0xc34] sm:$0xf0]  ;;  %v5278_v21 = vld [vmem:[#allocation9 + $0x338] sm:$0xf0] }
 0x2c7   :  { %v6684_v26 = vld [vmem:[#allocation9 + $0xe18] sm:$0xf]  ;;  %v6429_v59 = vor.u32 %v7593_v25, %v6428_v22  ;;  %3964 = vmatpush.bf16.msrb.mxu1 %v6173_v40  ;;  %v7365_v22 = vld [vmem:[#allocation9 + $0x51c] sm:$0xf]  ;;  %v5281_v29 = vor.u32 %v7301_v18, %v5278_v21 }
 0x2c8   :  { %v7657_v27 = vld [vmem:[#allocation9 + $0xe34] sm:$0xf0]  ;;  %3952 = vmatmul.bf16.vlgmr.msrb.gmra.mxu0 %v8099_v54  ;;  %v7429_v24 = vld [vmem:[#allocation9 + $0x71c] sm:$0xf]  ;;  %v5537_v30 = vor.u32 %v7365_v22, %v5534_v23 }
 0x2c9   :  { %v6685_v42 = vor.u32 %v7657_v27, %v6684_v26  ;;  %3977 = vmatpush.bf16.msrb.mxu2 %v6429_v59  ;;  %3996 = vmatpush.bf16.msra.mxu0 %v5121_v53  ;;  %v5790_v25 = vld [vmem:[#allocation9 + $0x738] sm:$0xf0]  ;;  %v5025_v26 = vor.u32 %v7237_v16, %v5022_v17  ;;  %v3745_v27 = vpop.f32.mrf.mxu0 }
 0x2ca   :  { %3965 = vmatmul.bf16.vlgmr.msrb.gmra.mxu1 %v8103_v57  ;;  %v7293_v35 = vld [vmem:[#allocation9 + $0x2dc] sm:$0xf]  ;;  %v3746_v36 = vadd.f32 %v3745_v27, %v8173_v0  ;;  %v5793_v39 = vor.u32 %v7429_v24, %v5790_v25 }
 0x2cb   :  { %3990 = vmatpush.bf16.msrb.mxu3 %v6685_v42  ;;  %4009 = vmatpush.bf16.msra.mxu1 %v5377_v52  ;;  %v5246_v40 = vld [vmem:[#allocation9 + $0x2f8] sm:$0xf0]  ;;  %v4993_v52 = vor.u32 %v7229_v31, %v4990_v34 }
 0x2cc   :  { %3978 = vmatmul.bf16.vlgmr.msrb.gmra.mxu2 %v8097_v51  ;;  %v7357_v59 = vld [vmem:[#allocation9 + $0x4dc] sm:$0xf]  ;;  %v3759_v53 = vadd.f32 %v3758_v37, %v3746_v36 }
 0x2cd   :  { %4022 = vmatpush.bf16.msra.mxu2 %v5633_v43  ;;  %3997 = vmatpush.bf16.msra.mxu0 %v5089_v1  ;;  %v5502_v41 = vld [vmem:[#allocation9 + $0x4f8] sm:$0xf0]  ;;  %v5249_v43 = vor.u32 %v7293_v35, %v5246_v40  ;;  %v3784_v1 = vpop.f32.mrf.mxu3 }
 0x2ce   :  { %3991 = vmatmul.bf16.vlgmr.msrb.gmra.mxu3 %v8101_v55  ;;  %v7421_v48 = vld [vmem:[#allocation9 + $0x6dc] sm:$0xf]  ;;  %v5505_v44 = vor.u32 %v7357_v59, %v5502_v41  ;;  %v3772_v63 = vadd.f32 %v3771_v28, %v3759_v53 }
 0x2cf   :  { %4035 = vmatpush.bf16.msra.mxu3 %v5889_v47  ;;  %4010 = vmatpush.bf16.msra.mxu1 %v5345_v2  ;;  %v5758_v42 = vld [vmem:[#allocation9 + $0x6f8] sm:$0xf0] }
 0x2d0   :  { %v7221_v45 = vld [vmem:[#allocation9 + $0x9c] sm:$0xf]  ;;  %v5761_v0 = vor.u32 %v7421_v48, %v5758_v42  ;;  %v8180_v5 = vadd.f32 %v3784_v1, %v3772_v63 }
 0x2d1   :  { %4023 = vmatpush.bf16.msra.mxu2 %v5601_v3  ;;  %3998 = vmatpush.bf16.msra.mxu0 %v5057_v13  ;;  %v4958_v46 = vld [vmem:[#allocation9 + $0xb8] sm:$0xf0]  ;;  %v3747_v6 = vpop.f32.mrf.mxu0 }
 0x2d2   :  { %v7285_v47 = vld [vmem:[#allocation9 + $0x29c] sm:$0xf]  ;;  %v4961_v4 = vor.u32 %v7221_v45, %v4958_v46 }
 0x2d3   :  { %4036 = vmatpush.bf16.msra.mxu3 %v5857_v7  ;;  %4011 = vmatpush.bf16.msra.mxu1 %v5313_v14  ;;  %v5214_v56 = vld [vmem:[#allocation9 + $0x2b8] sm:$0xf0] }
 0x2d4   :  { %v7349_v58 = vld [vmem:[#allocation9 + $0x49c] sm:$0xf]  ;;  %v5217_v7 = vor.u32 %v7285_v47, %v5214_v56 }
 0x2d5   :  { %4024 = vmatpush.bf16.msra.mxu2 %v5569_v15  ;;  %3999 = vmatpush.bf16.msra.mxu0 %v5025_v26  ;;  %v5470_v62 = vld [vmem:[#allocation9 + $0x4b8] sm:$0xf0]  ;;  %v3786_v36 = vpop.f32.mrf.mxu3 }
 0x2d6   :  { %v7413_v2 = vld [vmem:[#allocation9 + $0x69c] sm:$0xf]  ;;  %v5473_v8 = vor.u32 %v7349_v58, %v5470_v62 }
 0x2d7   :  { %4037 = vmatpush.bf16.msra.mxu3 %v5825_v20  ;;  %4012 = vmatpush.bf16.msra.mxu1 %v5281_v29  ;;  %v5726_v3 = vld [vmem:[#allocation9 + $0x6b8] sm:$0xf0]  ;;  %v3773_v29 = vpop.f32.mrf.mxu2 }
 0x2d8   :  { %v7213_v9 = vld [vmem:[#allocation9 + $0x5c] sm:$0xf]  ;;  %v5729_v13 = vor.u32 %v7413_v2, %v5726_v3 }
 0x2d9   :  { %4025 = vmatpush.bf16.msra.mxu2 %v5537_v30  ;;  %4000 = vmatpush.bf16.msra.mxu0 %v4993_v52  ;;  %v4926_v10 = vld [vmem:[#allocation9 + $0x78] sm:$0xf0] }
 0x2da   :  { %v7277_v11 = vld [vmem:[#allocation9 + $0x25c] sm:$0xf]  ;;  %v4929_v20 = vor.u32 %v7213_v9, %v4926_v10 }
 0x2db   :  { %4038 = vmatpush.bf16.msra.mxu3 %v5793_v39  ;;  %4013 = vmatpush.bf16.msra.mxu1 %v5249_v43  ;;  %v5182_v14 = vld [vmem:[#allocation9 + $0x278] sm:$0xf0] }
 0x2dc   :  { %v7341_v15 = vld [vmem:[#allocation9 + $0x45c] sm:$0xf]  ;;  %v5185_v23 = vor.u32 %v7277_v11, %v5182_v14 }
 0x2dd   :  { %4026 = vmatpush.bf16.msra.mxu2 %v5505_v44  ;;  %v5438_v16 = vld [vmem:[#allocation9 + $0x478] sm:$0xf0]  ;;  %4001 = vmatpush.bf16.msra.mxu0 %v4961_v4 }
 0x2de   :  { %v7405_v17 = vld [vmem:[#allocation9 + $0x65c] sm:$0xf]  ;;  %v5441_v24 = vor.u32 %v7341_v15, %v5438_v16 }
 0x2df   :  { %4039 = vmatpush.bf16.msra.mxu3 %v5761_v0  ;;  %v5694_v18 = vld [vmem:[#allocation9 + $0x678] sm:$0xf0]  ;;  %4014 = vmatpush.bf16.msra.mxu1 %v5217_v7 }
 0x2e0   :  { %v7205_v21 = vld [vmem:[#allocation9 + $0x1c] sm:$0xf]  ;;  %v5697_v30 = vor.u32 %v7405_v17, %v5694_v18 }
 0x2e1   :  { %v4894_v22 = vld [vmem:[#allocation9 + $0x38] sm:$0xf0]  ;;  %4027 = vmatpush.bf16.msra.mxu2 %v5473_v8  ;;  %4002 = vmatpush.bf16.msra.mxu0 %v4929_v20 }
 0x2e2   :  { %v7269_v25 = vld [vmem:[#allocation9 + $0x21c] sm:$0xf]  ;;  %v4897_v59 = vor.u32 %v7205_v21, %v4894_v22 }
 0x2e3   :  { %v5150_v26 = vld [vmem:[#allocation9 + $0x238] sm:$0xf0]  ;;  %4040 = vmatpush.bf16.msra.mxu3 %v5729_v13  ;;  %4015 = vmatpush.bf16.msra.mxu1 %v5185_v23 }
 0x2e4   :  { %v7333_v27 = vld [vmem:[#allocation9 + $0x41c] sm:$0xf]  ;;  %v5153_v53 = vor.u32 %v7269_v25, %v5150_v26 }
 0x2e5   :  { %v5406_v31 = vld [vmem:[#allocation9 + $0x438] sm:$0xf0]  ;;  %4028 = vmatpush.bf16.msra.mxu2 %v5441_v24  ;;  %4003 = vmatpush.bf16.msra.mxu0 %v4897_v59 }
 0x2e6   :  { %v7397_v34 = vld [vmem:[#allocation9 + $0x61c] sm:$0xf]  ;;  %v5409_v52 = vor.u32 %v7333_v27, %v5406_v31 }
 0x2e7   :  { %v5662_v35 = vld [vmem:[#allocation9 + $0x638] sm:$0xf0]  ;;  %4041 = vmatpush.bf16.msra.mxu3 %v5697_v30  ;;  %4016 = vmatpush.bf16.msra.mxu1 %v5153_v53  ;;  %v3797_v30 = vpop.f32.mrf.mxu0 }
 0x2e8   :  { %v7517_v37 = vld [vmem:[#allocation9 + $0x9dc] sm:$0xf]  ;;  %v5665_v45 = vor.u32 %v7397_v34, %v5662_v35  ;;  %4004 = vmatmul.bf16.vlgmr.msra.gmra.mxu0 %v8084_v32 }
 0x2e9   :  { %v6142_v39 = vld [vmem:[#allocation9 + $0x9f8] sm:$0xf0]  ;;  %4029 = vmatpush.bf16.msra.mxu2 %v5409_v52 }
 0x2ea   :  { %v7581_v40 = vld [vmem:[#allocation9 + $0xbdc] sm:$0xf]  ;;  %v6145_v46 = vor.u32 %v7517_v37, %v6142_v39  ;;  %4017 = vmatmul.bf16.vlgmr.msra.gmra.mxu1 %v8088_v38  ;;  %v3810_v37 = vpop.f32.mrf.mxu1 }
 0x2eb   :  { %v6398_v41 = vld [vmem:[#allocation9 + $0xbf8] sm:$0xf0]  ;;  %4042 = vmatpush.bf16.msra.mxu3 %v5665_v45 }
 0x2ec   :  { %v7645_v48 = vld [vmem:[#allocation9 + $0xddc] sm:$0xf]  ;;  %v6401_v47 = vor.u32 %v7581_v40, %v6398_v41  ;;  %4048 = vmatpush.bf16.msrb.mxu0 %v6145_v46  ;;  %4030 = vmatmul.bf16.vlgmr.msra.gmra.mxu2 %v8080_v19 }
 0x2ed   :  { %v6654_v42 = vld [vmem:[#allocation9 + $0xdf8] sm:$0xf0] }
 0x2ee   :  { %v7709_v43 = vld [vmem:[#allocation9 + $0xfdc] sm:$0xf]  ;;  %v6657_v28 = vor.u32 %v7645_v48, %v6654_v42  ;;  %4061 = vmatpush.bf16.msrb.mxu1 %v6401_v47  ;;  %4043 = vmatmul.bf16.vlgmr.msra.gmra.mxu3 %v8086_v33  ;;  %v3811_v48 = vadd.f32 %v3810_v37, %v3797_v30 }
 0x2ef   :  { %v6910_v44 = vld [vmem:[#allocation9 + $0xff8] sm:$0xf0] }
 0x2f0   :  { %v7509_v0 = vld [vmem:[#allocation9 + $0x99c] sm:$0xf]  ;;  %v6913_v62 = vor.u32 %v7709_v43, %v6910_v44  ;;  %4074 = vmatpush.bf16.msrb.mxu2 %v6657_v28  ;;  %v3823_v28 = vpop.f32.mrf.mxu2 }
 0x2f1   :  { %v6110_v56 = vld [vmem:[#allocation9 + $0x9b8] sm:$0xf0] }
 0x2f2   :  { %v7573_v58 = vld [vmem:[#allocation9 + $0xb9c] sm:$0xf]  ;;  %v6113_v6 = vor.u32 %v7509_v0, %v6110_v56  ;;  %4087 = vmatpush.bf16.msrb.mxu3 %v6913_v62 }
 0x2f3   :  { %v6366_v63 = vld [vmem:[#allocation9 + $0xbb8] sm:$0xf0] }
 0x2f4   :  { %v7637_v1 = vld [vmem:[#allocation9 + $0xd9c] sm:$0xf]  ;;  %v6369_v7 = vor.u32 %v7573_v58, %v6366_v63  ;;  %4049 = vmatpush.bf16.msrb.mxu0 %v6113_v6  ;;  %v3824_v63 = vadd.f32 %v3823_v28, %v3811_v48  ;;  %v7720_v48 = vld [vmem:[#allocation10 + $0x30] sm:$0xff] }
 0x2f5   :  { %v6622_v2 = vld [vmem:[#allocation9 + $0xdb8] sm:$0xf0] }
 0x2f6   :  { %v7701_v3 = vld [vmem:[#allocation9 + $0xf9c] sm:$0xf]  ;;  %v6625_v8 = vor.u32 %v7637_v1, %v6622_v2  ;;  %4062 = vmatpush.bf16.msrb.mxu1 %v6369_v7  ;;  %v3836_v1 = vpop.f32.mrf.mxu3  ;;  %v3799_v7 = vpop.f32.mrf.mxu0 }
 0x2f7   :  { %v6878_v4 = vld [vmem:[#allocation9 + $0xfb8] sm:$0xf0]  ;;  %v8186_v6 = vadd.f32 %v3836_v1, %v3824_v63  ;;  %v7732_v7 = vld [vmem:[#allocation10 + $0x90] sm:$0xff] }
 0x2f8   :  { %v7501_v9 = vld [vmem:[#allocation9 + $0x95c] sm:$0xf]  ;;  %v6881_v12 = vor.u32 %v7701_v3, %v6878_v4  ;;  %4075 = vmatpush.bf16.msrb.mxu2 %v6625_v8 }
 0x2f9   :  { %v6078_v10 = vld [vmem:[#allocation9 + $0x978] sm:$0xf0] }
 0x2fa   :  { %v7565_v11 = vld [vmem:[#allocation9 + $0xb5c] sm:$0xf]  ;;  %v6081_v18 = vor.u32 %v7501_v9, %v6078_v10  ;;  %4088 = vmatpush.bf16.msrb.mxu3 %v6881_v12 }
 0x2fb   :  { %v6334_v13 = vld [vmem:[#allocation9 + $0xb78] sm:$0xf0] }
 0x2fc   :  { %v7629_v14 = vld [vmem:[#allocation9 + $0xd5c] sm:$0xf]  ;;  %v6337_v20 = vor.u32 %v7565_v11, %v6334_v13  ;;  %4050 = vmatpush.bf16.msrb.mxu0 %v6081_v18  ;;  %v3812_v13 = vpop.f32.mrf.mxu1 }
 0x2fd   :  { %v6590_v15 = vld [vmem:[#allocation9 + $0xd78] sm:$0xf0] }
 0x2fe   :  { %v7693_v16 = vld [vmem:[#allocation9 + $0xf5c] sm:$0xf]  ;;  %v6593_v21 = vor.u32 %v7629_v14, %v6590_v15  ;;  %4063 = vmatpush.bf16.msrb.mxu1 %v6337_v20  ;;  %v3838_v30 = vpop.f32.mrf.mxu3  ;;  %v8192_v28 = vpop.f32.mrf.mxu0 }
 0x2ff   :  { %v6846_v17 = vld [vmem:[#allocation9 + $0xf78] sm:$0xf0] }
 0x300   :  { %v7493_v22 = vld [vmem:[#allocation9 + $0x91c] sm:$0xf]  ;;  %v6849_v24 = vor.u32 %v7693_v16, %v6846_v17  ;;  %4076 = vmatpush.bf16.msrb.mxu2 %v6593_v21 }
 0x301   :  { %v6046_v23 = vld [vmem:[#allocation9 + $0x938] sm:$0xf0] }
 0x302   :  { %v7557_v19 = vld [vmem:[#allocation9 + $0xb1c] sm:$0xf]  ;;  %v6049_v33 = vor.u32 %v7493_v22, %v6046_v23  ;;  %4089 = vmatpush.bf16.msrb.mxu3 %v6849_v24 }
 0x303   :  { %v6302_v25 = vld [vmem:[#allocation9 + $0xb38] sm:$0xf0] }
 0x304   :  { %v7621_v26 = vld [vmem:[#allocation9 + $0xd1c] sm:$0xf]  ;;  %v6305_v38 = vor.u32 %v7557_v19, %v6302_v25  ;;  %4051 = vmatpush.bf16.msrb.mxu0 %v6049_v33 }
 0x305   :  { %v6558_v27 = vld [vmem:[#allocation9 + $0xd38] sm:$0xf0] }
 0x306   :  { %v7685_v29 = vld [vmem:[#allocation9 + $0xf1c] sm:$0xf]  ;;  %v6561_v31 = vor.u32 %v7621_v26, %v6558_v27  ;;  %4064 = vmatpush.bf16.msrb.mxu1 %v6305_v38  ;;  %v3825_v26 = vpop.f32.mrf.mxu2  ;;  %v8198_v1 = vpop.f32.mrf.mxu3 }
 0x307   :  { %v6814_v32 = vld [vmem:[#allocation9 + $0xf38] sm:$0xf0]  ;;  %v7752_v26 = vld [vmem:[#allocation10 + $0x130] sm:$0xff] }
 0x308   :  { %v7485_v34 = vld [vmem:[#allocation9 + $0x8dc] sm:$0xf]  ;;  %v6817_v39 = vor.u32 %v7685_v29, %v6814_v32  ;;  %4077 = vmatpush.bf16.msrb.mxu2 %v6561_v31 }
 0x309   :  { %v6014_v35 = vld [vmem:[#allocation9 + $0x8f8] sm:$0xf0] }
 0x30a   :  { %v7549_v36 = vld [vmem:[#allocation9 + $0xadc] sm:$0xf]  ;;  %v6017_v52 = vor.u32 %v7485_v34, %v6014_v35  ;;  %4090 = vmatpush.bf16.msrb.mxu3 %v6817_v39 }
 0x30b   :  { %v6270_v40 = vld [vmem:[#allocation9 + $0xaf8] sm:$0xf0] }
 0x30c   :  { %v7613_v59 = vld [vmem:[#allocation9 + $0xcdc] sm:$0xf]  ;;  %v6273_v43 = vor.u32 %v7549_v36, %v6270_v40  ;;  %4052 = vmatpush.bf16.msrb.mxu0 %v6017_v52  ;;  %v7744_v52 = vld [vmem:[#allocation10 + $0xf0] sm:$0xff] }
 0x30d   :  { %v6526_v41 = vld [vmem:[#allocation9 + $0xcf8] sm:$0xf0] }
 0x30e   :  { %v7677_v42 = vld [vmem:[#allocation9 + $0xedc] sm:$0xf]  ;;  %v6529_v44 = vor.u32 %v7613_v59, %v6526_v41  ;;  %4065 = vmatpush.bf16.msrb.mxu1 %v6273_v43  ;;  %v7719_v43 = vld [vmem:[#allocation10 + $0x28] sm:$0xff] }
 0x30f   :  { %v6782_v53 = vld [vmem:[#allocation9 + $0xef8] sm:$0xf0] }
 0x310   :  { %v7477_v45 = vld [vmem:[#allocation9 + $0x89c] sm:$0xf]  ;;  %v6785_v0 = vor.u32 %v7677_v42, %v6782_v53  ;;  %4078 = vmatpush.bf16.msrb.mxu2 %v6529_v44  ;;  %v7728_v42 = vld [vmem:[#allocation10 + $0x70] sm:$0xff]  ;;  %v7727_v44 = vld [vmem:[#allocation10 + $0x68] sm:$0xff] }
 0x311   :  { %v5982_v46 = vld [vmem:[#allocation9 + $0x8b8] sm:$0xf0]  ;;  %v7736_v53 = vld [vmem:[#allocation10 + $0xb0] sm:$0xff] }
 0x312   :  { %v7541_v47 = vld [vmem:[#allocation9 + $0xa9c] sm:$0xf]  ;;  %v5985_v4 = vor.u32 %v7477_v45, %v5982_v46  ;;  %4091 = vmatpush.bf16.msrb.mxu3 %v6785_v0  ;;  %v7735_v45 = vld [vmem:[#allocation10 + $0xa8] sm:$0xff]  ;;  %v8194_v0 = vpop.f32.mrf.mxu1 }
 0x313   :  { %v6238_v56 = vld [vmem:[#allocation9 + $0xab8] sm:$0xf0]  ;;  %v7743_v46 = vld [vmem:[#allocation10 + $0xe8] sm:$0xff] }
 0x314   :  { %v7605_v58 = vld [vmem:[#allocation9 + $0xc9c] sm:$0xf]  ;;  %v6241_v8 = vor.u32 %v7541_v47, %v6238_v56  ;;  %4053 = vmatpush.bf16.msrb.mxu0 %v5985_v4  ;;  %v7718_v47 = vld [vmem:[#allocation10 + $0x20] sm:$0xff]  ;;  %v7724_v4 = vld [vmem:[#allocation10 + $0x50] sm:$0xff] }
 0x315   :  { %v6494_v62 = vld [vmem:[#allocation9 + $0xcb8] sm:$0xf0] }
 0x316   :  { %v7669_v2 = vld [vmem:[#allocation9 + $0xe9c] sm:$0xf]  ;;  %v6497_v9 = vor.u32 %v7605_v58, %v6494_v62  ;;  %4066 = vmatpush.bf16.msrb.mxu1 %v6241_v8  ;;  %v8196_v62 = vpop.f32.mrf.mxu2 }
 0x317   :  { %v6750_v3 = vld [vmem:[#allocation9 + $0xeb8] sm:$0xf0] }
 0x318   :  { %v7469_v10 = vld [vmem:[#allocation9 + $0x85c] sm:$0xf]  ;;  %v6753_v14 = vor.u32 %v7669_v2, %v6750_v3  ;;  %4079 = vmatpush.bf16.msrb.mxu2 %v6497_v9  ;;  %v7716_v2 = vld [vmem:[#allocation10 + $0x10] sm:$0xff]  ;;  %v3851_v3 = vpop.f32.mrf.mxu0 }
 0x319   :  { %v5950_v11 = vld [vmem:[#allocation9 + $0x878] sm:$0xf0]  ;;  %v7740_v9 = vld [vmem:[#allocation10 + $0xd0] sm:$0xff] }
 0x31a   :  { %v7533_v12 = vld [vmem:[#allocation9 + $0xa5c] sm:$0xf]  ;;  %v5953_v21 = vor.u32 %v7469_v10, %v5950_v11  ;;  %4092 = vmatpush.bf16.msrb.mxu3 %v6753_v14  ;;  %v3864_v8 = vpop.f32.mrf.mxu1  ;;  %v7715_v10 = vld [vmem:[#allocation10 + $0x8] sm:$0xff] }
 0x31b   :  { %v6206_v15 = vld [vmem:[#allocation9 + $0xa78] sm:$0xf0]  ;;  %v7723_v11 = vld [vmem:[#allocation10 + $0x48] sm:$0xff] }
 0x31c   :  { %v7597_v16 = vld [vmem:[#allocation9 + $0xc5c] sm:$0xf]  ;;  %v6209_v22 = vor.u32 %v7533_v12, %v6206_v15  ;;  %4054 = vmatpush.bf16.msrb.mxu0 %v5953_v21  ;;  %v7731_v12 = vld [vmem:[#allocation10 + $0x88] sm:$0xff]  ;;  %v3890_v15 = vpop.f32.mrf.mxu3 }
 0x31d   :  { %v6462_v17 = vld [vmem:[#allocation9 + $0xc78] sm:$0xf0]  ;;  %v7739_v14 = vld [vmem:[#allocation10 + $0xc8] sm:$0xff] }
 0x31e   :  { %v7661_v18 = vld [vmem:[#allocation9 + $0xe5c] sm:$0xf]  ;;  %v6465_v23 = vor.u32 %v7597_v16, %v6462_v17  ;;  %4067 = vmatpush.bf16.msrb.mxu1 %v6209_v22  ;;  %v3877_v13 = vpop.f32.mrf.mxu2  ;;  %v7714_v16 = vld [vmem:[#allocation10] sm:$0xff] }
 0x31f   :  { %v6718_v20 = vld [vmem:[#allocation9 + $0xe78] sm:$0xf0]  ;;  %v7722_v17 = vld [vmem:[#allocation10 + $0x40] sm:$0xff] }
 0x320   :  { %v7461_v19 = vld [vmem:[#allocation9 + $0x81c] sm:$0xf]  ;;  %v6721_v27 = vor.u32 %v7661_v18, %v6718_v20  ;;  %4080 = vmatpush.bf16.msrb.mxu2 %v6465_v23  ;;  %v7730_v18 = vld [vmem:[#allocation10 + $0x80] sm:$0xff]  ;;  %v4128_v23 = vpack.c.bf16 %v8128_v61, %v8128_v61  ;;  %v7768_v61 = vld [vmem:[#allocation10 + $0x1b0] sm:$0xff]  ;;  %v3901_v30 = vpop.f32.mrf.mxu0 }
 0x321   :  { %v5918_v24 = vld [vmem:[#allocation9 + $0x838] sm:$0xf0]  ;;  %v7738_v20 = vld [vmem:[#allocation10 + $0xc0] sm:$0xff] }
 0x322   :  { %v7525_v25 = vld [vmem:[#allocation9 + $0xa1c] sm:$0xf]  ;;  %v5921_v34 = vor.u32 %v7461_v19, %v5918_v24  ;;  %4093 = vmatpush.bf16.msrb.mxu3 %v6721_v27  ;;  %v4129_v24 = vpack.c.bf16 %v8141_v50, %v8141_v50  ;;  %v4131_v27 = vpack.c.bf16 %v8167_v60, %v8167_v60  ;;  %v7759_v50 = vld [vmem:[#allocation10 + $0x168] sm:$0xff]  ;;  %v3914_v60 = vpop.f32.mrf.mxu1 }
 0x323   :  { %v6174_v29 = vld [vmem:[#allocation9 + $0xa38] sm:$0xf0] }
 0x324   :  { %v7589_v32 = vld [vmem:[#allocation9 + $0xc1c] sm:$0xf]  ;;  %v6177_v35 = vor.u32 %v7525_v25, %v6174_v29  ;;  %4055 = vmatpush.bf16.msrb.mxu0 %v5921_v34  ;;  %v4130_v25 = vpack.c.bf16 %v8154_v49, %v8154_v49  ;;  %v7760_v29 = vld [vmem:[#allocation10 + $0x170] sm:$0xff]  ;;  %v7767_v49 = vld [vmem:[#allocation10 + $0x1a8] sm:$0xff] }
 0x325   :  { %v6430_v33 = vld [vmem:[#allocation9 + $0xc38] sm:$0xf0] }
 0x326   :  { %v7653_v38 = vld [vmem:[#allocation9 + $0xe1c] sm:$0xf]  ;;  %v6433_v36 = vor.u32 %v7589_v32, %v6430_v33  ;;  %4068 = vmatpush.bf16.msrb.mxu1 %v6177_v35  ;;  %v7751_v32 = vld [vmem:[#allocation10 + $0x128] sm:$0xff]  ;;  %v7750_v33 = vld [vmem:[#allocation10 + $0x120] sm:$0xff] }
 0x327   :  { %v6686_v31 = vld [vmem:[#allocation9 + $0xe38] sm:$0xf0]  ;;  %4056 = vmatmul.bf16.vlgmr.msrb.gmra.mxu0 %v8099_v54  ;;  %v7726_v54 = vld [vmem:[#allocation10 + $0x60] sm:$0xff] }
 0x328   :  { %v6689_v37 = vor.u32 %v7653_v38, %v6686_v31  ;;  %v7721_v39 = vld [vmem:[#allocation10 + $0x38] sm:$0xff]  ;;  %4081 = vmatpush.bf16.msrb.mxu2 %v6433_v36  ;;  %v7758_v38 = vld [vmem:[#allocation10 + $0x160] sm:$0xff]  ;;  %v3927_v36 = vpop.f32.mrf.mxu2 }
 0x329   :  { %v7729_v40 = vld [vmem:[#allocation10 + $0x78] sm:$0xff]  ;;  %4648 = vmatpush.bf16.msra.mxu0 %v7721_v39  ;;  %4069 = vmatmul.bf16.vlgmr.msrb.gmra.mxu1 %v8103_v57  ;;  %v7734_v57 = vld [vmem:[#allocation10 + $0xa0] sm:$0xff]  ;;  %v3940_v39 = vpop.f32.mrf.mxu3 }
 0x32a   :  { %v7737_v59 = vld [vmem:[#allocation10 + $0xb8] sm:$0xff]  ;;  %4094 = vmatpush.bf16.msrb.mxu3 %v6689_v37  ;;  %4661 = vmatpush.bf16.msra.mxu1 %v7729_v40  ;;  %v7766_v31 = vld [vmem:[#allocation10 + $0x1a0] sm:$0xff]  ;;  %v3850_v37 = vadd.f32 %v8192_v28, %v8186_v6 }
 0x32b   :  { %v7745_v41 = vld [vmem:[#allocation10 + $0xf8] sm:$0xff]  ;;  %4082 = vmatmul.bf16.vlgmr.msrb.gmra.mxu2 %v8097_v51  ;;  %v7742_v51 = vld [vmem:[#allocation10 + $0xe0] sm:$0xff] }
 0x32c   :  { %4674 = vmatpush.bf16.msra.mxu2 %v7737_v59  ;;  %v7725_v56 = vld [vmem:[#allocation10 + $0x58] sm:$0xff]  ;;  %v7748_v59 = vld [vmem:[#allocation10 + $0x110] sm:$0xff]  ;;  %v7746_v28 = vld [vmem:[#allocation10 + $0x100] sm:$0xff] }
 0x32d   :  { %4095 = vmatmul.bf16.vlgmr.msrb.gmra.mxu3 %v8101_v55  ;;  %4649 = vmatpush.bf16.msra.mxu0 %v7720_v48  ;;  %v7717_v55 = vld [vmem:[#allocation10 + $0x18] sm:$0xff]  ;;  %v7756_v48 = vld [vmem:[#allocation10 + $0x150] sm:$0xff] }
 0x32e   :  { %4687 = vmatpush.bf16.msra.mxu3 %v7745_v41  ;;  %4662 = vmatpush.bf16.msra.mxu1 %v7728_v42  ;;  %v7733_v58 = vld [vmem:[#allocation10 + $0x98] sm:$0xff]  ;;  %v3903_v41 = vpop.f32.mrf.mxu0  ;;  %v3916_v42 = vpop.f32.mrf.mxu1 }
 0x32f   :  { %v7741_v63 = vld [vmem:[#allocation10 + $0xd8] sm:$0xff] }
 0x330   :  { %4675 = vmatpush.bf16.msra.mxu2 %v7736_v53  ;;  %v7753_v21 = vld [vmem:[#allocation10 + $0x138] sm:$0xff]  ;;  %v3863_v53 = vadd.f32 %v8194_v0, %v3850_v37  ;;  %v7762_v0 = vld [vmem:[#allocation10 + $0x180] sm:$0xff] }
 0x331   :  { %4650 = vmatpush.bf16.msra.mxu0 %v7719_v43  ;;  %v7761_v22 = vld [vmem:[#allocation10 + $0x178] sm:$0xff]  ;;  %v7747_v43 = vld [vmem:[#allocation10 + $0x108] sm:$0xff] }
 0x332   :  { %4688 = vmatpush.bf16.msra.mxu3 %v7744_v52  ;;  %4663 = vmatpush.bf16.msra.mxu1 %v7727_v44  ;;  %v7769_v19 = vld [vmem:[#allocation10 + $0x1b8] sm:$0xff]  ;;  %v7764_v52 = vld [vmem:[#allocation10 + $0x190] sm:$0xff]  ;;  %v7755_v44 = vld [vmem:[#allocation10 + $0x148] sm:$0xff]  ;;  %v3876_v6 = vadd.f32 %v8196_v62, %v3863_v53 }
 0x333   :  { %v7749_v34 = vld [vmem:[#allocation10 + $0x118] sm:$0xff] }
 0x334   :  { %4676 = vmatpush.bf16.msra.mxu2 %v7735_v45  ;;  %v7757_v35 = vld [vmem:[#allocation10 + $0x158] sm:$0xff]  ;;  %v3929_v45 = vpop.f32.mrf.mxu2 }
 0x335   :  { %4651 = vmatpush.bf16.msra.mxu0 %v7718_v47  ;;  %v7765_v40 = vld [vmem:[#allocation10 + $0x198] sm:$0xff]  ;;  %v7763_v47 = vld [vmem:[#allocation10 + $0x188] sm:$0xff] }
 0x336   :  { %4689 = vmatpush.bf16.msra.mxu3 %v7743_v46  ;;  %4664 = vmatpush.bf16.msra.mxu1 %v7726_v54  ;;  %v3942_v46 = vpop.f32.mrf.mxu3  ;;  %v7754_v54 = vld [vmem:[#allocation10 + $0x140] sm:$0xff] }
 0x338   :  { %4677 = vmatpush.bf16.msra.mxu2 %v7734_v57  ;;  %v3889_v57 = vadd.f32 %v8198_v1, %v3876_v6 }
 0x339   :  { %4652 = vmatpush.bf16.msra.mxu0 %v7717_v55  ;;  %v4132_v55 = vpack.c.bf16 %v8180_v5, %v8180_v5 }
 0x33a   :  { %4690 = vmatpush.bf16.msra.mxu3 %v7742_v51  ;;  %4665 = vmatpush.bf16.msra.mxu1 %v7725_v56  ;;  %v3915_v51 = vadd.f32 %v3914_v60, %v3901_v30  ;;  %v4133_v56 = vpack.c.bf16 %v3889_v57, %v3889_v57 }
 0x33c   :  { %4678 = vmatpush.bf16.msra.mxu2 %v7733_v58  ;;  %v3928_v58 = vadd.f32 %v3927_v36, %v3915_v51 }
 0x33d   :  { %4653 = vmatpush.bf16.msra.mxu0 %v7716_v2 }
 0x33e   :  { %4691 = vmatpush.bf16.msra.mxu3 %v7741_v63  ;;  %4666 = vmatpush.bf16.msra.mxu1 %v7724_v4  ;;  %v3941_v62 = vadd.f32 %v3940_v39, %v3928_v58  ;;  %v7783_v58 = vld [vmem:[#allocation13 + $0x28] sm:$0xff] }
 0x340   :  { %4679 = vmatpush.bf16.msra.mxu2 %v7732_v7  ;;  %v7777_v7 = vld [vmem:[#allocation10 + $0x1f8] sm:$0xff] }
 0x341   :  { %4654 = vmatpush.bf16.msra.mxu0 %v7715_v10  ;;  %v7776_v10 = vld [vmem:[#allocation10 + $0x1f0] sm:$0xff] }
 0x342   :  { %4692 = vmatpush.bf16.msra.mxu3 %v7740_v9  ;;  %4667 = vmatpush.bf16.msra.mxu1 %v7723_v11 }
 0x344   :  { %4680 = vmatpush.bf16.msra.mxu2 %v7731_v12 }
 0x345   :  { %4655 = vmatpush.bf16.msra.mxu0 %v7714_v16  ;;  %v3953_v63 = vpop.f32.mrf.mxu0 }
 0x346   :  { %4693 = vmatpush.bf16.msra.mxu3 %v7739_v14  ;;  %4668 = vmatpush.bf16.msra.mxu1 %v7722_v17  ;;  %v3954_v2 = vadd.f32 %v3953_v63, %v3941_v62  ;;  %v7775_v14 = vld [vmem:[#allocation10 + $0x1e8] sm:$0xff]  ;;  %v7774_v17 = vld [vmem:[#allocation10 + $0x1e0] sm:$0xff] }
 0x347   :  { %v3966_v3 = vpop.f32.mrf.mxu1 }
 0x348   :  { %4681 = vmatpush.bf16.msra.mxu2 %v7730_v18  ;;  %4656 = vmatmul.bf16.vlgmr.msra.gmra.mxu0 %v4128_v23  ;;  %v3967_v4 = vadd.f32 %v3966_v3, %v3954_v2  ;;  %v7773_v18 = vld [vmem:[#allocation10 + $0x1d8] sm:$0xff]  ;;  %v7771_v23 = vld [vmem:[#allocation10 + $0x1c8] sm:$0xff] }
 0x349   :  { %4700 = vmatpush.bf16.msrb.mxu0 %v7753_v21  ;;  %4669 = vmatmul.bf16.vlgmr.msra.gmra.mxu1 %v4129_v24  ;;  %v7782_v2 = vld [vmem:[#allocation13 + $0x20] sm:$0xff]  ;;  %v7781_v3 = vld [vmem:[#allocation13 + $0x18] sm:$0xff] }
 0x34a   :  { %4694 = vmatpush.bf16.msra.mxu3 %v7738_v20  ;;  %4713 = vmatpush.bf16.msrb.mxu1 %v7761_v22  ;;  %v7772_v20 = vld [vmem:[#allocation10 + $0x1d0] sm:$0xff] }
 0x34b   :  { %4682 = vmatmul.bf16.vlgmr.msra.gmra.mxu2 %v4130_v25  ;;  %v7770_v25 = vld [vmem:[#allocation10 + $0x1c0] sm:$0xff] }
 0x34c   :  { %4726 = vmatpush.bf16.msrb.mxu2 %v7769_v19 }
 0x34d   :  { %4695 = vmatmul.bf16.vlgmr.msra.gmra.mxu3 %v4131_v27  ;;  %4701 = vmatpush.bf16.msrb.mxu0 %v7752_v26  ;;  %v3955_v12 = vpop.f32.mrf.mxu0 }
 0x34e   :  { %4714 = vmatpush.bf16.msrb.mxu1 %v7760_v29  ;;  %4739 = vmatpush.bf16.msrb.mxu3 %v7777_v7 }
 0x34f   :  { %v3979_v1 = vpop.f32.mrf.mxu2  ;;  %v3968_v5 = vpop.f32.mrf.mxu1 }
 0x350   :  { %4727 = vmatpush.bf16.msrb.mxu2 %v7768_v61  ;;  %v3980_v8 = vadd.f32 %v3979_v1, %v3967_v4  ;;  %v7780_v4 = vld [vmem:[#allocation13 + $0x10] sm:$0xff] }
 0x351   :  { %4702 = vmatpush.bf16.msrb.mxu0 %v7751_v32  ;;  %v3992_v9 = vpop.f32.mrf.mxu3 }
 0x352   :  { %4715 = vmatpush.bf16.msrb.mxu1 %v7759_v50  ;;  %v3993_v11 = vadd.f32 %v3992_v9, %v3980_v8  ;;  %4740 = vmatpush.bf16.msrb.mxu3 %v7776_v10  ;;  %v7779_v8 = vld [vmem:[#allocation13 + $0x8] sm:$0xff]  ;;  %v7778_v9 = vld [vmem:[#allocation13] sm:$0xff] }
 0x354   :  { %4728 = vmatpush.bf16.msrb.mxu2 %v7767_v49  ;;  %v4134_v13 = vpack.c.bf16 %v3993_v11, %v3993_v11  ;;  %v7798_v11 = vld [vmem:[#allocation12] ss:$0 sm:$0xff] }
 0x355   :  { %4703 = vmatpush.bf16.msrb.mxu0 %v7750_v33 }
 0x356   :  { %4716 = vmatpush.bf16.msrb.mxu1 %v7758_v38  ;;  %4741 = vmatpush.bf16.msrb.mxu3 %v7775_v14 }
 0x357   :  { %v3981_v15 = vpop.f32.mrf.mxu2 }
 0x358   :  { %4729 = vmatpush.bf16.msrb.mxu2 %v7766_v31 }
 0x359   :  { %4704 = vmatpush.bf16.msrb.mxu0 %v7749_v34  ;;  %v3994_v16 = vpop.f32.mrf.mxu3 }
 0x35a   :  { %4717 = vmatpush.bf16.msrb.mxu1 %v7757_v35  ;;  %4742 = vmatpush.bf16.msrb.mxu3 %v7774_v17  ;;  %v7799_v17 = vld [vmem:[#allocation15] ss:$0 sm:$0xff] }
 0x35c   :  { %4730 = vmatpush.bf16.msrb.mxu2 %v7765_v40 }
 0x35d   :  { %4705 = vmatpush.bf16.msrb.mxu0 %v7748_v59 }
 0x35e   :  { %4718 = vmatpush.bf16.msrb.mxu1 %v7756_v48  ;;  %4743 = vmatpush.bf16.msrb.mxu3 %v7773_v18 }
 0x360   :  { %4731 = vmatpush.bf16.msrb.mxu2 %v7764_v52 }
 0x361   :  { %4706 = vmatpush.bf16.msrb.mxu0 %v7747_v43 }
 0x362   :  { %4719 = vmatpush.bf16.msrb.mxu1 %v7755_v44  ;;  %4744 = vmatpush.bf16.msrb.mxu3 %v7772_v20 }
 0x364   :  { %4732 = vmatpush.bf16.msrb.mxu2 %v7763_v47 }
 0x365   :  { %4707 = vmatpush.bf16.msrb.mxu0 %v7746_v28  ;;  %v4005_v21 = vpop.f32.mrf.mxu0 }
 0x366   :  { %4720 = vmatpush.bf16.msrb.mxu1 %v7754_v54  ;;  %4745 = vmatpush.bf16.msrb.mxu3 %v7771_v23 }
 0x367   :  { %v4018_v22 = vpop.f32.mrf.mxu1 }
 0x368   :  { %4708 = vmatmul.bf16.vlgmr.msrb.gmra.mxu0 %v4132_v55  ;;  %4733 = vmatpush.bf16.msrb.mxu2 %v7762_v0  ;;  %v4019_v32 = vadd.f32 %v4018_v22, %v4005_v21  ;;  %v7785_v0 = vld [vmem:[#allocation13 + $0x38] sm:$0xff] }
 0x369   :  { %4721 = vmatmul.bf16.vlgmr.msrb.gmra.mxu1 %v4133_v56  ;;  %4832 = vmatpush.bf16.msra.mxu0 %v7785_v0  ;;  %v7784_v56 = vld [vmem:[#allocation13 + $0x30] sm:$0xff] }
 0x36a   :  { %4746 = vmatpush.bf16.msrb.mxu3 %v7770_v25 }
 0x36b   :  { %4734 = vmatmul.bf16.vlgmr.msrb.gmra.mxu2 %v4134_v13 }
 0x36d   :  { %v4007_v26 = vpop.f32.mrf.mxu0  ;;  %4833 = vmatpush.bf16.msra.mxu0 %v7784_v56 }
 0x36f   :  { %v4031_v19 = vpop.f32.mrf.mxu2  ;;  %v4020_v27 = vpop.f32.mrf.mxu1 }
 0x370   :  { %v4032_v50 = vadd.f32 %v4031_v19, %v4019_v32 }
 0x371   :  { %v4044_v24 = vpop.f32.mrf.mxu3  ;;  %4834 = vmatpush.bf16.msra.mxu0 %v7783_v58 }
 0x372   :  { %v4045_v49 = vadd.f32 %v4044_v24, %v4032_v50 }
 0x375   :  { %4835 = vmatpush.bf16.msra.mxu0 %v7782_v2 }
 0x377   :  { %v4033_v29 = vpop.f32.mrf.mxu2 }
 0x379   :  { %v4046_v61 = vpop.f32.mrf.mxu3  ;;  %4836 = vmatpush.bf16.msra.mxu0 %v7781_v3 }
 0x37d   :  { %4837 = vmatpush.bf16.msra.mxu0 %v7780_v4 }
 0x381   :  { %4838 = vmatpush.bf16.msra.mxu0 %v7779_v8 }
 0x385   :  { %4839 = vmatpush.bf16.msra.mxu0 %v7778_v9 }
 0x3a4   :  { %v4057_v33 = vpop.f32.mrf.mxu0 }
 0x3a5   :  { %v4058_v38 = vadd.f32 %v4057_v33, %v4045_v49 }
 0x3a6   :  { %v4070_v30 = vpop.f32.mrf.mxu1 }
 0x3a7   :  { %v4071_v60 = vadd.f32 %v4070_v30, %v4058_v38 }
 0x3ac   :  { %v4059_v36 = vpop.f32.mrf.mxu0 }
 0x3ae   :  { %v4083_v31 = vpop.f32.mrf.mxu2  ;;  %v4072_v37 = vpop.f32.mrf.mxu1 }
 0x3af   :  { %v4084_v34 = vadd.f32 %v4083_v31, %v4071_v60 }
 0x3b0   :  { %v4096_v35 = vpop.f32.mrf.mxu3 }
 0x3b1   :  { %v4097_v39 = vadd.f32 %v4096_v35, %v4084_v34 }
 0x3b3   :  { %v4135_v40 = vpack.c.bf16 %v4097_v39, %v4097_v39 }
 0x3b5   :  { %4747 = vmatmul.bf16.vlgmr.msrb.gmra.mxu3 %v4135_v40 }
 0x3b6   :  { %v4085_v59 = vpop.f32.mrf.mxu2 }
 0x3b8   :  { %v4098_v41 = vpop.f32.mrf.mxu3 }
 0x3c5   :  { %v4657_v48 = vpop.f32.mrf.mxu0 }
 0x3c6   :  { %v4670_v42 = vpop.f32.mrf.mxu1 }
 0x3c7   :  { %v4671_v53 = vadd.f32 %v4670_v42, %v4657_v48 }
 0x3cd   :  { %v4659_v45 = vpop.f32.mrf.mxu0 }
 0x3ce   :  { %v4683_v52 = vpop.f32.mrf.mxu2  ;;  %v4672_v6 = vpop.f32.mrf.mxu1 }
 0x3cf   :  { %v4684_v43 = vadd.f32 %v4683_v52, %v4671_v53 }
 0x3d0   :  { %v4696_v44 = vpop.f32.mrf.mxu3 }
 0x3d1   :  { %v4697_v46 = vadd.f32 %v4696_v44, %v4684_v43 }
 0x3d6   :  { %v4685_v47 = vpop.f32.mrf.mxu2 }
 0x3d8   :  { %v4698_v28 = vpop.f32.mrf.mxu3 }
 0x3e5   :  { %v4709_v54 = vpop.f32.mrf.mxu0 }
 0x3e6   :  { %v4710_v57 = vadd.f32 %v4709_v54, %v4697_v46  ;;  %v4722_v51 = vpop.f32.mrf.mxu1 }
 0x3e8   :  { %v4723_v55 = vadd.f32 %v4722_v51, %v4710_v57 }
 0x3ed   :  { %v4711_v62 = vpop.f32.mrf.mxu0 }
 0x3ee   :  { %v4724_v63 = vpop.f32.mrf.mxu1  ;;  %v4735_v7 = vpop.f32.mrf.mxu2 }
 0x3ef   :  { %v4736_v10 = vadd.f32 %v4735_v7, %v4723_v55 }
 0x3f6   :  { %v4737_v1 = vpop.f32.mrf.mxu2 }
 0x438   :  { %v4748_v12 = vpop.f32.mrf.mxu3 }
 0x439   :  { %v4749_v5 = vadd.f32 %v4748_v12, %v4736_v10 }
 0x43b   :  { %v4761_v13 = vadd.f32 %v7798_v11, %v4749_v5 }
 0x43d   :  { %v4762_v14 = vmax.f32 %v4761_v13, 0.0 }
 0x43f   :  { %v4763_v15 = vpack.c.bf16 %v4762_v14, %v4762_v14 }
 0x440   :  { %v4750_v16 = vpop.f32.mrf.mxu3 }
 0x441   :  { %4840 = vmatmul.bf16.vlgmr.msra.gmra.mxu0 %v4763_v15 }
 0x4be   :  { %v4841_v18 = vpop.f32.mrf.mxu0 }
 0x4bf   :  { %v4842_v20 = vadd.f32 %v7799_v17, %v4841_v18 }
 0x4c1   :  { %4845 = vst [vmem:[#allocation16] sm:$0xff] %v4842_v20 }
 0x4c2   :  { %4856 = dma.vmem_to_hbm [thread:$0]  %s4852_s6, 128, %s4854_s14, [#allocation6]  }
 0x4c6   :  { %v4843_v21 = vpop.f32.mrf.mxu0 }
 0x4c7   :  { %8000 = dma.done.wait [#allocation6], 128  }
 0x4c8   :  { %8001 = vsyncadd [#allocation6], 4294967168 }
 0x4c9   :  { %4861 = vsyncpa [#allocation5], 1 }
 0x4ca   :  { %4862 = vsyncpa [#allocation8], 1 }
 0x4cb   :  { %4863 = vsyncpa [#allocation11], 1 }
 0x4cc   :  { %4864 = vsyncpa [#allocation14], 1 }
 0x4cd   :  { %4865 = vsyncpa [#allocation6], 1 }

// kernel: tpu_custom_call.1
= control target key start
LH: loop header
LB: loop body
LE: loop exit
PB: predicated region body
PF: predicated region fallthrough
CT: control target
= control target key end

     0   :  { %12 = vsyncpa [#allocation5], 0  ;;  %s8218_s0 = inlined_call_operand.hbm [shape: f32[8,1024], index: 0, kind: input, shape index: {}]   ;;  %s8219_s1 = inlined_call_operand.hbm [shape: f32[1,1024], index: 1, kind: input, shape index: {}]   ;;  %s8220_s2 = inlined_call_operand.hbm [shape: bf16[1024,1024], index: 2, kind: input, shape index: {}]   ;;  %s8221_s3 = inlined_call_operand.hbm [shape: bf16[1024,128], index: 3, kind: input, shape index: {}]   ;;  %s8222_s4 = inlined_call_operand.hbm [shape: f32[1,128], index: 4, kind: input, shape index: {}]   ;;  %s8223_s5 = inlined_call_operand.hbm [shape: bf16[128,128], index: 5, kind: input, shape index: {}]   ;;  %s8224_s6 = inlined_call_operand.hbm [shape: f32[1,128], index: 6, kind: input, shape index: {}]   ;;  %s8225_s7 = inlined_call_operand.hbm [shape: f32[8,128], index: 7, kind: output, shape index: {}]  }
   0x1   :  { %13 = vsyncpa [#allocation8], 0 }
   0x2   :  { %14 = vsyncpa [#allocation11], 0 }
   0x3   :  { %15 = vsyncpa [#allocation14], 0  ;;  %s33_s26 = sshll.u32 %s8219_s1, 4  ;;  %s34_s26 = int_to_ptr.hbm [resolvable:$true] %s33_s26 }
   0x4   :  { %16 = vsyncpa [#allocation6], 0  ;;  %s8002_s27 = smov [#allocation7]   ;;  %s56_s8 = sshll.u32 %s8221_s3, 4  ;;  %s57_s8 = int_to_ptr.hbm [resolvable:$true] %s56_s8 }
   0x5   :  { %s35_s28 = sshll.u32 %s8002_s27, 4  ;;  %s8003_s9 = smov [#allocation10]   ;;  %s36_s28 = int_to_ptr.vmem [resolvable:$true] %s35_s28 }
   0x6   :  { %38 = dma.hbm_to_vmem [thread:$0]  %s34_s26, 128, %s36_s28, [#allocation8]  }
   0x7   :  { %s58_s10 = sshll.u32 %s8003_s9, 4  ;;  %s8004_s11 = smov 64   ;;  %s59_s10 = int_to_ptr.vmem [resolvable:$true] %s58_s10 }
   0x8   :  { %s8005_s12 = smov 4   ;;  %s80_s1 = sshll.u32 %s8223_s5, 4  ;;  %s81_s1 = int_to_ptr.hbm [resolvable:$true] %s80_s1 }
   0x9   :  { %64 = dma.hbm_to_vmem [thread:$0]  %s57_s8, 8192, %s59_s10, [#allocation11], %s8004_s11, %s8004_s11, %s8005_s12  }
   0xa   :  { %s8006_s15 = smov [#allocation13]   ;;  %s22_s3 = sshll.u32 %s8218_s0, 4  ;;  %s23_s3 = int_to_ptr.hbm [resolvable:$true] %s22_s3 }
   0xb   :  { %s82_s16 = sshll.u32 %s8006_s15, 4  ;;  %s8007_s19 = smov [#allocation4]   ;;  %s83_s16 = int_to_ptr.vmem [resolvable:$true] %s82_s16 }
   0xc   :  { %88 = dma.hbm_to_vmem [thread:$0]  %s81_s1, 1024, %s83_s16, [#allocation14], %s8004_s11, %s8004_s11, %s8005_s12  }
   0xd   :  { %s24_s20 = sshll.u32 %s8007_s19, 4  ;;  %s43_s23 = sshll.u32 %s8220_s2, 4  ;;  %s25_s20 = int_to_ptr.vmem [resolvable:$true] %s24_s20  ;;  %s44_s23 = int_to_ptr.hbm [resolvable:$true] %s43_s23 }
   0xe   :  { %27 = dma.hbm_to_vmem [thread:$0]  %s23_s3, 1024, %s25_s20, [#allocation5]  }
   0xf   :  { %s8008_s5 = smov [#allocation9]   ;;  %s70_s27 = sshll.u32 %s8222_s4, 4  ;;  %s71_s27 = int_to_ptr.hbm [resolvable:$true] %s70_s27 }
  0x10   :  { %s45_s24 = sshll.u32 %s8008_s5, 4  ;;  %s8009_s28 = smov 512   ;;  %s46_s24 = int_to_ptr.vmem [resolvable:$true] %s45_s24 }
  0x11   :  { %s8010_s0 = smov 32   ;;  %s8011_s29 = smov [#allocation12]  }
  0x12   :  { %51 = dma.hbm_to_vmem [thread:$0]  %s44_s23, 65536, %s46_s24, [#allocation8], %s8009_s28, %s8009_s28, %s8010_s0  }
  0x13   :  { %s72_s30 = sshll.u32 %s8011_s29, 4  ;;  %s94_s2 = sshll.u32 %s8224_s6, 4  ;;  %s73_s30 = int_to_ptr.vmem [resolvable:$true] %s72_s30  ;;  %s95_s2 = int_to_ptr.hbm [resolvable:$true] %s94_s2 }
  0x14   :  { %75 = dma.hbm_to_vmem [thread:$0]  %s71_s27, 16, %s73_s30, [#allocation11]  }
  0x15   :  { %s8012_s10 = smov [#allocation15]  }
  0x16   :  { %s96_s11 = sshll.u32 %s8012_s10, 4  ;;  %s97_s11 = int_to_ptr.vmem [resolvable:$true] %s96_s11 }
  0x17   :  { %99 = dma.hbm_to_vmem [thread:$0]  %s95_s2, 16, %s97_s11, [#allocation14]  }
  0x18   :  { %7992 = dma.done.wait [#allocation5], 1024  }
  0x19   :  { %7993 = vsyncadd [#allocation5], 4294966272 }
  0x1a   :  { %7994 = dma.done.wait [#allocation8], 65664  }
  0x1b   :  { %7995 = vsyncadd [#allocation8], 4294901632 }
  0x1c   :  { %7996 = dma.done.wait [#allocation11], 8208  }
  0x1d   :  { %7997 = vsyncadd [#allocation11], 4294959088 }
  0x1e   :  { %7998 = dma.done.wait [#allocation14], 1040  }
  0x1f   :  { %7999 = vsyncadd [#allocation14], 4294966256  ;;  %v5092_v0 = vld [vmem:[#allocation9 + $0x1c0] sm:$0xf]  ;;  %s8013_s4 = smov [#allocation16]   ;;  %s4853_s14 = sshll.u32 %s8225_s7, 4  ;;  %s4854_s14 = int_to_ptr.hbm [resolvable:$true] %s4853_s14 }
  0x20   :  { %v7262_v1 = vld [vmem:[#allocation9 + $0x1dc] sm:$0xf0]  ;;  %s4851_s6 = sshll.u32 %s8013_s4, 4  ;;  %s4852_s6 = int_to_ptr.vmem [resolvable:$true] %s4851_s6 }
  0x21   :  { %v5348_v2 = vld [vmem:[#allocation9 + $0x3c0] sm:$0xf]  ;;  %v5093_v3 = vor.u32 %v7262_v1, %v5092_v0 }
  0x22   :  { %v7326_v4 = vld [vmem:[#allocation9 + $0x3dc] sm:$0xf0] }
  0x23   :  { %v5604_v5 = vld [vmem:[#allocation9 + $0x5c0] sm:$0xf]  ;;  %v5349_v7 = vor.u32 %v7326_v4, %v5348_v2  ;;  %3268 = vmatpush.bf16.msra.mxu0 %v5093_v3 }
  0x24   :  { %v7390_v6 = vld [vmem:[#allocation9 + $0x5dc] sm:$0xf0] }
  0x25   :  { %v5605_v8 = vor.u32 %v7390_v6, %v5604_v5  ;;  %v5860_v9 = vld [vmem:[#allocation9 + $0x7c0] sm:$0xf]  ;;  %3281 = vmatpush.bf16.msra.mxu1 %v5349_v7 }
  0x26   :  { %v7454_v10 = vld [vmem:[#allocation9 + $0x7dc] sm:$0xf0] }
  0x27   :  { %v5060_v11 = vld [vmem:[#allocation9 + $0x180] sm:$0xf]  ;;  %v5861_v12 = vor.u32 %v7454_v10, %v5860_v9  ;;  %3294 = vmatpush.bf16.msra.mxu2 %v5605_v8 }
  0x28   :  { %v7254_v13 = vld [vmem:[#allocation9 + $0x19c] sm:$0xf0] }
  0x29   :  { %v5316_v14 = vld [vmem:[#allocation9 + $0x380] sm:$0xf]  ;;  %v5061_v16 = vor.u32 %v7254_v13, %v5060_v11  ;;  %3307 = vmatpush.bf16.msra.mxu3 %v5861_v12 }
  0x2a   :  { %v7318_v15 = vld [vmem:[#allocation9 + $0x39c] sm:$0xf0] }
  0x2b   :  { %v5317_v17 = vor.u32 %v7318_v15, %v5316_v14  ;;  %v5572_v18 = vld [vmem:[#allocation9 + $0x580] sm:$0xf]  ;;  %3269 = vmatpush.bf16.msra.mxu0 %v5061_v16 }
  0x2c   :  { %v7382_v19 = vld [vmem:[#allocation9 + $0x59c] sm:$0xf0] }
  0x2d   :  { %v5828_v20 = vld [vmem:[#allocation9 + $0x780] sm:$0xf]  ;;  %v5573_v21 = vor.u32 %v7382_v19, %v5572_v18  ;;  %3282 = vmatpush.bf16.msra.mxu1 %v5317_v17 }
  0x2e   :  { %v7446_v22 = vld [vmem:[#allocation9 + $0x79c] sm:$0xf0] }
  0x2f   :  { %v5028_v23 = vld [vmem:[#allocation9 + $0x140] sm:$0xf]  ;;  %v5829_v25 = vor.u32 %v7446_v22, %v5828_v20  ;;  %3295 = vmatpush.bf16.msra.mxu2 %v5573_v21 }
  0x30   :  { %v7246_v24 = vld [vmem:[#allocation9 + $0x15c] sm:$0xf0] }
  0x31   :  { %v5284_v26 = vld [vmem:[#allocation9 + $0x340] sm:$0xf]  ;;  %v5029_v29 = vor.u32 %v7246_v24, %v5028_v23  ;;  %3308 = vmatpush.bf16.msra.mxu3 %v5829_v25 }
  0x32   :  { %v7310_v27 = vld [vmem:[#allocation9 + $0x35c] sm:$0xf0] }
  0x33   :  { %v5540_v28 = vld [vmem:[#allocation9 + $0x540] sm:$0xf]  ;;  %v5285_v33 = vor.u32 %v7310_v27, %v5284_v26  ;;  %3270 = vmatpush.bf16.msra.mxu0 %v5029_v29 }
  0x34   :  { %v7374_v30 = vld [vmem:[#allocation9 + $0x55c] sm:$0xf0] }
  0x35   :  { %v5796_v31 = vld [vmem:[#allocation9 + $0x740] sm:$0xf]  ;;  %v5541_v34 = vor.u32 %v7374_v30, %v5540_v28  ;;  %3283 = vmatpush.bf16.msra.mxu1 %v5285_v33 }
  0x36   :  { %v7438_v32 = vld [vmem:[#allocation9 + $0x75c] sm:$0xf0] }
  0x37   :  { %v4996_v35 = vld [vmem:[#allocation9 + $0x100] sm:$0xf]  ;;  %v5797_v38 = vor.u32 %v7438_v32, %v5796_v31  ;;  %3296 = vmatpush.bf16.msra.mxu2 %v5541_v34 }
  0x38   :  { %v7238_v36 = vld [vmem:[#allocation9 + $0x11c] sm:$0xf0] }
  0x39   :  { %v5252_v37 = vld [vmem:[#allocation9 + $0x300] sm:$0xf]  ;;  %v4997_v44 = vor.u32 %v7238_v36, %v4996_v35  ;;  %3309 = vmatpush.bf16.msra.mxu3 %v5797_v38 }
  0x3a   :  { %v7302_v39 = vld [vmem:[#allocation9 + $0x31c] sm:$0xf0] }
  0x3b   :  { %v5508_v40 = vld [vmem:[#allocation9 + $0x500] sm:$0xf]  ;;  %v5253_v45 = vor.u32 %v7302_v39, %v5252_v37  ;;  %3271 = vmatpush.bf16.msra.mxu0 %v4997_v44 }
  0x3c   :  { %v7366_v41 = vld [vmem:[#allocation9 + $0x51c] sm:$0xf0] }
  0x3d   :  { %v5764_v42 = vld [vmem:[#allocation9 + $0x700] sm:$0xf]  ;;  %v5509_v46 = vor.u32 %v7366_v41, %v5508_v40  ;;  %3284 = vmatpush.bf16.msra.mxu1 %v5253_v45 }
  0x3e   :  { %v7430_v43 = vld [vmem:[#allocation9 + $0x71c] sm:$0xf0] }
  0x3f   :  { %v4964_v47 = vld [vmem:[#allocation9 + $0xc0] sm:$0xf]  ;;  %v5765_v50 = vor.u32 %v7430_v43, %v5764_v42  ;;  %3297 = vmatpush.bf16.msra.mxu2 %v5509_v46 }
  0x40   :  { %v7230_v48 = vld [vmem:[#allocation9 + $0xdc] sm:$0xf0] }
  0x41   :  { %v5220_v49 = vld [vmem:[#allocation9 + $0x2c0] sm:$0xf]  ;;  %v4965_v56 = vor.u32 %v7230_v48, %v4964_v47  ;;  %3310 = vmatpush.bf16.msra.mxu3 %v5765_v50 }
  0x42   :  { %v7294_v51 = vld [vmem:[#allocation9 + $0x2dc] sm:$0xf0] }
  0x43   :  { %v5476_v52 = vld [vmem:[#allocation9 + $0x4c0] sm:$0xf]  ;;  %v5221_v57 = vor.u32 %v7294_v51, %v5220_v49  ;;  %3272 = vmatpush.bf16.msra.mxu0 %v4965_v56 }
  0x44   :  { %v7358_v53 = vld [vmem:[#allocation9 + $0x4dc] sm:$0xf0] }
  0x45   :  { %v5732_v54 = vld [vmem:[#allocation9 + $0x6c0] sm:$0xf]  ;;  %v5477_v58 = vor.u32 %v7358_v53, %v5476_v52  ;;  %3285 = vmatpush.bf16.msra.mxu1 %v5221_v57 }
  0x46   :  { %v7422_v55 = vld [vmem:[#allocation9 + $0x6dc] sm:$0xf0] }
  0x47   :  { %v4932_v59 = vld [vmem:[#allocation9 + $0x80] sm:$0xf]  ;;  %v5733_v62 = vor.u32 %v7422_v55, %v5732_v54  ;;  %3298 = vmatpush.bf16.msra.mxu2 %v5477_v58 }
  0x48   :  { %v7222_v60 = vld [vmem:[#allocation9 + $0x9c] sm:$0xf0] }
  0x49   :  { %v5188_v61 = vld [vmem:[#allocation9 + $0x280] sm:$0xf]  ;;  %v4933_v4 = vor.u32 %v7222_v60, %v4932_v59  ;;  %3311 = vmatpush.bf16.msra.mxu3 %v5733_v62  ;;  %v8075_v59 = vld [vmem:[#allocation7] sm:$0xff] }
  0x4a   :  { %v7286_v63 = vld [vmem:[#allocation9 + $0x29c] sm:$0xf0] }
  0x4b   :  { %v5444_v0 = vld [vmem:[#allocation9 + $0x480] sm:$0xf]  ;;  %v5189_v5 = vor.u32 %v7286_v63, %v5188_v61  ;;  %3273 = vmatpush.bf16.msra.mxu0 %v4933_v4  ;;  %v149_v63 = vld [vmem:[#allocation4 + $0x10] sm:$0xff] }
  0x4c   :  { %v7350_v1 = vld [vmem:[#allocation9 + $0x49c] sm:$0xf0] }
  0x4d   :  { %v5700_v2 = vld [vmem:[#allocation9 + $0x680] sm:$0xf]  ;;  %v5445_v6 = vor.u32 %v7350_v1, %v5444_v0  ;;  %3286 = vmatpush.bf16.msra.mxu1 %v5189_v5  ;;  %v158_v0 = vperm.slane %v8075_v59, 2 }
  0x4e   :  { %v7414_v3 = vld [vmem:[#allocation9 + $0x69c] sm:$0xf0] }
  0x4f   :  { %v4900_v7 = vld [vmem:[#allocation9 + $0x40] sm:$0xf]  ;;  %v5701_v10 = vor.u32 %v7414_v3, %v5700_v2  ;;  %3299 = vmatpush.bf16.msra.mxu2 %v5445_v6 }
  0x50   :  { %v7214_v8 = vld [vmem:[#allocation9 + $0x5c] sm:$0xf0] }
  0x51   :  { %v5156_v9 = vld [vmem:[#allocation9 + $0x240] sm:$0xf]  ;;  %v4901_v16 = vor.u32 %v7214_v8, %v4900_v7  ;;  %3312 = vmatpush.bf16.msra.mxu3 %v5701_v10  ;;  %v174_v8 = vsub.f32 %v149_v63, %v158_v0 }
  0x52   :  { %v7278_v11 = vld [vmem:[#allocation9 + $0x25c] sm:$0xf0] }
  0x53   :  { %v5412_v12 = vld [vmem:[#allocation9 + $0x440] sm:$0xf]  ;;  %v5157_v19 = vor.u32 %v7278_v11, %v5156_v9  ;;  %3274 = vmatpush.bf16.msra.mxu0 %v4901_v16  ;;  %v147_v11 = vld [vmem:[#allocation4] sm:$0xff] }
  0x54   :  { %v7342_v13 = vld [vmem:[#allocation9 + $0x45c] sm:$0xf0] }
  0x55   :  { %v5668_v14 = vld [vmem:[#allocation9 + $0x640] sm:$0xf]  ;;  %v5413_v20 = vor.u32 %v7342_v13, %v5412_v12  ;;  %3287 = vmatpush.bf16.msra.mxu1 %v5157_v19  ;;  %v156_v12 = vperm.slane %v8075_v59, 0  ;;  %v150_v13 = vld [vmem:[#allocation4 + $0x18] sm:$0xff]  ;;  %v8080_v19 = vpack.c.bf16 %v174_v8, %v174_v8 }
  0x56   :  { %v7406_v15 = vld [vmem:[#allocation9 + $0x65c] sm:$0xf0] }
  0x57   :  { %v4868_v17 = vld [vmem:[#allocation9] sm:$0xf]  ;;  %v5669_v24 = vor.u32 %v7406_v15, %v5668_v14  ;;  %3300 = vmatpush.bf16.msra.mxu2 %v5413_v20  ;;  %v159_v14 = vperm.slane %v8075_v59, 3  ;;  %v157_v20 = vperm.slane %v8075_v59, 1 }
  0x58   :  { %v7206_v18 = vld [vmem:[#allocation9 + $0x1c] sm:$0xf0] }
  0x59   :  { %v5124_v21 = vld [vmem:[#allocation9 + $0x200] sm:$0xf]  ;;  %v4869_v31 = vor.u32 %v7206_v18, %v4868_v17  ;;  %3313 = vmatpush.bf16.msra.mxu3 %v5669_v24  ;;  %v175_v24 = vsub.f32 %v150_v13, %v159_v14 }
  0x5a   :  { %v7270_v22 = vld [vmem:[#allocation9 + $0x21c] sm:$0xf0] }
  0x5b   :  { %v5380_v23 = vld [vmem:[#allocation9 + $0x400] sm:$0xf]  ;;  %v5125_v35 = vor.u32 %v7270_v22, %v5124_v21  ;;  %3275 = vmatpush.bf16.msra.mxu0 %v4869_v31 }
  0x5c   :  { %v7334_v25 = vld [vmem:[#allocation9 + $0x41c] sm:$0xf0] }
  0x5d   :  { %v5636_v26 = vld [vmem:[#allocation9 + $0x600] sm:$0xf]  ;;  %v5381_v36 = vor.u32 %v7334_v25, %v5380_v23  ;;  %3288 = vmatpush.bf16.msra.mxu1 %v5125_v35  ;;  %v172_v23 = vsub.f32 %v147_v11, %v156_v12 }
  0x5e   :  { %v7398_v27 = vld [vmem:[#allocation9 + $0x61c] sm:$0xf0] }
  0x5f   :  { %v6116_v28 = vld [vmem:[#allocation9 + $0x9c0] sm:$0xf]  ;;  %v5637_v39 = vor.u32 %v7398_v27, %v5636_v26  ;;  %3301 = vmatpush.bf16.msra.mxu2 %v5381_v36 }
  0x60   :  { %v7518_v29 = vld [vmem:[#allocation9 + $0x9dc] sm:$0xf0] }
  0x61   :  { %v6372_v30 = vld [vmem:[#allocation9 + $0xbc0] sm:$0xf]  ;;  %v6117_v40 = vor.u32 %v7518_v29, %v6116_v28  ;;  %3314 = vmatpush.bf16.msra.mxu3 %v5637_v39 }
  0x62   :  { %v7582_v32 = vld [vmem:[#allocation9 + $0xbdc] sm:$0xf0]  ;;  %3302 = vmatmul.bf16.vlgmr.msra.gmra.mxu2 %v8080_v19 }
  0x63   :  { %v6628_v33 = vld [vmem:[#allocation9 + $0xdc0] sm:$0xf]  ;;  %v6373_v41 = vor.u32 %v7582_v32, %v6372_v30  ;;  %3320 = vmatpush.bf16.msrb.mxu0 %v6117_v40  ;;  %v8084_v32 = vpack.c.bf16 %v172_v23, %v172_v23  ;;  %v5094_v23 = vld [vmem:[#allocation9 + $0x1e0] sm:$0xf0] }
  0x64   :  { %v7646_v34 = vld [vmem:[#allocation9 + $0xddc] sm:$0xf0] }
  0x65   :  { %v6884_v37 = vld [vmem:[#allocation9 + $0xfc0] sm:$0xf]  ;;  %v6629_v42 = vor.u32 %v7646_v34, %v6628_v33  ;;  %3333 = vmatpush.bf16.msrb.mxu1 %v6373_v41  ;;  %v8086_v33 = vpack.c.bf16 %v175_v24, %v175_v24  ;;  %3276 = vmatmul.bf16.vlgmr.msra.gmra.mxu0 %v8084_v32  ;;  %v7322_v24 = vld [vmem:[#allocation9 + $0x3c4] sm:$0xf] }
  0x66   :  { %v7710_v38 = vld [vmem:[#allocation9 + $0xfdc] sm:$0xf0] }
  0x67   :  { %v6084_v43 = vld [vmem:[#allocation9 + $0x980] sm:$0xf]  ;;  %v6885_v46 = vor.u32 %v7710_v38, %v6884_v37  ;;  %3346 = vmatpush.bf16.msrb.mxu2 %v6629_v42  ;;  %3315 = vmatmul.bf16.vlgmr.msra.gmra.mxu3 %v8086_v33 }
  0x68   :  { %v7510_v44 = vld [vmem:[#allocation9 + $0x99c] sm:$0xf0] }
  0x69   :  { %v6340_v45 = vld [vmem:[#allocation9 + $0xb80] sm:$0xf]  ;;  %v6085_v52 = vor.u32 %v7510_v44, %v6084_v43  ;;  %3359 = vmatpush.bf16.msrb.mxu3 %v6885_v46 }
  0x6a   :  { %v7574_v47 = vld [vmem:[#allocation9 + $0xb9c] sm:$0xf0] }
  0x6b   :  { %v6596_v48 = vld [vmem:[#allocation9 + $0xd80] sm:$0xf]  ;;  %v6341_v55 = vor.u32 %v7574_v47, %v6340_v45  ;;  %3321 = vmatpush.bf16.msrb.mxu0 %v6085_v52 }
  0x6c   :  { %v7638_v49 = vld [vmem:[#allocation9 + $0xd9c] sm:$0xf0] }
  0x6d   :  { %v6852_v50 = vld [vmem:[#allocation9 + $0xf80] sm:$0xf]  ;;  %v6597_v56 = vor.u32 %v7638_v49, %v6596_v48  ;;  %3334 = vmatpush.bf16.msrb.mxu1 %v6341_v55 }
  0x6e   :  { %v7702_v51 = vld [vmem:[#allocation9 + $0xf9c] sm:$0xf0] }
  0x6f   :  { %v6052_v53 = vld [vmem:[#allocation9 + $0x940] sm:$0xf]  ;;  %v6853_v60 = vor.u32 %v7702_v51, %v6852_v50  ;;  %3347 = vmatpush.bf16.msrb.mxu2 %v6597_v56 }
  0x70   :  { %v7502_v54 = vld [vmem:[#allocation9 + $0x95c] sm:$0xf0] }
  0x71   :  { %v6308_v57 = vld [vmem:[#allocation9 + $0xb40] sm:$0xf]  ;;  %v6053_v4 = vor.u32 %v7502_v54, %v6052_v53  ;;  %3360 = vmatpush.bf16.msrb.mxu3 %v6853_v60 }
  0x72   :  { %v7566_v58 = vld [vmem:[#allocation9 + $0xb5c] sm:$0xf0] }
  0x73   :  { %v6564_v61 = vld [vmem:[#allocation9 + $0xd40] sm:$0xf]  ;;  %v6309_v9 = vor.u32 %v7566_v58, %v6308_v57  ;;  %3322 = vmatpush.bf16.msrb.mxu0 %v6053_v4 }
  0x74   :  { %v7630_v62 = vld [vmem:[#allocation9 + $0xd5c] sm:$0xf0] }
  0x75   :  { %v6820_v1 = vld [vmem:[#allocation9 + $0xf40] sm:$0xf]  ;;  %v6565_v10 = vor.u32 %v7630_v62, %v6564_v61  ;;  %3335 = vmatpush.bf16.msrb.mxu1 %v6309_v9  ;;  %v153_v9 = vld [vmem:[#allocation4 + $0x30] sm:$0xff] }
  0x76   :  { %v7694_v2 = vld [vmem:[#allocation9 + $0xf5c] sm:$0xf0] }
  0x77   :  { %v6020_v3 = vld [vmem:[#allocation9 + $0x900] sm:$0xf]  ;;  %v6821_v16 = vor.u32 %v7694_v2, %v6820_v1  ;;  %3348 = vmatpush.bf16.msrb.mxu2 %v6565_v10  ;;  %v162_v10 = vperm.slane %v8075_v59, 6 }
  0x78   :  { %v7494_v5 = vld [vmem:[#allocation9 + $0x91c] sm:$0xf0] }
  0x79   :  { %v6276_v6 = vld [vmem:[#allocation9 + $0xb00] sm:$0xf]  ;;  %v6021_v25 = vor.u32 %v7494_v5, %v6020_v3  ;;  %3361 = vmatpush.bf16.msrb.mxu3 %v6821_v16  ;;  %v163_v16 = vperm.slane %v8075_v59, 7 }
  0x7a   :  { %v7558_v7 = vld [vmem:[#allocation9 + $0xb1c] sm:$0xf0] }
  0x7b   :  { %v148_v15 = vld [vmem:[#allocation4 + $0x8] sm:$0xff]  ;;  %v6277_v26 = vor.u32 %v7558_v7, %v6276_v6  ;;  %3323 = vmatpush.bf16.msrb.mxu0 %v6021_v25 }
  0x7c   :  { %v6532_v17 = vld [vmem:[#allocation9 + $0xd00] sm:$0xf]  ;;  %v173_v27 = vsub.f32 %v148_v15, %v157_v20  ;;  %v160_v15 = vperm.slane %v8075_v59, 4  ;;  %v151_v20 = vld [vmem:[#allocation4 + $0x20] sm:$0xff] }
  0x7d   :  { %v7622_v18 = vld [vmem:[#allocation9 + $0xd1c] sm:$0xf0]  ;;  %3336 = vmatpush.bf16.msrb.mxu1 %v6277_v26 }
  0x7e   :  { %v6788_v21 = vld [vmem:[#allocation9 + $0xf00] sm:$0xf]  ;;  %v6533_v28 = vor.u32 %v7622_v18, %v6532_v17  ;;  %v8088_v38 = vpack.c.bf16 %v173_v27, %v173_v27  ;;  %v7258_v18 = vld [vmem:[#allocation9 + $0x1c4] sm:$0xf] }
  0x7f   :  { %v7686_v22 = vld [vmem:[#allocation9 + $0xf1c] sm:$0xf0] }
  0x80   :  { %v5988_v29 = vld [vmem:[#allocation9 + $0x8c0] sm:$0xf]  ;;  %v6789_v34 = vor.u32 %v7686_v22, %v6788_v21  ;;  %3289 = vmatmul.bf16.vlgmr.msra.gmra.mxu1 %v8088_v38  ;;  %3349 = vmatpush.bf16.msrb.mxu2 %v6533_v28  ;;  %v154_v21 = vld [vmem:[#allocation4 + $0x38] sm:$0xff]  ;;  %v161_v22 = vperm.slane %v8075_v59, 5  ;;  %v5350_v28 = vld [vmem:[#allocation9 + $0x3e0] sm:$0xf0]  ;;  %v5097_v59 = vor.u32 %v7258_v18, %v5094_v23 }
  0x81   :  { %v7486_v30 = vld [vmem:[#allocation9 + $0x8dc] sm:$0xf0]  ;;  %v4966_v23 = vld [vmem:[#allocation9 + $0xe0] sm:$0xf0] }
  0x82   :  { %v6244_v31 = vld [vmem:[#allocation9 + $0xac0] sm:$0xf]  ;;  %v5989_v41 = vor.u32 %v7486_v30, %v5988_v29  ;;  %3362 = vmatpush.bf16.msrb.mxu3 %v6789_v34  ;;  %v7386_v29 = vld [vmem:[#allocation9 + $0x5c4] sm:$0xf] }
  0x83   :  { %v7550_v35 = vld [vmem:[#allocation9 + $0xadc] sm:$0xf0]  ;;  %v5606_v30 = vld [vmem:[#allocation9 + $0x5e0] sm:$0xf0] }
  0x84   :  { %v6500_v36 = vld [vmem:[#allocation9 + $0xcc0] sm:$0xf]  ;;  %v6245_v42 = vor.u32 %v7550_v35, %v6244_v31  ;;  %3324 = vmatpush.bf16.msrb.mxu0 %v5989_v41  ;;  %v178_v31 = vsub.f32 %v153_v9, %v162_v10  ;;  %v7450_v35 = vld [vmem:[#allocation9 + $0x7c4] sm:$0xf] }
  0x85   :  { %v7614_v37 = vld [vmem:[#allocation9 + $0xcdc] sm:$0xf0]  ;;  %v7234_v9 = vld [vmem:[#allocation9 + $0x104] sm:$0xf] }
  0x86   :  { %v6756_v39 = vld [vmem:[#allocation9 + $0xec0] sm:$0xf]  ;;  %v6501_v43 = vor.u32 %v7614_v37, %v6500_v36  ;;  %3337 = vmatpush.bf16.msrb.mxu1 %v6245_v42  ;;  %v5862_v36 = vld [vmem:[#allocation9 + $0x7e0] sm:$0xf0]  ;;  %v176_v37 = vsub.f32 %v151_v20, %v160_v15  ;;  %v5353_v42 = vor.u32 %v7322_v24, %v5350_v28 }
  0x87   :  { %v7678_v40 = vld [vmem:[#allocation9 + $0xedc] sm:$0xf0]  ;;  %v4998_v10 = vld [vmem:[#allocation9 + $0x120] sm:$0xf0] }
  0x88   :  { %v5956_v44 = vld [vmem:[#allocation9 + $0x880] sm:$0xf]  ;;  %v6757_v47 = vor.u32 %v7678_v40, %v6756_v39  ;;  %3350 = vmatpush.bf16.msrb.mxu2 %v6501_v43  ;;  %v179_v39 = vsub.f32 %v154_v21, %v163_v16  ;;  %v5609_v43 = vor.u32 %v7386_v29, %v5606_v30  ;;  %v5510_v15 = vld [vmem:[#allocation9 + $0x520] sm:$0xf0]  ;;  %v5001_v18 = vor.u32 %v7234_v9, %v4998_v10 }
  0x89   :  { %v7478_v45 = vld [vmem:[#allocation9 + $0x89c] sm:$0xf0]  ;;  %v7426_v16 = vld [vmem:[#allocation9 + $0x704] sm:$0xf] }
  0x8a   :  { %v6212_v46 = vld [vmem:[#allocation9 + $0xa80] sm:$0xf]  ;;  %v5957_v53 = vor.u32 %v7478_v45, %v5956_v44  ;;  %3363 = vmatpush.bf16.msrb.mxu3 %v6757_v47  ;;  %v7250_v44 = vld [vmem:[#allocation9 + $0x184] sm:$0xf]  ;;  %v5865_v47 = vor.u32 %v7450_v35, %v5862_v36 }
  0x8b   :  { %v7542_v48 = vld [vmem:[#allocation9 + $0xa9c] sm:$0xf0]  ;;  %v5062_v45 = vld [vmem:[#allocation9 + $0x1a0] sm:$0xf0] }
  0x8c   :  { %v6468_v49 = vld [vmem:[#allocation9 + $0xc80] sm:$0xf]  ;;  %v6213_v56 = vor.u32 %v7542_v48, %v6212_v46  ;;  %3325 = vmatpush.bf16.msrb.mxu0 %v5957_v53  ;;  %v7314_v46 = vld [vmem:[#allocation9 + $0x384] sm:$0xf] }
  0x8d   :  { %v7606_v50 = vld [vmem:[#allocation9 + $0xc9c] sm:$0xf0]  ;;  %v5318_v48 = vld [vmem:[#allocation9 + $0x3a0] sm:$0xf0] }
  0x8e   :  { %v6724_v51 = vld [vmem:[#allocation9 + $0xe80] sm:$0xf]  ;;  %v6469_v57 = vor.u32 %v7606_v50, %v6468_v49  ;;  %3338 = vmatpush.bf16.msrb.mxu1 %v6213_v56  ;;  %v7378_v49 = vld [vmem:[#allocation9 + $0x584] sm:$0xf]  ;;  %v5065_v56 = vor.u32 %v7250_v44, %v5062_v45 }
  0x8f   :  { %v7670_v52 = vld [vmem:[#allocation9 + $0xe9c] sm:$0xf0]  ;;  %v5574_v50 = vld [vmem:[#allocation9 + $0x5a0] sm:$0xf0] }
  0x90   :  { %v5924_v54 = vld [vmem:[#allocation9 + $0x840] sm:$0xf]  ;;  %v6725_v62 = vor.u32 %v7670_v52, %v6724_v51  ;;  %3351 = vmatpush.bf16.msrb.mxu2 %v6469_v57  ;;  %v8097_v51 = vpack.c.bf16 %v178_v31, %v178_v31  ;;  %v7442_v52 = vld [vmem:[#allocation9 + $0x784] sm:$0xf] }
  0x91   :  { %v7470_v55 = vld [vmem:[#allocation9 + $0x85c] sm:$0xf0]  ;;  %v5830_v53 = vld [vmem:[#allocation9 + $0x7a0] sm:$0xf0] }
  0x92   :  { %v6180_v58 = vld [vmem:[#allocation9 + $0xa40] sm:$0xf]  ;;  %v5925_v6 = vor.u32 %v7470_v55, %v5924_v54  ;;  %3364 = vmatpush.bf16.msrb.mxu3 %v6725_v62  ;;  %v8099_v54 = vpack.c.bf16 %v176_v37, %v176_v37  ;;  %v8101_v55 = vpack.c.bf16 %v179_v39, %v179_v39  ;;  %v5030_v62 = vld [vmem:[#allocation9 + $0x160] sm:$0xf0] }
  0x93   :  { %v7534_v60 = vld [vmem:[#allocation9 + $0xa5c] sm:$0xf0]  ;;  %v7290_v24 = vld [vmem:[#allocation9 + $0x2c4] sm:$0xf] }
  0x94   :  { %v6436_v61 = vld [vmem:[#allocation9 + $0xc40] sm:$0xf]  ;;  %v6181_v11 = vor.u32 %v7534_v60, %v6180_v58  ;;  %3326 = vmatpush.bf16.msrb.mxu0 %v5925_v6  ;;  %v5321_v58 = vor.u32 %v7314_v46, %v5318_v48  ;;  %v5577_v60 = vor.u32 %v7378_v49, %v5574_v50  ;;  %v5478_v28 = vld [vmem:[#allocation9 + $0x4e0] sm:$0xf0] }
  0x95   :  { %v7598_v63 = vld [vmem:[#allocation9 + $0xc5c] sm:$0xf0]  ;;  %v7418_v29 = vld [vmem:[#allocation9 + $0x6c4] sm:$0xf] }
  0x96   :  { %v6692_v0 = vld [vmem:[#allocation9 + $0xe40] sm:$0xf]  ;;  %v6437_v12 = vor.u32 %v7598_v63, %v6436_v61  ;;  %3339 = vmatpush.bf16.msrb.mxu1 %v6181_v11  ;;  %v7242_v61 = vld [vmem:[#allocation9 + $0x144] sm:$0xf] }
  0x97   :  { %v7662_v1 = vld [vmem:[#allocation9 + $0xe5c] sm:$0xf0]  ;;  %v7306_v63 = vld [vmem:[#allocation9 + $0x344] sm:$0xf]  ;;  %v5033_v6 = vor.u32 %v7242_v61, %v5030_v62 }
  0x98   :  { %v5892_v2 = vld [vmem:[#allocation9 + $0x800] sm:$0xf]  ;;  %v6693_v17 = vor.u32 %v7662_v1, %v6692_v0  ;;  %3352 = vmatpush.bf16.msrb.mxu2 %v6437_v12  ;;  %v5833_v0 = vor.u32 %v7442_v52, %v5830_v53  ;;  %v5286_v1 = vld [vmem:[#allocation9 + $0x360] sm:$0xf0] }
  0x99   :  { %v7462_v3 = vld [vmem:[#allocation9 + $0x81c] sm:$0xf0]  ;;  %v7298_v11 = vld [vmem:[#allocation9 + $0x304] sm:$0xf] }
  0x9a   :  { %v6148_v4 = vld [vmem:[#allocation9 + $0xa00] sm:$0xf]  ;;  %v5893_v26 = vor.u32 %v7462_v3, %v5892_v2  ;;  %3365 = vmatpush.bf16.msrb.mxu3 %v6693_v17  ;;  %v7370_v2 = vld [vmem:[#allocation9 + $0x544] sm:$0xf] }
  0x9b   :  { %v7526_v5 = vld [vmem:[#allocation9 + $0xa1c] sm:$0xf0]  ;;  %v5542_v3 = vld [vmem:[#allocation9 + $0x560] sm:$0xf0] }
  0x9c   :  { %v6404_v7 = vld [vmem:[#allocation9 + $0xc00] sm:$0xf]  ;;  %v6149_v27 = vor.u32 %v7526_v5, %v6148_v4  ;;  %3327 = vmatpush.bf16.msrb.mxu0 %v5893_v26  ;;  %v7434_v4 = vld [vmem:[#allocation9 + $0x744] sm:$0xf] }
  0x9d   :  { %v7590_v8 = vld [vmem:[#allocation9 + $0xc1c] sm:$0xf0]  ;;  %v5798_v5 = vld [vmem:[#allocation9 + $0x760] sm:$0xf0] }
  0x9e   :  { %v6660_v13 = vld [vmem:[#allocation9 + $0xe00] sm:$0xf]  ;;  %v6405_v34 = vor.u32 %v7590_v8, %v6404_v7  ;;  %3340 = vmatpush.bf16.msrb.mxu1 %v6149_v27  ;;  %v5289_v7 = vor.u32 %v7306_v63, %v5286_v1  ;;  %v5545_v8 = vor.u32 %v7370_v2, %v5542_v3  ;;  %v5801_v12 = vor.u32 %v7434_v4, %v5798_v5  ;;  %v5766_v17 = vld [vmem:[#allocation9 + $0x720] sm:$0xf0] }
  0x9f   :  { %v7654_v14 = vld [vmem:[#allocation9 + $0xe1c] sm:$0xf0]  ;;  %3328 = vmatmul.bf16.vlgmr.msrb.gmra.mxu0 %v8099_v54  ;;  %v5222_v26 = vld [vmem:[#allocation9 + $0x2e0] sm:$0xf0] }
  0xa0   :  { %v152_v25 = vld [vmem:[#allocation4 + $0x28] sm:$0xff]  ;;  %v6661_v40 = vor.u32 %v7654_v14, %v6660_v13  ;;  %3353 = vmatpush.bf16.msrb.mxu2 %v6405_v34  ;;  %3372 = vmatpush.bf16.msra.mxu0 %v5097_v59  ;;  %v5225_v34 = vor.u32 %v7290_v24, %v5222_v26 }
  0xa1   :  { %v177_v41 = vsub.f32 %v152_v25, %v161_v22  ;;  %v5254_v13 = vld [vmem:[#allocation9 + $0x320] sm:$0xf0]  ;;  %v5769_v25 = vor.u32 %v7426_v16, %v5766_v17 }
  0xa2   :  { %3366 = vmatpush.bf16.msrb.mxu3 %v6661_v40  ;;  %3385 = vmatpush.bf16.msra.mxu1 %v5353_v42  ;;  %v7362_v14 = vld [vmem:[#allocation9 + $0x504] sm:$0xf]  ;;  %v5257_v20 = vor.u32 %v7298_v11, %v5254_v13 }
  0xa3   :  { %v8103_v57 = vpack.c.bf16 %v177_v41, %v177_v41  ;;  %3354 = vmatmul.bf16.vlgmr.msrb.gmra.mxu2 %v8097_v51  ;;  %v5513_v21 = vor.u32 %v7362_v14, %v5510_v15  ;;  %v7226_v22 = vld [vmem:[#allocation9 + $0xc4] sm:$0xf] }
  0xa4   :  { %3398 = vmatpush.bf16.msra.mxu2 %v5609_v43  ;;  %3373 = vmatpush.bf16.msra.mxu0 %v5065_v56  ;;  %v7354_v27 = vld [vmem:[#allocation9 + $0x4c4] sm:$0xf]  ;;  %v4969_v31 = vor.u32 %v7226_v22, %v4966_v23 }
  0xa5   :  { %3367 = vmatmul.bf16.vlgmr.msrb.gmra.mxu3 %v8101_v55  ;;  %3341 = vmatmul.bf16.vlgmr.msrb.gmra.mxu1 %v8103_v57  ;;  %v5734_v30 = vld [vmem:[#allocation9 + $0x6e0] sm:$0xf0]  ;;  %v5481_v35 = vor.u32 %v7354_v27, %v5478_v28 }
  0xa6   :  { %3411 = vmatpush.bf16.msra.mxu3 %v5865_v47  ;;  %3386 = vmatpush.bf16.msra.mxu1 %v5321_v58  ;;  %v7218_v36 = vld [vmem:[#allocation9 + $0x84] sm:$0xf]  ;;  %v5737_v40 = vor.u32 %v7418_v29, %v5734_v30 }
  0xa7   :  { %v4934_v37 = vld [vmem:[#allocation9 + $0xa0] sm:$0xf0] }
  0xa8   :  { %3399 = vmatpush.bf16.msra.mxu2 %v5577_v60  ;;  %3374 = vmatpush.bf16.msra.mxu0 %v5033_v6  ;;  %v7282_v39 = vld [vmem:[#allocation9 + $0x284] sm:$0xf]  ;;  %v4937_v45 = vor.u32 %v7218_v36, %v4934_v37 }
  0xa9   :  { %v5190_v59 = vld [vmem:[#allocation9 + $0x2a0] sm:$0xf0] }
  0xaa   :  { %3412 = vmatpush.bf16.msra.mxu3 %v5833_v0  ;;  %3387 = vmatpush.bf16.msra.mxu1 %v5289_v7  ;;  %v7346_v41 = vld [vmem:[#allocation9 + $0x484] sm:$0xf]  ;;  %v5193_v46 = vor.u32 %v7282_v39, %v5190_v59 }
  0xab   :  { %v5446_v42 = vld [vmem:[#allocation9 + $0x4a0] sm:$0xf0] }
  0xac   :  { %3400 = vmatpush.bf16.msra.mxu2 %v5545_v8  ;;  %3375 = vmatpush.bf16.msra.mxu0 %v5001_v18  ;;  %v7410_v43 = vld [vmem:[#allocation9 + $0x684] sm:$0xf]  ;;  %v5449_v47 = vor.u32 %v7346_v41, %v5446_v42 }
  0xad   :  { %v5702_v44 = vld [vmem:[#allocation9 + $0x6a0] sm:$0xf0] }
  0xae   :  { %3413 = vmatpush.bf16.msra.mxu3 %v5801_v12  ;;  %3388 = vmatpush.bf16.msra.mxu1 %v5257_v20  ;;  %v7210_v48 = vld [vmem:[#allocation9 + $0x44] sm:$0xf]  ;;  %v5705_v52 = vor.u32 %v7410_v43, %v5702_v44 }
  0xaf   :  { %v4902_v49 = vld [vmem:[#allocation9 + $0x60] sm:$0xf0] }
  0xb0   :  { %3401 = vmatpush.bf16.msra.mxu2 %v5513_v21  ;;  %3376 = vmatpush.bf16.msra.mxu0 %v4969_v31  ;;  %v7274_v50 = vld [vmem:[#allocation9 + $0x244] sm:$0xf]  ;;  %v4905_v63 = vor.u32 %v7210_v48, %v4902_v49 }
  0xb1   :  { %v5158_v53 = vld [vmem:[#allocation9 + $0x260] sm:$0xf0] }
  0xb2   :  { %3414 = vmatpush.bf16.msra.mxu3 %v5769_v25  ;;  %3389 = vmatpush.bf16.msra.mxu1 %v5225_v34  ;;  %v7338_v56 = vld [vmem:[#allocation9 + $0x444] sm:$0xf]  ;;  %v5161_v3 = vor.u32 %v7274_v50, %v5158_v53 }
  0xb3   :  { %v5414_v58 = vld [vmem:[#allocation9 + $0x460] sm:$0xf0] }
  0xb4   :  { %3402 = vmatpush.bf16.msra.mxu2 %v5481_v35  ;;  %v7402_v60 = vld [vmem:[#allocation9 + $0x644] sm:$0xf]  ;;  %3377 = vmatpush.bf16.msra.mxu0 %v4937_v45  ;;  %v5417_v4 = vor.u32 %v7338_v56, %v5414_v58 }
  0xb5   :  { %v5670_v61 = vld [vmem:[#allocation9 + $0x660] sm:$0xf0] }
  0xb6   :  { %3415 = vmatpush.bf16.msra.mxu3 %v5737_v40  ;;  %v7202_v62 = vld [vmem:[#allocation9 + $0x4] sm:$0xf]  ;;  %3390 = vmatpush.bf16.msra.mxu1 %v5193_v46  ;;  %v5673_v8 = vor.u32 %v7402_v60, %v5670_v61 }
  0xb7   :  { %v4870_v0 = vld [vmem:[#allocation9 + $0x20] sm:$0xf0] }
  0xb8   :  { %v7266_v1 = vld [vmem:[#allocation9 + $0x204] sm:$0xf]  ;;  %3403 = vmatpush.bf16.msra.mxu2 %v5449_v47  ;;  %3378 = vmatpush.bf16.msra.mxu0 %v4905_v63  ;;  %v4873_v13 = vor.u32 %v7202_v62, %v4870_v0 }
  0xb9   :  { %v5126_v2 = vld [vmem:[#allocation9 + $0x220] sm:$0xf0] }
  0xba   :  { %v7330_v5 = vld [vmem:[#allocation9 + $0x404] sm:$0xf]  ;;  %3416 = vmatpush.bf16.msra.mxu3 %v5705_v52  ;;  %3391 = vmatpush.bf16.msra.mxu1 %v5161_v3  ;;  %v5129_v17 = vor.u32 %v7266_v1, %v5126_v2 }
  0xbb   :  { %v5382_v6 = vld [vmem:[#allocation9 + $0x420] sm:$0xf0] }
  0xbc   :  { %v7394_v7 = vld [vmem:[#allocation9 + $0x604] sm:$0xf]  ;;  %3404 = vmatpush.bf16.msra.mxu2 %v5417_v4  ;;  %v5385_v18 = vor.u32 %v7330_v5, %v5382_v6  ;;  %3379 = vmatpush.bf16.msra.mxu0 %v4873_v13 }
  0xbd   :  { %v5638_v9 = vld [vmem:[#allocation9 + $0x620] sm:$0xf0] }
  0xbe   :  { %v7514_v10 = vld [vmem:[#allocation9 + $0x9c4] sm:$0xf]  ;;  %3417 = vmatpush.bf16.msra.mxu3 %v5673_v8  ;;  %v5641_v22 = vor.u32 %v7394_v7, %v5638_v9  ;;  %3392 = vmatpush.bf16.msra.mxu1 %v5129_v17 }
  0xbf   :  { %v6118_v11 = vld [vmem:[#allocation9 + $0x9e0] sm:$0xf0]  ;;  %3380 = vmatmul.bf16.vlgmr.msra.gmra.mxu0 %v8084_v32 }
  0xc0   :  { %v7578_v12 = vld [vmem:[#allocation9 + $0xbc4] sm:$0xf]  ;;  %v6121_v23 = vor.u32 %v7514_v10, %v6118_v11  ;;  %3405 = vmatpush.bf16.msra.mxu2 %v5385_v18 }
  0xc1   :  { %v6374_v14 = vld [vmem:[#allocation9 + $0xbe0] sm:$0xf0]  ;;  %3393 = vmatmul.bf16.vlgmr.msra.gmra.mxu1 %v8088_v38 }
  0xc2   :  { %v7642_v15 = vld [vmem:[#allocation9 + $0xdc4] sm:$0xf]  ;;  %v6377_v24 = vor.u32 %v7578_v12, %v6374_v14  ;;  %3418 = vmatpush.bf16.msra.mxu3 %v5641_v22  ;;  %3424 = vmatpush.bf16.msrb.mxu0 %v6121_v23 }
  0xc3   :  { %v6630_v16 = vld [vmem:[#allocation9 + $0xde0] sm:$0xf0]  ;;  %3406 = vmatmul.bf16.vlgmr.msra.gmra.mxu2 %v8080_v19 }
  0xc4   :  { %v7706_v20 = vld [vmem:[#allocation9 + $0xfc4] sm:$0xf]  ;;  %v6633_v25 = vor.u32 %v7642_v15, %v6630_v16  ;;  %3437 = vmatpush.bf16.msrb.mxu1 %v6377_v24 }
  0xc5   :  { %v6886_v21 = vld [vmem:[#allocation9 + $0xfe0] sm:$0xf0]  ;;  %3419 = vmatmul.bf16.vlgmr.msra.gmra.mxu3 %v8086_v33 }
  0xc6   :  { %v7506_v26 = vld [vmem:[#allocation9 + $0x984] sm:$0xf]  ;;  %v6889_v29 = vor.u32 %v7706_v20, %v6886_v21  ;;  %3450 = vmatpush.bf16.msrb.mxu2 %v6633_v25 }
  0xc7   :  { %v6086_v27 = vld [vmem:[#allocation9 + $0x9a0] sm:$0xf0] }
  0xc8   :  { %v7570_v28 = vld [vmem:[#allocation9 + $0xb84] sm:$0xf]  ;;  %v6089_v37 = vor.u32 %v7506_v26, %v6086_v27  ;;  %3463 = vmatpush.bf16.msrb.mxu3 %v6889_v29 }
  0xc9   :  { %v6342_v30 = vld [vmem:[#allocation9 + $0xba0] sm:$0xf0] }
  0xca   :  { %v7634_v31 = vld [vmem:[#allocation9 + $0xd84] sm:$0xf]  ;;  %v6345_v39 = vor.u32 %v7570_v28, %v6342_v30  ;;  %3425 = vmatpush.bf16.msrb.mxu0 %v6089_v37 }
  0xcb   :  { %v6598_v34 = vld [vmem:[#allocation9 + $0xda0] sm:$0xf0] }
  0xcc   :  { %v7698_v35 = vld [vmem:[#allocation9 + $0xf84] sm:$0xf]  ;;  %v6601_v40 = vor.u32 %v7634_v31, %v6598_v34  ;;  %3438 = vmatpush.bf16.msrb.mxu1 %v6345_v39 }
  0xcd   :  { %v6854_v36 = vld [vmem:[#allocation9 + $0xfa0] sm:$0xf0] }
  0xce   :  { %v7498_v59 = vld [vmem:[#allocation9 + $0x944] sm:$0xf]  ;;  %v6857_v43 = vor.u32 %v7698_v35, %v6854_v36  ;;  %3451 = vmatpush.bf16.msrb.mxu2 %v6601_v40 }
  0xcf   :  { %v6054_v41 = vld [vmem:[#allocation9 + $0x960] sm:$0xf0] }
  0xd0   :  { %v7562_v42 = vld [vmem:[#allocation9 + $0xb44] sm:$0xf]  ;;  %v6057_v49 = vor.u32 %v7498_v59, %v6054_v41  ;;  %3464 = vmatpush.bf16.msrb.mxu3 %v6857_v43 }
  0xd1   :  { %v6310_v44 = vld [vmem:[#allocation9 + $0xb60] sm:$0xf0] }
  0xd2   :  { %v7626_v45 = vld [vmem:[#allocation9 + $0xd44] sm:$0xf]  ;;  %v6313_v50 = vor.u32 %v7562_v42, %v6310_v44  ;;  %3426 = vmatpush.bf16.msrb.mxu0 %v6057_v49 }
  0xd3   :  { %v6566_v46 = vld [vmem:[#allocation9 + $0xd60] sm:$0xf0] }
  0xd4   :  { %v7690_v47 = vld [vmem:[#allocation9 + $0xf44] sm:$0xf]  ;;  %v6569_v52 = vor.u32 %v7626_v45, %v6566_v46  ;;  %3439 = vmatpush.bf16.msrb.mxu1 %v6313_v50 }
  0xd5   :  { %v6822_v48 = vld [vmem:[#allocation9 + $0xf60] sm:$0xf0] }
  0xd6   :  { %v7490_v53 = vld [vmem:[#allocation9 + $0x904] sm:$0xf]  ;;  %v6825_v60 = vor.u32 %v7690_v47, %v6822_v48  ;;  %3452 = vmatpush.bf16.msrb.mxu2 %v6569_v52 }
  0xd7   :  { %v6022_v56 = vld [vmem:[#allocation9 + $0x920] sm:$0xf0] }
  0xd8   :  { %v7554_v58 = vld [vmem:[#allocation9 + $0xb04] sm:$0xf]  ;;  %v6025_v2 = vor.u32 %v7490_v53, %v6022_v56  ;;  %3465 = vmatpush.bf16.msrb.mxu3 %v6825_v60  ;;  %v5100_v56 = vld [vmem:[#allocation9 + $0x1c8] sm:$0xf] }
  0xd9   :  { %v6278_v61 = vld [vmem:[#allocation9 + $0xb20] sm:$0xf0]  ;;  %v5356_v60 = vld [vmem:[#allocation9 + $0x3c8] sm:$0xf] }
  0xda   :  { %v7618_v62 = vld [vmem:[#allocation9 + $0xd04] sm:$0xf]  ;;  %v6281_v3 = vor.u32 %v7554_v58, %v6278_v61  ;;  %3427 = vmatpush.bf16.msrb.mxu0 %v6025_v2  ;;  %v7263_v58 = vld [vmem:[#allocation9 + $0x1e4] sm:$0xf0] }
  0xdb   :  { %v6534_v63 = vld [vmem:[#allocation9 + $0xd20] sm:$0xf0] }
  0xdc   :  { %v7682_v0 = vld [vmem:[#allocation9 + $0xf04] sm:$0xf]  ;;  %v6537_v4 = vor.u32 %v7618_v62, %v6534_v63  ;;  %3440 = vmatpush.bf16.msrb.mxu1 %v6281_v3  ;;  %v7327_v62 = vld [vmem:[#allocation9 + $0x3e4] sm:$0xf0] }
  0xdd   :  { %v6790_v1 = vld [vmem:[#allocation9 + $0xf20] sm:$0xf0]  ;;  %v5612_v63 = vld [vmem:[#allocation9 + $0x5c8] sm:$0xf] }
  0xde   :  { %v7482_v5 = vld [vmem:[#allocation9 + $0x8c4] sm:$0xf]  ;;  %v6793_v8 = vor.u32 %v7682_v0, %v6790_v1  ;;  %3453 = vmatpush.bf16.msrb.mxu2 %v6537_v4  ;;  %v7391_v0 = vld [vmem:[#allocation9 + $0x5e4] sm:$0xf0] }
  0xdf   :  { %v5990_v6 = vld [vmem:[#allocation9 + $0x8e0] sm:$0xf0]  ;;  %v5868_v3 = vld [vmem:[#allocation9 + $0x7c8] sm:$0xf] }
  0xe0   :  { %v7546_v7 = vld [vmem:[#allocation9 + $0xac4] sm:$0xf]  ;;  %v5993_v14 = vor.u32 %v7482_v5, %v5990_v6  ;;  %3466 = vmatpush.bf16.msrb.mxu3 %v6793_v8  ;;  %v7455_v4 = vld [vmem:[#allocation9 + $0x7e4] sm:$0xf0]  ;;  %v5101_v6 = vor.u32 %v7263_v58, %v5100_v56  ;;  %v5613_v8 = vor.u32 %v7391_v0, %v5612_v63 }
  0xe1   :  { %v6246_v9 = vld [vmem:[#allocation9 + $0xae0] sm:$0xf0]  ;;  %v5484_v56 = vld [vmem:[#allocation9 + $0x4c8] sm:$0xf] }
  0xe2   :  { %v7610_v10 = vld [vmem:[#allocation9 + $0xcc4] sm:$0xf]  ;;  %v6249_v15 = vor.u32 %v7546_v7, %v6246_v9  ;;  %3428 = vmatpush.bf16.msrb.mxu0 %v5993_v14  ;;  %v5357_v7 = vor.u32 %v7327_v62, %v5356_v60  ;;  %v5068_v9 = vld [vmem:[#allocation9 + $0x188] sm:$0xf] }
  0xe3   :  { %v6502_v11 = vld [vmem:[#allocation9 + $0xce0] sm:$0xf0]  ;;  %v5580_v14 = vld [vmem:[#allocation9 + $0x588] sm:$0xf] }
  0xe4   :  { %v7674_v12 = vld [vmem:[#allocation9 + $0xec4] sm:$0xf]  ;;  %v6505_v16 = vor.u32 %v7610_v10, %v6502_v11  ;;  %3441 = vmatpush.bf16.msrb.mxu1 %v6249_v15  ;;  %v7255_v10 = vld [vmem:[#allocation9 + $0x1a4] sm:$0xf0] }
  0xe5   :  { %v6758_v13 = vld [vmem:[#allocation9 + $0xee0] sm:$0xf0]  ;;  %v5324_v11 = vld [vmem:[#allocation9 + $0x388] sm:$0xf] }
  0xe6   :  { %v7474_v17 = vld [vmem:[#allocation9 + $0x884] sm:$0xf]  ;;  %v6761_v21 = vor.u32 %v7674_v12, %v6758_v13  ;;  %3454 = vmatpush.bf16.msrb.mxu2 %v6505_v16  ;;  %v5869_v12 = vor.u32 %v7455_v4, %v5868_v3  ;;  %v7319_v13 = vld [vmem:[#allocation9 + $0x3a4] sm:$0xf0] }
  0xe7   :  { %v5958_v18 = vld [vmem:[#allocation9 + $0x8a0] sm:$0xf0]  ;;  %v7383_v15 = vld [vmem:[#allocation9 + $0x5a4] sm:$0xf0] }
  0xe8   :  { %v7538_v20 = vld [vmem:[#allocation9 + $0xa84] sm:$0xf]  ;;  %v5961_v27 = vor.u32 %v7474_v17, %v5958_v18  ;;  %3467 = vmatpush.bf16.msrb.mxu3 %v6761_v21  ;;  %v5836_v16 = vld [vmem:[#allocation9 + $0x788] sm:$0xf]  ;;  %v5069_v18 = vor.u32 %v7255_v10, %v5068_v9  ;;  %v5581_v21 = vor.u32 %v7383_v15, %v5580_v14 }
  0xe9   :  { %v6214_v22 = vld [vmem:[#allocation9 + $0xaa0] sm:$0xf0]  ;;  %v7447_v17 = vld [vmem:[#allocation9 + $0x7a4] sm:$0xf0] }
  0xea   :  { %v7602_v23 = vld [vmem:[#allocation9 + $0xc84] sm:$0xf]  ;;  %v6217_v28 = vor.u32 %v7538_v20, %v6214_v22  ;;  %3429 = vmatpush.bf16.msrb.mxu0 %v5961_v27  ;;  %v5325_v20 = vor.u32 %v7319_v13, %v5324_v11  ;;  %v5036_v22 = vld [vmem:[#allocation9 + $0x148] sm:$0xf] }
  0xeb   :  { %v6470_v24 = vld [vmem:[#allocation9 + $0xca0] sm:$0xf0]  ;;  %v5548_v27 = vld [vmem:[#allocation9 + $0x548] sm:$0xf] }
  0xec   :  { %v7666_v25 = vld [vmem:[#allocation9 + $0xe84] sm:$0xf]  ;;  %v6473_v29 = vor.u32 %v7602_v23, %v6470_v24  ;;  %3442 = vmatpush.bf16.msrb.mxu1 %v6217_v28  ;;  %v7247_v23 = vld [vmem:[#allocation9 + $0x164] sm:$0xf0] }
  0xed   :  { %v6726_v26 = vld [vmem:[#allocation9 + $0xea0] sm:$0xf0]  ;;  %v5292_v24 = vld [vmem:[#allocation9 + $0x348] sm:$0xf] }
  0xee   :  { %v7466_v30 = vld [vmem:[#allocation9 + $0x844] sm:$0xf]  ;;  %v6729_v35 = vor.u32 %v7666_v25, %v6726_v26  ;;  %3455 = vmatpush.bf16.msrb.mxu2 %v6473_v29  ;;  %v5837_v25 = vor.u32 %v7447_v17, %v5836_v16  ;;  %v7311_v26 = vld [vmem:[#allocation9 + $0x364] sm:$0xf0] }
  0xef   :  { %v5926_v31 = vld [vmem:[#allocation9 + $0x860] sm:$0xf0]  ;;  %v7375_v28 = vld [vmem:[#allocation9 + $0x564] sm:$0xf0] }
  0xf0   :  { %v7530_v34 = vld [vmem:[#allocation9 + $0xa44] sm:$0xf]  ;;  %v5929_v41 = vor.u32 %v7466_v30, %v5926_v31  ;;  %3468 = vmatpush.bf16.msrb.mxu3 %v6729_v35  ;;  %v5804_v29 = vld [vmem:[#allocation9 + $0x748] sm:$0xf]  ;;  %v5037_v31 = vor.u32 %v7247_v23, %v5036_v22  ;;  %v5549_v35 = vor.u32 %v7375_v28, %v5548_v27 }
  0xf1   :  { %v6182_v36 = vld [vmem:[#allocation9 + $0xa60] sm:$0xf0]  ;;  %v7439_v30 = vld [vmem:[#allocation9 + $0x764] sm:$0xf0] }
  0xf2   :  { %v7594_v37 = vld [vmem:[#allocation9 + $0xc44] sm:$0xf]  ;;  %v6185_v44 = vor.u32 %v7530_v34, %v6182_v36  ;;  %3430 = vmatpush.bf16.msrb.mxu0 %v5929_v41  ;;  %v5293_v34 = vor.u32 %v7311_v26, %v5292_v24  ;;  %v5004_v36 = vld [vmem:[#allocation9 + $0x108] sm:$0xf] }
  0xf3   :  { %v6438_v39 = vld [vmem:[#allocation9 + $0xc60] sm:$0xf0]  ;;  %v5516_v41 = vld [vmem:[#allocation9 + $0x508] sm:$0xf] }
  0xf4   :  { %v7658_v40 = vld [vmem:[#allocation9 + $0xe44] sm:$0xf]  ;;  %v6441_v45 = vor.u32 %v7594_v37, %v6438_v39  ;;  %3443 = vmatpush.bf16.msrb.mxu1 %v6185_v44  ;;  %v7239_v37 = vld [vmem:[#allocation9 + $0x124] sm:$0xf0] }
  0xf5   :  { %v6694_v59 = vld [vmem:[#allocation9 + $0xe60] sm:$0xf0]  ;;  %v5260_v39 = vld [vmem:[#allocation9 + $0x308] sm:$0xf] }
  0xf6   :  { %v7458_v42 = vld [vmem:[#allocation9 + $0x804] sm:$0xf]  ;;  %v6697_v49 = vor.u32 %v7658_v40, %v6694_v59  ;;  %3456 = vmatpush.bf16.msrb.mxu2 %v6441_v45  ;;  %v5805_v40 = vor.u32 %v7439_v30, %v5804_v29  ;;  %v7303_v59 = vld [vmem:[#allocation9 + $0x324] sm:$0xf0]  ;;  %v5005_v45 = vor.u32 %v7239_v37, %v5004_v36 }
  0xf7   :  { %v5894_v43 = vld [vmem:[#allocation9 + $0x820] sm:$0xf0]  ;;  %v7431_v44 = vld [vmem:[#allocation9 + $0x724] sm:$0xf0] }
  0xf8   :  { %v7522_v46 = vld [vmem:[#allocation9 + $0xa04] sm:$0xf]  ;;  %v5897_v61 = vor.u32 %v7458_v42, %v5894_v43  ;;  %3469 = vmatpush.bf16.msrb.mxu3 %v6697_v49  ;;  %v7367_v42 = vld [vmem:[#allocation9 + $0x524] sm:$0xf0] }
  0xf9   :  { %v6150_v47 = vld [vmem:[#allocation9 + $0xa20] sm:$0xf0]  ;;  %v5772_v43 = vld [vmem:[#allocation9 + $0x708] sm:$0xf] }
  0xfa   :  { %v7586_v48 = vld [vmem:[#allocation9 + $0xc04] sm:$0xf]  ;;  %v6153_v1 = vor.u32 %v7522_v46, %v6150_v47  ;;  %3431 = vmatpush.bf16.msrb.mxu0 %v5897_v61  ;;  %v5261_v46 = vor.u32 %v7303_v59, %v5260_v39  ;;  %v5517_v47 = vor.u32 %v7367_v42, %v5516_v41  ;;  %v7231_v49 = vld [vmem:[#allocation9 + $0xe4] sm:$0xf0] }
  0xfb   :  { %v6406_v50 = vld [vmem:[#allocation9 + $0xc20] sm:$0xf0]  ;;  %v7359_v58 = vld [vmem:[#allocation9 + $0x4e4] sm:$0xf0] }
  0xfc   :  { %v7650_v52 = vld [vmem:[#allocation9 + $0xe04] sm:$0xf]  ;;  %v6409_v2 = vor.u32 %v7586_v48, %v6406_v50  ;;  %3444 = vmatpush.bf16.msrb.mxu1 %v6153_v1  ;;  %v4972_v48 = vld [vmem:[#allocation9 + $0xc8] sm:$0xf]  ;;  %v5485_v0 = vor.u32 %v7359_v58, %v5484_v56 }
  0xfd   :  { %v6662_v53 = vld [vmem:[#allocation9 + $0xe20] sm:$0xf0]  ;;  %3432 = vmatmul.bf16.vlgmr.msrb.gmra.mxu0 %v8099_v54  ;;  %v5228_v50 = vld [vmem:[#allocation9 + $0x2c8] sm:$0xf]  ;;  %v4973_v62 = vor.u32 %v7231_v49, %v4972_v48 }
  0xfe   :  { %v6665_v5 = vor.u32 %v7650_v52, %v6662_v53  ;;  %3457 = vmatpush.bf16.msrb.mxu2 %v6409_v2  ;;  %3476 = vmatpush.bf16.msra.mxu0 %v5101_v6  ;;  %v5773_v52 = vor.u32 %v7431_v44, %v5772_v43  ;;  %v7295_v53 = vld [vmem:[#allocation9 + $0x2e4] sm:$0xf0] }
  0xff   :  { %3445 = vmatmul.bf16.vlgmr.msrb.gmra.mxu1 %v8103_v57  ;;  %v5740_v60 = vld [vmem:[#allocation9 + $0x6c8] sm:$0xf]  ;;  %v5229_v63 = vor.u32 %v7295_v53, %v5228_v50 }
 0x100   :  { %3470 = vmatpush.bf16.msrb.mxu3 %v6665_v5  ;;  %3489 = vmatpush.bf16.msra.mxu1 %v5357_v7  ;;  %v7423_v61 = vld [vmem:[#allocation9 + $0x6e4] sm:$0xf0] }
 0x101   :  { %3458 = vmatmul.bf16.vlgmr.msrb.gmra.mxu2 %v8097_v51  ;;  %v4940_v1 = vld [vmem:[#allocation9 + $0x88] sm:$0xf]  ;;  %v5741_v4 = vor.u32 %v7423_v61, %v5740_v60 }
 0x102   :  { %3502 = vmatpush.bf16.msra.mxu2 %v5613_v8  ;;  %3477 = vmatpush.bf16.msra.mxu0 %v5069_v18  ;;  %v7223_v2 = vld [vmem:[#allocation9 + $0xa4] sm:$0xf0] }
 0x103   :  { %3471 = vmatmul.bf16.vlgmr.msrb.gmra.mxu3 %v8101_v55  ;;  %v5196_v3 = vld [vmem:[#allocation9 + $0x288] sm:$0xf]  ;;  %v4941_v10 = vor.u32 %v7223_v2, %v4940_v1 }
 0x104   :  { %3515 = vmatpush.bf16.msra.mxu3 %v5869_v12  ;;  %3490 = vmatpush.bf16.msra.mxu1 %v5325_v20  ;;  %v7287_v5 = vld [vmem:[#allocation9 + $0x2a4] sm:$0xf0] }
 0x105   :  { %v5452_v6 = vld [vmem:[#allocation9 + $0x488] sm:$0xf]  ;;  %v5197_v11 = vor.u32 %v7287_v5, %v5196_v3 }
 0x106   :  { %3503 = vmatpush.bf16.msra.mxu2 %v5581_v21  ;;  %3478 = vmatpush.bf16.msra.mxu0 %v5037_v31  ;;  %v7351_v7 = vld [vmem:[#allocation9 + $0x4a4] sm:$0xf0] }
 0x107   :  { %v5708_v8 = vld [vmem:[#allocation9 + $0x688] sm:$0xf]  ;;  %v5453_v12 = vor.u32 %v7351_v7, %v5452_v6 }
 0x108   :  { %3516 = vmatpush.bf16.msra.mxu3 %v5837_v25  ;;  %3491 = vmatpush.bf16.msra.mxu1 %v5293_v34  ;;  %v7415_v9 = vld [vmem:[#allocation9 + $0x6a4] sm:$0xf0] }
 0x109   :  { %v4908_v13 = vld [vmem:[#allocation9 + $0x48] sm:$0xf]  ;;  %v5709_v16 = vor.u32 %v7415_v9, %v5708_v8 }
 0x10a   :  { %3504 = vmatpush.bf16.msra.mxu2 %v5549_v35  ;;  %3479 = vmatpush.bf16.msra.mxu0 %v5005_v45  ;;  %v7215_v14 = vld [vmem:[#allocation9 + $0x64] sm:$0xf0] }
 0x10b   :  { %v5164_v15 = vld [vmem:[#allocation9 + $0x248] sm:$0xf]  ;;  %v4909_v23 = vor.u32 %v7215_v14, %v4908_v13 }
 0x10c   :  { %3517 = vmatpush.bf16.msra.mxu3 %v5805_v40  ;;  %3492 = vmatpush.bf16.msra.mxu1 %v5261_v46  ;;  %v7279_v17 = vld [vmem:[#allocation9 + $0x264] sm:$0xf0] }
 0x10d   :  { %v5420_v18 = vld [vmem:[#allocation9 + $0x448] sm:$0xf]  ;;  %v5165_v26 = vor.u32 %v7279_v17, %v5164_v15 }
 0x10e   :  { %3505 = vmatpush.bf16.msra.mxu2 %v5517_v47  ;;  %3480 = vmatpush.bf16.msra.mxu0 %v4973_v62  ;;  %v7343_v20 = vld [vmem:[#allocation9 + $0x464] sm:$0xf0] }
 0x10f   :  { %v5676_v21 = vld [vmem:[#allocation9 + $0x648] sm:$0xf]  ;;  %v5421_v27 = vor.u32 %v7343_v20, %v5420_v18 }
 0x110   :  { %3518 = vmatpush.bf16.msra.mxu3 %v5773_v52  ;;  %3493 = vmatpush.bf16.msra.mxu1 %v5229_v63  ;;  %v7407_v22 = vld [vmem:[#allocation9 + $0x664] sm:$0xf0] }
 0x111   :  { %v4876_v24 = vld [vmem:[#allocation9 + $0x8] sm:$0xf]  ;;  %v5677_v31 = vor.u32 %v7407_v22, %v5676_v21 }
 0x112   :  { %3506 = vmatpush.bf16.msra.mxu2 %v5485_v0  ;;  %3481 = vmatpush.bf16.msra.mxu0 %v4941_v10  ;;  %v7207_v25 = vld [vmem:[#allocation9 + $0x24] sm:$0xf0] }
 0x113   :  { %v5132_v28 = vld [vmem:[#allocation9 + $0x208] sm:$0xf]  ;;  %v4877_v59 = vor.u32 %v7207_v25, %v4876_v24 }
 0x114   :  { %3519 = vmatpush.bf16.msra.mxu3 %v5741_v4  ;;  %3494 = vmatpush.bf16.msra.mxu1 %v5197_v11  ;;  %v7271_v29 = vld [vmem:[#allocation9 + $0x224] sm:$0xf0] }
 0x115   :  { %v5388_v30 = vld [vmem:[#allocation9 + $0x408] sm:$0xf]  ;;  %v5133_v44 = vor.u32 %v7271_v29, %v5132_v28 }
 0x116   :  { %3507 = vmatpush.bf16.msra.mxu2 %v5453_v12  ;;  %v7335_v34 = vld [vmem:[#allocation9 + $0x424] sm:$0xf0]  ;;  %3482 = vmatpush.bf16.msra.mxu0 %v4909_v23 }
 0x117   :  { %v5644_v35 = vld [vmem:[#allocation9 + $0x608] sm:$0xf]  ;;  %v5389_v45 = vor.u32 %v7335_v34, %v5388_v30 }
 0x118   :  { %3520 = vmatpush.bf16.msra.mxu3 %v5709_v16  ;;  %v7399_v36 = vld [vmem:[#allocation9 + $0x624] sm:$0xf0]  ;;  %3495 = vmatpush.bf16.msra.mxu1 %v5165_v26 }
 0x119   :  { %v6124_v37 = vld [vmem:[#allocation9 + $0x9c8] sm:$0xf]  ;;  %v5645_v48 = vor.u32 %v7399_v36, %v5644_v35 }
 0x11a   :  { %v7519_v39 = vld [vmem:[#allocation9 + $0x9e4] sm:$0xf0]  ;;  %3508 = vmatpush.bf16.msra.mxu2 %v5421_v27  ;;  %3483 = vmatpush.bf16.msra.mxu0 %v4877_v59 }
 0x11b   :  { %v6380_v40 = vld [vmem:[#allocation9 + $0xbc8] sm:$0xf]  ;;  %v6125_v49 = vor.u32 %v7519_v39, %v6124_v37 }
 0x11c   :  { %v7583_v41 = vld [vmem:[#allocation9 + $0xbe4] sm:$0xf0]  ;;  %3521 = vmatpush.bf16.msra.mxu3 %v5677_v31  ;;  %3496 = vmatpush.bf16.msra.mxu1 %v5133_v44 }
 0x11d   :  { %v6636_v42 = vld [vmem:[#allocation9 + $0xdc8] sm:$0xf]  ;;  %v6381_v50 = vor.u32 %v7583_v41, %v6380_v40  ;;  %3484 = vmatmul.bf16.vlgmr.msra.gmra.mxu0 %v8084_v32 }
 0x11e   :  { %v7647_v43 = vld [vmem:[#allocation9 + $0xde4] sm:$0xf0]  ;;  %3509 = vmatpush.bf16.msra.mxu2 %v5389_v45  ;;  %3528 = vmatpush.bf16.msrb.mxu0 %v6125_v49 }
 0x11f   :  { %v6892_v46 = vld [vmem:[#allocation9 + $0xfc8] sm:$0xf]  ;;  %v6637_v52 = vor.u32 %v7647_v43, %v6636_v42  ;;  %3497 = vmatmul.bf16.vlgmr.msra.gmra.mxu1 %v8088_v38 }
 0x120   :  { %v7711_v47 = vld [vmem:[#allocation9 + $0xfe4] sm:$0xf0]  ;;  %3522 = vmatpush.bf16.msra.mxu3 %v5645_v48  ;;  %3541 = vmatpush.bf16.msrb.mxu1 %v6381_v50 }
 0x121   :  { %v6092_v53 = vld [vmem:[#allocation9 + $0x988] sm:$0xf]  ;;  %v6893_v60 = vor.u32 %v7711_v47, %v6892_v46  ;;  %3510 = vmatmul.bf16.vlgmr.msra.gmra.mxu2 %v8080_v19 }
 0x122   :  { %v7511_v56 = vld [vmem:[#allocation9 + $0x9a4] sm:$0xf0]  ;;  %3554 = vmatpush.bf16.msrb.mxu2 %v6637_v52 }
 0x123   :  { %v6348_v58 = vld [vmem:[#allocation9 + $0xb88] sm:$0xf]  ;;  %v6093_v2 = vor.u32 %v7511_v56, %v6092_v53  ;;  %3523 = vmatmul.bf16.vlgmr.msra.gmra.mxu3 %v8086_v33 }
 0x124   :  { %v7575_v61 = vld [vmem:[#allocation9 + $0xba4] sm:$0xf0]  ;;  %3567 = vmatpush.bf16.msrb.mxu3 %v6893_v60 }
 0x125   :  { %v6604_v62 = vld [vmem:[#allocation9 + $0xd88] sm:$0xf]  ;;  %v6349_v3 = vor.u32 %v7575_v61, %v6348_v58  ;;  %3529 = vmatpush.bf16.msrb.mxu0 %v6093_v2  ;;  %v3277_v58 = vpop.f32.mrf.mxu0 }
 0x126   :  { %v7639_v63 = vld [vmem:[#allocation9 + $0xda4] sm:$0xf0] }
 0x127   :  { %v6860_v0 = vld [vmem:[#allocation9 + $0xf88] sm:$0xf]  ;;  %v6605_v4 = vor.u32 %v7639_v63, %v6604_v62  ;;  %3542 = vmatpush.bf16.msrb.mxu1 %v6349_v3 }
 0x128   :  { %v7703_v1 = vld [vmem:[#allocation9 + $0xfa4] sm:$0xf0] }
 0x129   :  { %v6060_v5 = vld [vmem:[#allocation9 + $0x948] sm:$0xf]  ;;  %v6861_v8 = vor.u32 %v7703_v1, %v6860_v0  ;;  %3555 = vmatpush.bf16.msrb.mxu2 %v6605_v4  ;;  %v3290_v1 = vpop.f32.mrf.mxu1 }
 0x12a   :  { %v7503_v6 = vld [vmem:[#allocation9 + $0x964] sm:$0xf0] }
 0x12b   :  { %v6316_v7 = vld [vmem:[#allocation9 + $0xb48] sm:$0xf]  ;;  %v6061_v14 = vor.u32 %v7503_v6, %v6060_v5  ;;  %3568 = vmatpush.bf16.msrb.mxu3 %v6861_v8  ;;  %v3291_v6 = vadd.f32 %v3290_v1, %v3277_v58  ;;  %v5838_v58 = vld [vmem:[#allocation9 + $0x7a8] sm:$0xf0] }
 0x12c   :  { %v7567_v9 = vld [vmem:[#allocation9 + $0xb64] sm:$0xf0]  ;;  %v5038_v1 = vld [vmem:[#allocation9 + $0x168] sm:$0xf0] }
 0x12d   :  { %v6572_v10 = vld [vmem:[#allocation9 + $0xd48] sm:$0xf]  ;;  %v6317_v15 = vor.u32 %v7567_v9, %v6316_v7  ;;  %3530 = vmatpush.bf16.msrb.mxu0 %v6061_v14  ;;  %v3303_v9 = vpop.f32.mrf.mxu2 }
 0x12e   :  { %v7631_v11 = vld [vmem:[#allocation9 + $0xd64] sm:$0xf0] }
 0x12f   :  { %v6828_v12 = vld [vmem:[#allocation9 + $0xf48] sm:$0xf]  ;;  %v6573_v16 = vor.u32 %v7631_v11, %v6572_v10  ;;  %3543 = vmatpush.bf16.msrb.mxu1 %v6317_v15 }
 0x130   :  { %v7695_v13 = vld [vmem:[#allocation9 + $0xf64] sm:$0xf0] }
 0x131   :  { %v6028_v17 = vld [vmem:[#allocation9 + $0x908] sm:$0xf]  ;;  %v6829_v21 = vor.u32 %v7695_v13, %v6828_v12  ;;  %3556 = vmatpush.bf16.msrb.mxu2 %v6573_v16  ;;  %v3304_v13 = vadd.f32 %v3303_v9, %v3291_v6  ;;  %v5550_v6 = vld [vmem:[#allocation9 + $0x568] sm:$0xf0] }
 0x132   :  { %v7495_v18 = vld [vmem:[#allocation9 + $0x924] sm:$0xf0] }
 0x133   :  { %v6284_v20 = vld [vmem:[#allocation9 + $0xb08] sm:$0xf]  ;;  %v6029_v27 = vor.u32 %v7495_v18, %v6028_v17  ;;  %3569 = vmatpush.bf16.msrb.mxu3 %v6829_v21 }
 0x134   :  { %v7559_v22 = vld [vmem:[#allocation9 + $0xb24] sm:$0xf0] }
 0x135   :  { %v6540_v23 = vld [vmem:[#allocation9 + $0xd08] sm:$0xf]  ;;  %v6285_v28 = vor.u32 %v7559_v22, %v6284_v20  ;;  %3531 = vmatpush.bf16.msrb.mxu0 %v6029_v27  ;;  %v7323_v27 = vld [vmem:[#allocation9 + $0x3cc] sm:$0xf] }
 0x136   :  { %v7623_v24 = vld [vmem:[#allocation9 + $0xd24] sm:$0xf0] }
 0x137   :  { %v6796_v25 = vld [vmem:[#allocation9 + $0xf08] sm:$0xf]  ;;  %v6541_v29 = vor.u32 %v7623_v24, %v6540_v23  ;;  %3544 = vmatpush.bf16.msrb.mxu1 %v6285_v28  ;;  %v3316_v24 = vpop.f32.mrf.mxu3 }
 0x138   :  { %v7687_v26 = vld [vmem:[#allocation9 + $0xf24] sm:$0xf0]  ;;  %v8121_v28 = vadd.f32 %v3316_v24, %v3304_v13  ;;  %v5006_v13 = vld [vmem:[#allocation9 + $0x128] sm:$0xf0] }
 0x139   :  { %v5996_v30 = vld [vmem:[#allocation9 + $0x8c8] sm:$0xf]  ;;  %v6797_v35 = vor.u32 %v7687_v26, %v6796_v25  ;;  %3557 = vmatpush.bf16.msrb.mxu2 %v6541_v29  ;;  %v7259_v25 = vld [vmem:[#allocation9 + $0x1cc] sm:$0xf] }
 0x13a   :  { %v7487_v31 = vld [vmem:[#allocation9 + $0x8e4] sm:$0xf0]  ;;  %v5102_v26 = vld [vmem:[#allocation9 + $0x1e8] sm:$0xf0] }
 0x13b   :  { %v6252_v34 = vld [vmem:[#allocation9 + $0xac8] sm:$0xf]  ;;  %v5997_v41 = vor.u32 %v7487_v31, %v5996_v30  ;;  %3570 = vmatpush.bf16.msrb.mxu3 %v6797_v35  ;;  %v5358_v30 = vld [vmem:[#allocation9 + $0x3e8] sm:$0xf0]  ;;  %v3279_v35 = vpop.f32.mrf.mxu0 }
 0x13c   :  { %v7551_v36 = vld [vmem:[#allocation9 + $0xae4] sm:$0xf0]  ;;  %v7387_v31 = vld [vmem:[#allocation9 + $0x5cc] sm:$0xf] }
 0x13d   :  { %v6508_v37 = vld [vmem:[#allocation9 + $0xcc8] sm:$0xf]  ;;  %v6253_v42 = vor.u32 %v7551_v36, %v6252_v34  ;;  %3532 = vmatpush.bf16.msrb.mxu0 %v5997_v41  ;;  %v5614_v34 = vld [vmem:[#allocation9 + $0x5e8] sm:$0xf0] }
 0x13e   :  { %v7615_v39 = vld [vmem:[#allocation9 + $0xce4] sm:$0xf0]  ;;  %v5230_v35 = vld [vmem:[#allocation9 + $0x2e8] sm:$0xf0] }
 0x13f   :  { %v6764_v40 = vld [vmem:[#allocation9 + $0xec8] sm:$0xf]  ;;  %v6509_v43 = vor.u32 %v7615_v39, %v6508_v37  ;;  %3545 = vmatpush.bf16.msrb.mxu1 %v6253_v42  ;;  %v7451_v39 = vld [vmem:[#allocation9 + $0x7cc] sm:$0xf]  ;;  %v5105_v42 = vor.u32 %v7259_v25, %v5102_v26 }
 0x140   :  { %v7679_v59 = vld [vmem:[#allocation9 + $0xee4] sm:$0xf0]  ;;  %v7227_v26 = vld [vmem:[#allocation9 + $0xcc] sm:$0xf] }
 0x141   :  { %v5964_v44 = vld [vmem:[#allocation9 + $0x888] sm:$0xf]  ;;  %v6765_v47 = vor.u32 %v7679_v59, %v6764_v40  ;;  %3558 = vmatpush.bf16.msrb.mxu2 %v6509_v43  ;;  %v5870_v40 = vld [vmem:[#allocation9 + $0x7e8] sm:$0xf0]  ;;  %v3292_v59 = vpop.f32.mrf.mxu1  ;;  %v5361_v43 = vor.u32 %v7323_v27, %v5358_v30 }
 0x142   :  { %v7479_v45 = vld [vmem:[#allocation9 + $0x8a4] sm:$0xf0]  ;;  %v4974_v27 = vld [vmem:[#allocation9 + $0xe8] sm:$0xf0] }
 0x143   :  { %v6220_v46 = vld [vmem:[#allocation9 + $0xa88] sm:$0xf]  ;;  %v5965_v56 = vor.u32 %v7479_v45, %v5964_v44  ;;  %3571 = vmatpush.bf16.msrb.mxu3 %v6765_v47  ;;  %v5617_v44 = vor.u32 %v7387_v31, %v5614_v34  ;;  %v7251_v45 = vld [vmem:[#allocation9 + $0x18c] sm:$0xf] }
 0x144   :  { %v7543_v48 = vld [vmem:[#allocation9 + $0xaa4] sm:$0xf0]  ;;  %v7315_v47 = vld [vmem:[#allocation9 + $0x38c] sm:$0xf] }
 0x145   :  { %v6476_v49 = vld [vmem:[#allocation9 + $0xc88] sm:$0xf]  ;;  %v6221_v60 = vor.u32 %v7543_v48, %v6220_v46  ;;  %3533 = vmatpush.bf16.msrb.mxu0 %v5965_v56  ;;  %v5070_v46 = vld [vmem:[#allocation9 + $0x1a8] sm:$0xf0]  ;;  %v3305_v48 = vpop.f32.mrf.mxu2 }
 0x146   :  { %v7607_v50 = vld [vmem:[#allocation9 + $0xca4] sm:$0xf0]  ;;  %v7443_v56 = vld [vmem:[#allocation9 + $0x78c] sm:$0xf] }
 0x147   :  { %v6732_v52 = vld [vmem:[#allocation9 + $0xe88] sm:$0xf]  ;;  %v6477_v61 = vor.u32 %v7607_v50, %v6476_v49  ;;  %3546 = vmatpush.bf16.msrb.mxu1 %v6221_v60  ;;  %v5873_v49 = vor.u32 %v7451_v39, %v5870_v40  ;;  %v5326_v50 = vld [vmem:[#allocation9 + $0x3a8] sm:$0xf0]  ;;  %v5073_v60 = vor.u32 %v7251_v45, %v5070_v46 }
 0x148   :  { %v7671_v53 = vld [vmem:[#allocation9 + $0xea4] sm:$0xf0]  ;;  %v7419_v39 = vld [vmem:[#allocation9 + $0x6cc] sm:$0xf] }
 0x149   :  { %v5932_v62 = vld [vmem:[#allocation9 + $0x848] sm:$0xf]  ;;  %v6733_v2 = vor.u32 %v7671_v53, %v6732_v52  ;;  %3559 = vmatpush.bf16.msrb.mxu2 %v6477_v61  ;;  %v7379_v52 = vld [vmem:[#allocation9 + $0x58c] sm:$0xf]  ;;  %v3318_v61 = vpop.f32.mrf.mxu3  ;;  %v3342_v31 = vpop.f32.mrf.mxu1 }
 0x14a   :  { %v7471_v63 = vld [vmem:[#allocation9 + $0x864] sm:$0xf0]  ;;  %v5582_v53 = vld [vmem:[#allocation9 + $0x5a8] sm:$0xf0] }
 0x14b   :  { %v6188_v0 = vld [vmem:[#allocation9 + $0xa48] sm:$0xf]  ;;  %v5933_v10 = vor.u32 %v7471_v63, %v5932_v62  ;;  %3572 = vmatpush.bf16.msrb.mxu3 %v6733_v2  ;;  %v5329_v62 = vor.u32 %v7315_v47, %v5326_v50  ;;  %v5585_v63 = vor.u32 %v7379_v52, %v5582_v53  ;;  %v7307_v2 = vld [vmem:[#allocation9 + $0x34c] sm:$0xf] }
 0x14c   :  { %v7535_v3 = vld [vmem:[#allocation9 + $0xa64] sm:$0xf0]  ;;  %v5742_v40 = vld [vmem:[#allocation9 + $0x6e8] sm:$0xf0] }
 0x14d   :  { %v6444_v4 = vld [vmem:[#allocation9 + $0xc48] sm:$0xf]  ;;  %v6189_v14 = vor.u32 %v7535_v3, %v6188_v0  ;;  %3534 = vmatpush.bf16.msrb.mxu0 %v5933_v10  ;;  %v7243_v0 = vld [vmem:[#allocation9 + $0x14c] sm:$0xf]  ;;  %v5841_v3 = vor.u32 %v7443_v56, %v5838_v58  ;;  %v3355_v47 = vpop.f32.mrf.mxu2 }
 0x14e   :  { %v7599_v5 = vld [vmem:[#allocation9 + $0xc64] sm:$0xf0]  ;;  %v5041_v9 = vor.u32 %v7243_v0, %v5038_v1  ;;  %v4942_v45 = vld [vmem:[#allocation9 + $0xa8] sm:$0xf0] }
 0x14f   :  { %v6700_v7 = vld [vmem:[#allocation9 + $0xe48] sm:$0xf]  ;;  %v6445_v15 = vor.u32 %v7599_v5, %v6444_v4  ;;  %3547 = vmatpush.bf16.msrb.mxu1 %v6189_v14  ;;  %v5294_v4 = vld [vmem:[#allocation9 + $0x368] sm:$0xf0] }
 0x150   :  { %v7663_v8 = vld [vmem:[#allocation9 + $0xe64] sm:$0xf0]  ;;  %v7371_v5 = vld [vmem:[#allocation9 + $0x54c] sm:$0xf]  ;;  %v5297_v10 = vor.u32 %v7307_v2, %v5294_v4 }
 0x151   :  { %v5900_v11 = vld [vmem:[#allocation9 + $0x808] sm:$0xf]  ;;  %v6701_v20 = vor.u32 %v7663_v8, %v6700_v7  ;;  %3560 = vmatpush.bf16.msrb.mxu2 %v6445_v15  ;;  %v7435_v7 = vld [vmem:[#allocation9 + $0x74c] sm:$0xf]  ;;  %v3368_v53 = vpop.f32.mrf.mxu3  ;;  %v3344_v4 = vpop.f32.mrf.mxu1 }
 0x152   :  { %v7463_v12 = vld [vmem:[#allocation9 + $0x824] sm:$0xf0]  ;;  %v5806_v8 = vld [vmem:[#allocation9 + $0x768] sm:$0xf0] }
 0x153   :  { %v6156_v16 = vld [vmem:[#allocation9 + $0xa08] sm:$0xf]  ;;  %v5901_v29 = vor.u32 %v7463_v12, %v5900_v11  ;;  %3573 = vmatpush.bf16.msrb.mxu3 %v6701_v20  ;;  %v5553_v11 = vor.u32 %v7371_v5, %v5550_v6  ;;  %v7235_v12 = vld [vmem:[#allocation9 + $0x10c] sm:$0xf]  ;;  %v5809_v15 = vor.u32 %v7435_v7, %v5806_v8 }
 0x154   :  { %v7527_v17 = vld [vmem:[#allocation9 + $0xa24] sm:$0xf0]  ;;  %v7299_v14 = vld [vmem:[#allocation9 + $0x30c] sm:$0xf] }
 0x155   :  { %v6412_v18 = vld [vmem:[#allocation9 + $0xc08] sm:$0xf]  ;;  %v6157_v36 = vor.u32 %v7527_v17, %v6156_v16  ;;  %3535 = vmatpush.bf16.msrb.mxu0 %v5901_v29  ;;  %v5262_v16 = vld [vmem:[#allocation9 + $0x328] sm:$0xf0] }
 0x156   :  { %v7591_v21 = vld [vmem:[#allocation9 + $0xc24] sm:$0xf0]  ;;  %v7363_v17 = vld [vmem:[#allocation9 + $0x50c] sm:$0xf]  ;;  %v5265_v24 = vor.u32 %v7299_v14, %v5262_v16 }
 0x157   :  { %v6668_v22 = vld [vmem:[#allocation9 + $0xe08] sm:$0xf]  ;;  %v6413_v37 = vor.u32 %v7591_v21, %v6412_v18  ;;  %3548 = vmatpush.bf16.msrb.mxu1 %v6157_v36  ;;  %v5518_v18 = vld [vmem:[#allocation9 + $0x528] sm:$0xf0] }
 0x158   :  { %v7655_v23 = vld [vmem:[#allocation9 + $0xe24] sm:$0xf0]  ;;  %3536 = vmatmul.bf16.vlgmr.msrb.gmra.mxu0 %v8099_v54  ;;  %v7427_v20 = vld [vmem:[#allocation9 + $0x70c] sm:$0xf]  ;;  %v5521_v25 = vor.u32 %v7363_v17, %v5518_v18 }
 0x159   :  { %v6669_v41 = vor.u32 %v7655_v23, %v6668_v22  ;;  %3561 = vmatpush.bf16.msrb.mxu2 %v6413_v37  ;;  %3580 = vmatpush.bf16.msra.mxu0 %v5105_v42  ;;  %v5774_v21 = vld [vmem:[#allocation9 + $0x728] sm:$0xf0]  ;;  %v5009_v22 = vor.u32 %v7235_v12, %v5006_v13  ;;  %v3329_v23 = vpop.f32.mrf.mxu0 }
 0x15a   :  { %3549 = vmatmul.bf16.vlgmr.msrb.gmra.mxu1 %v8103_v57  ;;  %v7291_v29 = vld [vmem:[#allocation9 + $0x2cc] sm:$0xf]  ;;  %v3330_v30 = vadd.f32 %v3329_v23, %v8121_v28  ;;  %v5777_v34 = vor.u32 %v7427_v20, %v5774_v21  ;;  %v5745_v28 = vor.u32 %v7419_v39, %v5742_v40  ;;  %v3357_v20 = vpop.f32.mrf.mxu2 }
 0x15b   :  { %3574 = vmatpush.bf16.msrb.mxu3 %v6669_v41  ;;  %3593 = vmatpush.bf16.msra.mxu1 %v5361_v43  ;;  %v7355_v36 = vld [vmem:[#allocation9 + $0x4cc] sm:$0xf]  ;;  %v4977_v41 = vor.u32 %v7227_v26, %v4974_v27  ;;  %v5233_v42 = vor.u32 %v7291_v29, %v5230_v35 }
 0x15c   :  { %3562 = vmatmul.bf16.vlgmr.msrb.gmra.mxu2 %v8097_v51  ;;  %v5486_v37 = vld [vmem:[#allocation9 + $0x4e8] sm:$0xf0]  ;;  %v3343_v59 = vadd.f32 %v3342_v31, %v3330_v30 }
 0x15d   :  { %3606 = vmatpush.bf16.msra.mxu2 %v5617_v44  ;;  %3581 = vmatpush.bf16.msra.mxu0 %v5073_v60  ;;  %v5489_v43 = vor.u32 %v7355_v36, %v5486_v37  ;;  %v7219_v44 = vld [vmem:[#allocation9 + $0x8c] sm:$0xf] }
 0x15e   :  { %3575 = vmatmul.bf16.vlgmr.msrb.gmra.mxu3 %v8101_v55  ;;  %v7283_v46 = vld [vmem:[#allocation9 + $0x28c] sm:$0xf]  ;;  %v3356_v52 = vadd.f32 %v3355_v47, %v3343_v59  ;;  %v4945_v60 = vor.u32 %v7219_v44, %v4942_v45 }
 0x15f   :  { %3619 = vmatpush.bf16.msra.mxu3 %v5873_v49  ;;  %3594 = vmatpush.bf16.msra.mxu1 %v5329_v62  ;;  %v5198_v48 = vld [vmem:[#allocation9 + $0x2a8] sm:$0xf0] }
 0x160   :  { %v7347_v49 = vld [vmem:[#allocation9 + $0x48c] sm:$0xf]  ;;  %v8128_v61 = vadd.f32 %v3368_v53, %v3356_v52 }
 0x161   :  { %3607 = vmatpush.bf16.msra.mxu2 %v5585_v63  ;;  %3582 = vmatpush.bf16.msra.mxu0 %v5041_v9  ;;  %v5454_v50 = vld [vmem:[#allocation9 + $0x4a8] sm:$0xf0]  ;;  %v3331_v62 = vpop.f32.mrf.mxu0  ;;  %v5201_v63 = vor.u32 %v7283_v46, %v5198_v48 }
 0x162   :  { %v7411_v56 = vld [vmem:[#allocation9 + $0x68c] sm:$0xf]  ;;  %v5457_v0 = vor.u32 %v7347_v49, %v5454_v50 }
 0x163   :  { %3620 = vmatpush.bf16.msra.mxu3 %v5841_v3  ;;  %3595 = vmatpush.bf16.msra.mxu1 %v5297_v10  ;;  %v5710_v58 = vld [vmem:[#allocation9 + $0x6a8] sm:$0xf0] }
 0x164   :  { %v7211_v1 = vld [vmem:[#allocation9 + $0x4c] sm:$0xf]  ;;  %v5713_v5 = vor.u32 %v7411_v56, %v5710_v58 }
 0x165   :  { %3608 = vmatpush.bf16.msra.mxu2 %v5553_v11  ;;  %3583 = vmatpush.bf16.msra.mxu0 %v5009_v22  ;;  %v4910_v2 = vld [vmem:[#allocation9 + $0x68] sm:$0xf0] }
 0x166   :  { %v7275_v3 = vld [vmem:[#allocation9 + $0x24c] sm:$0xf]  ;;  %v4913_v11 = vor.u32 %v7211_v1, %v4910_v2 }
 0x167   :  { %3621 = vmatpush.bf16.msra.mxu3 %v5809_v15  ;;  %3596 = vmatpush.bf16.msra.mxu1 %v5265_v24  ;;  %v5166_v6 = vld [vmem:[#allocation9 + $0x268] sm:$0xf0] }
 0x168   :  { %v7339_v7 = vld [vmem:[#allocation9 + $0x44c] sm:$0xf]  ;;  %v5169_v14 = vor.u32 %v7275_v3, %v5166_v6 }
 0x169   :  { %3609 = vmatpush.bf16.msra.mxu2 %v5521_v25  ;;  %3584 = vmatpush.bf16.msra.mxu0 %v4977_v41  ;;  %v5422_v8 = vld [vmem:[#allocation9 + $0x468] sm:$0xf0]  ;;  %v3370_v25 = vpop.f32.mrf.mxu3  ;;  %v3381_v20 = vpop.f32.mrf.mxu0 }
 0x16a   :  { %v7403_v9 = vld [vmem:[#allocation9 + $0x64c] sm:$0xf]  ;;  %v5425_v15 = vor.u32 %v7339_v7, %v5422_v8 }
 0x16b   :  { %3622 = vmatpush.bf16.msra.mxu3 %v5777_v34  ;;  %3597 = vmatpush.bf16.msra.mxu1 %v5233_v42  ;;  %v5678_v10 = vld [vmem:[#allocation9 + $0x668] sm:$0xf0] }
 0x16c   :  { %v7203_v12 = vld [vmem:[#allocation9 + $0xc] sm:$0xf]  ;;  %v5681_v21 = vor.u32 %v7403_v9, %v5678_v10 }
 0x16d   :  { %3610 = vmatpush.bf16.msra.mxu2 %v5489_v43  ;;  %3585 = vmatpush.bf16.msra.mxu0 %v4945_v60  ;;  %v4878_v13 = vld [vmem:[#allocation9 + $0x28] sm:$0xf0] }
 0x16e   :  { %v7267_v16 = vld [vmem:[#allocation9 + $0x20c] sm:$0xf]  ;;  %v4881_v30 = vor.u32 %v7203_v12, %v4878_v13 }
 0x16f   :  { %3623 = vmatpush.bf16.msra.mxu3 %v5745_v28  ;;  %3598 = vmatpush.bf16.msra.mxu1 %v5201_v63  ;;  %v5134_v17 = vld [vmem:[#allocation9 + $0x228] sm:$0xf0] }
 0x170   :  { %v7331_v18 = vld [vmem:[#allocation9 + $0x40c] sm:$0xf]  ;;  %v5137_v36 = vor.u32 %v7267_v16, %v5134_v17 }
 0x171   :  { %3611 = vmatpush.bf16.msra.mxu2 %v5457_v0  ;;  %v5390_v22 = vld [vmem:[#allocation9 + $0x428] sm:$0xf0]  ;;  %3586 = vmatpush.bf16.msra.mxu0 %v4913_v11 }
 0x172   :  { %v7395_v23 = vld [vmem:[#allocation9 + $0x60c] sm:$0xf]  ;;  %v5393_v37 = vor.u32 %v7331_v18, %v5390_v22 }
 0x173   :  { %3624 = vmatpush.bf16.msra.mxu3 %v5713_v5  ;;  %v5646_v24 = vld [vmem:[#allocation9 + $0x628] sm:$0xf0]  ;;  %3599 = vmatpush.bf16.msra.mxu1 %v5169_v14 }
 0x174   :  { %v7515_v26 = vld [vmem:[#allocation9 + $0x9cc] sm:$0xf]  ;;  %v5649_v59 = vor.u32 %v7395_v23, %v5646_v24 }
 0x175   :  { %v6126_v27 = vld [vmem:[#allocation9 + $0x9e8] sm:$0xf0]  ;;  %3612 = vmatpush.bf16.msra.mxu2 %v5425_v15  ;;  %3587 = vmatpush.bf16.msra.mxu0 %v4881_v30 }
 0x176   :  { %v7579_v29 = vld [vmem:[#allocation9 + $0xbcc] sm:$0xf]  ;;  %v6129_v41 = vor.u32 %v7515_v26, %v6126_v27  ;;  %v3394_v26 = vpop.f32.mrf.mxu1 }
 0x177   :  { %v6382_v31 = vld [vmem:[#allocation9 + $0xbe8] sm:$0xf0]  ;;  %3625 = vmatpush.bf16.msra.mxu3 %v5681_v21  ;;  %3600 = vmatpush.bf16.msra.mxu1 %v5137_v36 }
 0x178   :  { %v7643_v34 = vld [vmem:[#allocation9 + $0xdcc] sm:$0xf]  ;;  %v6385_v42 = vor.u32 %v7579_v29, %v6382_v31  ;;  %3588 = vmatmul.bf16.vlgmr.msra.gmra.mxu0 %v8084_v32 }
 0x179   :  { %v6638_v35 = vld [vmem:[#allocation9 + $0xde8] sm:$0xf0]  ;;  %3613 = vmatpush.bf16.msra.mxu2 %v5393_v37  ;;  %3632 = vmatpush.bf16.msrb.mxu0 %v6129_v41 }
 0x17a   :  { %v7707_v39 = vld [vmem:[#allocation9 + $0xfcc] sm:$0xf]  ;;  %v6641_v43 = vor.u32 %v7643_v34, %v6638_v35  ;;  %3601 = vmatmul.bf16.vlgmr.msra.gmra.mxu1 %v8088_v38  ;;  %v3395_v34 = vadd.f32 %v3394_v26, %v3381_v20 }
 0x17b   :  { %v6894_v40 = vld [vmem:[#allocation9 + $0xfe8] sm:$0xf0]  ;;  %3626 = vmatpush.bf16.msra.mxu3 %v5649_v59  ;;  %3645 = vmatpush.bf16.msrb.mxu1 %v6385_v42 }
 0x17c   :  { %v7507_v44 = vld [vmem:[#allocation9 + $0x98c] sm:$0xf]  ;;  %v6897_v47 = vor.u32 %v7707_v39, %v6894_v40  ;;  %3614 = vmatmul.bf16.vlgmr.msra.gmra.mxu2 %v8080_v19 }
 0x17d   :  { %v6094_v45 = vld [vmem:[#allocation9 + $0x9a8] sm:$0xf0]  ;;  %3658 = vmatpush.bf16.msrb.mxu2 %v6641_v43  ;;  %v3407_v43 = vpop.f32.mrf.mxu2 }
 0x17e   :  { %v7571_v46 = vld [vmem:[#allocation9 + $0xb8c] sm:$0xf]  ;;  %v6097_v53 = vor.u32 %v7507_v44, %v6094_v45  ;;  %3627 = vmatmul.bf16.vlgmr.msra.gmra.mxu3 %v8086_v33 }
 0x17f   :  { %v6350_v28 = vld [vmem:[#allocation9 + $0xba8] sm:$0xf0]  ;;  %3671 = vmatpush.bf16.msrb.mxu3 %v6897_v47 }
 0x180   :  { %v7635_v48 = vld [vmem:[#allocation9 + $0xd8c] sm:$0xf]  ;;  %v6353_v56 = vor.u32 %v7571_v46, %v6350_v28  ;;  %3633 = vmatpush.bf16.msrb.mxu0 %v6097_v53  ;;  %v3408_v28 = vadd.f32 %v3407_v43, %v3395_v34  ;;  %v5332_v43 = vld [vmem:[#allocation9 + $0x390] sm:$0xf] }
 0x181   :  { %v6606_v49 = vld [vmem:[#allocation9 + $0xda8] sm:$0xf0] }
 0x182   :  { %v7699_v50 = vld [vmem:[#allocation9 + $0xf8c] sm:$0xf]  ;;  %v6609_v58 = vor.u32 %v7635_v48, %v6606_v49  ;;  %3646 = vmatpush.bf16.msrb.mxu1 %v6353_v56  ;;  %v3420_v48 = vpop.f32.mrf.mxu3  ;;  %v3383_v56 = vpop.f32.mrf.mxu0 }
 0x183   :  { %v6862_v52 = vld [vmem:[#allocation9 + $0xfa8] sm:$0xf0]  ;;  %v8134_v53 = vadd.f32 %v3420_v48, %v3408_v28  ;;  %v5844_v28 = vld [vmem:[#allocation9 + $0x790] sm:$0xf] }
 0x184   :  { %v7499_v60 = vld [vmem:[#allocation9 + $0x94c] sm:$0xf]  ;;  %v6865_v0 = vor.u32 %v7699_v50, %v6862_v52  ;;  %3659 = vmatpush.bf16.msrb.mxu2 %v6609_v58  ;;  %v7448_v48 = vld [vmem:[#allocation9 + $0x7ac] sm:$0xf0] }
 0x185   :  { %v6062_v62 = vld [vmem:[#allocation9 + $0x968] sm:$0xf0]  ;;  %v5044_v56 = vld [vmem:[#allocation9 + $0x150] sm:$0xf] }
 0x186   :  { %v7563_v63 = vld [vmem:[#allocation9 + $0xb4c] sm:$0xf]  ;;  %v6065_v6 = vor.u32 %v7499_v60, %v6062_v62  ;;  %3672 = vmatpush.bf16.msrb.mxu3 %v6865_v0 }
 0x187   :  { %v6318_v1 = vld [vmem:[#allocation9 + $0xb68] sm:$0xf0] }
 0x188   :  { %v7627_v2 = vld [vmem:[#allocation9 + $0xd4c] sm:$0xf]  ;;  %v6321_v7 = vor.u32 %v7563_v63, %v6318_v1  ;;  %3634 = vmatpush.bf16.msrb.mxu0 %v6065_v6  ;;  %v3396_v1 = vpop.f32.mrf.mxu1 }
 0x189   :  { %v6574_v3 = vld [vmem:[#allocation9 + $0xd68] sm:$0xf0]  ;;  %v7376_v1 = vld [vmem:[#allocation9 + $0x56c] sm:$0xf0] }
 0x18a   :  { %v7691_v4 = vld [vmem:[#allocation9 + $0xf4c] sm:$0xf]  ;;  %v6577_v8 = vor.u32 %v7627_v2, %v6574_v3  ;;  %3647 = vmatpush.bf16.msrb.mxu1 %v6321_v7 }
 0x18b   :  { %v6830_v5 = vld [vmem:[#allocation9 + $0xf68] sm:$0xf0] }
 0x18c   :  { %v7491_v9 = vld [vmem:[#allocation9 + $0x90c] sm:$0xf]  ;;  %v6833_v12 = vor.u32 %v7691_v4, %v6830_v5  ;;  %3660 = vmatpush.bf16.msrb.mxu2 %v6577_v8 }
 0x18d   :  { %v6030_v10 = vld [vmem:[#allocation9 + $0x928] sm:$0xf0] }
 0x18e   :  { %v7555_v11 = vld [vmem:[#allocation9 + $0xb0c] sm:$0xf]  ;;  %v6033_v18 = vor.u32 %v7491_v9, %v6030_v10  ;;  %3673 = vmatpush.bf16.msrb.mxu3 %v6833_v12 }
 0x18f   :  { %v6286_v13 = vld [vmem:[#allocation9 + $0xb28] sm:$0xf0] }
 0x190   :  { %v7619_v14 = vld [vmem:[#allocation9 + $0xd0c] sm:$0xf]  ;;  %v6289_v21 = vor.u32 %v7555_v11, %v6286_v13  ;;  %3635 = vmatpush.bf16.msrb.mxu0 %v6033_v18 }
 0x191   :  { %v6542_v15 = vld [vmem:[#allocation9 + $0xd28] sm:$0xf0] }
 0x192   :  { %v7683_v16 = vld [vmem:[#allocation9 + $0xf0c] sm:$0xf]  ;;  %v6545_v22 = vor.u32 %v7619_v14, %v6542_v15  ;;  %3648 = vmatpush.bf16.msrb.mxu1 %v6289_v21 }
 0x193   :  { %v6798_v17 = vld [vmem:[#allocation9 + $0xf28] sm:$0xf0] }
 0x194   :  { %v7483_v23 = vld [vmem:[#allocation9 + $0x8cc] sm:$0xf]  ;;  %v6801_v27 = vor.u32 %v7683_v16, %v6798_v17  ;;  %3661 = vmatpush.bf16.msrb.mxu2 %v6545_v22  ;;  %v3409_v16 = vpop.f32.mrf.mxu2  ;;  %v3422_v22 = vpop.f32.mrf.mxu3 }
 0x195   :  { %v5998_v24 = vld [vmem:[#allocation9 + $0x8e8] sm:$0xf0]  ;;  %v7232_v22 = vld [vmem:[#allocation9 + $0xec] sm:$0xf0] }
 0x196   :  { %v7547_v25 = vld [vmem:[#allocation9 + $0xacc] sm:$0xf]  ;;  %v6001_v37 = vor.u32 %v7483_v23, %v5998_v24  ;;  %3674 = vmatpush.bf16.msrb.mxu3 %v6801_v27  ;;  %v5108_v23 = vld [vmem:[#allocation9 + $0x1d0] sm:$0xf] }
 0x197   :  { %v6254_v29 = vld [vmem:[#allocation9 + $0xae8] sm:$0xf0]  ;;  %v7264_v24 = vld [vmem:[#allocation9 + $0x1ec] sm:$0xf0] }
 0x198   :  { %v7611_v30 = vld [vmem:[#allocation9 + $0xccc] sm:$0xf]  ;;  %v6257_v39 = vor.u32 %v7547_v25, %v6254_v29  ;;  %3636 = vmatpush.bf16.msrb.mxu0 %v6001_v37  ;;  %v5364_v25 = vld [vmem:[#allocation9 + $0x3d0] sm:$0xf] }
 0x199   :  { %v6510_v31 = vld [vmem:[#allocation9 + $0xce8] sm:$0xf0]  ;;  %v7328_v27 = vld [vmem:[#allocation9 + $0x3ec] sm:$0xf0] }
 0x19a   :  { %v7675_v35 = vld [vmem:[#allocation9 + $0xecc] sm:$0xf]  ;;  %v6513_v40 = vor.u32 %v7611_v30, %v6510_v31  ;;  %3649 = vmatpush.bf16.msrb.mxu1 %v6257_v39  ;;  %v5620_v29 = vld [vmem:[#allocation9 + $0x5d0] sm:$0xf]  ;;  %v5109_v39 = vor.u32 %v7264_v24, %v5108_v23 }
 0x19b   :  { %v6766_v36 = vld [vmem:[#allocation9 + $0xee8] sm:$0xf0]  ;;  %v7392_v30 = vld [vmem:[#allocation9 + $0x5ec] sm:$0xf0] }
 0x19c   :  { %v7475_v59 = vld [vmem:[#allocation9 + $0x88c] sm:$0xf]  ;;  %v6769_v44 = vor.u32 %v7675_v35, %v6766_v36  ;;  %3662 = vmatpush.bf16.msrb.mxu2 %v6513_v40  ;;  %v5876_v35 = vld [vmem:[#allocation9 + $0x7d0] sm:$0xf]  ;;  %v5365_v40 = vor.u32 %v7328_v27, %v5364_v25  ;;  %v3446_v25 = vpop.f32.mrf.mxu1 }
 0x19d   :  { %v5966_v41 = vld [vmem:[#allocation9 + $0x8a8] sm:$0xf0]  ;;  %v7456_v36 = vld [vmem:[#allocation9 + $0x7ec] sm:$0xf0] }
 0x19e   :  { %v7539_v42 = vld [vmem:[#allocation9 + $0xa8c] sm:$0xf]  ;;  %v5969_v52 = vor.u32 %v7475_v59, %v5966_v41  ;;  %3675 = vmatpush.bf16.msrb.mxu3 %v6769_v44  ;;  %v5621_v59 = vor.u32 %v7392_v30, %v5620_v29  ;;  %v5076_v41 = vld [vmem:[#allocation9 + $0x190] sm:$0xf]  ;;  %v5877_v44 = vor.u32 %v7456_v36, %v5876_v35 }
 0x19f   :  { %v6222_v45 = vld [vmem:[#allocation9 + $0xaa8] sm:$0xf0]  ;;  %v5236_v23 = vld [vmem:[#allocation9 + $0x2d0] sm:$0xf] }
 0x1a0   :  { %v7603_v46 = vld [vmem:[#allocation9 + $0xc8c] sm:$0xf]  ;;  %v6225_v58 = vor.u32 %v7539_v42, %v6222_v45  ;;  %3637 = vmatpush.bf16.msrb.mxu0 %v5969_v52  ;;  %v7256_v42 = vld [vmem:[#allocation9 + $0x1ac] sm:$0xf0] }
 0x1a1   :  { %v6478_v47 = vld [vmem:[#allocation9 + $0xca8] sm:$0xf0]  ;;  %v7320_v45 = vld [vmem:[#allocation9 + $0x3ac] sm:$0xf0] }
 0x1a2   :  { %v7667_v49 = vld [vmem:[#allocation9 + $0xe8c] sm:$0xf]  ;;  %v6481_v60 = vor.u32 %v7603_v46, %v6478_v47  ;;  %3650 = vmatpush.bf16.msrb.mxu1 %v6225_v58  ;;  %v5588_v46 = vld [vmem:[#allocation9 + $0x590] sm:$0xf] }
 0x1a3   :  { %v6734_v50 = vld [vmem:[#allocation9 + $0xea8] sm:$0xf0]  ;;  %v7384_v47 = vld [vmem:[#allocation9 + $0x5ac] sm:$0xf0] }
 0x1a4   :  { %v7467_v62 = vld [vmem:[#allocation9 + $0x84c] sm:$0xf]  ;;  %v6737_v2 = vor.u32 %v7667_v49, %v6734_v50  ;;  %3663 = vmatpush.bf16.msrb.mxu2 %v6481_v60  ;;  %v5077_v49 = vor.u32 %v7256_v42, %v5076_v41  ;;  %v5333_v50 = vor.u32 %v7320_v45, %v5332_v43  ;;  %v5589_v52 = vor.u32 %v7384_v47, %v5588_v46  ;;  %v7248_v58 = vld [vmem:[#allocation9 + $0x16c] sm:$0xf0]  ;;  %v3459_v42 = vpop.f32.mrf.mxu2  ;;  %v3472_v47 = vpop.f32.mrf.mxu3 }
 0x1a5   :  { %v5934_v63 = vld [vmem:[#allocation9 + $0x868] sm:$0xf0]  ;;  %v5300_v60 = vld [vmem:[#allocation9 + $0x350] sm:$0xf] }
 0x1a6   :  { %v7531_v0 = vld [vmem:[#allocation9 + $0xa4c] sm:$0xf]  ;;  %v5937_v8 = vor.u32 %v7467_v62, %v5934_v63  ;;  %3676 = vmatpush.bf16.msrb.mxu3 %v6737_v2  ;;  %v5845_v62 = vor.u32 %v7448_v48, %v5844_v28  ;;  %v7312_v63 = vld [vmem:[#allocation9 + $0x36c] sm:$0xf0] }
 0x1a7   :  { %v6190_v3 = vld [vmem:[#allocation9 + $0xa68] sm:$0xf0]  ;;  %v5812_v2 = vld [vmem:[#allocation9 + $0x750] sm:$0xf] }
 0x1a8   :  { %v7595_v4 = vld [vmem:[#allocation9 + $0xc4c] sm:$0xf]  ;;  %v6193_v11 = vor.u32 %v7531_v0, %v6190_v3  ;;  %3638 = vmatpush.bf16.msrb.mxu0 %v5937_v8  ;;  %v5556_v0 = vld [vmem:[#allocation9 + $0x550] sm:$0xf] }
 0x1a9   :  { %v6446_v5 = vld [vmem:[#allocation9 + $0xc68] sm:$0xf0]  ;;  %v7440_v3 = vld [vmem:[#allocation9 + $0x76c] sm:$0xf0] }
 0x1aa   :  { %v7659_v6 = vld [vmem:[#allocation9 + $0xe4c] sm:$0xf]  ;;  %v6449_v12 = vor.u32 %v7595_v4, %v6446_v5  ;;  %3651 = vmatpush.bf16.msrb.mxu1 %v6193_v11  ;;  %v5045_v4 = vor.u32 %v7248_v58, %v5044_v56  ;;  %v5301_v5 = vor.u32 %v7312_v63, %v5300_v60  ;;  %v7240_v8 = vld [vmem:[#allocation9 + $0x12c] sm:$0xf0] }
 0x1ab   :  { %v6702_v7 = vld [vmem:[#allocation9 + $0xe68] sm:$0xf0]  ;;  %v7304_v11 = vld [vmem:[#allocation9 + $0x32c] sm:$0xf0] }
 0x1ac   :  { %v7459_v9 = vld [vmem:[#allocation9 + $0x80c] sm:$0xf]  ;;  %v6705_v17 = vor.u32 %v7659_v6, %v6702_v7  ;;  %3664 = vmatpush.bf16.msrb.mxu2 %v6449_v12  ;;  %v5557_v6 = vor.u32 %v7376_v1, %v5556_v0  ;;  %v5012_v7 = vld [vmem:[#allocation9 + $0x110] sm:$0xf]  ;;  %v3448_v0 = vpop.f32.mrf.mxu1 }
 0x1ad   :  { %v5902_v10 = vld [vmem:[#allocation9 + $0x828] sm:$0xf0]  ;;  %v5524_v12 = vld [vmem:[#allocation9 + $0x510] sm:$0xf]  ;;  %v5013_v16 = vor.u32 %v7240_v8, %v5012_v7 }
 0x1ae   :  { %v7523_v13 = vld [vmem:[#allocation9 + $0xa0c] sm:$0xf]  ;;  %v5905_v26 = vor.u32 %v7459_v9, %v5902_v10  ;;  %3677 = vmatpush.bf16.msrb.mxu3 %v6705_v17  ;;  %v5268_v9 = vld [vmem:[#allocation9 + $0x310] sm:$0xf]  ;;  %v5813_v10 = vor.u32 %v7440_v3, %v5812_v2  ;;  %v3433_v17 = vpop.f32.mrf.mxu0 }
 0x1af   :  { %v6158_v14 = vld [vmem:[#allocation9 + $0xa28] sm:$0xf0]  ;;  %v3434_v24 = vadd.f32 %v3433_v17, %v8134_v53  ;;  %v7296_v27 = vld [vmem:[#allocation9 + $0x2ec] sm:$0xf0] }
 0x1b0   :  { %v7587_v15 = vld [vmem:[#allocation9 + $0xc0c] sm:$0xf]  ;;  %v6161_v31 = vor.u32 %v7523_v13, %v6158_v14  ;;  %3639 = vmatpush.bf16.msrb.mxu0 %v5905_v26  ;;  %v7368_v13 = vld [vmem:[#allocation9 + $0x52c] sm:$0xf0] }
 0x1b1   :  { %v6414_v18 = vld [vmem:[#allocation9 + $0xc28] sm:$0xf0]  ;;  %v5780_v14 = vld [vmem:[#allocation9 + $0x710] sm:$0xf]  ;;  %v3447_v35 = vadd.f32 %v3446_v25, %v3434_v24 }
 0x1b2   :  { %v7651_v20 = vld [vmem:[#allocation9 + $0xe0c] sm:$0xf]  ;;  %v6417_v34 = vor.u32 %v7587_v15, %v6414_v18  ;;  %3652 = vmatpush.bf16.msrb.mxu1 %v6161_v31  ;;  %v7432_v15 = vld [vmem:[#allocation9 + $0x72c] sm:$0xf0]  ;;  %v5269_v18 = vor.u32 %v7304_v11, %v5268_v9 }
 0x1b3   :  { %v6670_v21 = vld [vmem:[#allocation9 + $0xe28] sm:$0xf0]  ;;  %3640 = vmatmul.bf16.vlgmr.msrb.gmra.mxu0 %v8099_v54  ;;  %v5781_v26 = vor.u32 %v7432_v15, %v5780_v14  ;;  %v5492_v29 = vld [vmem:[#allocation9 + $0x4d0] sm:$0xf]  ;;  %v3460_v46 = vadd.f32 %v3459_v42, %v3447_v35  ;;  %v3461_v15 = vpop.f32.mrf.mxu2 }
 0x1b4   :  { %v6673_v37 = vor.u32 %v7651_v20, %v6670_v21  ;;  %3665 = vmatpush.bf16.msrb.mxu2 %v6417_v34  ;;  %3684 = vmatpush.bf16.msra.mxu0 %v5109_v39  ;;  %v5525_v20 = vor.u32 %v7368_v13, %v5524_v12  ;;  %v4980_v21 = vld [vmem:[#allocation9 + $0xd0] sm:$0xf] }
 0x1b5   :  { %3653 = vmatmul.bf16.vlgmr.msrb.gmra.mxu1 %v8103_v57  ;;  %v7360_v30 = vld [vmem:[#allocation9 + $0x4ec] sm:$0xf0]  ;;  %v4981_v36 = vor.u32 %v7232_v22, %v4980_v21  ;;  %v3474_v21 = vpop.f32.mrf.mxu3 }
 0x1b6   :  { %3678 = vmatpush.bf16.msrb.mxu3 %v6673_v37  ;;  %3697 = vmatpush.bf16.msra.mxu1 %v5365_v40  ;;  %v5748_v31 = vld [vmem:[#allocation9 + $0x6d0] sm:$0xf]  ;;  %v5237_v37 = vor.u32 %v7296_v27, %v5236_v23  ;;  %v5493_v39 = vor.u32 %v7360_v30, %v5492_v29 }
 0x1b7   :  { %3666 = vmatmul.bf16.vlgmr.msrb.gmra.mxu2 %v8097_v51  ;;  %v7424_v34 = vld [vmem:[#allocation9 + $0x6ec] sm:$0xf0] }
 0x1b8   :  { %3710 = vmatpush.bf16.msra.mxu2 %v5621_v59  ;;  %3685 = vmatpush.bf16.msra.mxu0 %v5077_v49  ;;  %v4948_v40 = vld [vmem:[#allocation9 + $0x90] sm:$0xf]  ;;  %v5749_v53 = vor.u32 %v7424_v34, %v5748_v31 }
 0x1b9   :  { %3679 = vmatmul.bf16.vlgmr.msrb.gmra.mxu3 %v8101_v55  ;;  %v7224_v59 = vld [vmem:[#allocation9 + $0xac] sm:$0xf0] }
 0x1ba   :  { %3723 = vmatpush.bf16.msra.mxu3 %v5877_v44  ;;  %3698 = vmatpush.bf16.msra.mxu1 %v5333_v50  ;;  %v5204_v41 = vld [vmem:[#allocation9 + $0x290] sm:$0xf]  ;;  %v4949_v49 = vor.u32 %v7224_v59, %v4948_v40  ;;  %v8141_v50 = vadd.f32 %v3472_v47, %v3460_v46 }
 0x1bb   :  { %v7288_v43 = vld [vmem:[#allocation9 + $0x2ac] sm:$0xf0] }
 0x1bc   :  { %3711 = vmatpush.bf16.msra.mxu2 %v5589_v52  ;;  %3686 = vmatpush.bf16.msra.mxu0 %v5045_v4  ;;  %v5460_v44 = vld [vmem:[#allocation9 + $0x490] sm:$0xf]  ;;  %v3435_v52 = vpop.f32.mrf.mxu0  ;;  %v5205_v56 = vor.u32 %v7288_v43, %v5204_v41 }
 0x1bd   :  { %v7352_v45 = vld [vmem:[#allocation9 + $0x4ac] sm:$0xf0] }
 0x1be   :  { %3724 = vmatpush.bf16.msra.mxu3 %v5845_v62  ;;  %3699 = vmatpush.bf16.msra.mxu1 %v5301_v5  ;;  %v5716_v28 = vld [vmem:[#allocation9 + $0x690] sm:$0xf]  ;;  %v5461_v58 = vor.u32 %v7352_v45, %v5460_v44 }
 0x1bf   :  { %v7416_v48 = vld [vmem:[#allocation9 + $0x6ac] sm:$0xf0] }
 0x1c0   :  { %3712 = vmatpush.bf16.msra.mxu2 %v5557_v6  ;;  %3687 = vmatpush.bf16.msra.mxu0 %v5013_v16  ;;  %v4916_v60 = vld [vmem:[#allocation9 + $0x50] sm:$0xf]  ;;  %v5717_v1 = vor.u32 %v7416_v48, %v5716_v28 }
 0x1c1   :  { %v7216_v62 = vld [vmem:[#allocation9 + $0x6c] sm:$0xf0] }
 0x1c2   :  { %3725 = vmatpush.bf16.msra.mxu3 %v5813_v10  ;;  %3700 = vmatpush.bf16.msra.mxu1 %v5269_v18  ;;  %v5172_v63 = vld [vmem:[#allocation9 + $0x250] sm:$0xf]  ;;  %v4917_v7 = vor.u32 %v7216_v62, %v4916_v60 }
 0x1c3   :  { %v7280_v2 = vld [vmem:[#allocation9 + $0x26c] sm:$0xf0] }
 0x1c4   :  { %3713 = vmatpush.bf16.msra.mxu2 %v5525_v20  ;;  %3688 = vmatpush.bf16.msra.mxu0 %v4981_v36  ;;  %v5428_v3 = vld [vmem:[#allocation9 + $0x450] sm:$0xf]  ;;  %v5173_v10 = vor.u32 %v7280_v2, %v5172_v63 }
 0x1c5   :  { %v7344_v4 = vld [vmem:[#allocation9 + $0x46c] sm:$0xf0] }
 0x1c6   :  { %3726 = vmatpush.bf16.msra.mxu3 %v5781_v26  ;;  %3701 = vmatpush.bf16.msra.mxu1 %v5237_v37  ;;  %v5684_v5 = vld [vmem:[#allocation9 + $0x650] sm:$0xf]  ;;  %v5429_v11 = vor.u32 %v7344_v4, %v5428_v3 }
 0x1c7   :  { %v7408_v6 = vld [vmem:[#allocation9 + $0x66c] sm:$0xf0] }
 0x1c8   :  { %3714 = vmatpush.bf16.msra.mxu2 %v5493_v39  ;;  %3689 = vmatpush.bf16.msra.mxu0 %v4949_v49  ;;  %v4884_v8 = vld [vmem:[#allocation9 + $0x10] sm:$0xf]  ;;  %v5685_v16 = vor.u32 %v7408_v6, %v5684_v5 }
 0x1c9   :  { %v7208_v9 = vld [vmem:[#allocation9 + $0x2c] sm:$0xf0] }
 0x1ca   :  { %3727 = vmatpush.bf16.msra.mxu3 %v5749_v53  ;;  %3702 = vmatpush.bf16.msra.mxu1 %v5205_v56  ;;  %v5140_v12 = vld [vmem:[#allocation9 + $0x210] sm:$0xf]  ;;  %v4885_v25 = vor.u32 %v7208_v9, %v4884_v8 }
 0x1cb   :  { %v7272_v13 = vld [vmem:[#allocation9 + $0x22c] sm:$0xf0] }
 0x1cc   :  { %3715 = vmatpush.bf16.msra.mxu2 %v5461_v58  ;;  %v5396_v14 = vld [vmem:[#allocation9 + $0x410] sm:$0xf]  ;;  %3690 = vmatpush.bf16.msra.mxu0 %v4917_v7  ;;  %v5141_v30 = vor.u32 %v7272_v13, %v5140_v12 }
 0x1cd   :  { %v7336_v17 = vld [vmem:[#allocation9 + $0x42c] sm:$0xf0] }
 0x1ce   :  { %3728 = vmatpush.bf16.msra.mxu3 %v5717_v1  ;;  %v5652_v18 = vld [vmem:[#allocation9 + $0x610] sm:$0xf]  ;;  %3703 = vmatpush.bf16.msra.mxu1 %v5173_v10  ;;  %v5397_v31 = vor.u32 %v7336_v17, %v5396_v14 }
 0x1cf   :  { %v7400_v20 = vld [vmem:[#allocation9 + $0x62c] sm:$0xf0] }
 0x1d0   :  { %v6132_v22 = vld [vmem:[#allocation9 + $0x9d0] sm:$0xf]  ;;  %3716 = vmatpush.bf16.msra.mxu2 %v5429_v11  ;;  %v5653_v36 = vor.u32 %v7400_v20, %v5652_v18  ;;  %3691 = vmatpush.bf16.msra.mxu0 %v4885_v25 }
 0x1d1   :  { %v7520_v23 = vld [vmem:[#allocation9 + $0x9ec] sm:$0xf0] }
 0x1d2   :  { %v6388_v24 = vld [vmem:[#allocation9 + $0xbd0] sm:$0xf]  ;;  %3729 = vmatpush.bf16.msra.mxu3 %v5685_v16  ;;  %v6133_v37 = vor.u32 %v7520_v23, %v6132_v22  ;;  %3704 = vmatpush.bf16.msra.mxu1 %v5141_v30  ;;  %v3485_v16 = vpop.f32.mrf.mxu0  ;;  %v3498_v23 = vpop.f32.mrf.mxu1 }
 0x1d3   :  { %v7584_v26 = vld [vmem:[#allocation9 + $0xbec] sm:$0xf0]  ;;  %3692 = vmatmul.bf16.vlgmr.msra.gmra.mxu0 %v8084_v32 }
 0x1d4   :  { %v6644_v27 = vld [vmem:[#allocation9 + $0xdd0] sm:$0xf]  ;;  %v6389_v39 = vor.u32 %v7584_v26, %v6388_v24  ;;  %3717 = vmatpush.bf16.msra.mxu2 %v5397_v31  ;;  %3736 = vmatpush.bf16.msrb.mxu0 %v6133_v37 }
 0x1d5   :  { %v7648_v29 = vld [vmem:[#allocation9 + $0xdec] sm:$0xf0]  ;;  %3705 = vmatmul.bf16.vlgmr.msra.gmra.mxu1 %v8088_v38 }
 0x1d6   :  { %v6900_v34 = vld [vmem:[#allocation9 + $0xfd0] sm:$0xf]  ;;  %v6645_v40 = vor.u32 %v7648_v29, %v6644_v27  ;;  %3730 = vmatpush.bf16.msra.mxu3 %v5653_v36  ;;  %3749 = vmatpush.bf16.msrb.mxu1 %v6389_v39  ;;  %v3499_v29 = vadd.f32 %v3498_v23, %v3485_v16  ;;  %v7324_v23 = vld [vmem:[#allocation9 + $0x3d4] sm:$0xf] }
 0x1d7   :  { %v7712_v35 = vld [vmem:[#allocation9 + $0xfec] sm:$0xf0]  ;;  %3718 = vmatmul.bf16.vlgmr.msra.gmra.mxu2 %v8080_v19 }
 0x1d8   :  { %v6100_v59 = vld [vmem:[#allocation9 + $0x990] sm:$0xf]  ;;  %v6901_v53 = vor.u32 %v7712_v35, %v6900_v34  ;;  %3762 = vmatpush.bf16.msrb.mxu2 %v6645_v40 }
 0x1d9   :  { %v7512_v41 = vld [vmem:[#allocation9 + $0x9ac] sm:$0xf0]  ;;  %3731 = vmatmul.bf16.vlgmr.msra.gmra.mxu3 %v8086_v33 }
 0x1da   :  { %v6356_v42 = vld [vmem:[#allocation9 + $0xb90] sm:$0xf]  ;;  %v6101_v28 = vor.u32 %v7512_v41, %v6100_v59  ;;  %3775 = vmatpush.bf16.msrb.mxu3 %v6901_v53  ;;  %v3511_v59 = vpop.f32.mrf.mxu2 }
 0x1db   :  { %v7576_v43 = vld [vmem:[#allocation9 + $0xbac] sm:$0xf0] }
 0x1dc   :  { %v6612_v44 = vld [vmem:[#allocation9 + $0xd90] sm:$0xf]  ;;  %v6357_v48 = vor.u32 %v7576_v43, %v6356_v42  ;;  %3737 = vmatpush.bf16.msrb.mxu0 %v6101_v28 }
 0x1dd   :  { %v7640_v45 = vld [vmem:[#allocation9 + $0xdac] sm:$0xf0] }
 0x1de   :  { %v6868_v46 = vld [vmem:[#allocation9 + $0xf90] sm:$0xf]  ;;  %v6613_v49 = vor.u32 %v7640_v45, %v6612_v44  ;;  %3750 = vmatpush.bf16.msrb.mxu1 %v6357_v48  ;;  %v3512_v44 = vadd.f32 %v3511_v59, %v3499_v29  ;;  %v3524_v45 = vpop.f32.mrf.mxu3  ;;  %v5078_v59 = vld [vmem:[#allocation9 + $0x1b0] sm:$0xf0] }
 0x1df   :  { %v7704_v47 = vld [vmem:[#allocation9 + $0xfac] sm:$0xf0] }
 0x1e0   :  { %v6068_v52 = vld [vmem:[#allocation9 + $0x950] sm:$0xf]  ;;  %v6869_v60 = vor.u32 %v7704_v47, %v6868_v46  ;;  %3763 = vmatpush.bf16.msrb.mxu2 %v6613_v49  ;;  %v8147_v48 = vadd.f32 %v3524_v45, %v3512_v44  ;;  %v3487_v49 = vpop.f32.mrf.mxu0  ;;  %v5590_v44 = vld [vmem:[#allocation9 + $0x5b0] sm:$0xf0] }
 0x1e1   :  { %v7504_v56 = vld [vmem:[#allocation9 + $0x96c] sm:$0xf0]  ;;  %v7444_v45 = vld [vmem:[#allocation9 + $0x794] sm:$0xf] }
 0x1e2   :  { %v6324_v58 = vld [vmem:[#allocation9 + $0xb50] sm:$0xf]  ;;  %v6069_v3 = vor.u32 %v7504_v56, %v6068_v52  ;;  %3776 = vmatpush.bf16.msrb.mxu3 %v6869_v60 }
 0x1e3   :  { %v7568_v62 = vld [vmem:[#allocation9 + $0xb6c] sm:$0xf0] }
 0x1e4   :  { %v6580_v63 = vld [vmem:[#allocation9 + $0xd50] sm:$0xf]  ;;  %v6325_v4 = vor.u32 %v7568_v62, %v6324_v58  ;;  %3738 = vmatpush.bf16.msrb.mxu0 %v6069_v3 }
 0x1e5   :  { %v7632_v0 = vld [vmem:[#allocation9 + $0xd6c] sm:$0xf0] }
 0x1e6   :  { %v6836_v1 = vld [vmem:[#allocation9 + $0xf50] sm:$0xf]  ;;  %v6581_v5 = vor.u32 %v7632_v0, %v6580_v63  ;;  %3751 = vmatpush.bf16.msrb.mxu1 %v6325_v4  ;;  %v3500_v63 = vpop.f32.mrf.mxu1 }
 0x1e7   :  { %v7696_v2 = vld [vmem:[#allocation9 + $0xf6c] sm:$0xf0]  ;;  %v7372_v63 = vld [vmem:[#allocation9 + $0x554] sm:$0xf] }
 0x1e8   :  { %v6036_v6 = vld [vmem:[#allocation9 + $0x910] sm:$0xf]  ;;  %v6837_v9 = vor.u32 %v7696_v2, %v6836_v1  ;;  %3764 = vmatpush.bf16.msrb.mxu2 %v6581_v5 }
 0x1e9   :  { %v7496_v7 = vld [vmem:[#allocation9 + $0x92c] sm:$0xf0] }
 0x1ea   :  { %v6292_v8 = vld [vmem:[#allocation9 + $0xb10] sm:$0xf]  ;;  %v6037_v15 = vor.u32 %v7496_v7, %v6036_v6  ;;  %3777 = vmatpush.bf16.msrb.mxu3 %v6837_v9 }
 0x1eb   :  { %v7560_v10 = vld [vmem:[#allocation9 + $0xb2c] sm:$0xf0] }
 0x1ec   :  { %v6548_v11 = vld [vmem:[#allocation9 + $0xd10] sm:$0xf]  ;;  %v6293_v17 = vor.u32 %v7560_v10, %v6292_v8  ;;  %3739 = vmatpush.bf16.msrb.mxu0 %v6037_v15 }
 0x1ed   :  { %v7624_v12 = vld [vmem:[#allocation9 + $0xd2c] sm:$0xf0] }
 0x1ee   :  { %v6804_v13 = vld [vmem:[#allocation9 + $0xf10] sm:$0xf]  ;;  %v6549_v18 = vor.u32 %v7624_v12, %v6548_v11  ;;  %3752 = vmatpush.bf16.msrb.mxu1 %v6293_v17 }
 0x1ef   :  { %v7688_v14 = vld [vmem:[#allocation9 + $0xf2c] sm:$0xf0] }
 0x1f0   :  { %v6004_v20 = vld [vmem:[#allocation9 + $0x8d0] sm:$0xf]  ;;  %v6805_v24 = vor.u32 %v7688_v14, %v6804_v13  ;;  %3765 = vmatpush.bf16.msrb.mxu2 %v6549_v18  ;;  %v3513_v14 = vpop.f32.mrf.mxu2 }
 0x1f1   :  { %v7488_v21 = vld [vmem:[#allocation9 + $0x8ec] sm:$0xf0]  ;;  %v5782_v14 = vld [vmem:[#allocation9 + $0x730] sm:$0xf0] }
 0x1f2   :  { %v6260_v22 = vld [vmem:[#allocation9 + $0xad0] sm:$0xf]  ;;  %v6005_v34 = vor.u32 %v7488_v21, %v6004_v20  ;;  %3778 = vmatpush.bf16.msrb.mxu3 %v6805_v24  ;;  %v3526_v20 = vpop.f32.mrf.mxu3  ;;  %v7260_v21 = vld [vmem:[#allocation9 + $0x1d4] sm:$0xf] }
 0x1f3   :  { %v7552_v25 = vld [vmem:[#allocation9 + $0xaec] sm:$0xf0]  ;;  %v7228_v20 = vld [vmem:[#allocation9 + $0xd4] sm:$0xf] }
 0x1f4   :  { %v6516_v26 = vld [vmem:[#allocation9 + $0xcd0] sm:$0xf]  ;;  %v6261_v35 = vor.u32 %v7552_v25, %v6260_v22  ;;  %3740 = vmatpush.bf16.msrb.mxu0 %v6005_v34  ;;  %v5110_v22 = vld [vmem:[#allocation9 + $0x1f0] sm:$0xf0] }
 0x1f5   :  { %v7616_v27 = vld [vmem:[#allocation9 + $0xcec] sm:$0xf0]  ;;  %v5366_v25 = vld [vmem:[#allocation9 + $0x3f0] sm:$0xf0] }
 0x1f6   :  { %v6772_v30 = vld [vmem:[#allocation9 + $0xed0] sm:$0xf]  ;;  %v6517_v36 = vor.u32 %v7616_v27, %v6516_v26  ;;  %3753 = vmatpush.bf16.msrb.mxu1 %v6261_v35  ;;  %v7388_v26 = vld [vmem:[#allocation9 + $0x5d4] sm:$0xf] }
 0x1f7   :  { %v7680_v31 = vld [vmem:[#allocation9 + $0xeec] sm:$0xf0]  ;;  %v5622_v27 = vld [vmem:[#allocation9 + $0x5f0] sm:$0xf0] }
 0x1f8   :  { %v5972_v37 = vld [vmem:[#allocation9 + $0x890] sm:$0xf]  ;;  %v6773_v41 = vor.u32 %v7680_v31, %v6772_v30  ;;  %3766 = vmatpush.bf16.msrb.mxu2 %v6517_v36  ;;  %v7452_v31 = vld [vmem:[#allocation9 + $0x7d4] sm:$0xf]  ;;  %v5113_v36 = vor.u32 %v7260_v21, %v5110_v22 }
 0x1f9   :  { %v7480_v39 = vld [vmem:[#allocation9 + $0x8ac] sm:$0xf0]  ;;  %v5878_v34 = vld [vmem:[#allocation9 + $0x7f0] sm:$0xf0] }
 0x1fa   :  { %v6228_v40 = vld [vmem:[#allocation9 + $0xa90] sm:$0xf]  ;;  %v5973_v28 = vor.u32 %v7480_v39, %v5972_v37  ;;  %3779 = vmatpush.bf16.msrb.mxu3 %v6773_v41  ;;  %v5369_v37 = vor.u32 %v7324_v23, %v5366_v25  ;;  %v5625_v39 = vor.u32 %v7388_v26, %v5622_v27  ;;  %v7316_v41 = vld [vmem:[#allocation9 + $0x394] sm:$0xf] }
 0x1fb   :  { %v7544_v42 = vld [vmem:[#allocation9 + $0xaac] sm:$0xf0]  ;;  %v4982_v21 = vld [vmem:[#allocation9 + $0xf0] sm:$0xf0] }
 0x1fc   :  { %v6484_v53 = vld [vmem:[#allocation9 + $0xc90] sm:$0xf]  ;;  %v6229_v52 = vor.u32 %v7544_v42, %v6228_v40  ;;  %3741 = vmatpush.bf16.msrb.mxu0 %v5973_v28  ;;  %v7252_v40 = vld [vmem:[#allocation9 + $0x194] sm:$0xf]  ;;  %v5881_v42 = vor.u32 %v7452_v31, %v5878_v34 }
 0x1fd   :  { %v7608_v43 = vld [vmem:[#allocation9 + $0xcac] sm:$0xf0]  ;;  %v7292_v22 = vld [vmem:[#allocation9 + $0x2d4] sm:$0xf] }
 0x1fe   :  { %v6740_v46 = vld [vmem:[#allocation9 + $0xe90] sm:$0xf]  ;;  %v6485_v56 = vor.u32 %v7608_v43, %v6484_v53  ;;  %3754 = vmatpush.bf16.msrb.mxu1 %v6229_v52  ;;  %v5334_v53 = vld [vmem:[#allocation9 + $0x3b0] sm:$0xf0] }
 0x1ff   :  { %v7672_v47 = vld [vmem:[#allocation9 + $0xeac] sm:$0xf0]  ;;  %v7380_v43 = vld [vmem:[#allocation9 + $0x594] sm:$0xf]  ;;  %v5337_v28 = vor.u32 %v7316_v41, %v5334_v53  ;;  %v3563_v41 = vpop.f32.mrf.mxu2 }
 0x200   :  { %v5940_v58 = vld [vmem:[#allocation9 + $0x850] sm:$0xf]  ;;  %v6741_v0 = vor.u32 %v7672_v47, %v6740_v46  ;;  %3767 = vmatpush.bf16.msrb.mxu2 %v6485_v56  ;;  %v5846_v46 = vld [vmem:[#allocation9 + $0x7b0] sm:$0xf0]  ;;  %v5081_v47 = vor.u32 %v7252_v40, %v5078_v59  ;;  %v5593_v49 = vor.u32 %v7380_v43, %v5590_v44 }
 0x201   :  { %v7472_v60 = vld [vmem:[#allocation9 + $0x86c] sm:$0xf0]  ;;  %v7244_v52 = vld [vmem:[#allocation9 + $0x154] sm:$0xf] }
 0x202   :  { %v6196_v62 = vld [vmem:[#allocation9 + $0xa50] sm:$0xf]  ;;  %v5941_v6 = vor.u32 %v7472_v60, %v5940_v58  ;;  %3780 = vmatpush.bf16.msrb.mxu3 %v6741_v0  ;;  %v5046_v56 = vld [vmem:[#allocation9 + $0x170] sm:$0xf0]  ;;  %v5849_v60 = vor.u32 %v7444_v45, %v5846_v46  ;;  %v3576_v45 = vpop.f32.mrf.mxu3 }
 0x203   :  { %v7536_v1 = vld [vmem:[#allocation9 + $0xa6c] sm:$0xf0]  ;;  %v7308_v58 = vld [vmem:[#allocation9 + $0x354] sm:$0xf] }
 0x204   :  { %v6452_v2 = vld [vmem:[#allocation9 + $0xc50] sm:$0xf]  ;;  %v6197_v9 = vor.u32 %v7536_v1, %v6196_v62  ;;  %3742 = vmatpush.bf16.msrb.mxu0 %v5941_v6  ;;  %v5302_v62 = vld [vmem:[#allocation9 + $0x370] sm:$0xf0] }
 0x205   :  { %v7600_v3 = vld [vmem:[#allocation9 + $0xc6c] sm:$0xf0]  ;;  %v5558_v0 = vld [vmem:[#allocation9 + $0x570] sm:$0xf0] }
 0x206   :  { %v6708_v4 = vld [vmem:[#allocation9 + $0xe50] sm:$0xf]  ;;  %v6453_v10 = vor.u32 %v7600_v3, %v6452_v2  ;;  %3755 = vmatpush.bf16.msrb.mxu1 %v6197_v9  ;;  %v7436_v1 = vld [vmem:[#allocation9 + $0x754] sm:$0xf]  ;;  %v5049_v3 = vor.u32 %v7244_v52, %v5046_v56 }
 0x207   :  { %v7664_v5 = vld [vmem:[#allocation9 + $0xe6c] sm:$0xf0]  ;;  %v5814_v2 = vld [vmem:[#allocation9 + $0x770] sm:$0xf0] }
 0x208   :  { %v5908_v7 = vld [vmem:[#allocation9 + $0x810] sm:$0xf]  ;;  %v6709_v15 = vor.u32 %v7664_v5, %v6708_v4  ;;  %3768 = vmatpush.bf16.msrb.mxu2 %v6453_v10  ;;  %v5305_v4 = vor.u32 %v7308_v58, %v5302_v62  ;;  %v5561_v5 = vor.u32 %v7372_v63, %v5558_v0  ;;  %v7236_v6 = vld [vmem:[#allocation9 + $0x114] sm:$0xf]  ;;  %v5817_v9 = vor.u32 %v7436_v1, %v5814_v2 }
 0x209   :  { %v7464_v8 = vld [vmem:[#allocation9 + $0x82c] sm:$0xf0]  ;;  %v5270_v10 = vld [vmem:[#allocation9 + $0x330] sm:$0xf0] }
 0x20a   :  { %v6164_v11 = vld [vmem:[#allocation9 + $0xa10] sm:$0xf]  ;;  %v5909_v24 = vor.u32 %v7464_v8, %v5908_v7  ;;  %3781 = vmatpush.bf16.msrb.mxu3 %v6709_v15  ;;  %v5014_v7 = vld [vmem:[#allocation9 + $0x130] sm:$0xf0] }
 0x20b   :  { %v7528_v12 = vld [vmem:[#allocation9 + $0xa2c] sm:$0xf0]  ;;  %v7300_v8 = vld [vmem:[#allocation9 + $0x314] sm:$0xf]  ;;  %v5017_v15 = vor.u32 %v7236_v6, %v5014_v7 }
 0x20c   :  { %v6420_v13 = vld [vmem:[#allocation9 + $0xc10] sm:$0xf]  ;;  %v6165_v29 = vor.u32 %v7528_v12, %v6164_v11  ;;  %3743 = vmatpush.bf16.msrb.mxu0 %v5909_v24  ;;  %v7364_v11 = vld [vmem:[#allocation9 + $0x514] sm:$0xf]  ;;  %v3550_v24 = vpop.f32.mrf.mxu1 }
 0x20d   :  { %v7592_v16 = vld [vmem:[#allocation9 + $0xc2c] sm:$0xf0]  ;;  %v5526_v12 = vld [vmem:[#allocation9 + $0x530] sm:$0xf0] }
 0x20e   :  { %v6676_v17 = vld [vmem:[#allocation9 + $0xe10] sm:$0xf]  ;;  %v6421_v30 = vor.u32 %v7592_v16, %v6420_v13  ;;  %3756 = vmatpush.bf16.msrb.mxu1 %v6165_v29  ;;  %v7428_v13 = vld [vmem:[#allocation9 + $0x714] sm:$0xf]  ;;  %v3537_v16 = vpop.f32.mrf.mxu0 }
 0x20f   :  { %v7656_v18 = vld [vmem:[#allocation9 + $0xe2c] sm:$0xf0]  ;;  %3744 = vmatmul.bf16.vlgmr.msrb.gmra.mxu0 %v8099_v54  ;;  %v3538_v23 = vadd.f32 %v3537_v16, %v8147_v48  ;;  %v5785_v25 = vor.u32 %v7428_v13, %v5782_v14  ;;  %v5238_v26 = vld [vmem:[#allocation9 + $0x2f0] sm:$0xf0] }
 0x210   :  { %v6677_v35 = vor.u32 %v7656_v18, %v6676_v17  ;;  %3769 = vmatpush.bf16.msrb.mxu2 %v6421_v30  ;;  %3788 = vmatpush.bf16.msra.mxu0 %v5113_v36  ;;  %v5273_v17 = vor.u32 %v7300_v8, %v5270_v10  ;;  %v5529_v18 = vor.u32 %v7364_v11, %v5526_v12  ;;  %v7356_v27 = vld [vmem:[#allocation9 + $0x4d4] sm:$0xf] }
 0x211   :  { %3757 = vmatmul.bf16.vlgmr.msrb.gmra.mxu1 %v8103_v57  ;;  %v5494_v29 = vld [vmem:[#allocation9 + $0x4f0] sm:$0xf0]  ;;  %v3551_v34 = vadd.f32 %v3550_v24, %v3538_v23  ;;  %v5241_v36 = vor.u32 %v7292_v22, %v5238_v26 }
 0x212   :  { %3782 = vmatpush.bf16.msrb.mxu3 %v6677_v35  ;;  %3801 = vmatpush.bf16.msra.mxu1 %v5369_v37  ;;  %v7420_v30 = vld [vmem:[#allocation9 + $0x6d4] sm:$0xf]  ;;  %v4985_v35 = vor.u32 %v7228_v20, %v4982_v21  ;;  %v5497_v37 = vor.u32 %v7356_v27, %v5494_v29  ;;  %v3578_v21 = vpop.f32.mrf.mxu3 }
 0x213   :  { %3770 = vmatmul.bf16.vlgmr.msrb.gmra.mxu2 %v8097_v51  ;;  %v5750_v31 = vld [vmem:[#allocation9 + $0x6f0] sm:$0xf0]  ;;  %v3564_v44 = vadd.f32 %v3563_v41, %v3551_v34 }
 0x214   :  { %3814 = vmatpush.bf16.msra.mxu2 %v5625_v39  ;;  %3789 = vmatpush.bf16.msra.mxu0 %v5081_v47  ;;  %v7220_v39 = vld [vmem:[#allocation9 + $0x94] sm:$0xf]  ;;  %v5753_v48 = vor.u32 %v7420_v30, %v5750_v31  ;;  %v3552_v0 = vpop.f32.mrf.mxu1 }
 0x215   :  { %3783 = vmatmul.bf16.vlgmr.msrb.gmra.mxu3 %v8101_v55  ;;  %v4950_v40 = vld [vmem:[#allocation9 + $0xb0] sm:$0xf0] }
 0x216   :  { %3827 = vmatpush.bf16.msra.mxu3 %v5881_v42  ;;  %3802 = vmatpush.bf16.msra.mxu1 %v5337_v28  ;;  %v7284_v59 = vld [vmem:[#allocation9 + $0x294] sm:$0xf]  ;;  %v4953_v28 = vor.u32 %v7220_v39, %v4950_v40  ;;  %v3539_v52 = vpop.f32.mrf.mxu0 }
 0x217   :  { %v5206_v42 = vld [vmem:[#allocation9 + $0x2b0] sm:$0xf0] }
 0x218   :  { %3815 = vmatpush.bf16.msra.mxu2 %v5593_v49  ;;  %3790 = vmatpush.bf16.msra.mxu0 %v5049_v3  ;;  %v7348_v53 = vld [vmem:[#allocation9 + $0x494] sm:$0xf]  ;;  %v8154_v49 = vadd.f32 %v3576_v45, %v3564_v44  ;;  %v5209_v56 = vor.u32 %v7284_v59, %v5206_v42 }
 0x219   :  { %v5462_v43 = vld [vmem:[#allocation9 + $0x4b0] sm:$0xf0] }
 0x21a   :  { %3828 = vmatpush.bf16.msra.mxu3 %v5849_v60  ;;  %3803 = vmatpush.bf16.msra.mxu1 %v5305_v4  ;;  %v7412_v46 = vld [vmem:[#allocation9 + $0x694] sm:$0xf]  ;;  %v5465_v58 = vor.u32 %v7348_v53, %v5462_v43 }
 0x21b   :  { %v5718_v47 = vld [vmem:[#allocation9 + $0x6b0] sm:$0xf0] }
 0x21c   :  { %3816 = vmatpush.bf16.msra.mxu2 %v5561_v5  ;;  %3791 = vmatpush.bf16.msra.mxu0 %v5017_v15  ;;  %v7212_v60 = vld [vmem:[#allocation9 + $0x54] sm:$0xf]  ;;  %v5721_v1 = vor.u32 %v7412_v46, %v5718_v47  ;;  %v3565_v15 = vpop.f32.mrf.mxu2 }
 0x21d   :  { %v4918_v62 = vld [vmem:[#allocation9 + $0x70] sm:$0xf0] }
 0x21e   :  { %3829 = vmatpush.bf16.msra.mxu3 %v5817_v9  ;;  %3804 = vmatpush.bf16.msra.mxu1 %v5273_v17  ;;  %v7276_v63 = vld [vmem:[#allocation9 + $0x254] sm:$0xf]  ;;  %v4921_v7 = vor.u32 %v7212_v60, %v4918_v62 }
 0x21f   :  { %v5174_v2 = vld [vmem:[#allocation9 + $0x270] sm:$0xf0] }
 0x220   :  { %3817 = vmatpush.bf16.msra.mxu2 %v5529_v18  ;;  %3792 = vmatpush.bf16.msra.mxu0 %v4985_v35  ;;  %v7340_v3 = vld [vmem:[#allocation9 + $0x454] sm:$0xf]  ;;  %v5177_v10 = vor.u32 %v7276_v63, %v5174_v2 }
 0x221   :  { %v5430_v4 = vld [vmem:[#allocation9 + $0x470] sm:$0xf0] }
 0x222   :  { %3830 = vmatpush.bf16.msra.mxu3 %v5785_v25  ;;  %3805 = vmatpush.bf16.msra.mxu1 %v5241_v36  ;;  %v7404_v5 = vld [vmem:[#allocation9 + $0x654] sm:$0xf]  ;;  %v5433_v11 = vor.u32 %v7340_v3, %v5430_v4 }
 0x223   :  { %v5686_v6 = vld [vmem:[#allocation9 + $0x670] sm:$0xf0] }
 0x224   :  { %3818 = vmatpush.bf16.msra.mxu2 %v5497_v37  ;;  %3793 = vmatpush.bf16.msra.mxu0 %v4953_v28  ;;  %v7204_v8 = vld [vmem:[#allocation9 + $0x14] sm:$0xf]  ;;  %v5689_v16 = vor.u32 %v7404_v5, %v5686_v6 }
 0x225   :  { %v4886_v9 = vld [vmem:[#allocation9 + $0x30] sm:$0xf0] }
 0x226   :  { %3831 = vmatpush.bf16.msra.mxu3 %v5753_v48  ;;  %3806 = vmatpush.bf16.msra.mxu1 %v5209_v56  ;;  %v7268_v12 = vld [vmem:[#allocation9 + $0x214] sm:$0xf]  ;;  %v4889_v25 = vor.u32 %v7204_v8, %v4886_v9 }
 0x227   :  { %v5142_v13 = vld [vmem:[#allocation9 + $0x230] sm:$0xf0] }
 0x228   :  { %3819 = vmatpush.bf16.msra.mxu2 %v5465_v58  ;;  %v7332_v14 = vld [vmem:[#allocation9 + $0x414] sm:$0xf]  ;;  %3794 = vmatpush.bf16.msra.mxu0 %v4921_v7  ;;  %v5145_v30 = vor.u32 %v7268_v12, %v5142_v13 }
 0x229   :  { %v5398_v17 = vld [vmem:[#allocation9 + $0x430] sm:$0xf0] }
 0x22a   :  { %3832 = vmatpush.bf16.msra.mxu3 %v5721_v1  ;;  %v7396_v18 = vld [vmem:[#allocation9 + $0x614] sm:$0xf]  ;;  %3807 = vmatpush.bf16.msra.mxu1 %v5177_v10  ;;  %v5401_v31 = vor.u32 %v7332_v14, %v5398_v17  ;;  %v3589_v17 = vpop.f32.mrf.mxu0 }
 0x22b   :  { %v5654_v20 = vld [vmem:[#allocation9 + $0x630] sm:$0xf0] }
 0x22c   :  { %v7516_v22 = vld [vmem:[#allocation9 + $0x9d4] sm:$0xf]  ;;  %3820 = vmatpush.bf16.msra.mxu2 %v5433_v11  ;;  %v5657_v36 = vor.u32 %v7396_v18, %v5654_v20  ;;  %3795 = vmatpush.bf16.msra.mxu0 %v4889_v25 }
 0x22d   :  { %v6134_v23 = vld [vmem:[#allocation9 + $0x9f0] sm:$0xf0] }
 0x22e   :  { %v7580_v24 = vld [vmem:[#allocation9 + $0xbd4] sm:$0xf]  ;;  %3833 = vmatpush.bf16.msra.mxu3 %v5689_v16  ;;  %v6137_v37 = vor.u32 %v7516_v22, %v6134_v23  ;;  %3808 = vmatpush.bf16.msra.mxu1 %v5145_v30 }
 0x22f   :  { %v6390_v26 = vld [vmem:[#allocation9 + $0xbf0] sm:$0xf0]  ;;  %3796 = vmatmul.bf16.vlgmr.msra.gmra.mxu0 %v8084_v32 }
 0x230   :  { %v7644_v27 = vld [vmem:[#allocation9 + $0xdd4] sm:$0xf]  ;;  %v6393_v39 = vor.u32 %v7580_v24, %v6390_v26  ;;  %3821 = vmatpush.bf16.msra.mxu2 %v5401_v31  ;;  %3840 = vmatpush.bf16.msrb.mxu0 %v6137_v37  ;;  %v3602_v24 = vpop.f32.mrf.mxu1 }
 0x231   :  { %v6646_v29 = vld [vmem:[#allocation9 + $0xdf0] sm:$0xf0]  ;;  %3809 = vmatmul.bf16.vlgmr.msra.gmra.mxu1 %v8088_v38  ;;  %v3603_v30 = vadd.f32 %v3602_v24, %v3589_v17  ;;  %v7265_v24 = vld [vmem:[#allocation9 + $0x1f4] sm:$0xf0] }
 0x232   :  { %v7708_v34 = vld [vmem:[#allocation9 + $0xfd4] sm:$0xf]  ;;  %v6649_v40 = vor.u32 %v7644_v27, %v6646_v29  ;;  %3834 = vmatpush.bf16.msra.mxu3 %v5657_v36  ;;  %3853 = vmatpush.bf16.msrb.mxu1 %v6393_v39 }
 0x233   :  { %v6902_v35 = vld [vmem:[#allocation9 + $0xff0] sm:$0xf0]  ;;  %3822 = vmatmul.bf16.vlgmr.msra.gmra.mxu2 %v8080_v19 }
 0x234   :  { %v7508_v59 = vld [vmem:[#allocation9 + $0x994] sm:$0xf]  ;;  %v6905_v42 = vor.u32 %v7708_v34, %v6902_v35  ;;  %3866 = vmatpush.bf16.msrb.mxu2 %v6649_v40 }
 0x235   :  { %v6102_v41 = vld [vmem:[#allocation9 + $0x9b0] sm:$0xf0]  ;;  %3835 = vmatmul.bf16.vlgmr.msra.gmra.mxu3 %v8086_v33 }
 0x236   :  { %v7572_v48 = vld [vmem:[#allocation9 + $0xb94] sm:$0xf]  ;;  %v6105_v47 = vor.u32 %v7508_v59, %v6102_v41  ;;  %3879 = vmatpush.bf16.msrb.mxu3 %v6905_v42  ;;  %v3615_v41 = vpop.f32.mrf.mxu2 }
 0x237   :  { %v6358_v53 = vld [vmem:[#allocation9 + $0xbb0] sm:$0xf0] }
 0x238   :  { %v7636_v43 = vld [vmem:[#allocation9 + $0xd94] sm:$0xf]  ;;  %v6361_v28 = vor.u32 %v7572_v48, %v6358_v53  ;;  %3841 = vmatpush.bf16.msrb.mxu0 %v6105_v47 }
 0x239   :  { %v6614_v44 = vld [vmem:[#allocation9 + $0xdb0] sm:$0xf0] }
 0x23a   :  { %v7700_v45 = vld [vmem:[#allocation9 + $0xf94] sm:$0xf]  ;;  %v6617_v52 = vor.u32 %v7636_v43, %v6614_v44  ;;  %3854 = vmatpush.bf16.msrb.mxu1 %v6361_v28  ;;  %v3616_v44 = vadd.f32 %v3615_v41, %v3603_v30  ;;  %v7393_v30 = vld [vmem:[#allocation9 + $0x5f4] sm:$0xf0] }
 0x23b   :  { %v6870_v46 = vld [vmem:[#allocation9 + $0xfb0] sm:$0xf0]  ;;  %v5084_v41 = vld [vmem:[#allocation9 + $0x198] sm:$0xf] }
 0x23c   :  { %v7500_v56 = vld [vmem:[#allocation9 + $0x954] sm:$0xf]  ;;  %v6873_v62 = vor.u32 %v7700_v45, %v6870_v46  ;;  %3867 = vmatpush.bf16.msrb.mxu2 %v6617_v52  ;;  %v3628_v45 = vpop.f32.mrf.mxu3 }
 0x23d   :  { %v6070_v58 = vld [vmem:[#allocation9 + $0x970] sm:$0xf0]  ;;  %v8160_v52 = vadd.f32 %v3628_v45, %v3616_v44  ;;  %v5596_v44 = vld [vmem:[#allocation9 + $0x598] sm:$0xf] }
 0x23e   :  { %v7564_v60 = vld [vmem:[#allocation9 + $0xb54] sm:$0xf]  ;;  %v6073_v4 = vor.u32 %v7500_v56, %v6070_v58  ;;  %3880 = vmatpush.bf16.msrb.mxu3 %v6873_v62  ;;  %v3591_v56 = vpop.f32.mrf.mxu0  ;;  %v7385_v45 = vld [vmem:[#allocation9 + $0x5b4] sm:$0xf0] }
 0x23f   :  { %v6326_v63 = vld [vmem:[#allocation9 + $0xb70] sm:$0xf0] }
 0x240   :  { %v7628_v0 = vld [vmem:[#allocation9 + $0xd54] sm:$0xf]  ;;  %v6329_v5 = vor.u32 %v7564_v60, %v6326_v63  ;;  %3842 = vmatpush.bf16.msrb.mxu0 %v6073_v4 }
 0x241   :  { %v6582_v1 = vld [vmem:[#allocation9 + $0xd70] sm:$0xf0] }
 0x242   :  { %v7692_v2 = vld [vmem:[#allocation9 + $0xf54] sm:$0xf]  ;;  %v6585_v6 = vor.u32 %v7628_v0, %v6582_v1  ;;  %3855 = vmatpush.bf16.msrb.mxu1 %v6329_v5  ;;  %v3604_v1 = vpop.f32.mrf.mxu1 }
 0x243   :  { %v6838_v3 = vld [vmem:[#allocation9 + $0xf70] sm:$0xf0]  ;;  %v7313_v1 = vld [vmem:[#allocation9 + $0x374] sm:$0xf0] }
 0x244   :  { %v7492_v7 = vld [vmem:[#allocation9 + $0x914] sm:$0xf]  ;;  %v6841_v10 = vor.u32 %v7692_v2, %v6838_v3  ;;  %3868 = vmatpush.bf16.msrb.mxu2 %v6585_v6 }
 0x245   :  { %v6038_v8 = vld [vmem:[#allocation9 + $0x930] sm:$0xf0] }
 0x246   :  { %v7556_v9 = vld [vmem:[#allocation9 + $0xb14] sm:$0xf]  ;;  %v6041_v16 = vor.u32 %v7492_v7, %v6038_v8  ;;  %3881 = vmatpush.bf16.msrb.mxu3 %v6841_v10 }
 0x247   :  { %v6294_v11 = vld [vmem:[#allocation9 + $0xb30] sm:$0xf0] }
 0x248   :  { %v7620_v12 = vld [vmem:[#allocation9 + $0xd14] sm:$0xf]  ;;  %v6297_v18 = vor.u32 %v7556_v9, %v6294_v11  ;;  %3843 = vmatpush.bf16.msrb.mxu0 %v6041_v16  ;;  %v3617_v16 = vpop.f32.mrf.mxu2 }
 0x249   :  { %v6550_v13 = vld [vmem:[#allocation9 + $0xd30] sm:$0xf0]  ;;  %v5788_v16 = vld [vmem:[#allocation9 + $0x718] sm:$0xf] }
 0x24a   :  { %v7684_v14 = vld [vmem:[#allocation9 + $0xf14] sm:$0xf]  ;;  %v6553_v20 = vor.u32 %v7620_v12, %v6550_v13  ;;  %3856 = vmatpush.bf16.msrb.mxu1 %v6297_v18 }
 0x24b   :  { %v6806_v15 = vld [vmem:[#allocation9 + $0xf30] sm:$0xf0] }
 0x24c   :  { %v7484_v21 = vld [vmem:[#allocation9 + $0x8d4] sm:$0xf]  ;;  %v6809_v25 = vor.u32 %v7684_v14, %v6806_v15  ;;  %3869 = vmatpush.bf16.msrb.mxu2 %v6553_v20 }
 0x24d   :  { %v6006_v22 = vld [vmem:[#allocation9 + $0x8f0] sm:$0xf0] }
 0x24e   :  { %v7548_v23 = vld [vmem:[#allocation9 + $0xad4] sm:$0xf]  ;;  %v6009_v35 = vor.u32 %v7484_v21, %v6006_v22  ;;  %3882 = vmatpush.bf16.msrb.mxu3 %v6809_v25  ;;  %v3630_v22 = vpop.f32.mrf.mxu3  ;;  %v5372_v25 = vld [vmem:[#allocation9 + $0x3d8] sm:$0xf] }
 0x24f   :  { %v6262_v26 = vld [vmem:[#allocation9 + $0xaf0] sm:$0xf0] }
 0x250   :  { %v7612_v27 = vld [vmem:[#allocation9 + $0xcd4] sm:$0xf]  ;;  %v6265_v36 = vor.u32 %v7548_v23, %v6262_v26  ;;  %3844 = vmatpush.bf16.msrb.mxu0 %v6009_v35  ;;  %v5116_v23 = vld [vmem:[#allocation9 + $0x1d8] sm:$0xf] }
 0x251   :  { %v6518_v29 = vld [vmem:[#allocation9 + $0xcf0] sm:$0xf0]  ;;  %v5884_v35 = vld [vmem:[#allocation9 + $0x7d8] sm:$0xf] }
 0x252   :  { %v7676_v31 = vld [vmem:[#allocation9 + $0xed4] sm:$0xf]  ;;  %v6521_v37 = vor.u32 %v7612_v27, %v6518_v29  ;;  %3857 = vmatpush.bf16.msrb.mxu1 %v6265_v36  ;;  %v7329_v27 = vld [vmem:[#allocation9 + $0x3f4] sm:$0xf0] }
 0x253   :  { %v6774_v34 = vld [vmem:[#allocation9 + $0xef0] sm:$0xf0]  ;;  %v5628_v29 = vld [vmem:[#allocation9 + $0x5d8] sm:$0xf] }
 0x254   :  { %v7476_v39 = vld [vmem:[#allocation9 + $0x894] sm:$0xf]  ;;  %v6777_v48 = vor.u32 %v7676_v31, %v6774_v34  ;;  %3870 = vmatpush.bf16.msrb.mxu2 %v6521_v37  ;;  %v7457_v36 = vld [vmem:[#allocation9 + $0x7f4] sm:$0xf0] }
 0x255   :  { %v5974_v40 = vld [vmem:[#allocation9 + $0x8b0] sm:$0xf0] }
 0x256   :  { %v7540_v59 = vld [vmem:[#allocation9 + $0xa94] sm:$0xf]  ;;  %v5977_v28 = vor.u32 %v7476_v39, %v5974_v40  ;;  %3883 = vmatpush.bf16.msrb.mxu3 %v6777_v48  ;;  %v5117_v39 = vor.u32 %v7265_v24, %v5116_v23  ;;  %v5373_v40 = vor.u32 %v7329_v27, %v5372_v25  ;;  %v7257_v48 = vld [vmem:[#allocation9 + $0x1b4] sm:$0xf0]  ;;  %v3654_v27 = vpop.f32.mrf.mxu1 }
 0x257   :  { %v6230_v42 = vld [vmem:[#allocation9 + $0xab0] sm:$0xf0]  ;;  %v4988_v23 = vld [vmem:[#allocation9 + $0xd8] sm:$0xf] }
 0x258   :  { %v7604_v53 = vld [vmem:[#allocation9 + $0xc94] sm:$0xf]  ;;  %v6233_v58 = vor.u32 %v7540_v59, %v6230_v42  ;;  %3845 = vmatpush.bf16.msrb.mxu0 %v5977_v28  ;;  %v5629_v59 = vor.u32 %v7393_v30, %v5628_v29  ;;  %v5340_v42 = vld [vmem:[#allocation9 + $0x398] sm:$0xf]  ;;  %v5085_v28 = vor.u32 %v7257_v48, %v5084_v41 }
 0x259   :  { %v6486_v43 = vld [vmem:[#allocation9 + $0xcb0] sm:$0xf0]  ;;  %v7233_v24 = vld [vmem:[#allocation9 + $0xf4] sm:$0xf0] }
 0x25a   :  { %v7668_v46 = vld [vmem:[#allocation9 + $0xe94] sm:$0xf]  ;;  %v6489_v60 = vor.u32 %v7604_v53, %v6486_v43  ;;  %3858 = vmatpush.bf16.msrb.mxu1 %v6233_v58  ;;  %v5885_v53 = vor.u32 %v7457_v36, %v5884_v35  ;;  %v7321_v43 = vld [vmem:[#allocation9 + $0x3b4] sm:$0xf0]  ;;  %v5597_v58 = vor.u32 %v7385_v45, %v5596_v44 }
 0x25b   :  { %v6742_v47 = vld [vmem:[#allocation9 + $0xeb0] sm:$0xf0]  ;;  %v5341_v56 = vor.u32 %v7321_v43, %v5340_v42  ;;  %v5244_v25 = vld [vmem:[#allocation9 + $0x2d8] sm:$0xf] }
 0x25c   :  { %v7468_v62 = vld [vmem:[#allocation9 + $0x854] sm:$0xf]  ;;  %v6745_v2 = vor.u32 %v7668_v46, %v6742_v47  ;;  %3871 = vmatpush.bf16.msrb.mxu2 %v6489_v60  ;;  %v5852_v46 = vld [vmem:[#allocation9 + $0x798] sm:$0xf] }
 0x25d   :  { %v5942_v63 = vld [vmem:[#allocation9 + $0x870] sm:$0xf0]  ;;  %v7449_v47 = vld [vmem:[#allocation9 + $0x7b4] sm:$0xf0] }
 0x25e   :  { %v7532_v0 = vld [vmem:[#allocation9 + $0xa54] sm:$0xf]  ;;  %v5945_v8 = vor.u32 %v7468_v62, %v5942_v63  ;;  %3884 = vmatpush.bf16.msrb.mxu3 %v6745_v2  ;;  %v5052_v60 = vld [vmem:[#allocation9 + $0x158] sm:$0xf] }
 0x25f   :  { %v6198_v3 = vld [vmem:[#allocation9 + $0xa70] sm:$0xf0]  ;;  %v7249_v62 = vld [vmem:[#allocation9 + $0x174] sm:$0xf0] }
 0x260   :  { %v7596_v4 = vld [vmem:[#allocation9 + $0xc54] sm:$0xf]  ;;  %v6201_v11 = vor.u32 %v7532_v0, %v6198_v3  ;;  %3846 = vmatpush.bf16.msrb.mxu0 %v5945_v8  ;;  %v5308_v63 = vld [vmem:[#allocation9 + $0x358] sm:$0xf]  ;;  %v5853_v0 = vor.u32 %v7449_v47, %v5852_v46  ;;  %v3680_v47 = vpop.f32.mrf.mxu3 }
 0x261   :  { %v6454_v5 = vld [vmem:[#allocation9 + $0xc70] sm:$0xf0]  ;;  %v5564_v2 = vld [vmem:[#allocation9 + $0x558] sm:$0xf] }
 0x262   :  { %v7660_v6 = vld [vmem:[#allocation9 + $0xe54] sm:$0xf]  ;;  %v6457_v12 = vor.u32 %v7596_v4, %v6454_v5  ;;  %3859 = vmatpush.bf16.msrb.mxu1 %v6201_v11  ;;  %v7377_v3 = vld [vmem:[#allocation9 + $0x574] sm:$0xf0] }
 0x263   :  { %v6710_v7 = vld [vmem:[#allocation9 + $0xe70] sm:$0xf0]  ;;  %v5820_v4 = vld [vmem:[#allocation9 + $0x758] sm:$0xf]  ;;  %v5565_v8 = vor.u32 %v7377_v3, %v5564_v2 }
 0x264   :  { %v7460_v9 = vld [vmem:[#allocation9 + $0x814] sm:$0xf]  ;;  %v6713_v17 = vor.u32 %v7660_v6, %v6710_v7  ;;  %3872 = vmatpush.bf16.msrb.mxu2 %v6457_v12  ;;  %v7441_v5 = vld [vmem:[#allocation9 + $0x774] sm:$0xf0]  ;;  %v5053_v6 = vor.u32 %v7249_v62, %v5052_v60  ;;  %v5309_v7 = vor.u32 %v7313_v1, %v5308_v63 }
 0x265   :  { %v5910_v10 = vld [vmem:[#allocation9 + $0x830] sm:$0xf0]  ;;  %v5276_v11 = vld [vmem:[#allocation9 + $0x318] sm:$0xf]  ;;  %v5821_v12 = vor.u32 %v7441_v5, %v5820_v4  ;;  %v3656_v4 = vpop.f32.mrf.mxu1 }
 0x266   :  { %v7524_v13 = vld [vmem:[#allocation9 + $0xa14] sm:$0xf]  ;;  %v5913_v26 = vor.u32 %v7460_v9, %v5910_v10  ;;  %3885 = vmatpush.bf16.msrb.mxu3 %v6713_v17  ;;  %v5020_v9 = vld [vmem:[#allocation9 + $0x118] sm:$0xf] }
 0x267   :  { %v6166_v14 = vld [vmem:[#allocation9 + $0xa30] sm:$0xf0]  ;;  %v7241_v10 = vld [vmem:[#allocation9 + $0x134] sm:$0xf0] }
 0x268   :  { %v7588_v15 = vld [vmem:[#allocation9 + $0xc14] sm:$0xf]  ;;  %v6169_v31 = vor.u32 %v7524_v13, %v6166_v14  ;;  %3847 = vmatpush.bf16.msrb.mxu0 %v5913_v26  ;;  %v7305_v13 = vld [vmem:[#allocation9 + $0x334] sm:$0xf0] }
 0x269   :  { %v6422_v18 = vld [vmem:[#allocation9 + $0xc30] sm:$0xf0]  ;;  %v5532_v14 = vld [vmem:[#allocation9 + $0x518] sm:$0xf] }
 0x26a   :  { %v7652_v20 = vld [vmem:[#allocation9 + $0xe14] sm:$0xf]  ;;  %v6425_v34 = vor.u32 %v7588_v15, %v6422_v18  ;;  %3860 = vmatpush.bf16.msrb.mxu1 %v6169_v31  ;;  %v7369_v15 = vld [vmem:[#allocation9 + $0x534] sm:$0xf0]  ;;  %v5021_v18 = vor.u32 %v7241_v10, %v5020_v9 }
 0x26b   :  { %v6678_v21 = vld [vmem:[#allocation9 + $0xe30] sm:$0xf0]  ;;  %3848 = vmatmul.bf16.vlgmr.msrb.gmra.mxu0 %v8099_v54  ;;  %v7433_v17 = vld [vmem:[#allocation9 + $0x734] sm:$0xf0]  ;;  %v5533_v22 = vor.u32 %v7369_v15, %v5532_v14 }
 0x26c   :  { %v6681_v37 = vor.u32 %v7652_v20, %v6678_v21  ;;  %3873 = vmatpush.bf16.msrb.mxu2 %v6425_v34  ;;  %3892 = vmatpush.bf16.msra.mxu0 %v5117_v39  ;;  %v3641_v20 = vpop.f32.mrf.mxu0  ;;  %v5277_v21 = vor.u32 %v7305_v13, %v5276_v11  ;;  %v5789_v29 = vor.u32 %v7433_v17, %v5788_v16  ;;  %v7297_v30 = vld [vmem:[#allocation9 + $0x2f4] sm:$0xf0] }
 0x26d   :  { %3861 = vmatmul.bf16.vlgmr.msrb.gmra.mxu1 %v8103_v57  ;;  %v3642_v26 = vadd.f32 %v3641_v20, %v8160_v52  ;;  %v5500_v31 = vld [vmem:[#allocation9 + $0x4d8] sm:$0xf]  ;;  %v4989_v39 = vor.u32 %v7233_v24, %v4988_v23 }
 0x26e   :  { %3886 = vmatpush.bf16.msrb.mxu3 %v6681_v37  ;;  %3905 = vmatpush.bf16.msra.mxu1 %v5373_v40  ;;  %v7361_v34 = vld [vmem:[#allocation9 + $0x4f4] sm:$0xf0]  ;;  %v5245_v40 = vor.u32 %v7297_v30, %v5244_v25  ;;  %v3682_v25 = vpop.f32.mrf.mxu3 }
 0x26f   :  { %3874 = vmatmul.bf16.vlgmr.msrb.gmra.mxu2 %v8097_v51  ;;  %v5756_v35 = vld [vmem:[#allocation9 + $0x6d8] sm:$0xf]  ;;  %v3655_v37 = vadd.f32 %v3654_v27, %v3642_v26 }
 0x270   :  { %3918 = vmatpush.bf16.msra.mxu2 %v5629_v59  ;;  %3893 = vmatpush.bf16.msra.mxu0 %v5085_v28  ;;  %v7425_v36 = vld [vmem:[#allocation9 + $0x6f4] sm:$0xf0]  ;;  %v5501_v59 = vor.u32 %v7361_v34, %v5500_v31 }
 0x271   :  { %3887 = vmatmul.bf16.vlgmr.msrb.gmra.mxu3 %v8101_v55  ;;  %v4956_v41 = vld [vmem:[#allocation9 + $0x98] sm:$0xf]  ;;  %v5757_v52 = vor.u32 %v7425_v36, %v5756_v35 }
 0x272   :  { %3931 = vmatpush.bf16.msra.mxu3 %v5885_v53  ;;  %3906 = vmatpush.bf16.msra.mxu1 %v5341_v56  ;;  %v7225_v48 = vld [vmem:[#allocation9 + $0xb4] sm:$0xf0]  ;;  %v3667_v53 = vpop.f32.mrf.mxu2 }
 0x273   :  { %v5212_v42 = vld [vmem:[#allocation9 + $0x298] sm:$0xf]  ;;  %v3668_v46 = vadd.f32 %v3667_v53, %v3655_v37 }
 0x274   :  { %3919 = vmatpush.bf16.msra.mxu2 %v5597_v58  ;;  %3894 = vmatpush.bf16.msra.mxu0 %v5053_v6  ;;  %v7289_v43 = vld [vmem:[#allocation9 + $0x2b4] sm:$0xf0]  ;;  %v4957_v58 = vor.u32 %v7225_v48, %v4956_v41  ;;  %v3643_v62 = vpop.f32.mrf.mxu0 }
 0x275   :  { %v5468_v44 = vld [vmem:[#allocation9 + $0x498] sm:$0xf]  ;;  %v8167_v60 = vadd.f32 %v3680_v47, %v3668_v46  ;;  %v5213_v63 = vor.u32 %v7289_v43, %v5212_v42 }
 0x276   :  { %3932 = vmatpush.bf16.msra.mxu3 %v5853_v0  ;;  %3907 = vmatpush.bf16.msra.mxu1 %v5309_v7  ;;  %v7353_v45 = vld [vmem:[#allocation9 + $0x4b4] sm:$0xf0] }
 0x277   :  { %v5724_v28 = vld [vmem:[#allocation9 + $0x698] sm:$0xf]  ;;  %v5469_v0 = vor.u32 %v7353_v45, %v5468_v44 }
 0x278   :  { %3920 = vmatpush.bf16.msra.mxu2 %v5565_v8  ;;  %3895 = vmatpush.bf16.msra.mxu0 %v5021_v18  ;;  %v7417_v56 = vld [vmem:[#allocation9 + $0x6b4] sm:$0xf0] }
 0x279   :  { %v4924_v1 = vld [vmem:[#allocation9 + $0x58] sm:$0xf]  ;;  %v5725_v5 = vor.u32 %v7417_v56, %v5724_v28 }
 0x27a   :  { %3933 = vmatpush.bf16.msra.mxu3 %v5821_v12  ;;  %3908 = vmatpush.bf16.msra.mxu1 %v5277_v21  ;;  %v7217_v2 = vld [vmem:[#allocation9 + $0x74] sm:$0xf0]  ;;  %v3669_v20 = vpop.f32.mrf.mxu2 }
 0x27b   :  { %v5180_v3 = vld [vmem:[#allocation9 + $0x258] sm:$0xf]  ;;  %v4925_v11 = vor.u32 %v7217_v2, %v4924_v1 }
 0x27c   :  { %3921 = vmatpush.bf16.msra.mxu2 %v5533_v22  ;;  %3896 = vmatpush.bf16.msra.mxu0 %v4989_v39  ;;  %v7281_v6 = vld [vmem:[#allocation9 + $0x274] sm:$0xf0] }
 0x27d   :  { %v5436_v7 = vld [vmem:[#allocation9 + $0x458] sm:$0xf]  ;;  %v5181_v14 = vor.u32 %v7281_v6, %v5180_v3 }
 0x27e   :  { %3934 = vmatpush.bf16.msra.mxu3 %v5789_v29  ;;  %3909 = vmatpush.bf16.msra.mxu1 %v5245_v40  ;;  %v7345_v8 = vld [vmem:[#allocation9 + $0x474] sm:$0xf0] }
 0x27f   :  { %v5692_v9 = vld [vmem:[#allocation9 + $0x658] sm:$0xf]  ;;  %v5437_v15 = vor.u32 %v7345_v8, %v5436_v7 }
 0x280   :  { %3922 = vmatpush.bf16.msra.mxu2 %v5501_v59  ;;  %v7409_v10 = vld [vmem:[#allocation9 + $0x674] sm:$0xf0]  ;;  %3897 = vmatpush.bf16.msra.mxu0 %v4957_v58 }
 0x281   :  { %v4892_v12 = vld [vmem:[#allocation9 + $0x18] sm:$0xf]  ;;  %v5693_v21 = vor.u32 %v7409_v10, %v5692_v9 }
 0x282   :  { %3935 = vmatpush.bf16.msra.mxu3 %v5757_v52  ;;  %v7209_v13 = vld [vmem:[#allocation9 + $0x34] sm:$0xf0]  ;;  %3910 = vmatpush.bf16.msra.mxu1 %v5213_v63 }
 0x283   :  { %v5148_v16 = vld [vmem:[#allocation9 + $0x218] sm:$0xf]  ;;  %v4893_v30 = vor.u32 %v7209_v13, %v4892_v12 }
 0x284   :  { %3923 = vmatpush.bf16.msra.mxu2 %v5469_v0  ;;  %v7273_v17 = vld [vmem:[#allocation9 + $0x234] sm:$0xf0]  ;;  %3898 = vmatpush.bf16.msra.mxu0 %v4925_v11 }
 0x285   :  { %v5404_v18 = vld [vmem:[#allocation9 + $0x418] sm:$0xf]  ;;  %v5149_v36 = vor.u32 %v7273_v17, %v5148_v16 }
 0x286   :  { %3936 = vmatpush.bf16.msra.mxu3 %v5725_v5  ;;  %v7337_v22 = vld [vmem:[#allocation9 + $0x434] sm:$0xf0]  ;;  %3911 = vmatpush.bf16.msra.mxu1 %v5181_v14 }
 0x287   :  { %v5660_v23 = vld [vmem:[#allocation9 + $0x618] sm:$0xf]  ;;  %v5405_v37 = vor.u32 %v7337_v22, %v5404_v18 }
 0x288   :  { %v7401_v24 = vld [vmem:[#allocation9 + $0x634] sm:$0xf0]  ;;  %3924 = vmatpush.bf16.msra.mxu2 %v5437_v15  ;;  %3899 = vmatpush.bf16.msra.mxu0 %v4893_v30  ;;  %v3706_v30 = vpop.f32.mrf.mxu1 }
 0x289   :  { %v6140_v26 = vld [vmem:[#allocation9 + $0x9d8] sm:$0xf]  ;;  %v5661_v59 = vor.u32 %v7401_v24, %v5660_v23  ;;  %v3693_v23 = vpop.f32.mrf.mxu0 }
 0x28a   :  { %v7521_v27 = vld [vmem:[#allocation9 + $0x9f4] sm:$0xf0]  ;;  %3937 = vmatpush.bf16.msra.mxu3 %v5693_v21  ;;  %3912 = vmatpush.bf16.msra.mxu1 %v5149_v36 }
 0x28b   :  { %v6396_v29 = vld [vmem:[#allocation9 + $0xbd8] sm:$0xf]  ;;  %v6141_v41 = vor.u32 %v7521_v27, %v6140_v26  ;;  %3900 = vmatmul.bf16.vlgmr.msra.gmra.mxu0 %v8084_v32 }
 0x28c   :  { %v7585_v31 = vld [vmem:[#allocation9 + $0xbf4] sm:$0xf0]  ;;  %3925 = vmatpush.bf16.msra.mxu2 %v5405_v37  ;;  %v3707_v37 = vadd.f32 %v3706_v30, %v3693_v23  ;;  %v7261_v30 = vld [vmem:[#allocation9 + $0x1dc] sm:$0xf] }
 0x28d   :  { %v6652_v34 = vld [vmem:[#allocation9 + $0xdd8] sm:$0xf]  ;;  %v6397_v48 = vor.u32 %v7585_v31, %v6396_v29  ;;  %3944 = vmatpush.bf16.msrb.mxu0 %v6141_v41  ;;  %3913 = vmatmul.bf16.vlgmr.msra.gmra.mxu1 %v8088_v38 }
 0x28e   :  { %v7649_v35 = vld [vmem:[#allocation9 + $0xdf4] sm:$0xf0]  ;;  %3938 = vmatpush.bf16.msra.mxu3 %v5661_v59 }
 0x28f   :  { %v6908_v39 = vld [vmem:[#allocation9 + $0xfd8] sm:$0xf]  ;;  %v6653_v42 = vor.u32 %v7649_v35, %v6652_v34  ;;  %3957 = vmatpush.bf16.msrb.mxu1 %v6397_v48  ;;  %3926 = vmatmul.bf16.vlgmr.msra.gmra.mxu2 %v8080_v19 }
 0x290   :  { %v7713_v40 = vld [vmem:[#allocation9 + $0xff4] sm:$0xf0] }
 0x291   :  { %v6108_v53 = vld [vmem:[#allocation9 + $0x998] sm:$0xf]  ;;  %v6909_v44 = vor.u32 %v7713_v40, %v6908_v39  ;;  %3970 = vmatpush.bf16.msrb.mxu2 %v6653_v42  ;;  %3939 = vmatmul.bf16.vlgmr.msra.gmra.mxu3 %v8086_v33 }
 0x292   :  { %v7513_v52 = vld [vmem:[#allocation9 + $0x9b4] sm:$0xf0] }
 0x293   :  { %v6364_v43 = vld [vmem:[#allocation9 + $0xb98] sm:$0xf]  ;;  %v6109_v58 = vor.u32 %v7513_v52, %v6108_v53  ;;  %3983 = vmatpush.bf16.msrb.mxu3 %v6909_v44 }
 0x294   :  { %v7577_v45 = vld [vmem:[#allocation9 + $0xbb4] sm:$0xf0] }
 0x295   :  { %v6620_v46 = vld [vmem:[#allocation9 + $0xd98] sm:$0xf]  ;;  %v6365_v62 = vor.u32 %v7577_v45, %v6364_v43  ;;  %3945 = vmatpush.bf16.msrb.mxu0 %v6109_v58  ;;  %v3719_v43 = vpop.f32.mrf.mxu2 }
 0x296   :  { %v7641_v47 = vld [vmem:[#allocation9 + $0xdb4] sm:$0xf0] }
 0x297   :  { %v6876_v28 = vld [vmem:[#allocation9 + $0xf98] sm:$0xf]  ;;  %v6621_v63 = vor.u32 %v7641_v47, %v6620_v46  ;;  %3958 = vmatpush.bf16.msrb.mxu1 %v6365_v62 }
 0x298   :  { %v7705_v56 = vld [vmem:[#allocation9 + $0xfb4] sm:$0xf0] }
 0x299   :  { %v6076_v0 = vld [vmem:[#allocation9 + $0x958] sm:$0xf]  ;;  %v6877_v3 = vor.u32 %v7705_v56, %v6876_v28  ;;  %3971 = vmatpush.bf16.msrb.mxu2 %v6621_v63  ;;  %v3720_v28 = vadd.f32 %v3719_v43, %v3707_v37  ;;  %v3732_v56 = vpop.f32.mrf.mxu3  ;;  %v7389_v37 = vld [vmem:[#allocation9 + $0x5dc] sm:$0xf] }
 0x29a   :  { %v7505_v1 = vld [vmem:[#allocation9 + $0x974] sm:$0xf0] }
 0x29b   :  { %v6332_v2 = vld [vmem:[#allocation9 + $0xb58] sm:$0xf]  ;;  %v6077_v9 = vor.u32 %v7505_v1, %v6076_v0  ;;  %3984 = vmatpush.bf16.msrb.mxu3 %v6877_v3  ;;  %v8173_v0 = vadd.f32 %v3732_v56, %v3720_v28  ;;  %v3695_v1 = vpop.f32.mrf.mxu0  ;;  %v5342_v28 = vld [vmem:[#allocation9 + $0x3b8] sm:$0xf0] }
 0x29c   :  { %v7569_v4 = vld [vmem:[#allocation9 + $0xb74] sm:$0xf0]  ;;  %v7381_v56 = vld [vmem:[#allocation9 + $0x59c] sm:$0xf] }
 0x29d   :  { %v6588_v5 = vld [vmem:[#allocation9 + $0xd58] sm:$0xf]  ;;  %v6333_v10 = vor.u32 %v7569_v4, %v6332_v2  ;;  %3946 = vmatpush.bf16.msrb.mxu0 %v6077_v9  ;;  %v3721_v23 = vpop.f32.mrf.mxu2 }
 0x29e   :  { %v7633_v6 = vld [vmem:[#allocation9 + $0xd74] sm:$0xf0]  ;;  %v5534_v23 = vld [vmem:[#allocation9 + $0x538] sm:$0xf0] }
 0x29f   :  { %v6844_v7 = vld [vmem:[#allocation9 + $0xf58] sm:$0xf]  ;;  %v6589_v11 = vor.u32 %v7633_v6, %v6588_v5  ;;  %3959 = vmatpush.bf16.msrb.mxu1 %v6333_v10 }
 0x2a0   :  { %v7697_v8 = vld [vmem:[#allocation9 + $0xf74] sm:$0xf0] }
 0x2a1   :  { %v6044_v12 = vld [vmem:[#allocation9 + $0x918] sm:$0xf]  ;;  %v6845_v15 = vor.u32 %v7697_v8, %v6844_v7  ;;  %3972 = vmatpush.bf16.msrb.mxu2 %v6589_v11  ;;  %v3708_v7 = vpop.f32.mrf.mxu1 }
 0x2a2   :  { %v7497_v13 = vld [vmem:[#allocation9 + $0x934] sm:$0xf0] }
 0x2a3   :  { %v6300_v14 = vld [vmem:[#allocation9 + $0xb18] sm:$0xf]  ;;  %v6045_v22 = vor.u32 %v7497_v13, %v6044_v12  ;;  %3985 = vmatpush.bf16.msrb.mxu3 %v6845_v15 }
 0x2a4   :  { %v7561_v16 = vld [vmem:[#allocation9 + $0xb34] sm:$0xf0] }
 0x2a5   :  { %v6556_v17 = vld [vmem:[#allocation9 + $0xd18] sm:$0xf]  ;;  %v6301_v24 = vor.u32 %v7561_v16, %v6300_v14  ;;  %3947 = vmatpush.bf16.msrb.mxu0 %v6045_v22 }
 0x2a6   :  { %v7625_v18 = vld [vmem:[#allocation9 + $0xd34] sm:$0xf0] }
 0x2a7   :  { %v6812_v20 = vld [vmem:[#allocation9 + $0xf18] sm:$0xf]  ;;  %v6557_v25 = vor.u32 %v7625_v18, %v6556_v17  ;;  %3960 = vmatpush.bf16.msrb.mxu1 %v6301_v24 }
 0x2a8   :  { %v7689_v21 = vld [vmem:[#allocation9 + $0xf34] sm:$0xf0] }
 0x2a9   :  { %v6012_v26 = vld [vmem:[#allocation9 + $0x8d8] sm:$0xf]  ;;  %v6813_v31 = vor.u32 %v7689_v21, %v6812_v20  ;;  %3973 = vmatpush.bf16.msrb.mxu2 %v6557_v25 }
 0x2aa   :  { %v7489_v27 = vld [vmem:[#allocation9 + $0x8f4] sm:$0xf0] }
 0x2ab   :  { %v6268_v29 = vld [vmem:[#allocation9 + $0xad8] sm:$0xf]  ;;  %v6013_v59 = vor.u32 %v7489_v27, %v6012_v26  ;;  %3986 = vmatpush.bf16.msrb.mxu3 %v6813_v31  ;;  %v5118_v31 = vld [vmem:[#allocation9 + $0x1f8] sm:$0xf0] }
 0x2ac   :  { %v7553_v34 = vld [vmem:[#allocation9 + $0xaf4] sm:$0xf0] }
 0x2ad   :  { %v6524_v35 = vld [vmem:[#allocation9 + $0xcd8] sm:$0xf]  ;;  %v6269_v41 = vor.u32 %v7553_v34, %v6268_v29  ;;  %3948 = vmatpush.bf16.msrb.mxu0 %v6013_v59  ;;  %v3734_v29 = vpop.f32.mrf.mxu3  ;;  %v7325_v34 = vld [vmem:[#allocation9 + $0x3dc] sm:$0xf] }
 0x2ae   :  { %v7617_v36 = vld [vmem:[#allocation9 + $0xcf4] sm:$0xf0] }
 0x2af   :  { %v6780_v39 = vld [vmem:[#allocation9 + $0xed8] sm:$0xf]  ;;  %v6525_v48 = vor.u32 %v7617_v36, %v6524_v35  ;;  %3961 = vmatpush.bf16.msrb.mxu1 %v6269_v41  ;;  %v5374_v36 = vld [vmem:[#allocation9 + $0x3f8] sm:$0xf0] }
 0x2b0   :  { %v7681_v40 = vld [vmem:[#allocation9 + $0xef4] sm:$0xf0]  ;;  %v7453_v41 = vld [vmem:[#allocation9 + $0x7dc] sm:$0xf] }
 0x2b1   :  { %v5980_v42 = vld [vmem:[#allocation9 + $0x898] sm:$0xf]  ;;  %v6781_v44 = vor.u32 %v7681_v40, %v6780_v39  ;;  %3974 = vmatpush.bf16.msrb.mxu2 %v6525_v48  ;;  %v5630_v39 = vld [vmem:[#allocation9 + $0x5f8] sm:$0xf0] }
 0x2b2   :  { %v7481_v53 = vld [vmem:[#allocation9 + $0x8b4] sm:$0xf0]  ;;  %v5886_v48 = vld [vmem:[#allocation9 + $0x7f8] sm:$0xf0]  ;;  %v5633_v43 = vor.u32 %v7389_v37, %v5630_v39  ;;  %v3758_v37 = vpop.f32.mrf.mxu1 }
 0x2b3   :  { %v6236_v52 = vld [vmem:[#allocation9 + $0xa98] sm:$0xf]  ;;  %v5981_v63 = vor.u32 %v7481_v53, %v5980_v42  ;;  %3987 = vmatpush.bf16.msrb.mxu3 %v6781_v44  ;;  %v5121_v53 = vor.u32 %v7261_v30, %v5118_v31  ;;  %v7253_v44 = vld [vmem:[#allocation9 + $0x19c] sm:$0xf] }
 0x2b4   :  { %v7545_v45 = vld [vmem:[#allocation9 + $0xab4] sm:$0xf0]  ;;  %v7229_v31 = vld [vmem:[#allocation9 + $0xdc] sm:$0xf] }
 0x2b5   :  { %v6492_v46 = vld [vmem:[#allocation9 + $0xc98] sm:$0xf]  ;;  %v6237_v2 = vor.u32 %v7545_v45, %v6236_v52  ;;  %3949 = vmatpush.bf16.msrb.mxu0 %v5981_v63  ;;  %v5377_v52 = vor.u32 %v7325_v34, %v5374_v36  ;;  %v5086_v45 = vld [vmem:[#allocation9 + $0x1b8] sm:$0xf0] }
 0x2b6   :  { %v7609_v47 = vld [vmem:[#allocation9 + $0xcb4] sm:$0xf0]  ;;  %v5854_v63 = vld [vmem:[#allocation9 + $0x7b8] sm:$0xf0]  ;;  %v5089_v1 = vor.u32 %v7253_v44, %v5086_v45 }
 0x2b7   :  { %v6748_v58 = vld [vmem:[#allocation9 + $0xe98] sm:$0xf]  ;;  %v6493_v3 = vor.u32 %v7609_v47, %v6492_v46  ;;  %3962 = vmatpush.bf16.msrb.mxu1 %v6237_v2  ;;  %v7317_v46 = vld [vmem:[#allocation9 + $0x39c] sm:$0xf]  ;;  %v5889_v47 = vor.u32 %v7453_v41, %v5886_v48 }
 0x2b8   :  { %v7673_v62 = vld [vmem:[#allocation9 + $0xeb4] sm:$0xf0]  ;;  %v5345_v2 = vor.u32 %v7317_v46, %v5342_v28  ;;  %v4990_v34 = vld [vmem:[#allocation9 + $0xf8] sm:$0xf0]  ;;  %v3771_v28 = vpop.f32.mrf.mxu2 }
 0x2b9   :  { %v5948_v4 = vld [vmem:[#allocation9 + $0x858] sm:$0xf]  ;;  %v6749_v8 = vor.u32 %v7673_v62, %v6748_v58  ;;  %3975 = vmatpush.bf16.msrb.mxu2 %v6493_v3  ;;  %v5598_v58 = vld [vmem:[#allocation9 + $0x5b8] sm:$0xf0] }
 0x2ba   :  { %v7473_v5 = vld [vmem:[#allocation9 + $0x874] sm:$0xf0]  ;;  %v7445_v62 = vld [vmem:[#allocation9 + $0x79c] sm:$0xf]  ;;  %v5601_v3 = vor.u32 %v7381_v56, %v5598_v58 }
 0x2bb   :  { %v6204_v6 = vld [vmem:[#allocation9 + $0xa58] sm:$0xf]  ;;  %v5949_v14 = vor.u32 %v7473_v5, %v5948_v4  ;;  %3988 = vmatpush.bf16.msrb.mxu3 %v6749_v8  ;;  %v7245_v4 = vld [vmem:[#allocation9 + $0x15c] sm:$0xf]  ;;  %v5857_v7 = vor.u32 %v7445_v62, %v5854_v63 }
 0x2bc   :  { %v7537_v9 = vld [vmem:[#allocation9 + $0xa74] sm:$0xf0]  ;;  %v5054_v5 = vld [vmem:[#allocation9 + $0x178] sm:$0xf0] }
 0x2bd   :  { %v6460_v10 = vld [vmem:[#allocation9 + $0xc58] sm:$0xf]  ;;  %v6205_v17 = vor.u32 %v7537_v9, %v6204_v6  ;;  %3950 = vmatpush.bf16.msrb.mxu0 %v5949_v14  ;;  %v7309_v6 = vld [vmem:[#allocation9 + $0x35c] sm:$0xf] }
 0x2be   :  { %v7601_v11 = vld [vmem:[#allocation9 + $0xc74] sm:$0xf0]  ;;  %v5310_v8 = vld [vmem:[#allocation9 + $0x378] sm:$0xf0] }
 0x2bf   :  { %v6716_v12 = vld [vmem:[#allocation9 + $0xe58] sm:$0xf]  ;;  %v6461_v18 = vor.u32 %v7601_v11, %v6460_v10  ;;  %3963 = vmatpush.bf16.msrb.mxu1 %v6205_v17  ;;  %v7373_v9 = vld [vmem:[#allocation9 + $0x55c] sm:$0xf]  ;;  %v5313_v14 = vor.u32 %v7309_v6, %v5310_v8 }
 0x2c0   :  { %v7665_v13 = vld [vmem:[#allocation9 + $0xe74] sm:$0xf0]  ;;  %v5566_v10 = vld [vmem:[#allocation9 + $0x578] sm:$0xf0] }
 0x2c1   :  { %v5916_v15 = vld [vmem:[#allocation9 + $0x818] sm:$0xf]  ;;  %v6717_v24 = vor.u32 %v7665_v13, %v6716_v12  ;;  %3976 = vmatpush.bf16.msrb.mxu2 %v6461_v18  ;;  %v7437_v11 = vld [vmem:[#allocation9 + $0x75c] sm:$0xf]  ;;  %v5057_v13 = vor.u32 %v7245_v4, %v5054_v5 }
 0x2c2   :  { %v7465_v16 = vld [vmem:[#allocation9 + $0x834] sm:$0xf0]  ;;  %v5822_v12 = vld [vmem:[#allocation9 + $0x778] sm:$0xf0] }
 0x2c3   :  { %v6172_v20 = vld [vmem:[#allocation9 + $0xa18] sm:$0xf]  ;;  %v5917_v35 = vor.u32 %v7465_v16, %v5916_v15  ;;  %3989 = vmatpush.bf16.msrb.mxu3 %v6717_v24  ;;  %v5569_v15 = vor.u32 %v7373_v9, %v5566_v10  ;;  %v7237_v16 = vld [vmem:[#allocation9 + $0x11c] sm:$0xf] }
 0x2c4   :  { %v7529_v21 = vld [vmem:[#allocation9 + $0xa34] sm:$0xf0]  ;;  %v5022_v17 = vld [vmem:[#allocation9 + $0x138] sm:$0xf0] }
 0x2c5   :  { %v6428_v22 = vld [vmem:[#allocation9 + $0xc18] sm:$0xf]  ;;  %v6173_v40 = vor.u32 %v7529_v21, %v6172_v20  ;;  %3951 = vmatpush.bf16.msrb.mxu0 %v5917_v35  ;;  %v7301_v18 = vld [vmem:[#allocation9 + $0x31c] sm:$0xf]  ;;  %v5825_v20 = vor.u32 %v7437_v11, %v5822_v12  ;;  %v3760_v12 = vpop.f32.mrf.mxu1 }
 0x2c6   :  { %v7593_v25 = vld [vmem:[#allocation9 + $0xc34] sm:$0xf0]  ;;  %v5278_v21 = vld [vmem:[#allocation9 + $0x338] sm:$0xf0] }
 0x2c7   :  { %v6684_v26 = vld [vmem:[#allocation9 + $0xe18] sm:$0xf]  ;;  %v6429_v59 = vor.u32 %v7593_v25, %v6428_v22  ;;  %3964 = vmatpush.bf16.msrb.mxu1 %v6173_v40  ;;  %v7365_v22 = vld [vmem:[#allocation9 + $0x51c] sm:$0xf]  ;;  %v5281_v29 = vor.u32 %v7301_v18, %v5278_v21 }
 0x2c8   :  { %v7657_v27 = vld [vmem:[#allocation9 + $0xe34] sm:$0xf0]  ;;  %3952 = vmatmul.bf16.vlgmr.msrb.gmra.mxu0 %v8099_v54  ;;  %v7429_v24 = vld [vmem:[#allocation9 + $0x71c] sm:$0xf]  ;;  %v5537_v30 = vor.u32 %v7365_v22, %v5534_v23 }
 0x2c9   :  { %v6685_v42 = vor.u32 %v7657_v27, %v6684_v26  ;;  %3977 = vmatpush.bf16.msrb.mxu2 %v6429_v59  ;;  %3996 = vmatpush.bf16.msra.mxu0 %v5121_v53  ;;  %v5790_v25 = vld [vmem:[#allocation9 + $0x738] sm:$0xf0]  ;;  %v5025_v26 = vor.u32 %v7237_v16, %v5022_v17  ;;  %v3745_v27 = vpop.f32.mrf.mxu0 }
 0x2ca   :  { %3965 = vmatmul.bf16.vlgmr.msrb.gmra.mxu1 %v8103_v57  ;;  %v7293_v35 = vld [vmem:[#allocation9 + $0x2dc] sm:$0xf]  ;;  %v3746_v36 = vadd.f32 %v3745_v27, %v8173_v0  ;;  %v5793_v39 = vor.u32 %v7429_v24, %v5790_v25 }
 0x2cb   :  { %3990 = vmatpush.bf16.msrb.mxu3 %v6685_v42  ;;  %4009 = vmatpush.bf16.msra.mxu1 %v5377_v52  ;;  %v5246_v40 = vld [vmem:[#allocation9 + $0x2f8] sm:$0xf0]  ;;  %v4993_v52 = vor.u32 %v7229_v31, %v4990_v34 }
 0x2cc   :  { %3978 = vmatmul.bf16.vlgmr.msrb.gmra.mxu2 %v8097_v51  ;;  %v7357_v59 = vld [vmem:[#allocation9 + $0x4dc] sm:$0xf]  ;;  %v3759_v53 = vadd.f32 %v3758_v37, %v3746_v36 }
 0x2cd   :  { %4022 = vmatpush.bf16.msra.mxu2 %v5633_v43  ;;  %3997 = vmatpush.bf16.msra.mxu0 %v5089_v1  ;;  %v5502_v41 = vld [vmem:[#allocation9 + $0x4f8] sm:$0xf0]  ;;  %v5249_v43 = vor.u32 %v7293_v35, %v5246_v40  ;;  %v3784_v1 = vpop.f32.mrf.mxu3 }
 0x2ce   :  { %3991 = vmatmul.bf16.vlgmr.msrb.gmra.mxu3 %v8101_v55  ;;  %v7421_v48 = vld [vmem:[#allocation9 + $0x6dc] sm:$0xf]  ;;  %v5505_v44 = vor.u32 %v7357_v59, %v5502_v41  ;;  %v3772_v63 = vadd.f32 %v3771_v28, %v3759_v53 }
 0x2cf   :  { %4035 = vmatpush.bf16.msra.mxu3 %v5889_v47  ;;  %4010 = vmatpush.bf16.msra.mxu1 %v5345_v2  ;;  %v5758_v42 = vld [vmem:[#allocation9 + $0x6f8] sm:$0xf0] }
 0x2d0   :  { %v7221_v45 = vld [vmem:[#allocation9 + $0x9c] sm:$0xf]  ;;  %v5761_v0 = vor.u32 %v7421_v48, %v5758_v42  ;;  %v8180_v5 = vadd.f32 %v3784_v1, %v3772_v63 }
 0x2d1   :  { %4023 = vmatpush.bf16.msra.mxu2 %v5601_v3  ;;  %3998 = vmatpush.bf16.msra.mxu0 %v5057_v13  ;;  %v4958_v46 = vld [vmem:[#allocation9 + $0xb8] sm:$0xf0]  ;;  %v3747_v6 = vpop.f32.mrf.mxu0 }
 0x2d2   :  { %v7285_v47 = vld [vmem:[#allocation9 + $0x29c] sm:$0xf]  ;;  %v4961_v4 = vor.u32 %v7221_v45, %v4958_v46 }
 0x2d3   :  { %4036 = vmatpush.bf16.msra.mxu3 %v5857_v7  ;;  %4011 = vmatpush.bf16.msra.mxu1 %v5313_v14  ;;  %v5214_v56 = vld [vmem:[#allocation9 + $0x2b8] sm:$0xf0] }
 0x2d4   :  { %v7349_v58 = vld [vmem:[#allocation9 + $0x49c] sm:$0xf]  ;;  %v5217_v7 = vor.u32 %v7285_v47, %v5214_v56 }
 0x2d5   :  { %4024 = vmatpush.bf16.msra.mxu2 %v5569_v15  ;;  %3999 = vmatpush.bf16.msra.mxu0 %v5025_v26  ;;  %v5470_v62 = vld [vmem:[#allocation9 + $0x4b8] sm:$0xf0]  ;;  %v3786_v36 = vpop.f32.mrf.mxu3 }
 0x2d6   :  { %v7413_v2 = vld [vmem:[#allocation9 + $0x69c] sm:$0xf]  ;;  %v5473_v8 = vor.u32 %v7349_v58, %v5470_v62 }
 0x2d7   :  { %4037 = vmatpush.bf16.msra.mxu3 %v5825_v20  ;;  %4012 = vmatpush.bf16.msra.mxu1 %v5281_v29  ;;  %v5726_v3 = vld [vmem:[#allocation9 + $0x6b8] sm:$0xf0]  ;;  %v3773_v29 = vpop.f32.mrf.mxu2 }
 0x2d8   :  { %v7213_v9 = vld [vmem:[#allocation9 + $0x5c] sm:$0xf]  ;;  %v5729_v13 = vor.u32 %v7413_v2, %v5726_v3 }
 0x2d9   :  { %4025 = vmatpush.bf16.msra.mxu2 %v5537_v30  ;;  %4000 = vmatpush.bf16.msra.mxu0 %v4993_v52  ;;  %v4926_v10 = vld [vmem:[#allocation9 + $0x78] sm:$0xf0] }
 0x2da   :  { %v7277_v11 = vld [vmem:[#allocation9 + $0x25c] sm:$0xf]  ;;  %v4929_v20 = vor.u32 %v7213_v9, %v4926_v10 }
 0x2db   :  { %4038 = vmatpush.bf16.msra.mxu3 %v5793_v39  ;;  %4013 = vmatpush.bf16.msra.mxu1 %v5249_v43  ;;  %v5182_v14 = vld [vmem:[#allocation9 + $0x278] sm:$0xf0] }
 0x2dc   :  { %v7341_v15 = vld [vmem:[#allocation9 + $0x45c] sm:$0xf]  ;;  %v5185_v23 = vor.u32 %v7277_v11, %v5182_v14 }
 0x2dd   :  { %4026 = vmatpush.bf16.msra.mxu2 %v5505_v44  ;;  %v5438_v16 = vld [vmem:[#allocation9 + $0x478] sm:$0xf0]  ;;  %4001 = vmatpush.bf16.msra.mxu0 %v4961_v4 }
 0x2de   :  { %v7405_v17 = vld [vmem:[#allocation9 + $0x65c] sm:$0xf]  ;;  %v5441_v24 = vor.u32 %v7341_v15, %v5438_v16 }
 0x2df   :  { %4039 = vmatpush.bf16.msra.mxu3 %v5761_v0  ;;  %v5694_v18 = vld [vmem:[#allocation9 + $0x678] sm:$0xf0]  ;;  %4014 = vmatpush.bf16.msra.mxu1 %v5217_v7 }
 0x2e0   :  { %v7205_v21 = vld [vmem:[#allocation9 + $0x1c] sm:$0xf]  ;;  %v5697_v30 = vor.u32 %v7405_v17, %v5694_v18 }
 0x2e1   :  { %v4894_v22 = vld [vmem:[#allocation9 + $0x38] sm:$0xf0]  ;;  %4027 = vmatpush.bf16.msra.mxu2 %v5473_v8  ;;  %4002 = vmatpush.bf16.msra.mxu0 %v4929_v20 }
 0x2e2   :  { %v7269_v25 = vld [vmem:[#allocation9 + $0x21c] sm:$0xf]  ;;  %v4897_v59 = vor.u32 %v7205_v21, %v4894_v22 }
 0x2e3   :  { %v5150_v26 = vld [vmem:[#allocation9 + $0x238] sm:$0xf0]  ;;  %4040 = vmatpush.bf16.msra.mxu3 %v5729_v13  ;;  %4015 = vmatpush.bf16.msra.mxu1 %v5185_v23 }
 0x2e4   :  { %v7333_v27 = vld [vmem:[#allocation9 + $0x41c] sm:$0xf]  ;;  %v5153_v53 = vor.u32 %v7269_v25, %v5150_v26 }
 0x2e5   :  { %v5406_v31 = vld [vmem:[#allocation9 + $0x438] sm:$0xf0]  ;;  %4028 = vmatpush.bf16.msra.mxu2 %v5441_v24  ;;  %4003 = vmatpush.bf16.msra.mxu0 %v4897_v59 }
 0x2e6   :  { %v7397_v34 = vld [vmem:[#allocation9 + $0x61c] sm:$0xf]  ;;  %v5409_v52 = vor.u32 %v7333_v27, %v5406_v31 }
 0x2e7   :  { %v5662_v35 = vld [vmem:[#allocation9 + $0x638] sm:$0xf0]  ;;  %4041 = vmatpush.bf16.msra.mxu3 %v5697_v30  ;;  %4016 = vmatpush.bf16.msra.mxu1 %v5153_v53  ;;  %v3797_v30 = vpop.f32.mrf.mxu0 }
 0x2e8   :  { %v7517_v37 = vld [vmem:[#allocation9 + $0x9dc] sm:$0xf]  ;;  %v5665_v45 = vor.u32 %v7397_v34, %v5662_v35  ;;  %4004 = vmatmul.bf16.vlgmr.msra.gmra.mxu0 %v8084_v32 }
 0x2e9   :  { %v6142_v39 = vld [vmem:[#allocation9 + $0x9f8] sm:$0xf0]  ;;  %4029 = vmatpush.bf16.msra.mxu2 %v5409_v52 }
 0x2ea   :  { %v7581_v40 = vld [vmem:[#allocation9 + $0xbdc] sm:$0xf]  ;;  %v6145_v46 = vor.u32 %v7517_v37, %v6142_v39  ;;  %4017 = vmatmul.bf16.vlgmr.msra.gmra.mxu1 %v8088_v38  ;;  %v3810_v37 = vpop.f32.mrf.mxu1 }
 0x2eb   :  { %v6398_v41 = vld [vmem:[#allocation9 + $0xbf8] sm:$0xf0]  ;;  %4042 = vmatpush.bf16.msra.mxu3 %v5665_v45 }
 0x2ec   :  { %v7645_v48 = vld [vmem:[#allocation9 + $0xddc] sm:$0xf]  ;;  %v6401_v47 = vor.u32 %v7581_v40, %v6398_v41  ;;  %4048 = vmatpush.bf16.msrb.mxu0 %v6145_v46  ;;  %4030 = vmatmul.bf16.vlgmr.msra.gmra.mxu2 %v8080_v19 }
 0x2ed   :  { %v6654_v42 = vld [vmem:[#allocation9 + $0xdf8] sm:$0xf0] }
 0x2ee   :  { %v7709_v43 = vld [vmem:[#allocation9 + $0xfdc] sm:$0xf]  ;;  %v6657_v28 = vor.u32 %v7645_v48, %v6654_v42  ;;  %4061 = vmatpush.bf16.msrb.mxu1 %v6401_v47  ;;  %4043 = vmatmul.bf16.vlgmr.msra.gmra.mxu3 %v8086_v33  ;;  %v3811_v48 = vadd.f32 %v3810_v37, %v3797_v30 }
 0x2ef   :  { %v6910_v44 = vld [vmem:[#allocation9 + $0xff8] sm:$0xf0] }
 0x2f0   :  { %v7509_v0 = vld [vmem:[#allocation9 + $0x99c] sm:$0xf]  ;;  %v6913_v62 = vor.u32 %v7709_v43, %v6910_v44  ;;  %4074 = vmatpush.bf16.msrb.mxu2 %v6657_v28  ;;  %v3823_v28 = vpop.f32.mrf.mxu2 }
 0x2f1   :  { %v6110_v56 = vld [vmem:[#allocation9 + $0x9b8] sm:$0xf0] }
 0x2f2   :  { %v7573_v58 = vld [vmem:[#allocation9 + $0xb9c] sm:$0xf]  ;;  %v6113_v6 = vor.u32 %v7509_v0, %v6110_v56  ;;  %4087 = vmatpush.bf16.msrb.mxu3 %v6913_v62 }
 0x2f3   :  { %v6366_v63 = vld [vmem:[#allocation9 + $0xbb8] sm:$0xf0] }
 0x2f4   :  { %v7637_v1 = vld [vmem:[#allocation9 + $0xd9c] sm:$0xf]  ;;  %v6369_v7 = vor.u32 %v7573_v58, %v6366_v63  ;;  %4049 = vmatpush.bf16.msrb.mxu0 %v6113_v6  ;;  %v3824_v63 = vadd.f32 %v3823_v28, %v3811_v48  ;;  %v7720_v48 = vld [vmem:[#allocation10 + $0x30] sm:$0xff] }
 0x2f5   :  { %v6622_v2 = vld [vmem:[#allocation9 + $0xdb8] sm:$0xf0] }
 0x2f6   :  { %v7701_v3 = vld [vmem:[#allocation9 + $0xf9c] sm:$0xf]  ;;  %v6625_v8 = vor.u32 %v7637_v1, %v6622_v2  ;;  %4062 = vmatpush.bf16.msrb.mxu1 %v6369_v7  ;;  %v3836_v1 = vpop.f32.mrf.mxu3  ;;  %v3799_v7 = vpop.f32.mrf.mxu0 }
 0x2f7   :  { %v6878_v4 = vld [vmem:[#allocation9 + $0xfb8] sm:$0xf0]  ;;  %v8186_v6 = vadd.f32 %v3836_v1, %v3824_v63  ;;  %v7732_v7 = vld [vmem:[#allocation10 + $0x90] sm:$0xff] }
 0x2f8   :  { %v7501_v9 = vld [vmem:[#allocation9 + $0x95c] sm:$0xf]  ;;  %v6881_v12 = vor.u32 %v7701_v3, %v6878_v4  ;;  %4075 = vmatpush.bf16.msrb.mxu2 %v6625_v8 }
 0x2f9   :  { %v6078_v10 = vld [vmem:[#allocation9 + $0x978] sm:$0xf0] }
 0x2fa   :  { %v7565_v11 = vld [vmem:[#allocation9 + $0xb5c] sm:$0xf]  ;;  %v6081_v18 = vor.u32 %v7501_v9, %v6078_v10  ;;  %4088 = vmatpush.bf16.msrb.mxu3 %v6881_v12 }
 0x2fb   :  { %v6334_v13 = vld [vmem:[#allocation9 + $0xb78] sm:$0xf0] }
 0x2fc   :  { %v7629_v14 = vld [vmem:[#allocation9 + $0xd5c] sm:$0xf]  ;;  %v6337_v20 = vor.u32 %v7565_v11, %v6334_v13  ;;  %4050 = vmatpush.bf16.msrb.mxu0 %v6081_v18  ;;  %v3812_v13 = vpop.f32.mrf.mxu1 }
 0x2fd   :  { %v6590_v15 = vld [vmem:[#allocation9 + $0xd78] sm:$0xf0] }
 0x2fe   :  { %v7693_v16 = vld [vmem:[#allocation9 + $0xf5c] sm:$0xf]  ;;  %v6593_v21 = vor.u32 %v7629_v14, %v6590_v15  ;;  %4063 = vmatpush.bf16.msrb.mxu1 %v6337_v20  ;;  %v3838_v30 = vpop.f32.mrf.mxu3  ;;  %v8192_v28 = vpop.f32.mrf.mxu0 }
 0x2ff   :  { %v6846_v17 = vld [vmem:[#allocation9 + $0xf78] sm:$0xf0] }
 0x300   :  { %v7493_v22 = vld [vmem:[#allocation9 + $0x91c] sm:$0xf]  ;;  %v6849_v24 = vor.u32 %v7693_v16, %v6846_v17  ;;  %4076 = vmatpush.bf16.msrb.mxu2 %v6593_v21 }
 0x301   :  { %v6046_v23 = vld [vmem:[#allocation9 + $0x938] sm:$0xf0] }
 0x302   :  { %v7557_v19 = vld [vmem:[#allocation9 + $0xb1c] sm:$0xf]  ;;  %v6049_v33 = vor.u32 %v7493_v22, %v6046_v23  ;;  %4089 = vmatpush.bf16.msrb.mxu3 %v6849_v24 }
 0x303   :  { %v6302_v25 = vld [vmem:[#allocation9 + $0xb38] sm:$0xf0] }
 0x304   :  { %v7621_v26 = vld [vmem:[#allocation9 + $0xd1c] sm:$0xf]  ;;  %v6305_v38 = vor.u32 %v7557_v19, %v6302_v25  ;;  %4051 = vmatpush.bf16.msrb.mxu0 %v6049_v33 }
 0x305   :  { %v6558_v27 = vld [vmem:[#allocation9 + $0xd38] sm:$0xf0] }
 0x306   :  { %v7685_v29 = vld [vmem:[#allocation9 + $0xf1c] sm:$0xf]  ;;  %v6561_v31 = vor.u32 %v7621_v26, %v6558_v27  ;;  %4064 = vmatpush.bf16.msrb.mxu1 %v6305_v38  ;;  %v3825_v26 = vpop.f32.mrf.mxu2  ;;  %v8198_v1 = vpop.f32.mrf.mxu3 }
 0x307   :  { %v6814_v32 = vld [vmem:[#allocation9 + $0xf38] sm:$0xf0]  ;;  %v7752_v26 = vld [vmem:[#allocation10 + $0x130] sm:$0xff] }
 0x308   :  { %v7485_v34 = vld [vmem:[#allocation9 + $0x8dc] sm:$0xf]  ;;  %v6817_v39 = vor.u32 %v7685_v29, %v6814_v32  ;;  %4077 = vmatpush.bf16.msrb.mxu2 %v6561_v31 }
 0x309   :  { %v6014_v35 = vld [vmem:[#allocation9 + $0x8f8] sm:$0xf0] }
 0x30a   :  { %v7549_v36 = vld [vmem:[#allocation9 + $0xadc] sm:$0xf]  ;;  %v6017_v52 = vor.u32 %v7485_v34, %v6014_v35  ;;  %4090 = vmatpush.bf16.msrb.mxu3 %v6817_v39 }
 0x30b   :  { %v6270_v40 = vld [vmem:[#allocation9 + $0xaf8] sm:$0xf0] }
 0x30c   :  { %v7613_v59 = vld [vmem:[#allocation9 + $0xcdc] sm:$0xf]  ;;  %v6273_v43 = vor.u32 %v7549_v36, %v6270_v40  ;;  %4052 = vmatpush.bf16.msrb.mxu0 %v6017_v52  ;;  %v7744_v52 = vld [vmem:[#allocation10 + $0xf0] sm:$0xff] }
 0x30d   :  { %v6526_v41 = vld [vmem:[#allocation9 + $0xcf8] sm:$0xf0] }
 0x30e   :  { %v7677_v42 = vld [vmem:[#allocation9 + $0xedc] sm:$0xf]  ;;  %v6529_v44 = vor.u32 %v7613_v59, %v6526_v41  ;;  %4065 = vmatpush.bf16.msrb.mxu1 %v6273_v43  ;;  %v7719_v43 = vld [vmem:[#allocation10 + $0x28] sm:$0xff] }
 0x30f   :  { %v6782_v53 = vld [vmem:[#allocation9 + $0xef8] sm:$0xf0] }
 0x310   :  { %v7477_v45 = vld [vmem:[#allocation9 + $0x89c] sm:$0xf]  ;;  %v6785_v0 = vor.u32 %v7677_v42, %v6782_v53  ;;  %4078 = vmatpush.bf16.msrb.mxu2 %v6529_v44  ;;  %v7728_v42 = vld [vmem:[#allocation10 + $0x70] sm:$0xff]  ;;  %v7727_v44 = vld [vmem:[#allocation10 + $0x68] sm:$0xff] }
 0x311   :  { %v5982_v46 = vld [vmem:[#allocation9 + $0x8b8] sm:$0xf0]  ;;  %v7736_v53 = vld [vmem:[#allocation10 + $0xb0] sm:$0xff] }
 0x312   :  { %v7541_v47 = vld [vmem:[#allocation9 + $0xa9c] sm:$0xf]  ;;  %v5985_v4 = vor.u32 %v7477_v45, %v5982_v46  ;;  %4091 = vmatpush.bf16.msrb.mxu3 %v6785_v0  ;;  %v7735_v45 = vld [vmem:[#allocation10 + $0xa8] sm:$0xff]  ;;  %v8194_v0 = vpop.f32.mrf.mxu1 }
 0x313   :  { %v6238_v56 = vld [vmem:[#allocation9 + $0xab8] sm:$0xf0]  ;;  %v7743_v46 = vld [vmem:[#allocation10 + $0xe8] sm:$0xff] }
 0x314   :  { %v7605_v58 = vld [vmem:[#allocation9 + $0xc9c] sm:$0xf]  ;;  %v6241_v8 = vor.u32 %v7541_v47, %v6238_v56  ;;  %4053 = vmatpush.bf16.msrb.mxu0 %v5985_v4  ;;  %v7718_v47 = vld [vmem:[#allocation10 + $0x20] sm:$0xff]  ;;  %v7724_v4 = vld [vmem:[#allocation10 + $0x50] sm:$0xff] }
 0x315   :  { %v6494_v62 = vld [vmem:[#allocation9 + $0xcb8] sm:$0xf0] }
 0x316   :  { %v7669_v2 = vld [vmem:[#allocation9 + $0xe9c] sm:$0xf]  ;;  %v6497_v9 = vor.u32 %v7605_v58, %v6494_v62  ;;  %4066 = vmatpush.bf16.msrb.mxu1 %v6241_v8  ;;  %v8196_v62 = vpop.f32.mrf.mxu2 }
 0x317   :  { %v6750_v3 = vld [vmem:[#allocation9 + $0xeb8] sm:$0xf0] }
 0x318   :  { %v7469_v10 = vld [vmem:[#allocation9 + $0x85c] sm:$0xf]  ;;  %v6753_v14 = vor.u32 %v7669_v2, %v6750_v3  ;;  %4079 = vmatpush.bf16.msrb.mxu2 %v6497_v9  ;;  %v7716_v2 = vld [vmem:[#allocation10 + $0x10] sm:$0xff]  ;;  %v3851_v3 = vpop.f32.mrf.mxu0 }
 0x319   :  { %v5950_v11 = vld [vmem:[#allocation9 + $0x878] sm:$0xf0]  ;;  %v7740_v9 = vld [vmem:[#allocation10 + $0xd0] sm:$0xff] }
 0x31a   :  { %v7533_v12 = vld [vmem:[#allocation9 + $0xa5c] sm:$0xf]  ;;  %v5953_v21 = vor.u32 %v7469_v10, %v5950_v11  ;;  %4092 = vmatpush.bf16.msrb.mxu3 %v6753_v14  ;;  %v3864_v8 = vpop.f32.mrf.mxu1  ;;  %v7715_v10 = vld [vmem:[#allocation10 + $0x8] sm:$0xff] }
 0x31b   :  { %v6206_v15 = vld [vmem:[#allocation9 + $0xa78] sm:$0xf0]  ;;  %v7723_v11 = vld [vmem:[#allocation10 + $0x48] sm:$0xff] }
 0x31c   :  { %v7597_v16 = vld [vmem:[#allocation9 + $0xc5c] sm:$0xf]  ;;  %v6209_v22 = vor.u32 %v7533_v12, %v6206_v15  ;;  %4054 = vmatpush.bf16.msrb.mxu0 %v5953_v21  ;;  %v7731_v12 = vld [vmem:[#allocation10 + $0x88] sm:$0xff]  ;;  %v3890_v15 = vpop.f32.mrf.mxu3 }
 0x31d   :  { %v6462_v17 = vld [vmem:[#allocation9 + $0xc78] sm:$0xf0]  ;;  %v7739_v14 = vld [vmem:[#allocation10 + $0xc8] sm:$0xff] }
 0x31e   :  { %v7661_v18 = vld [vmem:[#allocation9 + $0xe5c] sm:$0xf]  ;;  %v6465_v23 = vor.u32 %v7597_v16, %v6462_v17  ;;  %4067 = vmatpush.bf16.msrb.mxu1 %v6209_v22  ;;  %v3877_v13 = vpop.f32.mrf.mxu2  ;;  %v7714_v16 = vld [vmem:[#allocation10] sm:$0xff] }
 0x31f   :  { %v6718_v20 = vld [vmem:[#allocation9 + $0xe78] sm:$0xf0]  ;;  %v7722_v17 = vld [vmem:[#allocation10 + $0x40] sm:$0xff] }
 0x320   :  { %v7461_v19 = vld [vmem:[#allocation9 + $0x81c] sm:$0xf]  ;;  %v6721_v27 = vor.u32 %v7661_v18, %v6718_v20  ;;  %4080 = vmatpush.bf16.msrb.mxu2 %v6465_v23  ;;  %v7730_v18 = vld [vmem:[#allocation10 + $0x80] sm:$0xff]  ;;  %v4128_v23 = vpack.c.bf16 %v8128_v61, %v8128_v61  ;;  %v7768_v61 = vld [vmem:[#allocation10 + $0x1b0] sm:$0xff]  ;;  %v3901_v30 = vpop.f32.mrf.mxu0 }
 0x321   :  { %v5918_v24 = vld [vmem:[#allocation9 + $0x838] sm:$0xf0]  ;;  %v7738_v20 = vld [vmem:[#allocation10 + $0xc0] sm:$0xff] }
 0x322   :  { %v7525_v25 = vld [vmem:[#allocation9 + $0xa1c] sm:$0xf]  ;;  %v5921_v34 = vor.u32 %v7461_v19, %v5918_v24  ;;  %4093 = vmatpush.bf16.msrb.mxu3 %v6721_v27  ;;  %v4129_v24 = vpack.c.bf16 %v8141_v50, %v8141_v50  ;;  %v4131_v27 = vpack.c.bf16 %v8167_v60, %v8167_v60  ;;  %v7759_v50 = vld [vmem:[#allocation10 + $0x168] sm:$0xff]  ;;  %v3914_v60 = vpop.f32.mrf.mxu1 }
 0x323   :  { %v6174_v29 = vld [vmem:[#allocation9 + $0xa38] sm:$0xf0] }
 0x324   :  { %v7589_v32 = vld [vmem:[#allocation9 + $0xc1c] sm:$0xf]  ;;  %v6177_v35 = vor.u32 %v7525_v25, %v6174_v29  ;;  %4055 = vmatpush.bf16.msrb.mxu0 %v5921_v34  ;;  %v4130_v25 = vpack.c.bf16 %v8154_v49, %v8154_v49  ;;  %v7760_v29 = vld [vmem:[#allocation10 + $0x170] sm:$0xff]  ;;  %v7767_v49 = vld [vmem:[#allocation10 + $0x1a8] sm:$0xff] }
 0x325   :  { %v6430_v33 = vld [vmem:[#allocation9 + $0xc38] sm:$0xf0] }
 0x326   :  { %v7653_v38 = vld [vmem:[#allocation9 + $0xe1c] sm:$0xf]  ;;  %v6433_v36 = vor.u32 %v7589_v32, %v6430_v33  ;;  %4068 = vmatpush.bf16.msrb.mxu1 %v6177_v35  ;;  %v7751_v32 = vld [vmem:[#allocation10 + $0x128] sm:$0xff]  ;;  %v7750_v33 = vld [vmem:[#allocation10 + $0x120] sm:$0xff] }
 0x327   :  { %v6686_v31 = vld [vmem:[#allocation9 + $0xe38] sm:$0xf0]  ;;  %4056 = vmatmul.bf16.vlgmr.msrb.gmra.mxu0 %v8099_v54  ;;  %v7726_v54 = vld [vmem:[#allocation10 + $0x60] sm:$0xff] }
 0x328   :  { %v6689_v37 = vor.u32 %v7653_v38, %v6686_v31  ;;  %v7721_v39 = vld [vmem:[#allocation10 + $0x38] sm:$0xff]  ;;  %4081 = vmatpush.bf16.msrb.mxu2 %v6433_v36  ;;  %v7758_v38 = vld [vmem:[#allocation10 + $0x160] sm:$0xff]  ;;  %v3927_v36 = vpop.f32.mrf.mxu2 }
 0x329   :  { %v7729_v40 = vld [vmem:[#allocation10 + $0x78] sm:$0xff]  ;;  %4648 = vmatpush.bf16.msra.mxu0 %v7721_v39  ;;  %4069 = vmatmul.bf16.vlgmr.msrb.gmra.mxu1 %v8103_v57  ;;  %v7734_v57 = vld [vmem:[#allocation10 + $0xa0] sm:$0xff]  ;;  %v3940_v39 = vpop.f32.mrf.mxu3 }
 0x32a   :  { %v7737_v59 = vld [vmem:[#allocation10 + $0xb8] sm:$0xff]  ;;  %4094 = vmatpush.bf16.msrb.mxu3 %v6689_v37  ;;  %4661 = vmatpush.bf16.msra.mxu1 %v7729_v40  ;;  %v7766_v31 = vld [vmem:[#allocation10 + $0x1a0] sm:$0xff]  ;;  %v3850_v37 = vadd.f32 %v8192_v28, %v8186_v6 }
 0x32b   :  { %v7745_v41 = vld [vmem:[#allocation10 + $0xf8] sm:$0xff]  ;;  %4082 = vmatmul.bf16.vlgmr.msrb.gmra.mxu2 %v8097_v51  ;;  %v7742_v51 = vld [vmem:[#allocation10 + $0xe0] sm:$0xff] }
 0x32c   :  { %4674 = vmatpush.bf16.msra.mxu2 %v7737_v59  ;;  %v7725_v56 = vld [vmem:[#allocation10 + $0x58] sm:$0xff]  ;;  %v7748_v59 = vld [vmem:[#allocation10 + $0x110] sm:$0xff]  ;;  %v7746_v28 = vld [vmem:[#allocation10 + $0x100] sm:$0xff] }
 0x32d   :  { %4095 = vmatmul.bf16.vlgmr.msrb.gmra.mxu3 %v8101_v55  ;;  %4649 = vmatpush.bf16.msra.mxu0 %v7720_v48  ;;  %v7717_v55 = vld [vmem:[#allocation10 + $0x18] sm:$0xff]  ;;  %v7756_v48 = vld [vmem:[#allocation10 + $0x150] sm:$0xff] }
 0x32e   :  { %4687 = vmatpush.bf16.msra.mxu3 %v7745_v41  ;;  %4662 = vmatpush.bf16.msra.mxu1 %v7728_v42  ;;  %v7733_v58 = vld [vmem:[#allocation10 + $0x98] sm:$0xff]  ;;  %v3903_v41 = vpop.f32.mrf.mxu0  ;;  %v3916_v42 = vpop.f32.mrf.mxu1 }
 0x32f   :  { %v7741_v63 = vld [vmem:[#allocation10 + $0xd8] sm:$0xff] }
 0x330   :  { %4675 = vmatpush.bf16.msra.mxu2 %v7736_v53  ;;  %v7753_v21 = vld [vmem:[#allocation10 + $0x138] sm:$0xff]  ;;  %v3863_v53 = vadd.f32 %v8194_v0, %v3850_v37  ;;  %v7762_v0 = vld [vmem:[#allocation10 + $0x180] sm:$0xff] }
 0x331   :  { %4650 = vmatpush.bf16.msra.mxu0 %v7719_v43  ;;  %v7761_v22 = vld [vmem:[#allocation10 + $0x178] sm:$0xff]  ;;  %v7747_v43 = vld [vmem:[#allocation10 + $0x108] sm:$0xff] }
 0x332   :  { %4688 = vmatpush.bf16.msra.mxu3 %v7744_v52  ;;  %4663 = vmatpush.bf16.msra.mxu1 %v7727_v44  ;;  %v7769_v19 = vld [vmem:[#allocation10 + $0x1b8] sm:$0xff]  ;;  %v7764_v52 = vld [vmem:[#allocation10 + $0x190] sm:$0xff]  ;;  %v7755_v44 = vld [vmem:[#allocation10 + $0x148] sm:$0xff]  ;;  %v3876_v6 = vadd.f32 %v8196_v62, %v3863_v53 }
 0x333   :  { %v7749_v34 = vld [vmem:[#allocation10 + $0x118] sm:$0xff] }
 0x334   :  { %4676 = vmatpush.bf16.msra.mxu2 %v7735_v45  ;;  %v7757_v35 = vld [vmem:[#allocation10 + $0x158] sm:$0xff]  ;;  %v3929_v45 = vpop.f32.mrf.mxu2 }
 0x335   :  { %4651 = vmatpush.bf16.msra.mxu0 %v7718_v47  ;;  %v7765_v40 = vld [vmem:[#allocation10 + $0x198] sm:$0xff]  ;;  %v7763_v47 = vld [vmem:[#allocation10 + $0x188] sm:$0xff] }
 0x336   :  { %4689 = vmatpush.bf16.msra.mxu3 %v7743_v46  ;;  %4664 = vmatpush.bf16.msra.mxu1 %v7726_v54  ;;  %v3942_v46 = vpop.f32.mrf.mxu3  ;;  %v7754_v54 = vld [vmem:[#allocation10 + $0x140] sm:$0xff] }
 0x338   :  { %4677 = vmatpush.bf16.msra.mxu2 %v7734_v57  ;;  %v3889_v57 = vadd.f32 %v8198_v1, %v3876_v6 }
 0x339   :  { %4652 = vmatpush.bf16.msra.mxu0 %v7717_v55  ;;  %v4132_v55 = vpack.c.bf16 %v8180_v5, %v8180_v5 }
 0x33a   :  { %4690 = vmatpush.bf16.msra.mxu3 %v7742_v51  ;;  %4665 = vmatpush.bf16.msra.mxu1 %v7725_v56  ;;  %v3915_v51 = vadd.f32 %v3914_v60, %v3901_v30  ;;  %v4133_v56 = vpack.c.bf16 %v3889_v57, %v3889_v57 }
 0x33c   :  { %4678 = vmatpush.bf16.msra.mxu2 %v7733_v58  ;;  %v3928_v58 = vadd.f32 %v3927_v36, %v3915_v51 }
 0x33d   :  { %4653 = vmatpush.bf16.msra.mxu0 %v7716_v2 }
 0x33e   :  { %4691 = vmatpush.bf16.msra.mxu3 %v7741_v63  ;;  %4666 = vmatpush.bf16.msra.mxu1 %v7724_v4  ;;  %v3941_v62 = vadd.f32 %v3940_v39, %v3928_v58  ;;  %v7783_v58 = vld [vmem:[#allocation13 + $0x28] sm:$0xff] }
 0x340   :  { %4679 = vmatpush.bf16.msra.mxu2 %v7732_v7  ;;  %v7777_v7 = vld [vmem:[#allocation10 + $0x1f8] sm:$0xff] }
 0x341   :  { %4654 = vmatpush.bf16.msra.mxu0 %v7715_v10  ;;  %v7776_v10 = vld [vmem:[#allocation10 + $0x1f0] sm:$0xff] }
 0x342   :  { %4692 = vmatpush.bf16.msra.mxu3 %v7740_v9  ;;  %4667 = vmatpush.bf16.msra.mxu1 %v7723_v11 }
 0x344   :  { %4680 = vmatpush.bf16.msra.mxu2 %v7731_v12 }
 0x345   :  { %4655 = vmatpush.bf16.msra.mxu0 %v7714_v16  ;;  %v3953_v63 = vpop.f32.mrf.mxu0 }
 0x346   :  { %4693 = vmatpush.bf16.msra.mxu3 %v7739_v14  ;;  %4668 = vmatpush.bf16.msra.mxu1 %v7722_v17  ;;  %v3954_v2 = vadd.f32 %v3953_v63, %v3941_v62  ;;  %v7775_v14 = vld [vmem:[#allocation10 + $0x1e8] sm:$0xff]  ;;  %v7774_v17 = vld [vmem:[#allocation10 + $0x1e0] sm:$0xff] }
 0x347   :  { %v3966_v3 = vpop.f32.mrf.mxu1 }
 0x348   :  { %4681 = vmatpush.bf16.msra.mxu2 %v7730_v18  ;;  %4656 = vmatmul.bf16.vlgmr.msra.gmra.mxu0 %v4128_v23  ;;  %v3967_v4 = vadd.f32 %v3966_v3, %v3954_v2  ;;  %v7773_v18 = vld [vmem:[#allocation10 + $0x1d8] sm:$0xff]  ;;  %v7771_v23 = vld [vmem:[#allocation10 + $0x1c8] sm:$0xff] }
 0x349   :  { %4700 = vmatpush.bf16.msrb.mxu0 %v7753_v21  ;;  %4669 = vmatmul.bf16.vlgmr.msra.gmra.mxu1 %v4129_v24  ;;  %v7782_v2 = vld [vmem:[#allocation13 + $0x20] sm:$0xff]  ;;  %v7781_v3 = vld [vmem:[#allocation13 + $0x18] sm:$0xff] }
 0x34a   :  { %4694 = vmatpush.bf16.msra.mxu3 %v7738_v20  ;;  %4713 = vmatpush.bf16.msrb.mxu1 %v7761_v22  ;;  %v7772_v20 = vld [vmem:[#allocation10 + $0x1d0] sm:$0xff] }
 0x34b   :  { %4682 = vmatmul.bf16.vlgmr.msra.gmra.mxu2 %v4130_v25  ;;  %v7770_v25 = vld [vmem:[#allocation10 + $0x1c0] sm:$0xff] }
 0x34c   :  { %4726 = vmatpush.bf16.msrb.mxu2 %v7769_v19 }
 0x34d   :  { %4695 = vmatmul.bf16.vlgmr.msra.gmra.mxu3 %v4131_v27  ;;  %4701 = vmatpush.bf16.msrb.mxu0 %v7752_v26  ;;  %v3955_v12 = vpop.f32.mrf.mxu0 }
 0x34e   :  { %4714 = vmatpush.bf16.msrb.mxu1 %v7760_v29  ;;  %4739 = vmatpush.bf16.msrb.mxu3 %v7777_v7 }
 0x34f   :  { %v3979_v1 = vpop.f32.mrf.mxu2  ;;  %v3968_v5 = vpop.f32.mrf.mxu1 }
 0x350   :  { %4727 = vmatpush.bf16.msrb.mxu2 %v7768_v61  ;;  %v3980_v8 = vadd.f32 %v3979_v1, %v3967_v4  ;;  %v7780_v4 = vld [vmem:[#allocation13 + $0x10] sm:$0xff] }
 0x351   :  { %4702 = vmatpush.bf16.msrb.mxu0 %v7751_v32  ;;  %v3992_v9 = vpop.f32.mrf.mxu3 }
 0x352   :  { %4715 = vmatpush.bf16.msrb.mxu1 %v7759_v50  ;;  %v3993_v11 = vadd.f32 %v3992_v9, %v3980_v8  ;;  %4740 = vmatpush.bf16.msrb.mxu3 %v7776_v10  ;;  %v7779_v8 = vld [vmem:[#allocation13 + $0x8] sm:$0xff]  ;;  %v7778_v9 = vld [vmem:[#allocation13] sm:$0xff] }
 0x354   :  { %4728 = vmatpush.bf16.msrb.mxu2 %v7767_v49  ;;  %v4134_v13 = vpack.c.bf16 %v3993_v11, %v3993_v11  ;;  %v7798_v11 = vld [vmem:[#allocation12] ss:$0 sm:$0xff] }
 0x355   :  { %4703 = vmatpush.bf16.msrb.mxu0 %v7750_v33 }
 0x356   :  { %4716 = vmatpush.bf16.msrb.mxu1 %v7758_v38  ;;  %4741 = vmatpush.bf16.msrb.mxu3 %v7775_v14 }
 0x357   :  { %v3981_v15 = vpop.f32.mrf.mxu2 }
 0x358   :  { %4729 = vmatpush.bf16.msrb.mxu2 %v7766_v31 }
 0x359   :  { %4704 = vmatpush.bf16.msrb.mxu0 %v7749_v34  ;;  %v3994_v16 = vpop.f32.mrf.mxu3 }
 0x35a   :  { %4717 = vmatpush.bf16.msrb.mxu1 %v7757_v35  ;;  %4742 = vmatpush.bf16.msrb.mxu3 %v7774_v17  ;;  %v7799_v17 = vld [vmem:[#allocation15] ss:$0 sm:$0xff] }
 0x35c   :  { %4730 = vmatpush.bf16.msrb.mxu2 %v7765_v40 }
 0x35d   :  { %4705 = vmatpush.bf16.msrb.mxu0 %v7748_v59 }
 0x35e   :  { %4718 = vmatpush.bf16.msrb.mxu1 %v7756_v48  ;;  %4743 = vmatpush.bf16.msrb.mxu3 %v7773_v18 }
 0x360   :  { %4731 = vmatpush.bf16.msrb.mxu2 %v7764_v52 }
 0x361   :  { %4706 = vmatpush.bf16.msrb.mxu0 %v7747_v43 }
 0x362   :  { %4719 = vmatpush.bf16.msrb.mxu1 %v7755_v44  ;;  %4744 = vmatpush.bf16.msrb.mxu3 %v7772_v20 }
 0x364   :  { %4732 = vmatpush.bf16.msrb.mxu2 %v7763_v47 }
 0x365   :  { %4707 = vmatpush.bf16.msrb.mxu0 %v7746_v28  ;;  %v4005_v21 = vpop.f32.mrf.mxu0 }
 0x366   :  { %4720 = vmatpush.bf16.msrb.mxu1 %v7754_v54  ;;  %4745 = vmatpush.bf16.msrb.mxu3 %v7771_v23 }
 0x367   :  { %v4018_v22 = vpop.f32.mrf.mxu1 }
 0x368   :  { %4708 = vmatmul.bf16.vlgmr.msrb.gmra.mxu0 %v4132_v55  ;;  %4733 = vmatpush.bf16.msrb.mxu2 %v7762_v0  ;;  %v4019_v32 = vadd.f32 %v4018_v22, %v4005_v21  ;;  %v7785_v0 = vld [vmem:[#allocation13 + $0x38] sm:$0xff] }
 0x369   :  { %4721 = vmatmul.bf16.vlgmr.msrb.gmra.mxu1 %v4133_v56  ;;  %4832 = vmatpush.bf16.msra.mxu0 %v7785_v0  ;;  %v7784_v56 = vld [vmem:[#allocation13 + $0x30] sm:$0xff] }
 0x36a   :  { %4746 = vmatpush.bf16.msrb.mxu3 %v7770_v25 }
 0x36b   :  { %4734 = vmatmul.bf16.vlgmr.msrb.gmra.mxu2 %v4134_v13 }
 0x36d   :  { %v4007_v26 = vpop.f32.mrf.mxu0  ;;  %4833 = vmatpush.bf16.msra.mxu0 %v7784_v56 }
 0x36f   :  { %v4031_v19 = vpop.f32.mrf.mxu2  ;;  %v4020_v27 = vpop.f32.mrf.mxu1 }
 0x370   :  { %v4032_v50 = vadd.f32 %v4031_v19, %v4019_v32 }
 0x371   :  { %v4044_v24 = vpop.f32.mrf.mxu3  ;;  %4834 = vmatpush.bf16.msra.mxu0 %v7783_v58 }
 0x372   :  { %v4045_v49 = vadd.f32 %v4044_v24, %v4032_v50 }
 0x375   :  { %4835 = vmatpush.bf16.msra.mxu0 %v7782_v2 }
 0x377   :  { %v4033_v29 = vpop.f32.mrf.mxu2 }
 0x379   :  { %v4046_v61 = vpop.f32.mrf.mxu3  ;;  %4836 = vmatpush.bf16.msra.mxu0 %v7781_v3 }
 0x37d   :  { %4837 = vmatpush.bf16.msra.mxu0 %v7780_v4 }
 0x381   :  { %4838 = vmatpush.bf16.msra.mxu0 %v7779_v8 }
 0x385   :  { %4839 = vmatpush.bf16.msra.mxu0 %v7778_v9 }
 0x3a4   :  { %v4057_v33 = vpop.f32.mrf.mxu0 }
 0x3a5   :  { %v4058_v38 = vadd.f32 %v4057_v33, %v4045_v49 }
 0x3a6   :  { %v4070_v30 = vpop.f32.mrf.mxu1 }
 0x3a7   :  { %v4071_v60 = vadd.f32 %v4070_v30, %v4058_v38 }
 0x3ac   :  { %v4059_v36 = vpop.f32.mrf.mxu0 }
 0x3ae   :  { %v4083_v31 = vpop.f32.mrf.mxu2  ;;  %v4072_v37 = vpop.f32.mrf.mxu1 }
 0x3af   :  { %v4084_v34 = vadd.f32 %v4083_v31, %v4071_v60 }
 0x3b0   :  { %v4096_v35 = vpop.f32.mrf.mxu3 }
 0x3b1   :  { %v4097_v39 = vadd.f32 %v4096_v35, %v4084_v34 }
 0x3b3   :  { %v4135_v40 = vpack.c.bf16 %v4097_v39, %v4097_v39 }
 0x3b5   :  { %4747 = vmatmul.bf16.vlgmr.msrb.gmra.mxu3 %v4135_v40 }
 0x3b6   :  { %v4085_v59 = vpop.f32.mrf.mxu2 }
 0x3b8   :  { %v4098_v41 = vpop.f32.mrf.mxu3 }
 0x3c5   :  { %v4657_v48 = vpop.f32.mrf.mxu0 }
 0x3c6   :  { %v4670_v42 = vpop.f32.mrf.mxu1 }
 0x3c7   :  { %v4671_v53 = vadd.f32 %v4670_v42, %v4657_v48 }
 0x3cd   :  { %v4659_v45 = vpop.f32.mrf.mxu0 }
 0x3ce   :  { %v4683_v52 = vpop.f32.mrf.mxu2  ;;  %v4672_v6 = vpop.f32.mrf.mxu1 }
 0x3cf   :  { %v4684_v43 = vadd.f32 %v4683_v52, %v4671_v53 }
 0x3d0   :  { %v4696_v44 = vpop.f32.mrf.mxu3 }
 0x3d1   :  { %v4697_v46 = vadd.f32 %v4696_v44, %v4684_v43 }
 0x3d6   :  { %v4685_v47 = vpop.f32.mrf.mxu2 }
 0x3d8   :  { %v4698_v28 = vpop.f32.mrf.mxu3 }
 0x3e5   :  { %v4709_v54 = vpop.f32.mrf.mxu0 }
 0x3e6   :  { %v4710_v57 = vadd.f32 %v4709_v54, %v4697_v46  ;;  %v4722_v51 = vpop.f32.mrf.mxu1 }
 0x3e8   :  { %v4723_v55 = vadd.f32 %v4722_v51, %v4710_v57 }
 0x3ed   :  { %v4711_v62 = vpop.f32.mrf.mxu0 }
 0x3ee   :  { %v4724_v63 = vpop.f32.mrf.mxu1  ;;  %v4735_v7 = vpop.f32.mrf.mxu2 }
 0x3ef   :  { %v4736_v10 = vadd.f32 %v4735_v7, %v4723_v55 }
 0x3f6   :  { %v4737_v1 = vpop.f32.mrf.mxu2 }
 0x438   :  { %v4748_v12 = vpop.f32.mrf.mxu3 }
 0x439   :  { %v4749_v5 = vadd.f32 %v4748_v12, %v4736_v10 }
 0x43b   :  { %v4761_v13 = vadd.f32 %v7798_v11, %v4749_v5 }
 0x43d   :  { %v4762_v14 = vmax.f32 %v4761_v13, 0.0 }
 0x43f   :  { %v4763_v15 = vpack.c.bf16 %v4762_v14, %v4762_v14 }
 0x440   :  { %v4750_v16 = vpop.f32.mrf.mxu3 }
 0x441   :  { %4840 = vmatmul.bf16.vlgmr.msra.gmra.mxu0 %v4763_v15 }
 0x4be   :  { %v4841_v18 = vpop.f32.mrf.mxu0 }
 0x4bf   :  { %v4842_v20 = vadd.f32 %v7799_v17, %v4841_v18 }
 0x4c1   :  { %4845 = vst [vmem:[#allocation16] sm:$0xff] %v4842_v20 }
 0x4c2   :  { %4856 = dma.vmem_to_hbm [thread:$0]  %s4852_s6, 128, %s4854_s14, [#allocation6]  }
 0x4c6   :  { %v4843_v21 = vpop.f32.mrf.mxu0 }
 0x4c7   :  { %8000 = dma.done.wait [#allocation6], 128  }
 0x4c8   :  { %8001 = vsyncadd [#allocation6], 4294967168 }
 0x4c9   :  { %4861 = vsyncpa [#allocation5], 1 }
 0x4ca   :  { %4862 = vsyncpa [#allocation8], 1 }
 0x4cb   :  { %4863 = vsyncpa [#allocation11], 1 }
 0x4cc   :  { %4864 = vsyncpa [#allocation14], 1 }
 0x4cd   :  { %4865 = vsyncpa [#allocation6], 1 }

</bundles_post_ra>
